<compile_context>
chip_gen: v7x
topology: tpu7x:2x2x1
jax: 0.10.0
libtpu: 0.0.40
codegen_flags: <defaults>
</compile_context>

<pallas_src>
import jax
import jax.numpy as jnp
import numpy as np
from jax.experimental import pallas as pl
from jax.experimental.pallas import tpu as pltpu

H_DIM = 32       # h_dim
H_DIM_V = 16     # h_dim_v
DATA_DIM = 8     # data_dim
H128 = 128       # 2**7
H64 = 64         # 2**6


def _round_up(n, m):
    return ((n + m - 1) // m) * m


def mu_v_kernel(
    t_ref, x_ref, a_ref,
    wx1_ref, bx1_ref, wx2_ref, bx2_ref,
    wa1_ref, ba1_ref,
    wt1_ref, bt1_ref,
    wfold_ref, bfold_ref,
    out_ref,
):
    f32 = jnp.float32

    # ---- x branch: Linear(h_dim,128) -> tanh -> Linear(128,128) -> tanh
    x = x_ref[...]                                                      # (tb, h_dim)
    h1 = jnp.tanh(jnp.dot(x, wx1_ref[...], preferred_element_type=f32) + bx1_ref[...])
    h2 = jnp.tanh(jnp.dot(h1, wx2_ref[...], preferred_element_type=f32) + bx2_ref[...])  # (tb,128)

    # ---- t branch: [t, sin t, cos t] @ Wt1 as VPU scalar-weighted rows (K=3 off the MXU)
    tv = t_ref[...]                                                     # (tb, 1)
    ht = jnp.tanh(tv * wt1_ref[0:1, :]
                  + jnp.sin(tv) * wt1_ref[1:2, :]
                  + jnp.cos(tv) * wt1_ref[2:3, :]
                  + bt1_ref[...])                                       # (tb, 64)

    # ---- a branch: Linear(data_dim,64) -> tanh
    ha = jnp.tanh(jnp.dot(a_ref[...], wa1_ref[...], preferred_element_type=f32)
                  + ba1_ref[...])                                       # (tb, 64)

    # ---- folded tail: [ht | h2 | ha] @ Wfold + bfold  (single K=256 MXU dot)
    cat = jnp.concatenate([ht, h2, ha], axis=1)                         # (tb, 256)
    out = jnp.dot(cat, wfold_ref[...], preferred_element_type=f32) + bfold_ref[...]
    out_ref[...] = out.astype(out_ref.dtype)


def mu_v_forward(t, x, a, fp, tile_b=256):
    """t: (B,1), x: (B,h_dim), a: (B,data_dim). Returns (B, h_dim_v)."""
    B = x.shape[0]
    tb = min(tile_b, _round_up(B, 8))     # batch tile (multiple of f32 sublane 8)
    Bp = _round_up(B, tb)
    if Bp != B:
        pad = Bp - B
        t = jnp.pad(t, ((0, pad), (0, 0)))
        x = jnp.pad(x, ((0, pad), (0, 0)))
        a = jnp.pad(a, ((0, pad), (0, 0)))
    grid = (Bp // tb,)

    def row_spec(feat):
        return pl.BlockSpec((tb, feat), lambda i: (i, 0))

    def const_spec(arr):
        # Same block for every grid step -> weights stay VMEM-resident.
        return pl.BlockSpec(arr.shape, lambda i: (0, 0))

    weights = (
        fp["wx1"], fp["bx1"], fp["wx2"], fp["bx2"],
        fp["wa1"], fp["ba1"], fp["wt1"], fp["bt1"],
        fp["wfold"], fp["bfold"],
    )

    out = pl.pallas_call(
        mu_v_kernel,
        out_shape=jax.ShapeDtypeStruct((Bp, H_DIM_V), jnp.float32),
        grid=grid,
        in_specs=[row_spec(1), row_spec(H_DIM), row_spec(DATA_DIM)]
                 + [const_spec(w) for w in weights],
        out_specs=row_spec(H_DIM_V),
        compiler_params=pltpu.CompilerParams(
            dimension_semantics=("parallel",)),    # shards batch tiles across v7x's 2 TCs
    )(t, x, a, *weights)
    return out[:B]


def init_linear(key, fan_in, fan_out):
    """PyTorch nn.Linear default init, weight stored transposed as (in, out)."""
    kw, kb = jax.random.split(key)
    bound = 1.0 / np.sqrt(fan_in)
    w = jax.random.uniform(kw, (fan_in, fan_out), jnp.float32, -bound, bound)
    b = jax.random.uniform(kb, (1, fan_out), jnp.float32, -bound, bound)
    return w, b


def init_params(key):
    keys = jax.random.split(key, 8)
    p = {}
    p["wx1"], p["bx1"] = init_linear(keys[0], H_DIM, H128)
    p["wx2"], p["bx2"] = init_linear(keys[1], H128, H128)
    p["wx3"], p["bx3"] = init_linear(keys[2], H128, H64)
    p["wt1"], p["bt1"] = init_linear(keys[3], 3, H64)
    p["wt2"], p["bt2"] = init_linear(keys[4], H64, H64)
    p["wa1"], p["ba1"] = init_linear(keys[5], DATA_DIM, H64)
    p["wa2"], p["ba2"] = init_linear(keys[6], H64, H64)
    p["wp"], p["bp"] = init_linear(keys[7], 3 * H64, H_DIM_V)
    return p


def fold_params(p):
    """Exactly fold the post-tanh linear layers (Wt2/Wx3/Wa2) into the projection.

    out = (ht@Wt2+bt2)@Wp_t + (h2@Wx3+bx3)@Wp_x + (ha@Wa2+ba2)@Wp_a + bp
        = [ht | h2 | ha] @ [[Wt2@Wp_t],[Wx3@Wp_x],[Wa2@Wp_a]] + bfold
    """
    wp_t = p["wp"][0 * H64:1 * H64, :]          # (64, 16)  rows for out_t
    wp_x = p["wp"][1 * H64:2 * H64, :]          # (64, 16)  rows for out_x
    wp_a = p["wp"][2 * H64:3 * H64, :]          # (64, 16)  rows for out_a
    wfold = jnp.concatenate(
        [p["wt2"] @ wp_t,                        # (64, 16)
         p["wx3"] @ wp_x,                        # (128, 16)
         p["wa2"] @ wp_a],                       # (64, 16)
        axis=0)                                  # (256, 16)
    bfold = p["bt2"] @ wp_t + p["bx3"] @ wp_x + p["ba2"] @ wp_a + p["bp"]  # (1, 16)
    return {
        "wx1": p["wx1"], "bx1": p["bx1"],
        "wx2": p["wx2"], "bx2": p["bx2"],
        "wa1": p["wa1"], "ba1": p["ba1"],
        "wt1": p["wt1"], "bt1": p["bt1"],
        "wfold": wfold, "bfold": bfold,
    }


def mu_v_reference(t, x, a, p):
    """Pure-JAX reference mirroring the PyTorch forward exactly (unfolded)."""
    out_x = jnp.tanh(x @ p["wx1"] + p["bx1"])
    out_x = jnp.tanh(out_x @ p["wx2"] + p["bx2"])
    out_x = out_x @ p["wx3"] + p["bx3"]
    t_feat = jnp.concatenate([t, jnp.sin(t), jnp.cos(t)], axis=1)      # (B, 3)
    out_t = jnp.tanh(t_feat @ p["wt1"] + p["bt1"])
    out_t = out_t @ p["wt2"] + p["bt2"]
    out_a = jnp.tanh(a @ p["wa1"] + p["ba1"])
    out_a = out_a @ p["wa2"] + p["ba2"]
    out = jnp.concatenate([out_t, out_x, out_a], axis=1)               # (B, 192)
    return out @ p["wp"] + p["bp"]


if __name__ == "__main__":
    key = jax.random.PRNGKey(0)
    kp, kt, kx, ka = jax.random.split(key, 4)

    params = init_params(kp)
    fparams = fold_params(params)

    # Batched evaluation (e.g. many SDE particles/samples per step).
    B = 512
    t = jax.random.uniform(kt, (B, 1), jnp.float32)
    x = jax.random.normal(kx, (B, H_DIM), jnp.float32)
    a = jax.random.normal(ka, (B, DATA_DIM), jnp.float32)

    out = jax.block_until_ready(mu_v_forward(t, x, a, fparams))
    ref = jax.block_until_ready(mu_v_reference(t, x, a, params))
    assert out.shape == (B, H_DIM_V)
    np.testing.assert_allclose(np.asarray(out), np.asarray(ref), rtol=1e-4, atol=1e-4)

    # Batch-1 path: the exact call shape of the original PyTorch module.
    out1 = jax.block_until_ready(mu_v_forward(t[:1], x[:1], a[:1], fparams))
    ref1 = mu_v_reference(t[:1], x[:1], a[:1], params)
    assert out1.shape == (1, H_DIM_V)
    np.testing.assert_allclose(np.asarray(out1), np.asarray(ref1), rtol=1e-4, atol=1e-4)

    print("KERNEL_OK")
</pallas_src>

<mosaic_0001>
module attributes {stable_mosaic.version = 11 : i64} {
  func.func @mu_v_kernel(%arg0: i32, %arg1: memref<256x1xf32, #tpu.memory_space<vmem>>, %arg2: memref<256x32xf32, #tpu.memory_space<vmem>>, %arg3: memref<256x8xf32, #tpu.memory_space<vmem>>, %arg4: memref<32x128xf32, #tpu.memory_space<vmem>>, %arg5: memref<1x128xf32, #tpu.memory_space<vmem>>, %arg6: memref<128x128xf32, #tpu.memory_space<vmem>>, %arg7: memref<1x128xf32, #tpu.memory_space<vmem>>, %arg8: memref<8x64xf32, #tpu.memory_space<vmem>>, %arg9: memref<1x64xf32, #tpu.memory_space<vmem>>, %arg10: memref<3x64xf32, #tpu.memory_space<vmem>>, %arg11: memref<1x64xf32, #tpu.memory_space<vmem>>, %arg12: memref<256x16xf32, #tpu.memory_space<vmem>>, %arg13: memref<1x16xf32, #tpu.memory_space<vmem>>, %arg14: memref<256x16xf32, #tpu.memory_space<vmem>>) attributes {dimension_semantics = [#tpu.dimension_semantics<parallel>], iteration_bounds = array<i64: 2>, scalar_prefetch = 0 : i64, scratch_operands = 0 : i64, tpu.core_type = #tpu.core_type<tc>, window_params = [{transform_indices = @transform_0, window_bounds = array<i64: 256, 1>}, {transform_indices = @transform_1, window_bounds = array<i64: 256, 32>}, {transform_indices = @transform_2, window_bounds = array<i64: 256, 8>}, {pipeline_mode = #tpu.pipeline_mode<synchronous>, transform_indices = @transform_3, window_bounds = array<i64: 32, 128>}, {pipeline_mode = #tpu.pipeline_mode<synchronous>, transform_indices = @transform_4, window_bounds = array<i64: 1, 128>}, {pipeline_mode = #tpu.pipeline_mode<synchronous>, transform_indices = @transform_5, window_bounds = array<i64: 128, 128>}, {pipeline_mode = #tpu.pipeline_mode<synchronous>, transform_indices = @transform_6, window_bounds = array<i64: 1, 128>}, {pipeline_mode = #tpu.pipeline_mode<synchronous>, transform_indices = @transform_7, window_bounds = array<i64: 8, 64>}, {pipeline_mode = #tpu.pipeline_mode<synchronous>, transform_indices = @transform_8, window_bounds = array<i64: 1, 64>}, {pipeline_mode = #tpu.pipeline_mode<synchronous>, transform_indices = @transform_9, window_bounds = array<i64: 3, 64>}, {pipeline_mode = #tpu.pipeline_mode<synchronous>, transform_indices = @transform_10, window_bounds = array<i64: 1, 64>}, {pipeline_mode = #tpu.pipeline_mode<synchronous>, transform_indices = @transform_11, window_bounds = array<i64: 256, 16>}, {pipeline_mode = #tpu.pipeline_mode<synchronous>, transform_indices = @transform_12, window_bounds = array<i64: 1, 16>}, {transform_indices = @transform_13, window_bounds = array<i64: 256, 16>}]} {
    %c0 = arith.constant 0 : index
    %c0_0 = arith.constant 0 : index
    %0 = vector.load %arg2[%c0, %c0_0] : memref<256x32xf32, #tpu.memory_space<vmem>>, vector<256x32xf32>
    %c0_1 = arith.constant 0 : index
    %c0_2 = arith.constant 0 : index
    %1 = vector.load %arg4[%c0_1, %c0_2] : memref<32x128xf32, #tpu.memory_space<vmem>>, vector<32x128xf32>
    %cst = arith.constant dense<0.000000e+00> : vector<256x128xf32>
    %2 = tpu.matmul %0, %1, %cst {dimension_numbers = #tpu.dot_dimension_numbers<[1], [0], [0], [1], [0, 0, 1, 1], [], []>} : vector<256x32xf32>, vector<32x128xf32>, vector<256x128xf32> -> vector<256x128xf32>
    %c0_3 = arith.constant 0 : index
    %c0_4 = arith.constant 0 : index
    %3 = vector.load %arg5[%c0_3, %c0_4] : memref<1x128xf32, #tpu.memory_space<vmem>>, vector<1x128xf32>
    %4 = vector.broadcast %3 : vector<1x128xf32> to vector<256x128xf32>
    %5 = arith.addf %2, %4 : vector<256x128xf32>
    %6 = math.tanh %5 : vector<256x128xf32>
    %c0_5 = arith.constant 0 : index
    %c0_6 = arith.constant 0 : index
    %7 = vector.load %arg6[%c0_5, %c0_6] : memref<128x128xf32, #tpu.memory_space<vmem>>, vector<128x128xf32>
    %cst_7 = arith.constant dense<0.000000e+00> : vector<256x128xf32>
    %8 = tpu.matmul %6, %7, %cst_7 {dimension_numbers = #tpu.dot_dimension_numbers<[1], [0], [0], [1], [0, 0, 1, 1], [], []>} : vector<256x128xf32>, vector<128x128xf32>, vector<256x128xf32> -> vector<256x128xf32>
    %c0_8 = arith.constant 0 : index
    %c0_9 = arith.constant 0 : index
    %9 = vector.load %arg7[%c0_8, %c0_9] : memref<1x128xf32, #tpu.memory_space<vmem>>, vector<1x128xf32>
    %10 = vector.broadcast %9 : vector<1x128xf32> to vector<256x128xf32>
    %11 = arith.addf %8, %10 : vector<256x128xf32>
    %12 = math.tanh %11 : vector<256x128xf32>
    %c0_10 = arith.constant 0 : index
    %c0_11 = arith.constant 0 : index
    %13 = vector.load %arg1[%c0_10, %c0_11] : memref<256x1xf32, #tpu.memory_space<vmem>>, vector<256x1xf32>
    %c0_12 = arith.constant 0 : index
    %c0_13 = arith.constant 0 : index
    %14 = vector.load %arg10[%c0_12, %c0_13] : memref<3x64xf32, #tpu.memory_space<vmem>>, vector<1x64xf32>
    %15 = vector.broadcast %13 : vector<256x1xf32> to vector<256x64xf32>
    %16 = vector.broadcast %14 : vector<1x64xf32> to vector<256x64xf32>
    %17 = arith.mulf %15, %16 : vector<256x64xf32>
    %18 = math.sin %13 : vector<256x1xf32>
    %c1 = arith.constant 1 : index
    %c0_14 = arith.constant 0 : index
    %19 = vector.load %arg10[%c1, %c0_14] : memref<3x64xf32, #tpu.memory_space<vmem>>, vector<1x64xf32>
    %20 = vector.broadcast %18 : vector<256x1xf32> to vector<256x64xf32>
    %21 = vector.broadcast %19 : vector<1x64xf32> to vector<256x64xf32>
    %22 = arith.mulf %20, %21 : vector<256x64xf32>
    %23 = arith.addf %17, %22 : vector<256x64xf32>
    %24 = math.cos %13 : vector<256x1xf32>
    %c2 = arith.constant 2 : index
    %c0_15 = arith.constant 0 : index
    %25 = vector.load %arg10[%c2, %c0_15] : memref<3x64xf32, #tpu.memory_space<vmem>>, vector<1x64xf32>
    %26 = vector.broadcast %24 : vector<256x1xf32> to vector<256x64xf32>
    %27 = vector.broadcast %25 : vector<1x64xf32> to vector<256x64xf32>
    %28 = arith.mulf %26, %27 : vector<256x64xf32>
    %29 = arith.addf %23, %28 : vector<256x64xf32>
    %c0_16 = arith.constant 0 : index
    %c0_17 = arith.constant 0 : index
    %30 = vector.load %arg11[%c0_16, %c0_17] : memref<1x64xf32, #tpu.memory_space<vmem>>, vector<1x64xf32>
    %31 = vector.broadcast %30 : vector<1x64xf32> to vector<256x64xf32>
    %32 = arith.addf %29, %31 : vector<256x64xf32>
    %33 = math.tanh %32 : vector<256x64xf32>
    %c0_18 = arith.constant 0 : index
    %c0_19 = arith.constant 0 : index
    %34 = vector.load %arg3[%c0_18, %c0_19] : memref<256x8xf32, #tpu.memory_space<vmem>>, vector<256x8xf32>
    %c0_20 = arith.constant 0 : index
    %c0_21 = arith.constant 0 : index
    %35 = vector.load %arg8[%c0_20, %c0_21] : memref<8x64xf32, #tpu.memory_space<vmem>>, vector<8x64xf32>
    %cst_22 = arith.constant dense<0.000000e+00> : vector<256x64xf32>
    %36 = tpu.matmul %34, %35, %cst_22 {dimension_numbers = #tpu.dot_dimension_numbers<[1], [0], [0], [1], [0, 0, 1, 1], [], []>} : vector<256x8xf32>, vector<8x64xf32>, vector<256x64xf32> -> vector<256x64xf32>
    %c0_23 = arith.constant 0 : index
    %c0_24 = arith.constant 0 : index
    %37 = vector.load %arg9[%c0_23, %c0_24] : memref<1x64xf32, #tpu.memory_space<vmem>>, vector<1x64xf32>
    %38 = vector.broadcast %37 : vector<1x64xf32> to vector<256x64xf32>
    %39 = arith.addf %36, %38 : vector<256x64xf32>
    %40 = math.tanh %39 : vector<256x64xf32>
    %41 = tpu.concatenate %33, %12, %40 in 1 : vector<256x64xf32>, vector<256x128xf32>, vector<256x64xf32> -> vector<256x256xf32>
    %c0_25 = arith.constant 0 : index
    %c0_26 = arith.constant 0 : index
    %42 = vector.load %arg12[%c0_25, %c0_26] : memref<256x16xf32, #tpu.memory_space<vmem>>, vector<256x16xf32>
    %cst_27 = arith.constant dense<0.000000e+00> : vector<256x16xf32>
    %43 = tpu.matmul %41, %42, %cst_27 {dimension_numbers = #tpu.dot_dimension_numbers<[1], [0], [0], [1], [0, 0, 1, 1], [], []>} : vector<256x256xf32>, vector<256x16xf32>, vector<256x16xf32> -> vector<256x16xf32>
    %c0_28 = arith.constant 0 : index
    %c0_29 = arith.constant 0 : index
    %44 = vector.load %arg13[%c0_28, %c0_29] : memref<1x16xf32, #tpu.memory_space<vmem>>, vector<1x16xf32>
    %45 = vector.broadcast %44 : vector<1x16xf32> to vector<256x16xf32>
    %46 = arith.addf %43, %45 : vector<256x16xf32>
    %c0_30 = arith.constant 0 : index
    %c0_31 = arith.constant 0 : index
    %47 = vector.load %arg14[%c0_30, %c0_31] : memref<256x16xf32, #tpu.memory_space<vmem>>, vector<256x16xf32>
    tpu.vector_store %arg14[%c0_30, %c0_31], %46 {strides = array<i32>} : memref<256x16xf32, #tpu.memory_space<vmem>>, vector<256x16xf32>,
    return
  }
  func.func @transform_0(%arg0: i32) -> (i32, i32) {
    %c0_i32 = arith.constant 0 : i32
    %c0_i32_0 = arith.constant 0 : i32
    return %arg0, %c0_i32 : i32, i32
  }
  func.func @transform_1(%arg0: i32) -> (i32, i32) {
    %c0_i32 = arith.constant 0 : i32
    %c0_i32_0 = arith.constant 0 : i32
    return %arg0, %c0_i32 : i32, i32
  }
  func.func @transform_2(%arg0: i32) -> (i32, i32) {
    %c0_i32 = arith.constant 0 : i32
    %c0_i32_0 = arith.constant 0 : i32
    return %arg0, %c0_i32 : i32, i32
  }
  func.func @transform_3(%arg0: i32) -> (i32, i32) {
    %c0_i32 = arith.constant 0 : i32
    %c0_i32_0 = arith.constant 0 : i32
    %c0_i32_1 = arith.constant 0 : i32
    return %c0_i32, %c0_i32_0 : i32, i32
  }
  func.func @transform_4(%arg0: i32) -> (i32, i32) {
    %c0_i32 = arith.constant 0 : i32
    %c0_i32_0 = arith.constant 0 : i32
    %c0_i32_1 = arith.constant 0 : i32
    return %c0_i32, %c0_i32_0 : i32, i32
  }
  func.func @transform_5(%arg0: i32) -> (i32, i32) {
    %c0_i32 = arith.constant 0 : i32
    %c0_i32_0 = arith.constant 0 : i32
    %c0_i32_1 = arith.constant 0 : i32
    return %c0_i32, %c0_i32_0 : i32, i32
  }
  func.func @transform_6(%arg0: i32) -> (i32, i32) {
    %c0_i32 = arith.constant 0 : i32
    %c0_i32_0 = arith.constant 0 : i32
    %c0_i32_1 = arith.constant 0 : i32
    return %c0_i32, %c0_i32_0 : i32, i32
  }
  func.func @transform_7(%arg0: i32) -> (i32, i32) {
    %c0_i32 = arith.constant 0 : i32
    %c0_i32_0 = arith.constant 0 : i32
    %c0_i32_1 = arith.constant 0 : i32
    return %c0_i32, %c0_i32_0 : i32, i32
  }
  func.func @transform_8(%arg0: i32) -> (i32, i32) {
    %c0_i32 = arith.constant 0 : i32
    %c0_i32_0 = arith.constant 0 : i32
    %c0_i32_1 = arith.constant 0 : i32
    return %c0_i32, %c0_i32_0 : i32, i32
  }
  func.func @transform_9(%arg0: i32) -> (i32, i32) {
    %c0_i32 = arith.constant 0 : i32
    %c0_i32_0 = arith.constant 0 : i32
    %c0_i32_1 = arith.constant 0 : i32
    return %c0_i32, %c0_i32_0 : i32, i32
  }
  func.func @transform_10(%arg0: i32) -> (i32, i32) {
    %c0_i32 = arith.constant 0 : i32
    %c0_i32_0 = arith.constant 0 : i32
    %c0_i32_1 = arith.constant 0 : i32
    return %c0_i32, %c0_i32_0 : i32, i32
  }
  func.func @transform_11(%arg0: i32) -> (i32, i32) {
    %c0_i32 = arith.constant 0 : i32
    %c0_i32_0 = arith.constant 0 : i32
    %c0_i32_1 = arith.constant 0 : i32
    return %c0_i32, %c0_i32_0 : i32, i32
  }
  func.func @transform_12(%arg0: i32) -> (i32, i32) {
    %c0_i32 = arith.constant 0 : i32
    %c0_i32_0 = arith.constant 0 : i32
    %c0_i32_1 = arith.constant 0 : i32
    return %c0_i32, %c0_i32_0 : i32, i32
  }
  func.func @transform_13(%arg0: i32) -> (i32, i32) {
    %c0_i32 = arith.constant 0 : i32
    %c0_i32_0 = arith.constant 0 : i32
    return %arg0, %c0_i32 : i32, i32
  }
}

</mosaic_0001>

<bundles_post_ra>
// kernel: tpu_custom_call.1
= control target key start
LH: loop header
LB: loop body
LE: loop exit
PB: predicated region body
PF: predicated region fallthrough
CT: control target
= control target key end

     0   :  { %s11231_s25 = smov 0   ;;  %s17476_s0 = inlined_call_operand.vmem [shape: f32[512,1], index: 0, kind: input, shape index: {}]   ;;  %s17477_s1 = inlined_call_operand.vmem [shape: f32[512,32], index: 1, kind: input, shape index: {}]   ;;  %s17478_s2 = inlined_call_operand.vmem [shape: f32[512,8], index: 2, kind: input, shape index: {}]   ;;  %s17479_s3 = inlined_call_operand.vmem [shape: f32[32,128], index: 3, kind: input, shape index: {}]   ;;  %s17480_s4 = inlined_call_operand.vmem [shape: f32[1,128], index: 4, kind: input, shape index: {}]   ;;  %s17481_s5 = inlined_call_operand.vmem [shape: f32[128,128], index: 5, kind: input, shape index: {}]   ;;  %s17482_s6 = inlined_call_operand.vmem [shape: f32[1,128], index: 6, kind: input, shape index: {}]   ;;  %s17483_s7 = inlined_call_operand.vmem [shape: f32[8,64], index: 7, kind: input, shape index: {}]   ;;  %s17484_s8 = inlined_call_operand.vmem [shape: f32[1,64], index: 8, kind: input, shape index: {}]   ;;  %s17485_s9 = inlined_call_operand.vmem [shape: f32[3,64], index: 9, kind: input, shape index: {}]   ;;  %s17486_s10 = inlined_call_operand.vmem [shape: f32[1,64], index: 10, kind: input, shape index: {}]   ;;  %s17487_s11 = inlined_call_operand.vmem [shape: f32[256,16], index: 11, kind: input, shape index: {}]   ;;  %s17488_s12 = inlined_call_operand.vmem [shape: f32[1,16], index: 12, kind: input, shape index: {}]   ;;  %s17489_s13 = inlined_call_operand.vmem [shape: f32[512,16], index: 13, kind: output, shape index: {}]  }
   0x1 LB: > { %s9639_s26 = sadd.s32 4294967295, %s11150_s25   ;;  %p9643_p0 = scmp.ge.s32.totalorder %s11150_s25, 1  ;;  %s11150_s25 = sphi %s11231_s25, %s23_s25  }
   0x2   : > { %p410_p1 = scmp.lt.s32.totalorder %s11150_s25, 3 }
   0x4   : > { %p411_p2 = pnand %p9643_p0, %p410_p1 }
   0x6   : > { %414 = sbr.rel (%p411_p2) target bundleno = 1417 (0x589), region = 72 }
   0xd   : > { %v520_v0 = vld [vmem:[%s17479_s3] sm:$0xff]  ;;  %v521_v1 = vld [vmem:[%s17479_s3 + $0x8] sm:$0xff]  ;;  %v522_v2 = vld [vmem:[%s17479_s3 + $0x10] sm:$0xff]  ;;  %s9644_s16 = sshll.u32 %s9639_s26, 5  ;;  %v11152_v5 = vmov 0   ;;  %vm531_vm0 = vcmask 261120  }
   0xe   : > { %v10285_v3 = vpack.c.bf16 %v521_v1, %v520_v0  ;;  %v523_v4 = vld [vmem:[%s17479_s3 + $0x18] sm:$0xff]  ;;  %p465_p3 = scmp.lt.s32.totalorder %s9644_s16, 63  ;;  %10550 = vset.pattern.permute.xlu0 %v11152_v5  ;;  %10551 = vset.pattern.permute.xlu1 %v11152_v5  ;;  %v8579_v7 = vld [vmem:[%s17483_s7] sm:$0xff]  ;;  %vm8587_vm5 = vcmask 64512  }
   0xf   : > { %v10289_v6 = vpack.c.bf16 %v523_v4, %v522_v2 }
  0x10   : > { %10286 = vmatprep.subr.bf16.mxu0 %v10285_v3  ;;  %s18135_s16 = smov (!%p465_p3, %s9644_s16), 63 }
  0x11   : > { %10288 = vmatpush3.bf16.msra.mxu0 %v10285_v3  ;;  %s11251_s19 = sshll.u32 %s18135_s16, 3 }
  0x12   : > { %10290 = vmatprep.subr.bf16.mxu0 %v10289_v6  ;;  %s11257_s22 = scalar_lea.vmem %s17477_s1, %s11251_s19  ;;  %s11274_s28 = scalar_lea.vmem %s17476_s0, %s11251_s19 }
  0x13   : > { %v488_v8 = vld [vmem:[%s11257_s22] sm:$0xff]  ;;  %v489_v9 = vld [vmem:[%s11257_s22 + $0x8] sm:$0xff]  ;;  %v490_v10 = vld [vmem:[%s11257_s22 + $0x10] sm:$0xff]  ;;  %s11432_s14 = scalar_lea.vmem %s17478_s2, %s11251_s19  ;;  %s17375_s18 = scalar_lea.vmem %s17489_s13, %s11251_s19 }
  0x14   : > { %10107 = vmatprep.mubr.msk.f32.mxu0 %vm531_vm0, %v488_v8  ;;  %v491_v11 = vld [vmem:[%s11257_s22 + $0x18] sm:$0xff]  ;;  %v492_v12 = vld [vmem:[%s11257_s22 + $0x20] sm:$0xff]  ;;  %v493_v13 = vld [vmem:[%s11257_s22 + $0x28] sm:$0xff] }
  0x15   : > { %10292 = vmatpush3.bf16.msra.mxu0 %v10289_v6  ;;  %v494_v14 = vld [vmem:[%s11257_s22 + $0x30] sm:$0xff]  ;;  %v11281_v15 = vld [vmem:[%s11274_s28] sm:$0xff]  ;;  %v495_v17 = vld [vmem:[%s11257_s22 + $0x38] sm:$0xff] }
  0x16   : > { %10235 = vmatprep.subr.mxu0 %v8579_v7  ;;  %1200 = vperm.xlu0 %10550, %v11281_v15   ;;  %v11286_v16 = vld [vmem:[%s11274_s28 + $0x10] sm:$0xff]  ;;  %v496_v18 = vld [vmem:[%s11257_s22 + $0x40] sm:$0xff]  ;;  %v11293_v19 = vld [vmem:[%s11274_s28 + $0x8] sm:$0xff]  ;;  %v1397_v47 = vand.u32 2139095040, %v11281_v15 }
  0x17   : > { %1210 = vperm.xlu1 %10551, %v11286_v16   ;;  %v11296_v20 = vld [vmem:[%s11274_s28 + $0x18] sm:$0xff]  ;;  %v11301_v21 = vld [vmem:[%s11274_s28 + $0x20] sm:$0xff]  ;;  %v497_v22 = vld [vmem:[%s11257_s22 + $0x48] sm:$0xff]  ;;  %v1501_v49 = vand.u32 2139095040, %v11293_v19  ;;  %v1605_v59 = vand.u32 2139095040, %v11286_v16 }
  0x18   : > { %10108 = vmatmul.mubr.msk.f32.vlgmr.msra.gmra.mrb[0].mxu0 %vm531_vm0, %v489_v9  ;;  %v498_v23 = vld [vmem:[%s11257_s22 + $0x50] sm:$0xff]  ;;  %v11308_v24 = vld [vmem:[%s11274_s28 + $0x28] sm:$0xff]  ;;  %v499_v26 = vld [vmem:[%s11257_s22 + $0x58] sm:$0xff]  ;;  %v1813_v50 = vand.u32 2139095040, %v11301_v21  ;;  %v1398_v55 = vshrl.u32 %v1397_v47, 23  ;;  %v1709_v3 = vand.u32 2139095040, %v11296_v20 }
  0x19   : > { %10110 = vmatprep.mubr.msk.f32.mxu0 %vm531_vm0, %v490_v10  ;;  %10236 = vmatpush3.msra.mxu0 %v8579_v7  ;;  %v11313_v25 = vld [vmem:[%s11274_s28 + $0x30] sm:$0xff]  ;;  %v500_v27 = vld [vmem:[%s11257_s22 + $0x60] sm:$0xff]  ;;  %v11320_v28 = vld [vmem:[%s11274_s28 + $0x38] sm:$0xff]  ;;  %v1502_v57 = vshrl.u32 %v1501_v49, 23  ;;  %v1606_v7 = vshrl.u32 %v1605_v59, 23 }
  0x1a   : > { %1205 = vperm.xlu0 %10550, %v11293_v19   ;;  %v11325_v29 = vld [vmem:[%s11274_s28 + $0x40] sm:$0xff]  ;;  %v501_v30 = vld [vmem:[%s11257_s22 + $0x68] sm:$0xff]  ;;  %v502_v31 = vld [vmem:[%s11257_s22 + $0x70] sm:$0xff]  ;;  %v2021_v51 = vand.u32 2139095040, %v11313_v25  ;;  %v1814_v61 = vshrl.u32 %v1813_v50, 23  ;;  %v9687_v2 = vadd.s32 4294967169, %v1398_v55 }
  0x1b   : > { %1215 = vperm.xlu1 %10551, %v11296_v20   ;;  %v1174_v32 = vld [vmem:[%s11274_s28 + $0x48] sm:$0xff]  ;;  %v1175_v33 = vld [vmem:[%s11274_s28 + $0x50] sm:$0xff]  ;;  %v503_v34 = vld [vmem:[%s11257_s22 + $0x78] sm:$0xff]  ;;  %v2229_v58 = vand.u32 2139095040, %v11325_v29  ;;  %v9691_v5 = vadd.s32 4294967169, %v1502_v57 }
  0x1c   : > { %10111 = vmatmul.mubr.msk.f32.gmra.mrb[2].mxu0 %vm531_vm0, %v491_v11  ;;  %v504_v35 = vld [vmem:[%s11257_s22 + $0x80] sm:$0xff]  ;;  %v11340_v36 = vld [vmem:[%s11274_s28 + $0x58] sm:$0xff]  ;;  %v505_v37 = vld [vmem:[%s11257_s22 + $0x88] sm:$0xff]  ;;  %v2437_v60 = vand.u32 2139095040, %v1175_v33  ;;  %v2022_v62 = vshrl.u32 %v2021_v51, 23  ;;  %v9703_v9 = vadd.s32 4294967169, %v1814_v61 }
  0x1d   : > { %10113 = vmatprep.mubr.msk.f32.mxu0 %vm531_vm0, %v492_v12  ;;  %v506_v38 = vld [vmem:[%s11257_s22 + $0x90] sm:$0xff]  ;;  %v11347_v39 = vld [vmem:[%s11274_s28 + $0x60] sm:$0xff]  ;;  %v11352_v40 = vld [vmem:[%s11274_s28 + $0x68] sm:$0xff]  ;;  %v2230_v6 = vshrl.u32 %v2229_v58, 23  ;;  %v1508_v20 = vadd.s32 1, %v9691_v5 }
  0x1e   : > { %1220 = vperm.xlu0 %10550, %v11301_v21   ;;  %v507_v41 = vld [vmem:[%s11257_s22 + $0x98] sm:$0xff]  ;;  %v508_v42 = vld [vmem:[%s11257_s22 + $0xa0] sm:$0xff]  ;;  %v11359_v43 = vld [vmem:[%s11274_s28 + $0x70] sm:$0xff]  ;;  %v2438_v8 = vshrl.u32 %v2437_v60, 23  ;;  %v9711_v10 = vadd.s32 4294967169, %v2022_v62  ;;  %v2645_v11 = vand.u32 2139095040, %v11347_v39 }
  0x1f   : > { %1225 = vperm.xlu1 %10551, %v11308_v24   ;;  %v11364_v44 = vld [vmem:[%s11274_s28 + $0x78] sm:$0xff]  ;;  %v509_v45 = vld [vmem:[%s11257_s22 + $0xa8] sm:$0xff]  ;;  %v510_v46 = vld [vmem:[%s11257_s22 + $0xb0] sm:$0xff]  ;;  %v9719_v21 = vadd.s32 4294967169, %v2230_v6  ;;  %vm1509_vm2 = vcmp.gt.s32.totalorder %v1508_v20, 0 }
  0x20   : > { %10114 = vmatmul.mubr.msk.f32.gmra.mrb[4].mxu0 %vm531_vm0, %v493_v13  ;;  %v11372_v48 = vld [vmem:[%s11274_s28 + $0x80] sm:$0xff]  ;;  %v11380_v52 = vld [vmem:[%s11274_s28 + $0x88] sm:$0xff]  ;;  %v511_v53 = vld [vmem:[%s11257_s22 + $0xb8] sm:$0xff]  ;;  %v1510_v51 = vsel %vm1509_vm2, %v1508_v20, 0 }
  0x21   : > { %10116 = vmatprep.mubr.msk.f32.mxu0 %vm531_vm0, %v494_v14  ;;  %v512_v54 = vld [vmem:[%s11257_s22 + $0xc0] sm:$0xff]  ;;  %v11387_v56 = vld [vmem:[%s11274_s28 + $0x90] sm:$0xff]  ;;  %v11394_v63 = vld [vmem:[%s11274_s28 + $0x98] sm:$0xff]  ;;  %v2853_v14 = vand.u32 2139095040, %v11359_v43  ;;  %v11459_v6 = vshrl.u32 %v1510_v51, 5 }
  0x22   : > { %1230 = vperm.xlu0 %10550, %v11313_v25   ;;  %v513_v0 = vld [vmem:[%s11257_s22 + $0xc8] sm:$0xff]  ;;  %v514_v1 = vld [vmem:[%s11257_s22 + $0xd0] sm:$0xff]  ;;  %v11402_v4 = vld [vmem:[%s11274_s28 + $0xa0] sm:$0xff]  ;;  %v1820_v25 = vadd.s32 1, %v9703_v9 }
  0x23   : > { %1235 = vperm.xlu1 %10551, %v11320_v28   ;;  %v11408_v12 = vld [vmem:[%s11274_s28 + $0xa8] sm:$0xff]  ;;  %v515_v13 = vld [vmem:[%s11257_s22 + $0xd8] sm:$0xff]  ;;  %v516_v16 = vld [vmem:[%s11257_s22 + $0xe0] sm:$0xff] }
  0x24   : > { %10117 = vmatmul.mubr.msk.f32.gmra.mrb[6].mxu0 %vm531_vm0, %v495_v17  ;;  %v1404_v17 = vadd.s32 1, %v9687_v2  ;;  %v11416_v19 = vld [vmem:[%s11274_s28 + $0xb0] sm:$0xff]  ;;  %vm1821_vm3 = vcmp.gt.s32.totalorder %v1820_v25, 0  ;;  %v519_v47 = vld [vmem:[%s11257_s22 + $0xf8] sm:$0xff]  ;;  %v1193_v62 = vld [vmem:[%s11274_s28 + $0xe0] sm:$0xff] }
  0x25   : > { %10119 = vmatprep.mubr.msk.f32.mxu0 %vm531_vm0, %v496_v18  ;;  %v1710_v18 = vshrl.u32 %v1709_v3, 23  ;;  %v1192_v55 = vld [vmem:[%s11274_s28 + $0xd8] sm:$0xff]  ;;  %v1822_v57 = vsel %vm1821_vm3, %v1820_v25, 0  ;;  %v8548_v3 = vld [vmem:[%s11432_s14 + $0x8] sm:$0xff] }
  0x26   : > { %1240 = vperm.xlu0 %10550, %v11325_v29   ;;  %v11421_v29 = vld [vmem:[%s11274_s28 + $0xc0] sm:$0xff]  ;;  %vm1405_vm1 = vcmp.gt.s32.totalorder %v1404_v17, 0 }
  0x27   : > { %1245 = vperm.xlu1 %10551, %v1174_v32   ;;  %v2854_v32 = vshrl.u32 %v2853_v14, 23  ;;  %v1406_v50 = vsel %vm1405_vm1, %v1404_v17, 0 }
  0x28   : > { %10120 = vmatmul.mubr.msk.f32.gmra.mrb[8].mxu0 %vm531_vm0, %v497_v22  ;;  %v9695_v22 = vadd.s32 4294967169, %v1606_v7  ;;  %v11461_v7 = vand.u32 31, %v1510_v51 }
  0x29   : > { %10122 = vmatprep.mubr.msk.f32.mxu0 %vm531_vm0, %v498_v23  ;;  %v9727_v23 = vadd.s32 4294967169, %v2438_v8  ;;  %v11463_v8 = vand.u32 31, %v1822_v57 }
  0x2a   : > { %1250 = vperm.xlu0 %10550, %v1175_v33   ;;  %v3061_v33 = vand.u32 2139095040, %v11372_v48 }
  0x2b   : > { %1255 = vperm.xlu1 %10551, %v11340_v36   ;;  %17634 = vst [vmem:[#allocation3_spill] sm:$0xff] %v11463_v8 }
  0x2c   : > { %10123 = vmatmul.mubr.msk.f32.gmra.mrb[10].mxu0 %vm531_vm0, %v499_v26  ;;  %v2028_v26 = vadd.s32 1, %v9711_v10  ;;  %v3062_v49 = vshrl.u32 %v3061_v33, 23  ;;  %v8549_v10 = vld [vmem:[%s11432_s14 + $0x10] sm:$0xff] }
  0x2d   : > { %10125 = vmatprep.mubr.msk.f32.mxu0 %vm531_vm0, %v500_v27  ;;  %v2646_v27 = vshrl.u32 %v2645_v11, 23  ;;  %v1194_v11 = vld [vmem:[%s11274_s28 + $0xe8] sm:$0xff] }
  0x2e   : > { %1260 = vperm.xlu0 %10550, %v11347_v39   ;;  %vm2029_vm4 = vcmp.gt.s32.totalorder %v2028_v26, 0  ;;  %v9751_v5 = vadd.s32 4294967169, %v3062_v49  ;;  %v8552_v49 = vld [vmem:[%s11432_s14 + $0x28] sm:$0xff] }
  0x2f   : > { %1265 = vperm.xlu1 %10551, %v11352_v40   ;;  %v2030_v58 = vsel %vm2029_vm4, %v2028_v26, 0  ;;  %v8550_v26 = vld [vmem:[%s11432_s14 + $0x18] sm:$0xff] }
  0x30   : > { %10126 = vmatmul.mubr.msk.f32.gmra.mrb[12].mxu0 %vm531_vm0, %v501_v30  ;;  %v1188_v30 = vld [vmem:[%s11274_s28 + $0xb8] sm:$0xff]  ;;  %v11470_v14 = vand.u32 31, %v2030_v58  ;;  %v3068_v25 = vadd.s32 1, %v9751_v5 }
  0x31   : > { %10128 = vmatprep.mubr.msk.f32.mxu0 %vm531_vm0, %v502_v31  ;;  %v517_v31 = vld [vmem:[%s11257_s22 + $0xe8] sm:$0xff] }
  0x32   : > { %1270 = vperm.xlu0 %10550, %v11359_v43   ;;  %v2541_v43 = vand.u32 2139095040, %v11340_v36  ;;  %17636 = vst [vmem:[#allocation5_spill] sm:$0xff] %v11470_v14  ;;  %v11496_v33 = vsub.s32 32, %v11470_v14  ;;  %vm3069_vm12 = vcmp.gt.s32.totalorder %v3068_v25, 0 }
  0x33   : > { %1275 = vperm.xlu1 %10551, %v11364_v44  }
  0x34   : > { %10129 = vmatmul.mubr.msk.f32.gmra.mrb[14].mxu0 %vm531_vm0, %v503_v34  ;;  %v518_v34 = vld [vmem:[%s11257_s22 + $0xf0] sm:$0xff]  ;;  %v2542_v61 = vshrl.u32 %v2541_v43, 23  ;;  %17641 = vst [vmem:[#allocation10_spill] sm:$0xff] %v11496_v33  ;;  %s11159_s22 = smov 64  }
  0x35   : > { %10131 = vmatprep.mubr.msk.f32.mxu0 %vm531_vm0, %v504_v35  ;;  %v9699_v35 = vadd.s32 4294967169, %v1710_v18  ;;  %v3269_v18 = vand.u32 2139095040, %v11387_v56 }
  0x36   : > { %1280 = vperm.xlu0 %10550, %v11372_v48   ;;  %v9743_v48 = vadd.s32 4294967169, %v2854_v32  ;;  %v9731_v20 = vadd.s32 4294967169, %v2542_v61  ;;  %v8551_v32 = vld [vmem:[%s11432_s14 + $0x20] sm:$0xff] }
  0x37   : > { %1285 = vperm.xlu1 %10551, %v11380_v52   ;;  %v1716_v59 = vadd.s32 1, %v9699_v35 }
  0x38   : > { %10132 = vmatmul.mubr.msk.f32.gmra.mrb[16].mxu0 %vm531_vm0, %v505_v37  ;;  %v2236_v37 = vadd.s32 1, %v9719_v21  ;;  %v2860_v2 = vadd.s32 1, %v9743_v48  ;;  %v1195_v21 = vld [vmem:[%s11274_s28 + $0xf0] sm:$0xff]  ;;  %v2548_v43 = vadd.s32 1, %v9731_v20 }
  0x39   : > { %10134 = vmatprep.mubr.msk.f32.mxu0 %vm531_vm0, %v506_v38  ;;  %v1612_v38 = vadd.s32 1, %v9695_v22  ;;  %vm1717_vm9 = vcmp.gt.s32.totalorder %v1716_v59, 0 }
  0x3a   : > { %1290 = vperm.xlu0 %10550, %v11387_v56   ;;  %vm2237_vm6 = vcmp.gt.s32.totalorder %v2236_v37, 0  ;;  %vm2861_vm11 = vcmp.gt.s32.totalorder %v2860_v2, 0  ;;  %v11490_v56 = vshrl.u32 %v2030_v58, 5  ;;  %v1718_v35 = vsel %vm1717_vm9, %v1716_v59, 0 }
  0x3b   : > { %1295 = vperm.xlu1 %10551, %v11394_v63   ;;  %vm1613_vm7 = vcmp.gt.s32.totalorder %v1612_v38, 0  ;;  %v2238_v9 = vsel %vm2237_vm6, %v2236_v37, 0  ;;  %v11526_v58 = vshrl.u32 %v1718_v35, 5  ;;  %v11528_v59 = vand.u32 31, %v1718_v35 }
  0x3c   : > { %10135 = vmatmul.mubr.msk.f32.gmra.mrb[18].mxu0 %vm531_vm0, %v507_v41  ;;  %v2444_v41 = vadd.s32 1, %v9727_v23  ;;  %v11480_v23 = vand.u32 31, %v2238_v9  ;;  %17639 = vst [vmem:[#allocation8_spill] sm:$0xff] %v11490_v56  ;;  %vm2549_vm13 = vcmp.gt.s32.totalorder %v2548_v43, 0 }
  0x3d   : > { %10137 = vmatprep.mubr.msk.f32.mxu0 %vm531_vm0, %v508_v42  ;;  %v9735_v42 = vadd.s32 4294967169, %v2646_v27  ;;  %v11485_v27 = vsub.s32 32, %v11461_v7  ;;  %17649 = vst [vmem:[#allocation18_spill] sm:$0xff] %v11526_v58  ;;  %17650 = vst [vmem:[#allocation19_spill] sm:$0xff] %v11528_v59 }
  0x3e   : > { %1300 = vperm.xlu0 %10550, %v11402_v4   ;;  %vm2445_vm8 = vcmp.gt.s32.totalorder %v2444_v41, 0  ;;  %17637 = vst [vmem:[#allocation6_spill] sm:$0xff] %v11480_v23 }
  0x3f   : > { %1305 = vperm.xlu1 %10551, %v11408_v12   ;;  %v2652_v60 = vadd.s32 1, %v9735_v42  ;;  %v2446_v17 = vsel %vm2445_vm8, %v2444_v41, 0  ;;  %v2862_v41 = vsel %vm2861_vm11, %v2860_v2, 0  ;;  %v3270_v42 = vshrl.u32 %v3269_v18, 23 }
  0x40   : > { %10138 = vmatmul.mubr.msk.f32.gmra.mrb[20].mxu0 %vm531_vm0, %v509_v45  ;;  %v11438_v45 = vld [vmem:[%s11274_s28 + $0xd0] sm:$0xff] }
  0x41   : > { %10140 = vmatprep.mubr.msk.f32.mxu0 %vm531_vm0, %v510_v46  ;;  %17633 = vst [vmem:[#allocation2_spill] sm:$0xff] %v11438_v45  ;;  %v1190_v46 = vld [vmem:[%s11274_s28 + $0xc8] sm:$0xff]  ;;  %vm2653_vm10 = vcmp.gt.s32.totalorder %v2652_v60, 0  ;;  %v9759_v2 = vadd.s32 4294967169, %v3270_v42 }
  0x42   : > { %1310 = vperm.xlu0 %10550, %v11416_v19   ;;  %v2654_v37 = vsel %vm2653_vm10, %v2652_v60, 0  ;;  %v11530_v60 = vand.u32 31, %v2862_v41 }
  0x43   : > { %1315 = vperm.xlu1 %10551, %v1188_v30   ;;  %v11488_v30 = vsub.s32 32, %v11463_v8  ;;  %v11519_v51 = vand.u32 31, %v2654_v37  ;;  %v11547_v18 = vshrl.u32 %v2654_v37, 5  ;;  %v3276_v42 = vadd.s32 1, %v9759_v2 }
  0x44   : > { %10141 = vmatmul.mubr.msk.f32.gmra.mrb[22].mxu0 %vm531_vm0, %v511_v53  ;;  %v8547_v53 = vld [vmem:[%s11432_s14] sm:$0xff]  ;;  %v11560_v35 = vsub.s32 32, %v11530_v60 }
  0x45   : > { %10143 = vmatprep.mubr.msk.f32.mxu0 %vm531_vm0, %v512_v54  ;;  %v17490_v54 = vand.u32 2147483647, %v11281_v15  ;;  %17638 = vst [vmem:[#allocation7_spill] sm:$0xff] %v11488_v30  ;;  %v11550_v20 = vsub.s32 32, %v11519_v51  ;;  %vm3277_vm2 = vcmp.gt.s32.totalorder %v3276_v42, 0 }
  0x46   : > { %1320 = vperm.xlu0 %10550, %v11421_v29  }
  0x47   : > { %1325 = vperm.xlu1 %10551, %v1190_v46   ;;  %v11505_v46 = vshrl.u32 %v2238_v9, 5  ;;  %v17491_v9 = vmov 2475754826  }
  0x48   : > { %10144 = vmatmul.mubr.msk.f32.gmra.mrb[24].mxu0 %vm531_vm0, %v513_v0  ;;  %v11453_v0 = vshrl.u32 %v1406_v50, 5 }
  0x49   : > { %10146 = vmatprep.mubr.msk.f32.mxu0 %vm531_vm0, %v514_v1  ;;  %v11455_v1 = vand.u32 31, %v1406_v50  ;;  %17643 = vst [vmem:[#allocation12_spill] sm:$0xff] %v11505_v46  ;;  %v11517_v50 = vshrl.u32 %v2446_v17, 5 }
  0x4a   : > { %1330 = vperm.xlu0 %10550, %v11438_v45   ;;  %vm1426_vm14 = vcmp.lt.s32.totalorder %v11453_v0, 1  ;;  %vm1427_vm15 = vcmp.lt.s32.totalorder %v11453_v0, 2  ;;  %vm1429_vm1 = vcmp.lt.s32.totalorder %v11453_v0, 4 }
  0x4b   : > { %1335 = vperm.xlu1 %10551, %v1192_v55   ;;  %v11478_v22 = vsub.s32 32, %v11455_v1  ;;  %17647 = vst [vmem:[#allocation16_spill] sm:$0xff] %v11517_v50  ;;  %v8553_v55 = vld [vmem:[%s11432_s14 + $0x30] sm:$0xff] }
  0x4c   : > { %10147 = vmatmul.mubr.msk.f32.gmra.mrb[26].mxu0 %vm531_vm0, %v515_v13  ;;  %v11468_v13 = vshrl.u32 %v1822_v57, 5 }
  0x4d   : > { %10149 = vmatprep.mubr.msk.f32.mxu0 %vm531_vm0, %v516_v16  ;;  %v1614_v16 = vsel %vm1613_vm7, %v1612_v38, 0  ;;  %v1917_v38 = vand.u32 2139095040, %v11308_v24 }
  0x4e   : > { %17635 = vst [vmem:[#allocation4_spill] sm:$0xff] %v11468_v13  ;;  %1340 = vperm.xlu0 %10550, %v1193_v62   ;;  %v11510_v48 = vshrl.u32 %v1614_v16, 5  ;;  %v11534_v62 = vsel %vm3069_vm12, %v3068_v25, 0  ;;  %v8555_v25 = vld [vmem:[%s11432_s14 + $0x40] sm:$0xff] }
  0x4f   : > { %1345 = vperm.xlu1 %10551, %v1194_v11   ;;  %v11532_v61 = vshrl.u32 %v1917_v38, 23  ;;  %v1414_v11 = vshll.u32 %v17491_v9, %v11455_v1  ;;  %v11563_v38 = vand.u32 31, %v11534_v62 }
  0x50   : > { %10150 = vmatmul.mubr.msk.f32.gmra.mrb[28].mxu0 %vm531_vm0, %v517_v31  ;;  %v11492_v31 = vand.u32 31, %v1614_v16  ;;  %17645 = vst [vmem:[#allocation14_spill] sm:$0xff] %v11510_v48  ;;  %v17494_v16 = vmov 2131351028  }
  0x51   : > { %10152 = vmatprep.mubr.msk.f32.mxu0 %vm531_vm0, %v518_v34  ;;  %v11498_v34 = vand.u32 31, %v2446_v17  ;;  %17651 = vst [vmem:[#allocation20_spill] sm:$0xff] %v11532_v61  ;;  %v1415_v17 = vshrl.u32 %v17494_v16, %v11478_v22  ;;  %v1417_v37 = vshll.u32 %v17494_v16, %v11455_v1  ;;  %v17504_v16 = vmov 920167782  }
  0x52   : > { %17640 = vst [vmem:[#allocation9_spill] sm:$0xff] %v11492_v31  ;;  %1350 = vperm.xlu0 %10550, %v1195_v21   ;;  %v11515_v24 = vsub.s32 32, %v11492_v31 }
  0x53   : > { %17642 = vst [vmem:[#allocation11_spill] sm:$0xff] %v11498_v34  ;;  %v11524_v57 = vsub.s32 32, %v11498_v34  ;;  %v1416_v50 = vor.u32 %v1415_v17, %v1414_v11 }
  0x54   : > { %10153 = vmatmul.mubr.msk.f32.gmra.mrb[30].mxu0 %vm531_vm0, %v519_v47  ;;  %v11508_v47 = vsub.s32 32, %v11480_v23  ;;  %17646 = vst [vmem:[#allocation15_spill] sm:$0xff] %v11515_v24  ;;  %v1423_v23 = vshll.u32 %v17504_v16, %v11455_v1  ;;  %vm1428_vm0 = vcmp.lt.s32.totalorder %v11453_v0, 3  ;;  %v17653_v0 = vmov 683565275  }
  0x55   : > { %10237 = vmatprep.mubr.msk.f32.mxu0 %vm8587_vm5, %v8547_v53  ;;  %v2125_v53 = vand.u32 2139095040, %v11320_v28  ;;  %17648 = vst [vmem:[#allocation17_spill] sm:$0xff] %v11524_v57  ;;  %v8554_v28 = vld [vmem:[%s11432_s14 + $0x38] sm:$0xff]  ;;  %v8563_v57 = vld [vmem:[%s11432_s14 + $0x80] sm:$0xff]  ;;  %v2658_v31 = vshrl.u32 %v17653_v0, %v11550_v20 }
  0x56   : > { %17644 = vst [vmem:[#allocation13_spill] sm:$0xff] %v11508_v47 }
  0x57   : > { %v11552_v21 = vshrl.u32 %v2125_v53, 23  ;;  %v17517_v53 = vmov 2102212464  }
  0x58   : > { %10238 = vmatmul.mubr.msk.f32.vlgmr.msra.gmra.mrb[32].mxu0 %vm8587_vm5, %v8548_v3  ;;  %v17496_v3 = vmov 683565275   ;;  %v1420_v2 = vshll.u32 %v17517_v53, %v11455_v1 }
  0x59   : > { %10240 = vmatprep.mubr.msk.f32.mxu0 %vm8587_vm5, %v8549_v10  ;;  %v1411_v5 = vshll.u32 %v17496_v3, %v11455_v1  ;;  %v1412_v10 = vshrl.u32 %v17491_v9, %v11478_v22  ;;  %17652 = vst [vmem:[#allocation21_spill] sm:$0xff] %v11552_v21  ;;  %v8558_v1 = vld [vmem:[%s11432_s14 + $0x58] sm:$0xff] }
  0x5b   : > { %v1413_v9 = vor.u32 %v1412_v10, %v1411_v5  ;;  %v17502_v10 = vmov 1326507024  }
  0x5c   : > { %10241 = vmatmul.mubr.msk.f32.gmra.mrb[34].mxu0 %vm8587_vm5, %v8550_v26  ;;  %v1401_v26 = vand.u32 8388607, %v17490_v54  ;;  %v8556_v54 = vld [vmem:[%s11432_s14 + $0x48] sm:$0xff]  ;;  %v1424_v11 = vshrl.u32 %v17502_v10, %v11478_v22 }
  0x5d   : > { %10243 = vmatprep.mubr.msk.f32.mxu0 %vm8587_vm5, %v8551_v32  ;;  %v11557_v32 = vshrl.u32 %v2862_v41, 5  ;;  %v1410_v41 = vshrl.u32 %v17496_v3, %v11478_v22  ;;  %v8557_v3 = vld [vmem:[%s11432_s14 + $0x50] sm:$0xff] }
  0x5e   : > { %v1402_v46 = vor.u32 8388608, %v1401_v26  ;;  %v1425_v26 = vor.u32 %v1424_v11, %v1423_v23 }
  0x60   : > { %10244 = vmatmul.mubr.msk.f32.gmra.mrb[36].mxu0 %vm8587_vm5, %v8552_v49  ;;  %v11568_v49 = vsel %vm2549_vm13, %v2548_v43, 0  ;;  %v1421_v43 = vshrl.u32 %v17504_v16, %v11478_v22  ;;  %v1439_v23 = vsel %vm1429_vm1, %v1425_v26, 1326507024 }
  0x61   : > { %10246 = vmatprep.mubr.msk.f32.mxu0 %vm8587_vm5, %v8553_v55  ;;  %v1418_v55 = vshrl.u32 %v17517_v53, %v11478_v22  ;;  %v11590_v17 = vand.u32 31, %v11568_v49  ;;  %v1430_v22 = vsel %vm1426_vm14, %v1410_v41, %v1413_v9 }
  0x62   : > { %v1422_v5 = vor.u32 %v1421_v43, %v1420_v2 }
  0x63   : > { %v1419_v47 = vor.u32 %v1418_v55, %v1417_v37  ;;  %v1434_v37 = vsel %vm1426_vm14, %v1413_v9, %v1416_v50  ;;  %v8559_v55 = vld [vmem:[%s11432_s14 + $0x60] sm:$0xff]  ;;  %v11605_v11 = vsub.s32 32, %v11590_v17  ;;  %v2957_v9 = vand.u32 2139095040, %v11364_v44 }
  0x64   : > { %10247 = vmatmul.mubr.msk.f32.gmra.mrb[38].mxu0 %vm8587_vm5, %v8554_v28  ;;  %v3477_v28 = vand.u32 2139095040, %v11402_v4  ;;  %v3685_v4 = vand.u32 2139095040, %v11416_v19  ;;  %v1435_v43 = vsel %vm1429_vm1, %v1422_v5, 920167782  ;;  %v1442_v19 = vshll.u32 %v1402_v46, 8 }
  0x65   : > { %10249 = vmatprep.mubr.msk.f32.mxu0 %vm8587_vm5, %v8555_v25  ;;  %v2749_v25 = vand.u32 2139095040, %v11352_v40  ;;  %v1431_v2 = vsel %vm1429_vm1, %v1419_v47, 2102212464  ;;  %v1438_v10 = vsel %vm1426_vm14, %v1416_v50, %v1419_v47  ;;  %v1440_v41 = vsel %vm1428_vm0, %v1422_v5, %v1439_v23 }
  0x66   : > { %v1441_v26 = vsel %vm1427_vm15, %v1438_v10, %v1440_v41  ;;  %v11623_v44 = vsel %vm3277_vm2, %v3276_v42, 0  ;;  %v3686_v16 = vshrl.u32 %v3685_v4, 23  ;;  %v2555_v10 = vshll.u32 %v17653_v0, %v11590_v17 }
  0x67   : > { %v2750_v23 = vshrl.u32 %v2749_v25, 23  ;;  %v17655_v41 = vmov 2131351028   ;;  %v11641_v4 = vshrl.u32 %v11568_v49, 5  ;;  %v2564_v33 = vshll.u32 %v17517_v53, %v11590_v17 }
  0x68   : > { %10250 = vmatmul.mubr.msk.f32.gmra.mrb[40].mxu0 %vm8587_vm5, %v8556_v54  ;;  %v1432_v54 = vsel %vm1428_vm0, %v1416_v50, %v1431_v2  ;;  %v8560_v50 = vld [vmem:[%s11432_s14 + $0x68] sm:$0xff]  ;;  %v2559_v25 = vshrl.u32 %v17655_v41, %v11605_v11  ;;  %vm1396_vm14 = vcmp.lt.s32.totalorder %v11281_v15, 0  ;;  %vm2677_vm1 = vcmp.lt.s32.totalorder %v11547_v18, 4 }
  0x69   : > { %10252 = vmatprep.mubr.msk.f32.mxu0 %vm8587_vm5, %v8557_v3  ;;  %v1436_v3 = vsel %vm1428_vm0, %v1419_v47, %v1435_v43  ;;  %v1433_v47 = vsel %vm1427_vm15, %v1430_v22, %v1432_v54  ;;  %v2958_v22 = vshrl.u32 %v2957_v9, 23  ;;  %v17658_v9 = vmov 920167782  }
  0x6a   : > { %v1437_v46 = vsel %vm1427_vm15, %v1434_v37, %v1436_v3  ;;  %v8561_v37 = vld [vmem:[%s11432_s14 + $0x70] sm:$0xff]  ;;  %v11626_v3 = vmul.u32.u64.low %v1442_v19, %v1441_v26  ;;  %v11627_v5 = vmul.u32.u64.high %v1442_v19, %v1441_v26, %v11626_v3  ;;  %v1449_v42 = vmul.u32 %v1442_v19, %v1433_v47  ;;  %v8562_v26 = vld [vmem:[%s11432_s14 + $0x78] sm:$0xff] }
  0x6b   : > { %v11619_v2 = vmul.u32.u64.low %v1442_v19, %v1437_v46  ;;  %v11620_v43 = vmul.u32.u64.high %v1442_v19, %v1437_v46, %v11619_v2  ;;  %v2561_v19 = vshll.u32 %v17655_v41, %v11590_v17  ;;  %v11651_v47 = vand.u32 31, %v11623_v44 }
  0x6c   : > { %10253 = vmatmul.mubr.msk.f32.gmra.mrb[42].mxu0 %vm8587_vm5, %v8558_v1  ;;  %v3478_v1 = vshrl.u32 %v3477_v28, 23  ;;  %v17654_v28 = vmov 2475754826   ;;  %v2567_v30 = vshll.u32 %v17658_v9, %v11590_v17  ;;  %v9739_v8 = vadd.s32 4294967169, %v2750_v23 }
  0x6d   : > { %10255 = vmatprep.mubr.msk.f32.mxu0 %vm8587_vm5, %v8559_v55  ;;  %v1196_v55 = vld [vmem:[%s11274_s28 + $0xf8] sm:$0xff]  ;;  %v2556_v54 = vshrl.u32 %v17654_v28, %v11605_v11  ;;  %v2558_v46 = vshll.u32 %v17654_v28, %v11590_v17  ;;  %v1452_v3 = vadd.s32 1, %v11620_v43  ;;  %17656 = vst [vmem:[#allocation22_spill] sm:$0xff] %v11651_v47  ;;  %vm1451_vm3 = vc.u32 %v11627_v5, %v11619_v2 }
  0x6e   : > { %1355 = vperm.xlu1 %10551, %v1196_v55   ;;  %v9767_v55 = vadd.s32 4294967169, %v3478_v1  ;;  %v2565_v1 = vshrl.u32 %v17658_v9, %v11605_v11  ;;  %vm2570_vm4 = vcmp.lt.s32.totalorder %v11641_v4, 1  ;;  %vm2572_vm6 = vcmp.lt.s32.totalorder %v11641_v4, 3  ;;  %v8566_v17 = vld [vmem:[%s11432_s14 + $0x98] sm:$0xff] }
  0x6f   : > { %v1453_v49 = vsel %vm1451_vm3, %v1452_v3, %v11620_v43  ;;  %v2557_v56 = vor.u32 %v2556_v54, %v2555_v10  ;;  %v2560_v13 = vor.u32 %v2559_v25, %v2558_v46  ;;  %v8564_v43 = vld [vmem:[%s11432_s14 + $0x88] sm:$0xff]  ;;  %v17659_v54 = vmov 1326507024   ;;  %v8565_v25 = vld [vmem:[%s11432_s14 + $0x90] sm:$0xff] }
  0x70   : > { %10256 = vmatmul.mubr.msk.f32.gmra.mrb[44].mxu0 %vm8587_vm5, %v8560_v50  ;;  %v2562_v50 = vshrl.u32 %v17517_v53, %v11605_v11  ;;  %v1454_v14 = vadd.s32 %v1453_v49, %v1449_v42  ;;  %v2568_v3 = vshrl.u32 %v17659_v54, %v11605_v11  ;;  %v9775_v42 = vadd.s32 4294967169, %v3686_v16 }
  0x71   : > { %10258 = vmatprep.mubr.msk.f32.mxu0 %vm8587_vm5, %v8561_v37  ;;  %v17657_v37 = vand.u32 2147483647, %v11340_v36  ;;  %v2566_v49 = vor.u32 %v2565_v1, %v2564_v33  ;;  %vm2573_vm7 = vcmp.lt.s32.totalorder %v11641_v4, 4  ;;  %v2554_v23 = vshrl.u32 %v17653_v0, %v11605_v11 }
  0x72   : > { %v2563_v10 = vor.u32 %v2562_v50, %v2561_v19  ;;  %v1455_v46 = vadd.s32 536870912, %v1454_v14  ;;  %v2569_v53 = vor.u32 %v2568_v3, %v2567_v30  ;;  %vm2571_vm8 = vcmp.lt.s32.totalorder %v11641_v4, 2 }
  0x73   : > { %v2545_v34 = vand.u32 8388607, %v17657_v37  ;;  %v2578_v33 = vsel %vm2570_vm4, %v2557_v56, %v2560_v13  ;;  %v2756_v50 = vadd.s32 1, %v9739_v8  ;;  %v3692_v3 = vadd.s32 1, %v9775_v42 }
  0x74   : > { %10259 = vmatmul.mubr.msk.f32.gmra.mrb[46].mxu0 %vm8587_vm5, %v8562_v26  ;;  %v3484_v26 = vadd.s32 1, %v9767_v55  ;;  %v2575_v30 = vsel %vm2573_vm7, %v2563_v10, 2102212464  ;;  %v2582_v16 = vsel %vm2570_vm4, %v2560_v13, %v2563_v10  ;;  %v2583_v19 = vsel %vm2573_vm7, %v2569_v53, 1326507024 }
  0x75   : > { %10261 = vmatprep.mubr.msk.f32.mxu0 %vm8587_vm5, %v8563_v57  ;;  %v2546_v37 = vor.u32 8388608, %v2545_v34  ;;  %v11675_v57 = vshrl.u32 %v1455_v46, 30  ;;  %v2579_v34 = vsel %vm2573_vm7, %v2566_v49, 920167782  ;;  %v9747_v55 = vadd.s32 4294967169, %v2958_v22 }
  0x76   : > { %v2580_v11 = vsel %vm2572_vm6, %v2563_v10, %v2579_v34  ;;  %v2574_v8 = vsel %vm2570_vm4, %v2554_v23, %v2557_v56  ;;  %v2576_v53 = vsel %vm2572_vm6, %v2560_v13, %v2575_v30  ;;  %v11704_v10 = vshrl.u32 %v11534_v62, 5  ;;  %v8569_v13 = vld [vmem:[%s11432_s14 + $0xb0] sm:$0xff] }
  0x77   : > { %v1457_v1 = vshll.u32 %v11675_v57, 30  ;;  %v2581_v46 = vsel %vm2571_vm8, %v2578_v33, %v2580_v11  ;;  %v2586_v58 = vshll.u32 %v2546_v37, 8  ;;  %vm3485_vm9 = vcmp.gt.s32.totalorder %v3484_v26, 0  ;;  %v8570_v11 = vld [vmem:[%s11432_s14 + $0xb8] sm:$0xff] }
  0x78   : > { %10262 = vmatmul.mubr.msk.f32.gmra.mrb[48].mxu0 %vm8587_vm5, %v8564_v43  ;;  %v8567_v43 = vld [vmem:[%s11432_s14 + $0xa0] sm:$0xff]  ;;  %vm2757_vm10 = vcmp.gt.s32.totalorder %v2756_v50, 0  ;;  %v11718_v23 = vsub.s32 32, %v11563_v38  ;;  %v11721_v62 = vshrl.u32 %v11623_v44, 5  ;;  %v3893_v33 = vand.u32 2139095040, %v11421_v29 }
  0x79   : > { %10264 = vmatprep.mubr.msk.f32.mxu0 %vm8587_vm5, %v8565_v25  ;;  %v2584_v25 = vsel %vm2572_vm6, %v2566_v49, %v2583_v19  ;;  %v11694_v59 = vsub.s32 %v1454_v14, %v1457_v1  ;;  %v8568_v14 = vld [vmem:[%s11432_s14 + $0xa8] sm:$0xff]  ;;  %v2577_v30 = vsel %vm2571_vm8, %v2574_v8, %v2576_v53  ;;  %v11727_v34 = vsub.s32 32, %v11651_v47 }
  0x7a   : > { %v2585_v22 = vsel %vm2571_vm8, %v2582_v16, %v2584_v25  ;;  %17660 = vst [vmem:[#allocation23_spill] sm:$0xff] %v11721_v62  ;;  %vm3693_vm11 = vcmp.gt.s32.totalorder %v3692_v3, 0  ;;  %v11729_v16 = vadd.s32 1, %v9747_v55  ;;  %v3486_v1 = vsel %vm3485_vm9, %v3484_v26, 0  ;;  %v8571_v25 = vld [vmem:[%s11432_s14 + $0xc0] sm:$0xff] }
  0x7b   : > { %v11706_v42 = vmul.u32.u64.low %v2586_v58, %v2585_v22  ;;  %v11707_v49 = vmul.u32.u64.high %v2586_v58, %v2585_v22, %v11706_v42  ;;  %v1460_v37 = vsub.s32 0, %v11694_v59  ;;  %17661 = vst [vmem:[#allocation24_spill] sm:$0xff] %v11727_v34  ;;  %v2758_v44 = vsel %vm2757_vm10, %v2756_v50, 0 }
  0x7c   : > { %10265 = vmatmul.mubr.msk.f32.gmra.mrb[50].mxu0 %vm8587_vm5, %v8566_v17  ;;  %v11712_v56 = vmul.u32.u64.low %v2586_v58, %v2581_v46  ;;  %v11713_v17 = vmul.u32.u64.high %v2586_v58, %v2581_v46, %v11712_v56  ;;  %v2593_v46 = vmul.u32 %v2586_v58, %v2577_v30  ;;  %v17521_v55 = vand.u32 2147483647, %v11347_v39  ;;  %v8572_v30 = vld [vmem:[%s11432_s14 + $0xc8] sm:$0xff] }
  0x7d   : > { %10267 = vmatprep.mubr.msk.f32.mxu0 %vm8587_vm5, %v8567_v43  ;;  %v9688_v19 = vmin.u32 %v1460_v37, %v11694_v59  ;;  %v11743_v8 = vshrl.u32 %v3486_v1, 5  ;;  %v11746_v26 = vsel %vm3693_vm11, %v3692_v3, 0  ;;  %v11748_v50 = vshrl.u32 %v3893_v33, 23 }
  0x7e   : > { %vm2595_vm12 = vc.u32 %v11707_v49, %v11712_v56  ;;  %17663 = vst [vmem:[#allocation26_spill] sm:$0xff] %v11746_v26  ;;  %v2596_v53 = vadd.s32 1, %v11713_v17  ;;  %v11751_v22 = vand.u32 31, %v3486_v1  ;;  %v11753_v58 = vshrl.u32 %v2758_v44, 5 }
  0x7f   : > { %v1462_v43 = vclz %v9688_v19  ;;  %17662 = vst [vmem:[#allocation25_spill] sm:$0xff] %v11743_v8  ;;  %v11755_v42 = vand.u32 31, %v2758_v44  ;;  %v1450_v37 = vadd.s32 %v11619_v2, %v11627_v5  ;;  %v1480_v3 = vsub.s32 4, %v11675_v57 }
  0x80   : > { %10268 = vmatmul.mubr.msk.f32.gmra.mrb[52].mxu0 %vm8587_vm5, %v8568_v14  ;;  %17664 = vst [vmem:[#allocation27_spill] sm:$0xff] %v11751_v22  ;;  %v2659_v33 = vshll.u32 %v17653_v0, %v11519_v51  ;;  %v2649_v1 = vand.u32 8388607, %v17521_v55  ;;  %v2660_v44 = vshrl.u32 %v17654_v28, %v11550_v20  ;;  %v2662_v5 = vshll.u32 %v17654_v28, %v11519_v51 }
  0x81   : > { %10270 = vmatprep.mubr.msk.f32.mxu0 %vm8587_vm5, %v8569_v13  ;;  %v9689_v14 = vadd.s32 4294967294, %v1462_v43  ;;  %v2597_v13 = vsel %vm2595_vm12, %v2596_v53, %v11713_v17  ;;  %v2663_v17 = vshrl.u32 %v17655_v41, %v11550_v20  ;;  %v2665_v43 = vshll.u32 %v17655_v41, %v11519_v51 }
  0x82   : > { %v2598_v19 = vadd.s32 %v2597_v13, %v2593_v46  ;;  %v17665_v4 = vmov 2102212464   ;;  %v2669_v29 = vshrl.u32 %v17658_v9, %v11550_v20  ;;  %v2671_v48 = vshll.u32 %v17658_v9, %v11519_v51 }
  0x83   : > { %vm9690_vm13 = vcmp.lt.s32.totalorder %v9689_v14, 0  ;;  %v2666_v55 = vshrl.u32 %v17665_v4, %v11550_v20  ;;  %v2661_v45 = vor.u32 %v2660_v44, %v2659_v33  ;;  %v2664_v21 = vor.u32 %v2663_v17, %v2662_v5 }
  0x84   : > { %10271 = vmatmul.mubr.msk.f32.gmra.mrb[54].mxu0 %vm8587_vm5, %v8570_v11  ;;  %v8573_v11 = vld [vmem:[%s11432_s14 + $0xd0] sm:$0xff]  ;;  %v1465_v2 = vsel %vm9690_vm13, 0, %v9689_v14  ;;  %v2599_v13 = vadd.s32 536870912, %v2598_v19  ;;  %v2668_v14 = vshll.u32 %v17665_v4, %v11519_v51  ;;  %vm2965_vm15 = vcmp.gt.s32.totalorder %v11729_v16, 0 }
  0x85   : > { %10273 = vmatprep.mubr.msk.f32.mxu0 %vm8587_vm5, %v8571_v25  ;;  %v1466_v46 = vsub.s32 32, %v1465_v2  ;;  %v1467_v25 = vshll.u32 %v11694_v59, %v1465_v2  ;;  %v1470_v53 = vsub.s32 4294967266, %v1465_v2  ;;  %vm2674_vm0 = vcmp.lt.s32.totalorder %v11547_v18, 1 }
  0x86   : > { %v11789_v2 = vshrl.u32 %v2599_v13, 30  ;;  %v2670_v61 = vor.u32 %v2669_v29, %v2668_v14  ;;  %vm2676_vm2 = vcmp.lt.s32.totalorder %v11547_v18, 3  ;;  %vm2675_vm3 = vcmp.lt.s32.totalorder %v11547_v18, 2 }
  0x87   : > { %v1468_v24 = vshrl.u32 %v1450_v37, %v1466_v46  ;;  %v1471_v59 = vadd.s32 127, %v1470_v53  ;;  %v2650_v37 = vor.u32 8388608, %v2649_v1  ;;  %vm2540_vm8 = vcmp.lt.s32.totalorder %v11340_v36, 0 }
  0x88   : > { %10274 = vmatmul.mubr.msk.f32.gmra.mrb[56].mxu0 %vm8587_vm5, %v8572_v30  ;;  %v2672_v30 = vshrl.u32 %v17659_v54, %v11550_v20  ;;  %v2601_v51 = vshll.u32 %v11789_v2, 30  ;;  %v2683_v29 = vsel %vm2677_vm1, %v2670_v61, 920167782 }
  0x89   : > { %10276 = vmatprep.mubr.msk.f32.mxu0 %vm8587_vm5, %v8573_v11  ;;  %v1469_v8 = vor.u32 %v1468_v24, %v1467_v25  ;;  %v1472_v62 = vshll.u32 %v1471_v59, 23  ;;  %v2667_v11 = vor.u32 %v2666_v55, %v2665_v43  ;;  %v2682_v24 = vsel %vm2674_vm0, %v2661_v45, %v2664_v21  ;;  %v11884_v25 = vld [vmem:[%s11274_s28] sm:$0xff] }
  0x8a   : > { %v2673_v46 = vor.u32 %v2672_v30, %v2671_v48  ;;  %v11799_v34 = vsub.s32 %v2598_v19, %v2601_v51  ;;  %v1481_v48 = vsel %vm1396_vm14, %v1480_v3, %v11675_v57  ;;  %v2690_v44 = vshll.u32 %v2650_v37, 8  ;;  %17673 = vst [vmem:[#allocation31_spill] sm:$0xff] %v11884_v25 }
  0x8b   : > { %v1473_v53 = vor.u32 4788187, %v1472_v62  ;;  %v1476_v13 = vcvt.s32.f32 %v1469_v8  ;;  %v2679_v20 = vsel %vm2677_vm1, %v2667_v11, 2102212464  ;;  %v2678_v62 = vsel %vm2674_vm0, %v2658_v31, %v2661_v45  ;;  %v885_v45 = vld [vmem:[%s17481_s5] sm:$0xff]  ;;  %v886_v31 = vld [vmem:[%s17481_s5 + $0x8] sm:$0xff] }
  0x8c   : > { %v2604_v55 = vsub.s32 0, %v11799_v34  ;;  %v2684_v8 = vsel %vm2676_vm2, %v2667_v11, %v2683_v29  ;;  %v2686_v19 = vsel %vm2674_vm0, %v2664_v21, %v2667_v11  ;;  %v2687_v1 = vsel %vm2677_vm1, %v2673_v46, 1326507024 }
  0x8d   : > { %v1474_v33 = vand.u32 2147483647, %v1473_v53  ;;  %v2680_v43 = vsel %vm2676_vm2, %v2664_v21, %v2679_v20  ;;  %v2685_v57 = vsel %vm2675_vm3, %v2682_v24, %v2684_v8  ;;  %v17666_v3 = vand.u32 2147483647, %v11281_v15 }
  0x8e   : > { %v9732_v17 = vmin.u32 %v2604_v55, %v11799_v34  ;;  %v2688_v21 = vsel %vm2676_vm2, %v2670_v61, %v2687_v1  ;;  %v11834_v14 = vmul.u32.u64.low %v2690_v44, %v2685_v57  ;;  %v11835_v59 = vmul.u32.u64.high %v2690_v44, %v2685_v57, %v11834_v14 }
  0x8f   : > { %v1477_v5 = vmul.f32 %v1476_v13, %v1474_v33  ;;  %vm11828_vm4 = vcmp.le.f32.partialorder %v17666_v3, 0.7853982  ;;  %v11839_v30 = vshrl.u32 %v11746_v26, 5  ;;  %v17671_v46 = vand.u32 2139095040, %v11380_v52 }
  0x90   : > { %v11843_v37 = vsel %vm11828_vm4, 0, %v1481_v48  ;;  %v2606_v11 = vclz %v9732_v17  ;;  %v2681_v13 = vsel %vm2675_vm3, %v2678_v62, %v2680_v43  ;;  %v2689_v61 = vsel %vm2675_vm3, %v2686_v19, %v2688_v21 }
  0x91   : > { %17669 = vst [vmem:[#allocation28_spill] sm:$0xff] %v11839_v30  ;;  %v1478_v51 = vxor.u32 2147483648, %v1477_v5  ;;  %17670 = vst [vmem:[#allocation29_spill] sm:$0xff] %v11843_v37  ;;  %v3166_v53 = vshrl.u32 %v17671_v46, 23  ;;  %v10293_v20 = vpack.c.bf16 %v886_v31, %v885_v45  ;;  %v11859_v48 = vsel %vm2965_vm15, %v11729_v16, 0 }
  0x92   : > { %v9733_v29 = vadd.s32 4294967294, %v2606_v11  ;;  %v11853_v33 = vmul.u32.u64.low %v2690_v44, %v2689_v61  ;;  %v11854_v55 = vmul.u32.u64.high %v2690_v44, %v2689_v61, %v11853_v33  ;;  %v11862_v52 = vadd.s32 4294967169, %v11748_v50  ;;  %v8574_v11 = vld [vmem:[%s11432_s14 + $0xd8] sm:$0xff] }
  0x93   : > { %v1479_v24 = vsel %vm1396_vm14, %v1478_v51, %v1477_v5  ;;  %v1487_v62 = vadd.s32 3, %v11843_v37  ;;  %10294 = vmatprep.subr.bf16.mxu1 %v10293_v20  ;;  %v2594_v8 = vadd.s32 %v11712_v56, %v11707_v49  ;;  %v2700_v19 = vadd.s32 1, %v11835_v59  ;;  %10277 = vmatmul.mubr.msk.f32.gmra.mrb[58].mxu0 %vm8587_vm5, %v8574_v11 }
  0x94   : > { %17672 = vst [vmem:[#allocation30_spill] sm:$0xff] %v11862_v52  ;;  %v1482_v18 = vsel %vm11828_vm4, %v11281_v15, %v1479_v24  ;;  %vm9734_vm6 = vcmp.lt.s32.totalorder %v9733_v29, 0  ;;  %10296 = vmatpush3.bf16.msra.mxu1 %v10293_v20  ;;  %v2624_v50 = vsub.s32 4, %v11789_v2  ;;  %v2697_v1 = vmul.u32 %v2690_v44, %v2681_v13 }
  0x95   : > { %10712 = vcosq.f32 %v1482_v18  ;;  %v2609_v16 = vsel %vm9734_vm6, 0, %v9733_v29  ;;  %v9755_v5 = vadd.s32 4294967169, %v3166_v53  ;;  %v2761_v57 = vsub.s32 32, %v11755_v42 }
  0x96   : > { %10714 = vsinq.f32 %v1482_v18  ;;  %v2610_v17 = vsub.s32 32, %v2609_v16  ;;  %v2611_v15 = vshll.u32 %v11799_v34, %v2609_v16  ;;  %v2614_v43 = vsub.s32 4294967266, %v2609_v16 }
  0x97   : > { %v11875_v49 = vshrl.u32 %v11859_v48, 5  ;;  %v1488_v56 = vand.u32 3, %v1487_v62  ;;  %vm2699_vm7 = vc.u32 %v11854_v55, %v11834_v14  ;;  %v3373_v3 = vand.u32 2139095040, %v11394_v63 }
  0x98   : > { %v2612_v45 = vshrl.u32 %v2594_v8, %v2610_v17  ;;  %v2615_v31 = vadd.s32 127, %v2614_v43  ;;  %v2701_v44 = vsel %vm2699_vm7, %v2700_v19, %v11835_v59  ;;  %vm1486_vm9 = vweird.f32 %v11884_v25  ;;  %v887_v59 = vld [vmem:[%s17481_s5 + $0x10] sm:$0xff] }
  0x99   : > { %v2625_v21 = vsel %vm2540_vm8, %v2624_v50, %v11789_v2  ;;  %v2702_v51 = vadd.s32 %v2701_v44, %v2697_v1  ;;  %v11891_v46 = vadd.s32 1, %v9755_v5  ;;  %v17674_v53 = vand.u32 2147483647, %v11340_v36 }
  0x9a   : > { %v2613_v63 = vor.u32 %v2612_v45, %v2611_v15  ;;  %v2616_v13 = vshll.u32 %v2615_v31, 23  ;;  %vm1489_vm11 = vcmp.lt.s32.totalorder %v1488_v56, 2  ;;  %vm1490_vm12 = vcmp.eq.s32.totalorder %v1488_v56, 0 }
  0x9b   : > { %vm11895_vm10 = vcmp.le.f32.partialorder %v17674_v53, 0.7853982  ;;  %vm1493_vm13 = vcmp.eq.s32.totalorder %v1488_v56, 2  ;;  %v2703_v61 = vadd.s32 536870912, %v2702_v51  ;;  %v17530_v29 = vand.u32 2147483647, %v11352_v40 }
  0x9c   : > { %v2617_v20 = vor.u32 4788187, %v2616_v13  ;;  %v2620_v2 = vcvt.s32.f32 %v2613_v63  ;;  %v11902_v24 = vsel %vm11895_vm10, 0, %v2625_v21  ;;  %v2763_v18 = vshll.u32 %v17653_v0, %v11755_v42 }
  0x9d   : > { %v11905_v33 = vshrl.u32 %v2703_v61, 30  ;;  %v2764_v62 = vshrl.u32 %v17654_v28, %v2761_v57  ;;  %v2766_v8 = vshll.u32 %v17654_v28, %v11755_v42  ;;  %v2767_v50 = vshrl.u32 %v17655_v41, %v2761_v57 }
  0x9e   : > { %v2618_v16 = vand.u32 2147483647, %v2617_v20  ;;  %v2772_v1 = vshll.u32 %v17665_v4, %v11755_v42  ;;  %v2773_v5 = vshrl.u32 %v17658_v9, %v2761_v57  ;;  %v2769_v45 = vshll.u32 %v17655_v41, %v11755_v42 }
  0x9f   : > { %v11912_v19 = vpop.eup %10712  ;;  %v2705_v43 = vshll.u32 %v11905_v33, 30  ;;  %v2770_v31 = vshrl.u32 %v17665_v4, %v2761_v57  ;;  %v2753_v11 = vand.u32 8388607, %v17530_v29  ;;  %v2762_v53 = vshrl.u32 %v17653_v0, %v2761_v57 }
  0xa0   : > { %17677 = vst [vmem:[#allocation32_spill] sm:$0xff] %v11912_v19  ;;  %v11918_v17 = vpop.eup %10714  ;;  %v17532_v15 = vxor.u32 2147483648, %v11912_v19  ;;  %v2621_v21 = vmul.f32 %v2620_v2, %v2618_v16  ;;  %v2775_v61 = vshll.u32 %v17658_v9, %v11755_v42  ;;  %v2776_v20 = vshrl.u32 %v17659_v54, %v2761_v57  ;;  %v11951_v57 = vld [vmem:[%s11274_s28 + $0x58] sm:$0xff] }
  0xa1   : > { %17678 = vst [vmem:[#allocation33_spill] sm:$0xff] %v11918_v17  ;;  %v17534_v44 = vxor.u32 2147483648, %v11918_v17  ;;  %v11933_v13 = vsub.s32 %v2702_v51, %v2705_v43  ;;  %v2765_v29 = vor.u32 %v2764_v62, %v2763_v18  ;;  %v2774_v34 = vor.u32 %v2773_v5, %v2772_v1 }
  0xa2   : > { %v1495_v63 = vsel %vm1493_vm13, %v17532_v15, %v11918_v17  ;;  %v2622_v16 = vxor.u32 2147483648, %v2621_v21  ;;  %v2768_v51 = vor.u32 %v2767_v50, %v2766_v8  ;;  %v2771_v43 = vor.u32 %v2770_v31, %v2769_v45 }
  0xa3   : > { %v1492_v2 = vsel %vm1490_vm12, %v11912_v19, %v17534_v44  ;;  %v2708_v15 = vsub.s32 0, %v11933_v13  ;;  %vm2778_vm14 = vcmp.lt.s32.totalorder %v11753_v58, 1  ;;  %vm2781_vm15 = vcmp.lt.s32.totalorder %v11753_v58, 4 }
  0xa4   : > { %v1496_v30 = vsel %vm1489_vm11, %v1492_v2, %v1495_v63  ;;  %v2623_v42 = vsel %vm2540_vm8, %v2622_v16, %v2621_v21  ;;  %v2777_v62 = vor.u32 %v2776_v20, %v2775_v61  ;;  %vm2780_vm0 = vcmp.lt.s32.totalorder %v11753_v58, 3 }
  0xa5   : > { %v1497_v37 = vsel %vm1486_vm9, nan, %v1496_v30  ;;  %v2626_v56 = vsel %vm11895_vm10, %v11951_v57, %v2623_v42  ;;  %v9736_v18 = vmin.u32 %v2708_v15, %v11933_v13  ;;  %v3374_v30 = vshrl.u32 %v3373_v3, 23  ;;  %v888_v3 = vld [vmem:[%s17481_s5 + $0x18] sm:$0xff] }
  0xa6   : > { %4725 = vperm.xlu0 %10550, %v1497_v37   ;;  %10716 = vcosq.f32 %v2626_v56  ;;  %v2754_v36 = vor.u32 8388608, %v2753_v11  ;;  %v2787_v8 = vsel %vm2781_vm15, %v2774_v34, 920167782  ;;  %v2631_v37 = vadd.s32 3, %v11902_v24 }
  0xa7   : > { %10718 = vsinq.f32 %v2626_v56  ;;  %v2710_v50 = vclz %v9736_v18  ;;  %v2783_v1 = vsel %vm2781_vm15, %v2771_v43, 2102212464  ;;  %vm2779_vm1 = vcmp.lt.s32.totalorder %v11753_v58, 2 }
  0xa8   : > { %v2786_v5 = vsel %vm2778_vm14, %v2765_v29, %v2768_v51  ;;  %v2788_v15 = vsel %vm2780_vm0, %v2771_v43, %v2787_v8  ;;  %v2790_v45 = vsel %vm2778_vm14, %v2768_v51, %v2771_v43  ;;  %vm3173_vm2 = vcmp.gt.s32.totalorder %v11891_v46, 0 }
  0xa9   : > { %v9737_v31 = vadd.s32 4294967294, %v2710_v50  ;;  %v2782_v21 = vsel %vm2778_vm14, %v2762_v53, %v2765_v29  ;;  %v2791_v11 = vsel %vm2781_vm15, %v2777_v62, 1326507024  ;;  %v2784_v63 = vsel %vm2780_vm0, %v2768_v51, %v2783_v1 }
  0xaa   : > { %v2792_v61 = vsel %vm2780_vm0, %v2774_v34, %v2791_v11  ;;  %v2794_v20 = vshll.u32 %v2754_v36, 8  ;;  %v10297_v2 = vpack.c.bf16 %v888_v3, %v887_v59  ;;  %v2698_v16 = vadd.s32 %v11834_v14, %v11854_v55  ;;  %v8575_v3 = vld [vmem:[%s11432_s14 + $0xe0] sm:$0xff] }
  0xab   : > { %vm9738_vm3 = vcmp.lt.s32.totalorder %v9737_v31, 0  ;;  %v2789_v43 = vsel %vm2779_vm1, %v2786_v5, %v2788_v15  ;;  %v2793_v29 = vsel %vm2779_vm1, %v2790_v45, %v2792_v61  ;;  %v2632_v53 = vand.u32 3, %v2631_v37  ;;  %v8576_v5 = vld [vmem:[%s11432_s14 + $0xe8] sm:$0xff]  ;;  %10279 = vmatprep.mubr.msk.f32.mxu0 %vm8587_vm5, %v8575_v3 }
  0xac   : > { %v2713_v42 = vsel %vm9738_vm3, 0, %v9737_v31  ;;  %v11991_v51 = vmul.u32.u64.low %v2794_v20, %v2793_v29  ;;  %v11992_v56 = vmul.u32.u64.high %v2794_v20, %v2793_v29, %v11991_v51  ;;  %10298 = vmatprep.subr.bf16.mxu1 %v10297_v2  ;;  %v2785_v14 = vsel %vm2779_vm1, %v2782_v21, %v2784_v63  ;;  %10280 = vmatmul.mubr.msk.f32.gmra.mrb[60].mxu0 %vm8587_vm5, %v8576_v5  ;;  %v12038_v29 = vld [vmem:[%s11274_s28 + $0x60] sm:$0xff]  ;;  %v12067_v5 = vld [vmem:[%s11274_s28 + $0x70] sm:$0xff] }
  0xad   : > { %v2714_v34 = vsub.s32 32, %v2713_v42  ;;  %v2715_v18 = vshll.u32 %v11933_v13, %v2713_v42  ;;  %v2718_v62 = vsub.s32 4294967266, %v2713_v42  ;;  %10300 = vmatpush3.bf16.msra.mxu1 %v10297_v2  ;;  %v11998_v55 = vand.u32 31, %v11859_v48 }
  0xae   : > { %v9763_v36 = vadd.s32 4294967169, %v3374_v30  ;;  %v12000_v8 = vmul.u32.u64.low %v2794_v20, %v2789_v43  ;;  %v12001_v37 = vmul.u32.u64.high %v2794_v20, %v2789_v43, %v12000_v8  ;;  %v12007_v50 = vsel %vm3173_vm2, %v11891_v46, 0 }
  0xaf   : > { %v17679_v13 = vand.u32 2139095040, %v11408_v12  ;;  %v2716_v59 = vshrl.u32 %v2698_v16, %v2714_v34  ;;  %v2719_v58 = vadd.s32 127, %v2718_v62  ;;  %vm2634_vm4 = vcmp.eq.s32.totalorder %v2632_v53, 0 }
  0xb0   : > { %v12013_v15 = vpop.eup %10716  ;;  %vm2637_vm6 = vcmp.eq.s32.totalorder %v2632_v53, 2  ;;  %v2728_v48 = vsub.s32 4, %v11905_v33  ;;  %v2801_v30 = vmul.u32 %v2794_v20, %v2785_v14  ;;  %vm2803_vm7 = vc.u32 %v11992_v56, %v12000_v8 }
  0xb1   : > { %v3582_v1 = vshrl.u32 %v17679_v13, 23  ;;  %v12017_v45 = vpop.eup %10718  ;;  %v17535_v46 = vxor.u32 2147483648, %v12013_v15  ;;  %v2717_v12 = vor.u32 %v2716_v59, %v2715_v18  ;;  %v2720_v31 = vshll.u32 %v2719_v58, 23 }
  0xb2   : > { %v3380_v21 = vadd.s32 1, %v9763_v36  ;;  %vm2633_vm8 = vcmp.lt.s32.totalorder %v2632_v53, 2  ;;  %v17536_v11 = vxor.u32 2147483648, %v12017_v45  ;;  %v2804_v63 = vadd.s32 1, %v12001_v37  ;;  %v12051_v53 = vld [vmem:[%s11274_s28 + $0xb8] sm:$0xff] }
  0xb3   : > { %vm2630_vm10 = vweird.f32 %v11951_v57  ;;  %v2639_v61 = vsel %vm2637_vm6, %v17535_v46, %v12017_v45  ;;  %v2721_v20 = vor.u32 4788187, %v2720_v31  ;;  %v2724_v2 = vcvt.s32.f32 %v2717_v12 }
  0xb4   : > { %v12031_v16 = vsub.s32 32, %v11998_v55  ;;  %v2636_v43 = vsel %vm2634_vm4, %v12013_v15, %v17536_v11  ;;  %vm2644_vm11 = vcmp.lt.s32.totalorder %v12038_v29, 0  ;;  %v2805_v42 = vsel %vm2803_vm7, %v2804_v63, %v12001_v37 }
  0xb5   : > { %v2640_v51 = vsel %vm2633_vm8, %v2636_v43, %v2639_v61  ;;  %v2722_v34 = vand.u32 2147483647, %v2721_v20  ;;  %v2729_v18 = vsel %vm2644_vm11, %v2728_v48, %v11905_v33  ;;  %v2806_v62 = vadd.s32 %v2805_v42, %v2801_v30 }
  0xb6   : > { %v12046_v14 = vand.u32 31, %v12007_v50  ;;  %v12048_v36 = vadd.s32 4294967169, %v3582_v1  ;;  %v2641_v37 = vsel %vm2630_vm10, nan, %v2640_v51  ;;  %vm3381_vm12 = vcmp.gt.s32.totalorder %v3380_v21, 0 }
  0xb7   : > { %4780 = vperm.xlu0 %10550, %v2641_v37   ;;  %v17680_v59 = vand.u32 2147483647, %v11347_v39  ;;  %v2725_v33 = vmul.f32 %v2724_v2, %v2722_v34  ;;  %v2807_v3 = vadd.s32 536870912, %v2806_v62  ;;  %v17537_v48 = vand.u32 2147483647, %v12067_v5 }
  0xb8   : > { %v2867_v30 = vshll.u32 %v17653_v0, %v11530_v60  ;;  %v2868_v39 = vshrl.u32 %v17654_v28, %v11560_v35  ;;  %v2870_v63 = vshll.u32 %v17654_v28, %v11530_v60  ;;  %v2871_v61 = vshrl.u32 %v17655_v41, %v11560_v35 }
  0xb9   : > { %vm12058_vm13 = vcmp.le.f32.partialorder %v17680_v59, 0.7853982  ;;  %v2726_v12 = vxor.u32 2147483648, %v2725_v33  ;;  %v12074_v31 = vshrl.u32 %v2807_v3, 30  ;;  %v2873_v20 = vshll.u32 %v17655_v41, %v11530_v60 }
  0xba   : > { %v12064_v1 = vsel %vm12058_vm13, 0, %v2729_v18  ;;  %v2874_v2 = vshrl.u32 %v17665_v4, %v11560_v35  ;;  %v2876_v43 = vshll.u32 %v17665_v4, %v11530_v60  ;;  %v2877_v42 = vshrl.u32 %v17658_v9, %v11560_v35 }
  0xbb   : > { %v2727_v51 = vsel %vm2644_vm11, %v2726_v12, %v2725_v33  ;;  %v2735_v34 = vadd.s32 3, %v12064_v1  ;;  %v2809_v18 = vshll.u32 %v12074_v31, 30  ;;  %v2879_v37 = vshll.u32 %v17658_v9, %v11530_v60 }
  0xbc   : > { %v2730_v59 = vsel %vm12058_vm13, %v12038_v29, %v2727_v51  ;;  %v2857_v3 = vand.u32 8388607, %v17537_v48  ;;  %v2866_v44 = vshrl.u32 %v17653_v0, %v11560_v35  ;;  %v2869_v46 = vor.u32 %v2868_v39, %v2867_v30 }
  0xbd   : > { %10720 = vcosq.f32 %v2730_v59  ;;  %v12101_v33 = vsub.s32 %v2806_v62, %v2809_v18  ;;  %v2872_v12 = vor.u32 %v2871_v61, %v2870_v63  ;;  %v2880_v11 = vshrl.u32 %v17659_v54, %v11560_v35 }
  0xbe   : > { %v12106_v60 = vsel %vm3381_vm12, %v3380_v21, 0  ;;  %10722 = vsinq.f32 %v2730_v59  ;;  %v2875_v58 = vor.u32 %v2874_v2, %v2873_v20  ;;  %v2878_v51 = vor.u32 %v2877_v42, %v2876_v43  ;;  %v12121_v2 = vld [vmem:[%s11274_s28 + $0x68] sm:$0xff] }
  0xbf   : > { %v12108_v13 = vand.u32 3, %v2735_v34  ;;  %v2812_v48 = vsub.s32 0, %v12101_v33  ;;  %v2881_v25 = vor.u32 %v2880_v11, %v2879_v37  ;;  %vm2882_vm14 = vcmp.lt.s32.totalorder %v11557_v32, 1  ;;  %v890_v34 = vld [vmem:[%s17481_s5 + $0x28] sm:$0xff] }
  0xc0   : > { %v2858_v62 = vor.u32 8388608, %v2857_v3  ;;  %vm2883_vm15 = vcmp.lt.s32.totalorder %v11557_v32, 2  ;;  %vm2884_vm0 = vcmp.lt.s32.totalorder %v11557_v32, 3  ;;  %vm2885_vm1 = vcmp.lt.s32.totalorder %v11557_v32, 4 }
  0xc1   : > { %v9740_v35 = vmin.u32 %v2812_v48, %v12101_v33  ;;  %v2886_v21 = vsel %vm2882_vm14, %v2866_v44, %v2869_v46  ;;  %v2887_v30 = vsel %vm2885_vm1, %v2875_v58, 2102212464  ;;  %v2890_v39 = vsel %vm2882_vm14, %v2869_v46, %v2872_v12 }
  0xc2   : > { %v2888_v63 = vsel %vm2884_vm0, %v2872_v12, %v2887_v30  ;;  %v2891_v61 = vsel %vm2885_vm1, %v2878_v51, 920167782  ;;  %v2894_v11 = vsel %vm2882_vm14, %v2872_v12, %v2875_v58  ;;  %v2895_v20 = vsel %vm2885_vm1, %v2881_v25, 1326507024  ;;  %v889_v25 = vld [vmem:[%s17481_s5 + $0x20] sm:$0xff] }
  0xc3   : > { %vm2737_vm2 = vcmp.lt.s32.totalorder %v12108_v13, 2  ;;  %vm2738_vm3 = vcmp.eq.s32.totalorder %v12108_v13, 0  ;;  %vm2748_vm4 = vcmp.lt.s32.totalorder %v12121_v2, 0  ;;  %v2814_v43 = vclz %v9740_v35 }
  0xc4   : > { %v2832_v48 = vsub.s32 4, %v12074_v31  ;;  %v2892_v44 = vsel %vm2884_vm0, %v2875_v58, %v2891_v61  ;;  %v2896_v46 = vsel %vm2884_vm0, %v2878_v51, %v2895_v20  ;;  %v2898_v42 = vshll.u32 %v2858_v62, 8 }
  0xc5   : > { %v9741_v18 = vadd.s32 4294967294, %v2814_v43  ;;  %v2889_v37 = vsel %vm2883_vm15, %v2886_v21, %v2888_v63  ;;  %v2893_v59 = vsel %vm2883_vm15, %v2890_v39, %v2892_v44  ;;  %v2897_v3 = vsel %vm2883_vm15, %v2894_v11, %v2896_v46 }
  0xc6   : > { %v12141_v12 = vmul.u32.u64.low %v2898_v42, %v2897_v3  ;;  %v12142_v58 = vmul.u32.u64.high %v2898_v42, %v2897_v3, %v12141_v12  ;;  %v12144_v51 = vmul.u32.u64.low %v2898_v42, %v2893_v59  ;;  %v12145_v62 = vmul.u32.u64.high %v2898_v42, %v2893_v59, %v12144_v51 }
  0xc7   : > { %v12148_v35 = vpop.eup %10720  ;;  %vm2741_vm6 = vcmp.eq.s32.totalorder %v12108_v13, 2  ;;  %v2802_v21 = vadd.s32 %v12000_v8, %v11992_v56  ;;  %vm9742_vm7 = vcmp.lt.s32.totalorder %v9741_v18, 0  ;;  %v10301_v30 = vpack.c.bf16 %v890_v34, %v889_v25  ;;  %v8577_v56 = vld [vmem:[%s11432_s14 + $0xf0] sm:$0xff]  ;;  %v12193_v12 = vld [vmem:[%s11274_s28 + $0x8] sm:$0xff] }
  0xc8   : > { %v12153_v39 = vpop.eup %10722  ;;  %v17539_v32 = vxor.u32 2147483648, %v12148_v35  ;;  %v2817_v63 = vsel %vm9742_vm7, 0, %v9741_v18  ;;  %v2833_v61 = vsel %vm2748_vm4, %v2832_v48, %v12074_v31  ;;  %v2905_v11 = vmul.u32 %v2898_v42, %v2889_v37  ;;  %10282 = vmatprep.mubr.msk.f32.mxu0 %vm8587_vm5, %v8577_v56 }
  0xc9   : > { %v17540_v20 = vxor.u32 2147483648, %v12153_v39  ;;  %v2818_v43 = vsub.s32 32, %v2817_v63  ;;  %v2819_v44 = vshll.u32 %v12101_v33, %v2817_v63  ;;  %v2822_v46 = vsub.s32 4294967266, %v2817_v63  ;;  %10302 = vmatprep.subr.bf16.mxu1 %v10301_v30  ;;  %v8578_v33 = vld [vmem:[%s11432_s14 + $0xf8] sm:$0xff] }
  0xca   : > { %vm2734_vm8 = vweird.f32 %v12038_v29  ;;  %v2743_v8 = vsel %vm2741_vm6, %v17539_v32, %v12153_v39  ;;  %vm2907_vm11 = vc.u32 %v12142_v58, %v12144_v51  ;;  %v2908_v31 = vadd.s32 1, %v12145_v62  ;;  %10304 = vmatpush3.bf16.msra.mxu1 %v10301_v30  ;;  %10283 = vmatmul.mubr.msk.f32.gmra.mrb[62].mxu0 %vm8587_vm5, %v8578_v33 }
  0xcb   : > { %v2740_v48 = vsel %vm2738_vm3, %v12148_v35, %v17540_v20  ;;  %v17683_v42 = vand.u32 2147483647, %v11352_v40  ;;  %v2820_v34 = vshrl.u32 %v2802_v21, %v2818_v43  ;;  %v2823_v18 = vadd.s32 127, %v2822_v46 }
  0xcc   : > { %v2744_v37 = vsel %vm2737_vm2, %v2740_v48, %v2743_v8  ;;  %v2909_v3 = vsel %vm2907_vm11, %v2908_v31, %v12145_v62  ;;  %v17541_v40 = vand.u32 2147483647, %v12193_v12  ;;  %v1515_v13 = vshll.u32 %v17653_v0, %v11461_v7 }
  0xcd   : > { %vm12180_vm12 = vcmp.le.f32.partialorder %v17683_v42, 0.7853982  ;;  %v2745_v30 = vsel %vm2734_vm8, nan, %v2744_v37  ;;  %v2821_v21 = vor.u32 %v2820_v34, %v2819_v44  ;;  %v2824_v63 = vshll.u32 %v2823_v18, 23 }
  0xce   : > { %v12189_v59 = vsel %vm12180_vm12, 0, %v2833_v61  ;;  %v2910_v43 = vadd.s32 %v2909_v3, %v2905_v11  ;;  %4785 = vperm.xlu0 %10550, %v2745_v30   ;;  %v1516_v61 = vshrl.u32 %v17654_v28, %v11485_v27  ;;  %v1518_v62 = vshll.u32 %v17654_v28, %v11461_v7 }
  0xcf   : > { %v1519_v46 = vshrl.u32 %v17655_v41, %v11485_v27  ;;  %v2825_v56 = vor.u32 4788187, %v2824_v63  ;;  %v2828_v8 = vcvt.s32.f32 %v2821_v21  ;;  %v1521_v44 = vshll.u32 %v17655_v41, %v11461_v7 }
  0xd0   : > { %v2911_v31 = vadd.s32 536870912, %v2910_v43  ;;  %v1505_v11 = vand.u32 8388607, %v17541_v40  ;;  %v1514_v33 = vshrl.u32 %v17653_v0, %v11485_v27  ;;  %v1522_v48 = vshrl.u32 %v17665_v4, %v11485_v27 }
  0xd1   : > { %v1524_v42 = vshll.u32 %v17665_v4, %v11461_v7  ;;  %v2826_v34 = vand.u32 2147483647, %v2825_v56  ;;  %v1525_v37 = vshrl.u32 %v17658_v9, %v11485_v27  ;;  %v1527_v3 = vshll.u32 %v17658_v9, %v11461_v7 }
  0xd2   : > { %v2912_v18 = vshrl.u32 %v2911_v31, 30  ;;  %v1517_v30 = vor.u32 %v1516_v61, %v1515_v13  ;;  %v1520_v21 = vor.u32 %v1519_v46, %v1518_v62  ;;  %v1523_v63 = vor.u32 %v1522_v48, %v1521_v44 }
  0xd3   : > { %v1528_v32 = vshrl.u32 %v17659_v54, %v11485_v27  ;;  %v2829_v20 = vmul.f32 %v2828_v8, %v2826_v34  ;;  %v1526_v19 = vor.u32 %v1525_v37, %v1524_v42  ;;  %vm1530_vm5 = vcmp.lt.s32.totalorder %v11459_v6, 1 }
  0xd4   : > { %v2913_v40 = vshll.u32 %v2912_v18, 30  ;;  %v2839_v56 = vadd.s32 3, %v12189_v59  ;;  %vm2852_vm13 = vcmp.lt.s32.totalorder %v12067_v5, 0  ;;  %vm1533_vm14 = vcmp.lt.s32.totalorder %v11459_v6, 4 }
  0xd5   : > { %v1529_v31 = vor.u32 %v1528_v32, %v1527_v3  ;;  %v2830_v17 = vxor.u32 2147483648, %v2829_v20  ;;  %vm1532_vm15 = vcmp.lt.s32.totalorder %v11459_v6, 3  ;;  %v1535_v27 = vsel %vm1533_vm14, %v1523_v63, 2102212464 }
  0xd6   : > { %v12226_v7 = vsub.s32 %v2910_v43, %v2913_v40  ;;  %v1506_v13 = vor.u32 8388608, %v1505_v11  ;;  %vm1531_vm0 = vcmp.lt.s32.totalorder %v11459_v6, 2  ;;  %v1538_v61 = vsel %vm1530_vm5, %v1517_v30, %v1520_v21 }
  0xd7   : > { %v1539_v62 = vsel %vm1533_vm14, %v1526_v19, 920167782  ;;  %v2831_v32 = vsel %vm2748_vm4, %v2830_v17, %v2829_v20  ;;  %v2936_v43 = vsub.s32 4, %v2912_v18  ;;  %v1534_v46 = vsel %vm1530_vm5, %v1514_v33, %v1517_v30 }
  0xd8   : > { %v2916_v40 = vsub.s32 0, %v12226_v7  ;;  %v2834_v8 = vsel %vm12180_vm12, %v12121_v2, %v2831_v32  ;;  %v1536_v44 = vsel %vm1532_vm15, %v1520_v21, %v1535_v27  ;;  %v1540_v11 = vsel %vm1532_vm15, %v1523_v63, %v1539_v62  ;;  %v12280_v32 = vld [vmem:[%s11274_s28 + $0x78] sm:$0xff] }
  0xd9   : > { %v1543_v48 = vsel %vm1533_vm14, %v1529_v31, 1326507024  ;;  %10724 = vcosq.f32 %v2834_v8  ;;  %v1541_v20 = vsel %vm1531_vm0, %v1538_v61, %v1540_v11  ;;  %v1542_v25 = vsel %vm1530_vm5, %v1520_v21, %v1523_v63 }
  0xda   : > { %v9744_v17 = vmin.u32 %v2916_v40, %v12226_v7  ;;  %10726 = vsinq.f32 %v2834_v8  ;;  %v2840_v33 = vand.u32 3, %v2839_v56  ;;  %v1544_v42 = vsel %vm1532_vm15, %v1526_v19, %v1543_v48 }
  0xdb   : > { %v1546_v34 = vshll.u32 %v1506_v13, 8  ;;  %v12258_v37 = vand.u32 31, %v12106_v60  ;;  %v17687_v3 = vand.u32 2147483647, %v12067_v5  ;;  %v2937_v27 = vsel %vm2852_vm13, %v2936_v43, %v2912_v18 }
  0xdc   : > { %v2918_v31 = vclz %v9744_v17  ;;  %v1537_v21 = vsel %vm1531_vm0, %v1534_v46, %v1536_v44  ;;  %v1545_v19 = vsel %vm1531_vm0, %v1542_v25, %v1544_v42  ;;  %v17546_v40 = vand.u32 2147483647, %v12280_v32 }
  0xdd   : > { %17686 = vst [vmem:[#allocation34_spill] sm:$0xff] %v12258_v37  ;;  %vm12262_vm1 = vcmp.le.f32.partialorder %v17687_v3, 0.7853982  ;;  %v12272_v63 = vmul.u32.u64.low %v1546_v34, %v1541_v20  ;;  %v12273_v56 = vmul.u32.u64.high %v1546_v34, %v1541_v20, %v12272_v63  ;;  %vm2838_vm2 = vweird.f32 %v12121_v2 }
  0xde   : > { %v9745_v13 = vadd.s32 4294967294, %v2918_v31  ;;  %v12276_v61 = vmul.u32.u64.low %v1546_v34, %v1545_v19  ;;  %v12277_v62 = vmul.u32.u64.high %v1546_v34, %v1545_v19, %v12276_v61  ;;  %vm2841_vm3 = vcmp.lt.s32.totalorder %v2840_v33, 2 }
  0xdf   : > { %vm2842_vm4 = vcmp.eq.s32.totalorder %v2840_v33, 0  ;;  %vm2845_vm6 = vcmp.eq.s32.totalorder %v2840_v33, 2  ;;  %v2906_v6 = vadd.s32 %v12144_v51, %v12142_v58  ;;  %v12288_v18 = vsel %vm12262_vm1, 0, %v2937_v27 }
  0xe0   : > { %vm9746_vm7 = vcmp.lt.s32.totalorder %v9745_v13, 0  ;;  %v1553_v43 = vmul.u32 %v1546_v34, %v1537_v21  ;;  %v2970_v46 = vshrl.u32 %v17653_v0, %v12031_v16  ;;  %v1556_v44 = vadd.s32 1, %v12273_v56 }
  0xe1   : > { %v2921_v8 = vsel %vm9746_vm7, 0, %v9745_v13  ;;  %v2971_v11 = vshll.u32 %v17653_v0, %v11998_v55  ;;  %v2972_v48 = vshrl.u32 %v17654_v28, %v12031_v16  ;;  %v12300_v20 = vand.u32 8388607, %v17546_v40 }
  0xe2   : > { %v2922_v17 = vsub.s32 32, %v2921_v8  ;;  %v2923_v58 = vshll.u32 %v12226_v7, %v2921_v8  ;;  %v2926_v51 = vsub.s32 4294967266, %v2921_v8  ;;  %vm1555_vm11 = vc.u32 %v12277_v62, %v12272_v63 }
  0xe3   : > { %v2974_v25 = vshll.u32 %v17654_v28, %v11998_v55  ;;  %v2975_v42 = vshrl.u32 %v17655_v41, %v12031_v16  ;;  %v2977_v34 = vshll.u32 %v17655_v41, %v11998_v55  ;;  %v12310_v3 = vpop.eup %10724  ;;  %v1557_v27 = vsel %vm1555_vm11, %v1556_v44, %v12273_v56 }
  0xe4   : > { %v2924_v7 = vshrl.u32 %v2906_v6, %v2922_v17  ;;  %v2927_v31 = vadd.s32 127, %v2926_v51  ;;  %v2978_v21 = vshrl.u32 %v17665_v4, %v12031_v16  ;;  %v12315_v19 = vpop.eup %10726  ;;  %v17551_v13 = vxor.u32 2147483648, %v12310_v3 }
  0xe5   : > { %17690 = vst [vmem:[#allocation35_spill] sm:$0xff] %v12315_v19  ;;  %v1558_v61 = vadd.s32 %v1557_v27, %v1553_v43  ;;  %v2980_v8 = vshll.u32 %v17665_v4, %v11998_v55  ;;  %v2981_v40 = vshrl.u32 %v17658_v9, %v12031_v16  ;;  %v17554_v47 = vxor.u32 2147483648, %v12315_v19 }
  0xe6   : > { %v2925_v6 = vor.u32 %v2924_v7, %v2923_v58  ;;  %v2928_v17 = vshll.u32 %v2927_v31, 23  ;;  %v2973_v51 = vor.u32 %v2972_v48, %v2971_v11  ;;  %v2847_v56 = vsel %vm2845_vm6, %v17551_v13, %v12315_v19 }
  0xe7   : > { %v1559_v44 = vadd.s32 536870912, %v1558_v61  ;;  %v2982_v22 = vor.u32 %v2981_v40, %v2980_v8  ;;  %v2983_v43 = vshll.u32 %v17658_v9, %v11998_v55  ;;  %v2844_v27 = vsel %vm2842_vm4, %v12310_v3, %v17554_v47 }
  0xe8   : > { %v2929_v52 = vor.u32 4788187, %v2928_v17  ;;  %v2932_v26 = vcvt.s32.f32 %v2925_v6  ;;  %v2984_v11 = vshrl.u32 %v17659_v54, %v12031_v16  ;;  %v2848_v58 = vsel %vm2841_vm3, %v2844_v27, %v2847_v56 }
  0xe9   : > { %v1560_v7 = vshrl.u32 %v1559_v44, 30  ;;  %v2976_v31 = vor.u32 %v2975_v42, %v2974_v25  ;;  %v2979_v40 = vor.u32 %v2978_v21, %v2977_v34  ;;  %v2849_v55 = vsel %vm2838_vm2, nan, %v2848_v58 }
  0xea   : > { %v2930_v13 = vand.u32 2147483647, %v2929_v52  ;;  %v2985_v19 = vor.u32 %v2984_v11, %v2983_v43  ;;  %vm2986_vm12 = vcmp.lt.s32.totalorder %v11875_v49, 1  ;;  %4790 = vperm.xlu0 %10550, %v2849_v55   ;;  %vm2988_vm5 = vcmp.lt.s32.totalorder %v11875_v49, 3 }
  0xeb   : > { %v12335_v48 = vpop.f32.mrb[0].mxu0  ;;  %v1561_v6 = vshll.u32 %v1560_v7, 30  ;;  %v1584_v17 = vsub.s32 4, %v1560_v7  ;;  %vm2989_vm14 = vcmp.lt.s32.totalorder %v11875_v49, 4  ;;  %vm1500_vm15 = vcmp.lt.s32.totalorder %v12193_v12, 0 }
  0xec   : > { %v12338_v8 = vpop.f32.mrb[1].mxu0  ;;  %v2933_v16 = vmul.f32 %v2932_v26, %v2930_v13  ;;  %v2962_v33 = vor.u32 8388608, %v12300_v20  ;;  %v2995_v25 = vsel %vm2989_vm14, %v2982_v22, 920167782  ;;  %v2943_v52 = vadd.s32 3, %v12288_v18 }
  0xed   : > { %v12352_v34 = vsub.s32 %v1558_v61, %v1561_v6  ;;  %vm2987_vm0 = vcmp.lt.s32.totalorder %v11875_v49, 2  ;;  %v2991_v21 = vsel %vm2989_vm14, %v2979_v40, 2102212464  ;;  %v2990_v20 = vsel %vm2986_vm12, %v2970_v46, %v2973_v51 }
  0xee   : > { %v2934_v26 = vxor.u32 2147483648, %v2933_v16  ;;  %v2994_v13 = vsel %vm2986_vm12, %v2973_v51, %v2976_v31  ;;  %v2996_v44 = vsel %vm2988_vm5, %v2979_v40, %v2995_v25  ;;  %v1585_v43 = vsel %vm1500_vm15, %v1584_v17, %v1560_v7 }
  0xef   : > { %v12349_v42 = vpop.f32.mrb[2].mxu0  ;;  %v1564_v61 = vsub.s32 0, %v12352_v34  ;;  %v2998_v27 = vsel %vm2986_vm12, %v2976_v31, %v2979_v40  ;;  %v2999_v11 = vsel %vm2989_vm14, %v2985_v19, 1326507024  ;;  %v2992_v51 = vsel %vm2988_vm5, %v2976_v31, %v2991_v21  ;;  %v891_v31 = vld [vmem:[%s17481_s5 + $0x30] sm:$0xff] }
  0xf0   : > { %v12357_v56 = vpop.f32.mrb[3].mxu0  ;;  %v2935_v46 = vsel %vm2852_vm13, %v2934_v26, %v2933_v16  ;;  %v3000_v58 = vsel %vm2988_vm5, %v2982_v22, %v2999_v11  ;;  %v3002_v55 = vshll.u32 %v2962_v33, 8  ;;  %v2997_v19 = vsel %vm2987_vm0, %v2994_v13, %v2996_v44  ;;  %v892_v22 = vld [vmem:[%s17481_s5 + $0x38] sm:$0xff]  ;;  %v12558_v33 = vld [vmem:[%s17480_s4] ss:$0 sm:$0xff] }
  0xf1   : > { %v2938_v7 = vsel %vm12262_vm1, %v12067_v5, %v2935_v46  ;;  %v9692_v40 = vmin.u32 %v1564_v61, %v12352_v34  ;;  %v3001_v17 = vsel %vm2987_vm0, %v2998_v27, %v3000_v58  ;;  %v17691_v30 = vand.u32 2147483647, %v12193_v12 }
  0xf2   : > { %10728 = vcosq.f32 %v2938_v7  ;;  %v12402_v25 = vmul.u32.u64.low %v3002_v55, %v3001_v17  ;;  %v12403_v21 = vmul.u32.u64.high %v3002_v55, %v3001_v17, %v12402_v25  ;;  %v12405_v26 = vand.u32 3, %v2943_v52 }
  0xf3   : > { %v12378_v6 = vpop.f32.mrb[4].mxu0  ;;  %vm12398_vm13 = vcmp.le.f32.partialorder %v17691_v30, 0.7853982  ;;  %10730 = vsinq.f32 %v2938_v7  ;;  %v1566_v13 = vclz %v9692_v40  ;;  %v2993_v61 = vsel %vm2987_vm0, %v2990_v20, %v2992_v51  ;;  %v12452_v30 = vld [vmem:[%s11274_s28 + $0x80] sm:$0xff] }
  0xf4   : > { %v12394_v16 = vpop.f32.mrb[5].mxu0  ;;  %v12409_v44 = vsel %vm12398_vm13, 0, %v1585_v43  ;;  %v12413_v27 = vmul.u32.u64.low %v3002_v55, %v2997_v19  ;;  %v12414_v11 = vmul.u32.u64.high %v3002_v55, %v2997_v19, %v12413_v27  ;;  %v10305_v46 = vpack.c.bf16 %v892_v22, %v891_v31 }
  0xf5   : > { %17694 = vst [vmem:[#allocation36_spill] sm:$0xff] %v12409_v44  ;;  %v12417_v58 = vshrl.u32 %v12007_v50, 5  ;;  %v12420_v17 = vsub.s32 32, %v12046_v14  ;;  %v12423_v52 = vadd.s32 1, %v12048_v36  ;;  %v9693_v7 = vadd.s32 4294967294, %v1566_v13 }
  0xf6   : > { %v12426_v43 = vshrl.u32 %v12106_v60, 5  ;;  %v12429_v49 = vsub.s32 32, %v12258_v37  ;;  %v17697_v20 = vand.u32 2139095040, %v12051_v53  ;;  %v1591_v50 = vadd.s32 3, %v12409_v44  ;;  %10306 = vmatprep.subr.bf16.mxu1 %v10305_v46 }
  0xf7   : > { %vm2942_vm1 = vweird.f32 %v12067_v5  ;;  %v1554_v36 = vadd.s32 %v12272_v63, %v12277_v62  ;;  %vm9694_vm3 = vcmp.lt.s32.totalorder %v9693_v7, 0  ;;  %v3009_v40 = vmul.u32 %v3002_v55, %v2993_v61  ;;  %10308 = vmatpush3.bf16.msra.mxu1 %v10305_v46 }
  0xf8   : > { %17695 = vst [vmem:[#allocation37_spill] sm:$0xff] %v12426_v43  ;;  %17696 = vst [vmem:[#allocation38_spill] sm:$0xff] %v12429_v49  ;;  %v12433_v51 = vshrl.u32 %v17697_v20, 23  ;;  %vm3011_vm4 = vc.u32 %v12403_v21, %v12413_v27  ;;  %vm2945_vm6 = vcmp.lt.s32.totalorder %v12405_v26, 2  ;;  %v1569_v60 = vsel %vm9694_vm3, 0, %v9693_v7 }
  0xf9   : > { %v3012_v53 = vadd.s32 1, %v12414_v11  ;;  %v12443_v19 = vand.u32 3, %v11902_v24  ;;  %vm2946_vm7 = vcmp.eq.s32.totalorder %v12405_v26, 0  ;;  %v1570_v31 = vsub.s32 32, %v1569_v60 }
  0xfa   : > { %17698 = vst [vmem:[#allocation39_spill] sm:$0xff] %v12433_v51  ;;  %v1571_v22 = vshll.u32 %v12352_v34, %v1569_v60  ;;  %v1574_v63 = vsub.s32 4294967266, %v1569_v60  ;;  %vm2949_vm11 = vcmp.eq.s32.totalorder %v12405_v26, 2  ;;  %v12448_v62 = vand.u32 3, %v1591_v50 }
  0xfb   : > { %v3013_v55 = vsel %vm3011_vm4, %v3012_v53, %v12414_v11  ;;  %v1572_v13 = vshrl.u32 %v1554_v36, %v1570_v31  ;;  %v12456_v24 = vadd.s32 %v12413_v27, %v12403_v21  ;;  %vm6179_vm12 = vcmp.eq.s32.totalorder %v12443_v19, 0 }
  0xfc   : > { %v1575_v61 = vadd.s32 127, %v1574_v63  ;;  %v3014_v46 = vadd.s32 %v3013_v55, %v3009_v40  ;;  %v12458_v7 = vpop.eup %10728  ;;  %v12463_v34 = vshrl.u32 %v17653_v0, %v11718_v23  ;;  %v3075_v11 = vshll.u32 %v17653_v0, %v11563_v38 }
  0xfd   : > { %17699 = vst [vmem:[#allocation40_spill] sm:$0xff] %v12458_v7  ;;  %v3076_v20 = vshrl.u32 %v17654_v28, %v11718_v23  ;;  %v12469_v50 = vpop.eup %10730  ;;  %v17556_v21 = vxor.u32 2147483648, %v12458_v7  ;;  %v1573_v27 = vor.u32 %v1572_v13, %v1571_v22  ;;  %v3078_v53 = vshll.u32 %v17654_v28, %v11563_v38 }
  0xfe   : > { %v1576_v36 = vshll.u32 %v1575_v61, 23  ;;  %v3015_v40 = vadd.s32 536870912, %v3014_v46  ;;  %v17557_v60 = vxor.u32 2147483648, %v12469_v50  ;;  %v3079_v31 = vshrl.u32 %v17655_v41, %v11718_v23 }
  0xff   : > { %v3081_v63 = vshll.u32 %v17655_v41, %v11563_v38  ;;  %v2951_v55 = vsel %vm2949_vm11, %v17556_v21, %v12469_v50  ;;  %v1580_v13 = vcvt.s32.f32 %v1573_v27  ;;  %vm2956_vm5 = vcmp.lt.s32.totalorder %v12280_v32, 0 }
 0x100   : > { %v1577_v22 = vor.u32 4788187, %v1576_v36  ;;  %v3016_v61 = vshrl.u32 %v3015_v40, 30  ;;  %v2948_v47 = vsel %vm2946_vm7, %v12458_v7, %v17557_v60  ;;  %v3082_v25 = vshrl.u32 %v17665_v4, %v11718_v23 }
 0x101   : > { %v3084_v44 = vshll.u32 %v17665_v4, %v11563_v38  ;;  %v3085_v21 = vshrl.u32 %v17658_v9, %v11718_v23  ;;  %v2952_v27 = vsel %vm2945_vm6, %v2948_v47, %v2951_v55  ;;  %vm6182_vm14 = vcmp.eq.s32.totalorder %v12443_v19, 2 }
 0x102   : > { %v1578_v36 = vand.u32 2147483647, %v1577_v22  ;;  %v3017_v40 = vshll.u32 %v3016_v61, 30  ;;  %v2953_v60 = vsel %vm2942_vm1, nan, %v2952_v27  ;;  %v3087_v43 = vshll.u32 %v17658_v9, %v11563_v38 }
 0x103   : > { %v3086_v51 = vor.u32 %v3085_v21, %v3084_v44  ;;  %v3088_v49 = vshrl.u32 %v17659_v54, %v11718_v23  ;;  %4795 = vperm.xlu0 %10550, %v2953_v60   ;;  %v17700_v7 = vand.u32 2147483647, %v12280_v32  ;;  %v17703_v55 = vand.u32 2147483647, %v12452_v30  ;;  %v12516_v23 = vpop.f32.mrb[6].mxu0 }
 0x104   : > { %v1581_v37 = vmul.f32 %v1580_v13, %v1578_v36  ;;  %v12511_v26 = vsub.s32 %v3014_v46, %v3017_v40  ;;  %v3077_v44 = vor.u32 %v3076_v20, %v3075_v11  ;;  %v3040_v21 = vsub.s32 4, %v3016_v61  ;;  %v12522_v46 = vpop.f32.mrb[7].mxu0 }
 0x105   : > { %vm12507_vm0 = vcmp.le.f32.partialorder %v17700_v7, 0.7853982  ;;  %v3065_v22 = vand.u32 8388607, %v17703_v55  ;;  %v3080_v27 = vor.u32 %v3079_v31, %v3078_v53  ;;  %v3083_v38 = vor.u32 %v3082_v25, %v3081_v63 }
 0x106   : > { %vm3090_vm3 = vcmp.lt.s32.totalorder %v11704_v10, 1  ;;  %v1582_v60 = vxor.u32 2147483648, %v1581_v37  ;;  %v3020_v13 = vsub.s32 0, %v12511_v26  ;;  %vm6178_vm4 = vcmp.lt.s32.totalorder %v12443_v19, 2 }
 0x107   : > { %vm3092_vm6 = vcmp.lt.s32.totalorder %v11704_v10, 3  ;;  %vm3093_vm7 = vcmp.lt.s32.totalorder %v11704_v10, 4  ;;  %v17704_v7 = vxor.u32 2147483648, %v12017_v45  ;;  %v17705_v11 = vxor.u32 2147483648, %v12013_v15 }
 0x108   : > { %v3089_v53 = vor.u32 %v3088_v49, %v3087_v43  ;;  %v3099_v31 = vsel %vm3093_vm7, %v3086_v51, 920167782  ;;  %v1583_v63 = vsel %vm1500_vm15, %v1582_v60, %v1581_v37  ;;  %v9748_v36 = vmin.u32 %v3020_v13, %v12511_v26  ;;  %v12549_v49 = vpop.f32.mrb[8].mxu0  ;;  %v893_v13 = vld [vmem:[%s17481_s5 + $0x40] sm:$0xff] }
 0x109   : > { %v6181_v25 = vsel %vm6179_vm12, %v12013_v15, %v17704_v7  ;;  %v6184_v20 = vsel %vm6182_vm14, %v17705_v11, %v12017_v45  ;;  %v3066_v40 = vor.u32 8388608, %v3065_v22  ;;  %v3095_v55 = vsel %vm3093_vm7, %v3083_v38, 2102212464  ;;  %17706 = vst [vmem:[#allocation41_spill] sm:$0xff] %v12549_v49  ;;  %v894_v7 = vld [vmem:[%s17481_s5 + $0x48] sm:$0xff]  ;;  %v12566_v11 = vpop.f32.mrb[9].mxu0 }
 0x10a   : > { %v1586_v15 = vsel %vm12398_vm13, %v12193_v12, %v1583_v63  ;;  %vm3091_vm11 = vcmp.lt.s32.totalorder %v11704_v10, 2  ;;  %v3098_v45 = vsel %vm3090_vm3, %v3077_v44, %v3080_v27  ;;  %v3100_v43 = vsel %vm3092_vm6, %v3083_v38, %v3099_v31 }
 0x10b   : > { %10732 = vcosq.f32 %v1586_v15  ;;  %v3022_v37 = vclz %v9748_v36  ;;  %v3041_v22 = vsel %vm2956_vm5, %v3040_v21, %v3016_v61  ;;  %v3102_v60 = vsel %vm3090_vm3, %v3080_v27, %v3083_v38 }
 0x10c   : > { %10734 = vsinq.f32 %v1586_v15  ;;  %v3094_v61 = vsel %vm3090_vm3, %v12463_v34, %v3077_v44  ;;  %v3096_v21 = vsel %vm3092_vm6, %v3080_v27, %v3095_v55  ;;  %v3103_v38 = vsel %vm3093_vm7, %v3089_v53, 1326507024 }
 0x10d   : > { %v9749_v31 = vadd.s32 4294967294, %v3022_v37  ;;  %v3101_v63 = vsel %vm3091_vm11, %v3098_v45, %v3100_v43  ;;  %v3104_v36 = vsel %vm3092_vm6, %v3086_v51, %v3103_v38  ;;  %v3106_v49 = vshll.u32 %v3066_v40, 8  ;;  %v12607_v38 = vld [vmem:[%s11274_s28 + $0x88] sm:$0xff] }
 0x10e   : > { %v12581_v15 = vsel %vm12507_vm0, 0, %v3041_v22  ;;  %v3105_v34 = vsel %vm3091_vm11, %v3102_v60, %v3104_v36  ;;  %v10309_v44 = vpack.c.bf16 %v894_v7, %v893_v13  ;;  %v695_v27 = vadd.f32 %v12558_v33, %v12338_v8 }
 0x10f   : > { %vm9750_vm15 = vcmp.lt.s32.totalorder %v9749_v31, 0  ;;  %v3097_v53 = vsel %vm3091_vm11, %v3094_v61, %v3096_v21  ;;  %v12589_v55 = vmul.u32.u64.low %v3106_v49, %v3105_v34  ;;  %v12590_v45 = vmul.u32.u64.high %v3106_v49, %v3105_v34, %v12589_v55 }
 0x110   : > { %vm1590_vm13 = vweird.f32 %v12193_v12  ;;  %vm1597_vm12 = vcmp.eq.s32.totalorder %v12448_v62, 2  ;;  %v3025_v51 = vsel %vm9750_vm15, 0, %v9749_v31  ;;  %10310 = vmatprep.subr.bf16.mxu1 %v10309_v44  ;;  %10736 = vtanh.f32 %v695_v27 }
 0x111   : > { %v12594_v40 = vmul.u32.u64.low %v3106_v49, %v3101_v63  ;;  %v12595_v43 = vmul.u32.u64.high %v3106_v49, %v3101_v63, %v12594_v40  ;;  %v3026_v37 = vsub.s32 32, %v3025_v51  ;;  %v3027_v8 = vshll.u32 %v12511_v26, %v3025_v51  ;;  %10312 = vmatpush3.bf16.msra.mxu1 %v10309_v44 }
 0x112   : > { %v3030_v22 = vsub.s32 4294967266, %v3025_v51  ;;  %v3047_v10 = vadd.s32 3, %v12581_v15  ;;  %v6185_v60 = vsel %vm6178_vm4, %v6181_v25, %v6184_v20  ;;  %v3113_v13 = vmul.u32 %v3106_v49, %v3097_v53 }
 0x113   : > { %v6280_v7 = vand.u32 3, %v12064_v1  ;;  %v3028_v61 = vshrl.u32 %v12456_v24, %v3026_v37  ;;  %vm3115_vm14 = vc.u32 %v12590_v45, %v12594_v40  ;;  %v3162_v26 = vand.u32 2147483647, %v12607_v38 }
 0x114   : > { %v3031_v21 = vadd.s32 127, %v3030_v22  ;;  %v3116_v31 = vadd.s32 1, %v12595_v43  ;;  %v17707_v1 = vxor.u32 2147483648, %v12153_v39  ;;  %v17708_v49 = vxor.u32 2147483648, %v12148_v35 }
 0x115   : > { %vm6281_vm3 = vcmp.lt.s32.totalorder %v6280_v7, 2  ;;  %vm6282_vm6 = vcmp.eq.s32.totalorder %v6280_v7, 0  ;;  %vm6285_vm7 = vcmp.eq.s32.totalorder %v6280_v7, 2  ;;  %v12611_v19 = vpop.eup %10732  ;;  %v3029_v25 = vor.u32 %v3028_v61, %v3027_v8 }
 0x116   : > { %v3032_v20 = vshll.u32 %v3031_v21, 23  ;;  %v6284_v24 = vsel %vm6282_vm6, %v12148_v35, %v17707_v1  ;;  %v6287_v63 = vsel %vm6285_vm7, %v17708_v49, %v12153_v39  ;;  %v12619_v36 = vpop.eup %10734  ;;  %vm1593_vm4 = vcmp.lt.s32.totalorder %v12448_v62, 2 }
 0x117   : > { %vm1594_vm11 = vcmp.eq.s32.totalorder %v12448_v62, 0  ;;  %v17564_v34 = vxor.u32 2147483648, %v12611_v19  ;;  %v3117_v44 = vsel %vm3115_vm14, %v3116_v31, %v12595_v43  ;;  %v17565_v27 = vxor.u32 2147483648, %v12619_v36 }
 0x118   : > { %v3033_v53 = vor.u32 4788187, %v3032_v20  ;;  %v3036_v55 = vcvt.s32.f32 %v3029_v25  ;;  %v3118_v51 = vadd.s32 %v3117_v44, %v3113_v13  ;;  %v12634_v39 = vand.u32 3, %v3047_v10 }
 0x119   : > { %v1599_v35 = vsel %vm1597_vm12, %v17564_v34, %v12619_v36  ;;  %v6186_v37 = vsel %vm2630_vm10, nan, %v6185_v60  ;;  %v6288_v8 = vsel %vm6281_vm3, %v6284_v24, %v6287_v63  ;;  %v1596_v43 = vsel %vm1594_vm11, %v12611_v19, %v17565_v27 }
 0x11a   : > { %v3034_v22 = vand.u32 2147483647, %v3033_v53  ;;  %v3119_v61 = vadd.s32 536870912, %v3118_v51  ;;  %v3169_v13 = vand.u32 8388607, %v3162_v26  ;;  %v1600_v21 = vsel %vm1593_vm4, %v1596_v43, %v1599_v35  ;;  %v10737_v7 = vpop.eup %10736 }
 0x11b   : > { %v3179_v10 = vshll.u32 %v17653_v0, %v12046_v14  ;;  %v3180_v57 = vshrl.u32 %v17654_v28, %v12420_v17  ;;  %v3182_v60 = vshll.u32 %v17654_v28, %v12046_v14  ;;  %v1601_v31 = vsel %vm1590_vm13, nan, %v1600_v21  ;;  %10187 = vmatprep.mubr.f32.mxu1 %v10737_v7 }
 0x11c   : > { %v3037_v25 = vmul.f32 %v3036_v55, %v3034_v22  ;;  %v3120_v20 = vshrl.u32 %v3119_v61, 30  ;;  %v3183_v1 = vshrl.u32 %v17655_v41, %v12420_v17  ;;  %4730 = vperm.xlu1 %10551, %v1601_v31   ;;  %v3178_v62 = vshrl.u32 %v17653_v0, %v12420_v17 }
 0x11d   : > { %v3185_v24 = vshll.u32 %v17655_v41, %v12046_v14  ;;  %v3186_v49 = vshrl.u32 %v17665_v4, %v12420_v17  ;;  %v3188_v63 = vshll.u32 %v17665_v4, %v12046_v14  ;;  %v6289_v55 = vsel %vm2734_vm8, nan, %v6288_v8 }
 0x11e   : > { %v3038_v44 = vxor.u32 2147483648, %v3037_v25  ;;  %v3121_v53 = vshll.u32 %v3120_v20, 30  ;;  %v3189_v35 = vshrl.u32 %v17658_v9, %v12420_v17  ;;  %vm3060_vm10 = vcmp.lt.s32.totalorder %v12452_v30, 0 }
 0x11f   : > { %v3170_v43 = vor.u32 8388608, %v3169_v13  ;;  %v3181_v22 = vor.u32 %v3180_v57, %v3179_v10  ;;  %v3191_v61 = vshll.u32 %v17658_v9, %v12046_v14  ;;  %v3192_v21 = vshrl.u32 %v17659_v54, %v12420_v17 }
 0x120   : > { %v3039_v31 = vsel %vm2956_vm5, %v3038_v44, %v3037_v25  ;;  %v12675_v34 = vsub.s32 %v3118_v51, %v3121_v53  ;;  %v3184_v29 = vor.u32 %v3183_v1, %v3182_v60  ;;  %v3190_v8 = vor.u32 %v3189_v35, %v3188_v63  ;;  %8305 = vperm.xlu1 %10551, %v6186_v37   ;;  %v12704_v53 = vpop.f32.mrb[10].mxu0 }
 0x121   : > { %v3042_v7 = vsel %vm12507_vm0, %v12280_v32, %v3039_v31  ;;  %v3187_v13 = vor.u32 %v3186_v49, %v3185_v24  ;;  %v3193_v10 = vor.u32 %v3192_v21, %v3191_v61  ;;  %vm3194_vm8 = vcmp.lt.s32.totalorder %v12417_v58, 1  ;;  %v895_v21 = vld [vmem:[%s17481_s5 + $0x50] sm:$0xff]  ;;  %v896_v31 = vld [vmem:[%s17481_s5 + $0x58] sm:$0xff] }
 0x122   : > { %10738 = vcosq.f32 %v3042_v7  ;;  %v3124_v14 = vsub.s32 0, %v12675_v34  ;;  %v3144_v17 = vsub.s32 4, %v3120_v20  ;;  %vm3196_vm15 = vcmp.lt.s32.totalorder %v12417_v58, 3 }
 0x123   : > { %10740 = vsinq.f32 %v3042_v7  ;;  %vm3195_vm5 = vcmp.lt.s32.totalorder %v12417_v58, 2  ;;  %vm3197_vm12 = vcmp.lt.s32.totalorder %v12417_v58, 4  ;;  %v3198_v47 = vsel %vm3194_vm8, %v3178_v62, %v3181_v22 }
 0x124   : > { %v9752_v51 = vmin.u32 %v3124_v14, %v12675_v34  ;;  %v3199_v37 = vsel %vm3197_vm12, %v3187_v13, 2102212464  ;;  %v3202_v57 = vsel %vm3194_vm8, %v3181_v22, %v3184_v29  ;;  %v3203_v60 = vsel %vm3197_vm12, %v3190_v8, 920167782  ;;  %8310 = vperm.xlu1 %10551, %v6289_v55  }
 0x125   : > { %v3200_v25 = vsel %vm3196_vm15, %v3184_v29, %v3199_v37  ;;  %v3204_v1 = vsel %vm3196_vm15, %v3187_v13, %v3203_v60  ;;  %v3206_v24 = vsel %vm3194_vm8, %v3184_v29, %v3187_v13  ;;  %v3207_v49 = vsel %vm3197_vm12, %v3193_v10, 1326507024  ;;  %v12719_v29 = vpop.f32.mrb[11].mxu0  ;;  %v897_v37 = vld [vmem:[%s17481_s5 + $0x60] sm:$0xff] }
 0x126   : > { %vm3049_vm0 = vcmp.lt.s32.totalorder %v12634_v39, 2  ;;  %vm3050_vm14 = vcmp.eq.s32.totalorder %v12634_v39, 0  ;;  %v17709_v62 = vand.u32 2147483647, %v12452_v30  ;;  %v3126_v44 = vclz %v9752_v51 }
 0x127   : > { %vm3046_vm6 = vweird.f32 %v12280_v32  ;;  %v700_v55 = vadd.f32 %v12335_v48, %v12558_v33  ;;  %v3205_v35 = vsel %vm3195_vm5, %v3202_v57, %v3204_v1  ;;  %v3208_v22 = vsel %vm3196_vm15, %v3190_v8, %v3207_v49 }
 0x128   : > { %vm12700_vm3 = vcmp.le.f32.partialorder %v17709_v62, 0.7853982  ;;  %v3210_v61 = vshll.u32 %v3170_v43, 8  ;;  %v9753_v7 = vadd.s32 4294967294, %v3126_v44  ;;  %v3145_v48 = vsel %vm3060_vm10, %v3144_v17, %v3120_v20  ;;  %v898_v20 = vld [vmem:[%s17481_s5 + $0x68] sm:$0xff] }
 0x129   : > { %v3201_v13 = vsel %vm3195_vm5, %v3198_v47, %v3200_v25  ;;  %v3209_v43 = vsel %vm3195_vm5, %v3206_v24, %v3208_v22  ;;  %vm3053_vm7 = vcmp.eq.s32.totalorder %v12634_v39, 2  ;;  %v3114_v58 = vadd.s32 %v12594_v40, %v12590_v45 }
 0x12a   : > { %v12727_v8 = vmul.u32.u64.low %v3210_v61, %v3209_v43  ;;  %v12728_v10 = vmul.u32.u64.high %v3210_v61, %v3209_v43, %v12727_v8  ;;  %v12730_v14 = vmul.u32.u64.low %v3210_v61, %v3205_v35  ;;  %v12731_v51 = vmul.u32.u64.high %v3210_v61, %v3205_v35, %v12730_v14 }
 0x12b   : > { %vm9754_vm4 = vcmp.lt.s32.totalorder %v9753_v7, 0  ;;  %v10313_v17 = vpack.c.bf16 %v896_v31, %v895_v21  ;;  %v12745_v57 = vsel %vm12700_vm3, 0, %v3145_v48  ;;  %v3217_v60 = vmul.u32 %v3210_v61, %v3201_v13 }
 0x12c   : > { %v3129_v47 = vsel %vm9754_vm4, 0, %v9753_v7  ;;  %v6383_v25 = vand.u32 3, %v12189_v59  ;;  %v12748_v1 = vpop.eup %10738  ;;  %vm3589_vm11 = vcmp.gt.s32.totalorder %v12423_v52, 0  ;;  %v10317_v45 = vpack.c.bf16 %v898_v20, %v897_v37  ;;  %v17712_v37 = vld [vmem:[#allocation35_spill] sm:$0xff] }
 0x12d   : > { %v3130_v24 = vsub.s32 32, %v3129_v47  ;;  %v3131_v49 = vshll.u32 %v12675_v34, %v3129_v47  ;;  %v3134_v62 = vsub.s32 4294967266, %v3129_v47  ;;  %10314 = vmatprep.subr.bf16.mxu1 %v10313_v17  ;;  %v12752_v40 = vpop.eup %10740  ;;  %v3054_v44 = vxor.u32 2147483648, %v12748_v1 }
 0x12e   : > { %10742 = vtanh.f32 %v700_v55  ;;  %vm3219_vm8 = vc.u32 %v12728_v10, %v12730_v14  ;;  %v3220_v59 = vadd.s32 1, %v12731_v51  ;;  %10316 = vmatpush3.bf16.msra.mxu1 %v10313_v17  ;;  %v3051_v35 = vxor.u32 2147483648, %v12752_v40 }
 0x12f   : > { %v3132_v22 = vshrl.u32 %v3114_v58, %v3130_v24  ;;  %v3135_v61 = vadd.s32 127, %v3134_v62  ;;  %v3151_v34 = vadd.s32 3, %v12745_v57  ;;  %10318 = vmatprep.subr.bf16.mxu1 %v10317_v45  ;;  %v3055_v21 = vsel %vm3053_vm7, %v3054_v44, %v12752_v40 }
 0x130   : > { %v3221_v55 = vsel %vm3219_vm8, %v3220_v59, %v12731_v51  ;;  %v710_v31 = vadd.f32 %v12349_v42, %v12558_v33  ;;  %vm6385_vm15 = vcmp.eq.s32.totalorder %v6383_v25, 0  ;;  %v3052_v7 = vsel %vm3050_vm14, %v12748_v1, %v3051_v35 }
 0x131   : > { %v3133_v48 = vor.u32 %v3132_v22, %v3131_v49  ;;  %v3136_v13 = vshll.u32 %v3135_v61, 23  ;;  %v3222_v43 = vadd.s32 %v3221_v55, %v3217_v60  ;;  %v3056_v8 = vsel %vm3049_vm0, %v3052_v7, %v3055_v21 }
 0x132   : > { %vm6384_vm5 = vcmp.lt.s32.totalorder %v6383_v25, 2  ;;  %v17713_v20 = vxor.u32 2147483648, %v17712_v37  ;;  %vm6388_vm12 = vcmp.eq.s32.totalorder %v6383_v25, 2  ;;  %10320 = vmatpush3.bf16.msra.mxu1 %v10317_v45  ;;  %v3057_v42 = vsel %vm3046_vm6, nan, %v3056_v8 }
 0x133   : > { %v3137_v58 = vor.u32 4788187, %v3136_v13  ;;  %v3140_v17 = vcvt.s32.f32 %v3133_v48  ;;  %v3223_v47 = vadd.s32 536870912, %v3222_v43  ;;  %4800 = vperm.xlu0 %10550, %v3057_v42   ;;  %10744 = vtanh.f32 %v710_v31  ;;  %v17716_v31 = vld [vmem:[#allocation40_spill] sm:$0xff] }
 0x134   : > { %v6387_v51 = vsel %vm6385_vm15, %v12310_v3, %v17713_v20  ;;  %v705_v39 = vadd.f32 %v12558_v33, %v12357_v56  ;;  %v17714_v60 = vxor.u32 2147483648, %v12310_v3  ;;  %v6486_v49 = vand.u32 3, %v12288_v18  ;;  %v12793_v56 = vld [vmem:[%s11274_s28 + $0x98] sm:$0xff]  ;;  %v12811_v20 = vpop.f32.mrb[12].mxu0 }
 0x135   : > { %v3138_v25 = vand.u32 2147483647, %v3137_v58  ;;  %v3224_v62 = vshrl.u32 %v3223_v47, 30  ;;  %v720_v59 = vadd.f32 %v12378_v6, %v12558_v33  ;;  %v715_v61 = vadd.f32 %v12558_v33, %v12394_v16  ;;  %v12816_v42 = vpop.f32.mrb[13].mxu0 }
 0x136   : > { %v6390_v24 = vsel %vm6388_vm12, %v17714_v60, %v17712_v37  ;;  %vm6488_vm0 = vcmp.eq.s32.totalorder %v6486_v49, 0  ;;  %v17566_v3 = vand.u32 2147483647, %v12793_v56  ;;  %vm6487_vm14 = vcmp.lt.s32.totalorder %v6486_v49, 2 }
 0x137   : > { %v6391_v45 = vsel %vm6384_vm5, %v6387_v51, %v6390_v24  ;;  %v3141_v21 = vmul.f32 %v3140_v17, %v3138_v25  ;;  %v3225_v55 = vshll.u32 %v3224_v62, 30  ;;  %v17715_v18 = vxor.u32 2147483648, %v12469_v50  ;;  %v17719_v24 = vld [vmem:[#allocation38_spill] sm:$0xff] }
 0x138   : > { %v6392_v22 = vsel %vm2838_vm2, nan, %v6391_v45  ;;  %v12799_v6 = vpop.eup %10742  ;;  %v12804_v2 = vsel %vm3589_vm11, %v12423_v52, 0  ;;  %v3248_v16 = vsub.s32 4, %v3224_v62  ;;  %10746 = vtanh.f32 %v705_v39 }
 0x139   : > { %8315 = vperm.xlu1 %10551, %v6392_v22   ;;  %v6490_v7 = vsel %vm6488_vm0, %v17716_v31, %v17715_v18  ;;  %vm6491_vm2 = vcmp.eq.s32.totalorder %v6486_v49, 2  ;;  %v3142_v48 = vxor.u32 2147483648, %v3141_v21  ;;  %v12806_v13 = vsub.s32 %v3222_v43, %v3225_v55 }
 0x13a   : > { %10748 = vtanh.f32 %v720_v59  ;;  %v17717_v8 = vxor.u32 2147483648, %v17716_v31  ;;  %v12813_v51 = vand.u32 3, %v3151_v34  ;;  %vm3164_vm7 = vcmp.lt.s32.totalorder %v12607_v38, 0 }
 0x13b   : > { %10750 = vtanh.f32 %v715_v61  ;;  %v3143_v58 = vsel %vm3060_vm10, %v3142_v48, %v3141_v21  ;;  %v3228_v43 = vsub.s32 0, %v12806_v13  ;;  %v12823_v17 = vand.u32 8388607, %v17566_v3 }
 0x13c   : > { %v6493_v37 = vsel %vm6491_vm2, %v17717_v8, %v12469_v50  ;;  %v17718_v50 = vld [vmem:[#allocation34_spill] sm:$0xff]  ;;  %v3146_v34 = vsel %vm12700_vm3, %v12452_v30, %v3143_v58  ;;  %v3249_v39 = vsel %vm3164_vm7, %v3248_v16, %v3224_v62  ;;  %v3388_v49 = vshrl.u32 %v17654_v28, %v17719_v24 }
 0x13d   : > { %v6494_v52 = vsel %vm6487_vm14, %v6490_v7, %v6493_v37  ;;  %v3387_v47 = vshll.u32 %v17653_v0, %v17718_v50  ;;  %v12837_v25 = vand.u32 31, %v12804_v2  ;;  %10752 = vcosq.f32 %v3146_v34  ;;  %v12846_v62 = vpop.eup %10744 }
 0x13e   : > { %v6495_v60 = vsel %vm2942_vm1, nan, %v6494_v52  ;;  %vm12841_vm10 = vcmp.le.f32.partialorder %v3162_v26, 0.7853982  ;;  %v9756_v63 = vmin.u32 %v3228_v43, %v12806_v13  ;;  %10754 = vsinq.f32 %v3146_v34 }
 0x13f   : > { %8320 = vperm.xlu1 %10551, %v6495_v60   ;;  %v3218_v5 = vadd.s32 %v12730_v14, %v12728_v10  ;;  %v3386_v59 = vshrl.u32 %v17653_v0, %v17719_v24  ;;  %v3390_v22 = vshll.u32 %v17654_v28, %v17718_v50  ;;  %vm3157_vm1 = vcmp.eq.s32.totalorder %v12813_v51, 2 }
 0x140   : > { %v3230_v26 = vclz %v9756_v63  ;;  %v3251_v61 = vsel %vm12841_vm10, 0, %v3249_v39  ;;  %v3378_v21 = vor.u32 8388608, %v12823_v17  ;;  %v3389_v55 = vor.u32 %v3388_v49, %v3387_v47  ;;  %v17722_v17 = vld [vmem:[#allocation37_spill] sm:$0xff] }
 0x141   : > { %vm3154_vm3 = vcmp.eq.s32.totalorder %v12813_v51, 0  ;;  %v3391_v10 = vshrl.u32 %v17655_v41, %v17719_v24  ;;  %v3393_v14 = vshll.u32 %v17655_v41, %v17718_v50  ;;  %v3394_v18 = vshrl.u32 %v17665_v4, %v17719_v24 }
 0x142   : > { %v3396_v31 = vshll.u32 %v17665_v4, %v17718_v50  ;;  %vm3153_vm4 = vcmp.lt.s32.totalorder %v12813_v51, 2  ;;  %v9757_v7 = vadd.s32 4294967294, %v3230_v26  ;;  %v3397_v16 = vshrl.u32 %v17658_v9, %v17719_v24  ;;  %v12874_v37 = vpop.eup %10746 }
 0x143   : > { %v3399_v48 = vshll.u32 %v17658_v9, %v17718_v50  ;;  %v3400_v8 = vshrl.u32 %v17659_v54, %v17719_v24  ;;  %vm3150_vm11 = vweird.f32 %v12452_v30  ;;  %v3255_v52 = vadd.s32 3, %v3251_v61 }
 0x144   : > { %v3392_v58 = vor.u32 %v3391_v10, %v3390_v22  ;;  %v3395_v43 = vor.u32 %v3394_v18, %v3393_v14  ;;  %vm3402_vm8 = vcmp.lt.s32.totalorder %v17722_v17, 1  ;;  %v12878_v47 = vpop.eup %10748  ;;  %vm9758_vm15 = vcmp.lt.s32.totalorder %v9757_v7, 0 }
 0x145   : > { %v3398_v34 = vor.u32 %v3397_v16, %v3396_v31  ;;  %v3401_v39 = vor.u32 %v3400_v8, %v3399_v48  ;;  %vm3403_vm5 = vcmp.lt.s32.totalorder %v17722_v17, 2  ;;  %v12881_v50 = vpop.eup %10750  ;;  %v3233_v60 = vsel %vm9758_vm15, 0, %v9757_v7 }
 0x146   : > { %vm3404_vm12 = vcmp.lt.s32.totalorder %v17722_v17, 3  ;;  %vm3405_vm0 = vcmp.lt.s32.totalorder %v17722_v17, 4  ;;  %v3410_v24 = vsel %vm3402_vm8, %v3389_v55, %v3392_v58  ;;  %v3234_v49 = vsub.s32 32, %v3233_v60 }
 0x147   : > { %v3235_v63 = vshll.u32 %v12806_v13, %v3233_v60  ;;  %v3238_v22 = vsub.s32 4294967266, %v3233_v60  ;;  %v3407_v26 = vsel %vm3405_vm0, %v3395_v43, 2102212464  ;;  %v3406_v10 = vsel %vm3402_vm8, %v3386_v59, %v3389_v55  ;;  %v12892_v7 = vpop.eup %10752 }
 0x148   : > { %v3411_v14 = vsel %vm3405_vm0, %v3398_v34, 920167782  ;;  %v3414_v18 = vsel %vm3402_vm8, %v3392_v58, %v3395_v43  ;;  %v3415_v31 = vsel %vm3405_vm0, %v3401_v39, 1326507024  ;;  %v3236_v16 = vshrl.u32 %v3218_v5, %v3234_v49  ;;  %v12898_v60 = vpop.eup %10754 }
 0x149   : > { %v3239_v48 = vadd.s32 127, %v3238_v22  ;;  %v3408_v8 = vsel %vm3404_vm12, %v3392_v58, %v3407_v26  ;;  %v3412_v13 = vsel %vm3404_vm12, %v3395_v43, %v3411_v14  ;;  %v3158_v27 = vxor.u32 2147483648, %v12892_v7 }
 0x14a   : > { %v3413_v59 = vsel %vm3403_vm5, %v3410_v24, %v3412_v13  ;;  %v3416_v55 = vsel %vm3404_vm12, %v3398_v34, %v3415_v31  ;;  %v3418_v39 = vshll.u32 %v3378_v21, 8  ;;  %v3155_v5 = vxor.u32 2147483648, %v12898_v60  ;;  %v899_v21 = vld [vmem:[%s17481_s5 + $0x70] sm:$0xff]  ;;  %v900_v34 = vld [vmem:[%s17481_s5 + $0x78] sm:$0xff] }
 0x14b   : > { %v3237_v49 = vor.u32 %v3236_v16, %v3235_v63  ;;  %v3240_v22 = vshll.u32 %v3239_v48, 23  ;;  %v3417_v58 = vsel %vm3403_vm5, %v3414_v18, %v3416_v55  ;;  %v3159_v43 = vsel %vm3157_vm1, %v3158_v27, %v12898_v60 }
 0x14c   : > { %v12913_v26 = vand.u32 3, %v3251_v61  ;;  %v12915_v24 = vmul.u32.u64.low %v3418_v39, %v3417_v58  ;;  %v12916_v14 = vmul.u32.u64.high %v3418_v39, %v3417_v58, %v12915_v24  ;;  %v3156_v63 = vsel %vm3154_vm3, %v12892_v7, %v3155_v5 }
 0x14d   : > { %v3241_v18 = vor.u32 4788187, %v3240_v22  ;;  %v3244_v31 = vcvt.s32.f32 %v3237_v49  ;;  %v3409_v61 = vsel %vm3403_vm5, %v3406_v10, %v3408_v8  ;;  %v3160_v16 = vsel %vm3153_vm4, %v3156_v63, %v3159_v43  ;;  %v17724_v63 = vld [vmem:[#allocation26_spill] sm:$0xff] }
 0x14e   : > { %v12931_v48 = vmul.u32.u64.low %v3418_v39, %v3413_v59  ;;  %v12932_v13 = vmul.u32.u64.high %v3418_v39, %v3413_v59, %v12931_v48  ;;  %v730_v55 = vadd.f32 %v12516_v23, %v12558_v33  ;;  %v3161_v58 = vsel %vm3150_vm11, nan, %v3160_v16 }
 0x14f   : > { %v3242_v24 = vand.u32 2147483647, %v3241_v18  ;;  %v10321_v3 = vpack.c.bf16 %v900_v34, %v899_v21  ;;  %v725_v49 = vadd.f32 %v12558_v33, %v12522_v46  ;;  %4805 = vperm.xlu0 %10550, %v3161_v58   ;;  %v12941_v17 = vand.u32 3, %v3255_v52 }
 0x150   : > { %v3425_v51 = vmul.u32 %v3418_v39, %v3409_v61  ;;  %10756 = vtanh.f32 %v730_v55  ;;  %v6589_v10 = vand.u32 3, %v12581_v15  ;;  %vm3427_vm14 = vc.u32 %v12916_v14, %v12931_v48  ;;  %v17723_v39 = vld [vmem:[#allocation41_spill] sm:$0xff]  ;;  %v17725_v61 = vld [vmem:[#allocation30_spill] sm:$0xff]  ;;  %v12994_v55 = vpop.f32.mrb[14].mxu0 }
 0x151   : > { %v3245_v8 = vmul.f32 %v3244_v31, %v3242_v24  ;;  %10322 = vmatprep.subr.bf16.mxu1 %v10321_v3  ;;  %10758 = vtanh.f32 %v725_v49  ;;  %v735_v23 = vadd.f32 %v12558_v33, %v12566_v11  ;;  %v3428_v59 = vadd.s32 1, %v12932_v13  ;;  %v13004_v58 = vpop.f32.mrb[15].mxu0 }
 0x152   : > { %10324 = vmatpush3.bf16.msra.mxu1 %v10321_v3  ;;  %vm6590_vm2 = vcmp.lt.s32.totalorder %v6589_v10, 2  ;;  %vm6591_vm1 = vcmp.eq.s32.totalorder %v6589_v10, 0  ;;  %vm6594_vm3 = vcmp.eq.s32.totalorder %v6589_v10, 2  ;;  %v740_v22 = vadd.f32 %v17723_v39, %v12558_v33 }
 0x153   : > { %v3246_v46 = vxor.u32 2147483648, %v3245_v8  ;;  %v6593_v15 = vsel %vm6591_vm1, %v12748_v1, %v3051_v35  ;;  %v6596_v52 = vsel %vm6594_vm3, %v3054_v44, %v12752_v40  ;;  %v3429_v11 = vsel %vm3427_vm14, %v3428_v59, %v12932_v13  ;;  %v12965_v1 = vld [vmem:[%s11274_s28 + $0xa8] sm:$0xff] }
 0x154   : > { %v6597_v43 = vsel %vm6590_vm2, %v6593_v15, %v6596_v52  ;;  %10760 = vtanh.f32 %v735_v23  ;;  %v6692_v3 = vand.u32 3, %v12745_v57  ;;  %v3430_v34 = vadd.s32 %v3429_v11, %v3425_v51 }
 0x155   : > { %v3247_v21 = vsel %vm3164_vm7, %v3246_v46, %v3245_v8  ;;  %v6598_v35 = vsel %vm3046_vm6, nan, %v6597_v43  ;;  %10188 = vmatmul.mubr.f32.vlgmr.msra.gmra.mrb[0].mxu1 %v12799_v6  ;;  %v3578_v40 = vand.u32 2147483647, %v12965_v1  ;;  %v12977_v18 = vand.u32 31, %v17724_v63 }
 0x156   : > { %v3250_v44 = vsel %vm12841_vm10, %v12607_v38, %v3247_v21  ;;  %8325 = vperm.xlu1 %10551, %v6598_v35   ;;  %vm6693_vm4 = vcmp.lt.s32.totalorder %v6692_v3, 2  ;;  %vm6694_vm8 = vcmp.eq.s32.totalorder %v6692_v3, 0  ;;  %vm6697_vm15 = vcmp.eq.s32.totalorder %v6692_v3, 2  ;;  %10190 = vmatprep.mubr.f32.mxu1 %v12874_v37 }
 0x157   : > { %10762 = vcosq.f32 %v3250_v44  ;;  %v3431_v57 = vadd.s32 536870912, %v3430_v34  ;;  %v6696_v32 = vsel %vm6694_vm8, %v12892_v7, %v3155_v5  ;;  %v6699_v6 = vsel %vm6697_vm15, %v3158_v27, %v12898_v60  ;;  %v17726_v7 = vld [vmem:[#allocation39_spill] sm:$0xff] }
 0x158   : > { %v3593_v45 = vsub.s32 32, %v12837_v25  ;;  %10764 = vsinq.f32 %v3250_v44  ;;  %v6700_v31 = vsel %vm6693_vm4, %v6696_v32, %v6699_v6  ;;  %v12981_v16 = vadd.s32 1, %v17725_v61 }
 0x159   : > { %v12984_v37 = vshrl.u32 %v12804_v2, 5  ;;  %v3432_v13 = vshrl.u32 %v3431_v57, 30  ;;  %v6701_v5 = vsel %vm3150_vm11, nan, %v6700_v31  ;;  %10191 = vmatmul.mubr.f32.gmra.mrb[2].mxu1 %v12846_v62  ;;  %v12990_v60 = vadd.s32 4294967169, %v17726_v7 }
 0x15a   : > { %v10757_v27 = vpop.eup %10756  ;;  %vm6797_vm6 = vcmp.eq.s32.totalorder %v12913_v26, 0  ;;  %vm3372_vm7 = vcmp.lt.s32.totalorder %v12793_v56, 0  ;;  %10766 = vtanh.f32 %v740_v22  ;;  %8330 = vperm.xlu1 %10551, %v6701_v5   ;;  %vm3257_vm10 = vcmp.lt.s32.totalorder %v12941_v17, 2  ;;  %10193 = vmatprep.mubr.f32.mxu1 %v12881_v50 }
 0x15b   : > { %v10759_v2 = vpop.eup %10758  ;;  %vm6796_vm5 = vcmp.lt.s32.totalorder %v12913_v26, 2  ;;  %vm6800_vm11 = vcmp.eq.s32.totalorder %v12913_v26, 2  ;;  %v3433_v30 = vshll.u32 %v3432_v13, 30  ;;  %v13001_v62 = vand.u32 8388607, %v3578_v40 }
 0x15c   : > { %vm3254_vm12 = vweird.f32 %v12607_v38  ;;  %v3595_v24 = vshll.u32 %v17653_v0, %v12837_v25  ;;  %v3596_v49 = vshrl.u32 %v17654_v28, %v3593_v45  ;;  %v3601_v51 = vshll.u32 %v17655_v41, %v12837_v25 }
 0x15d   : > { %v3602_v10 = vshrl.u32 %v17665_v4, %v3593_v45  ;;  %v13013_v8 = vsub.s32 %v3430_v34, %v3433_v30  ;;  %v3456_v23 = vsub.s32 4, %v3432_v13  ;;  %v3598_v50 = vshll.u32 %v17654_v28, %v12837_v25  ;;  %10194 = vmatmul.mubr.f32.gmra.mrb[4].mxu1 %v12878_v47 }
 0x15e   : > { %v3599_v59 = vshrl.u32 %v17655_v41, %v3593_v45  ;;  %v10761_v46 = vpop.eup %10760  ;;  %vm3258_vm0 = vcmp.eq.s32.totalorder %v12941_v17, 0  ;;  %vm3261_vm14 = vcmp.eq.s32.totalorder %v12941_v17, 2  ;;  %v3604_v15 = vshll.u32 %v17665_v4, %v12837_v25  ;;  %10196 = vmatprep.mubr.f32.mxu1 %v10759_v2 }
 0x15f   : > { %v3605_v52 = vshrl.u32 %v17658_v9, %v3593_v45  ;;  %v3426_v39 = vadd.s32 %v12931_v48, %v12916_v14  ;;  %v3436_v22 = vsub.s32 0, %v13013_v8  ;;  %v3607_v11 = vshll.u32 %v17658_v9, %v12837_v25 }
 0x160   : > { %v3608_v47 = vshrl.u32 %v17659_v54, %v3593_v45  ;;  %v3586_v43 = vor.u32 8388608, %v13001_v62  ;;  %v3594_v3 = vshrl.u32 %v17653_v0, %v3593_v45  ;;  %v3597_v21 = vor.u32 %v3596_v49, %v3595_v24 }
 0x161   : > { %v3603_v34 = vor.u32 %v3602_v10, %v3601_v51  ;;  %v10763_v35 = vpop.eup %10762  ;;  %v9764_v44 = vmin.u32 %v3436_v22, %v13013_v8  ;;  %v3457_v57 = vsel %vm3372_vm7, %v3456_v23, %v3432_v13  ;;  %v3600_v14 = vor.u32 %v3599_v59, %v3598_v50  ;;  %10197 = vmatmul.mubr.f32.gmra.mrb[6].mxu1 %v10757_v27 }
 0x162   : > { %vm3613_vm2 = vcmp.lt.s32.totalorder %v12984_v37, 4  ;;  %v10765_v48 = vpop.eup %10764  ;;  %v3262_v25 = vxor.u32 2147483648, %v10763_v35  ;;  %v3606_v32 = vor.u32 %v3605_v52, %v3604_v15  ;;  %vm3610_vm1 = vcmp.lt.s32.totalorder %v12984_v37, 1  ;;  %10199 = vmatprep.mubr.f32.mxu1 %v10761_v46 }
 0x163   : > { %v3615_v6 = vsel %vm3613_vm2, %v3603_v34, 2102212464  ;;  %v3259_v63 = vxor.u32 2147483648, %v10765_v48  ;;  %v3438_v45 = vclz %v9764_v44  ;;  %v3609_v31 = vor.u32 %v3608_v47, %v3607_v11 }
 0x164   : > { %vm3611_vm3 = vcmp.lt.s32.totalorder %v12984_v37, 2  ;;  %v10767_v61 = vpop.eup %10766  ;;  %v3263_v13 = vsel %vm3261_vm14, %v3262_v25, %v10765_v48  ;;  %v6802_v5 = vsel %vm6800_vm11, %v3262_v25, %v10765_v48  ;;  %v17727_v27 = vand.u32 2147483647, %v12793_v56 }
 0x165   : > { %vm3612_vm8 = vcmp.lt.s32.totalorder %v12984_v37, 3  ;;  %v3614_v2 = vsel %vm3610_vm1, %v3594_v3, %v3597_v21  ;;  %v3260_v30 = vsel %vm3258_vm0, %v10763_v35, %v3259_v63  ;;  %v6799_v62 = vsel %vm6797_vm6, %v10763_v35, %v3259_v63  ;;  %10200 = vmatmul.mubr.f32.gmra.mrb[8].mxu1 %v10767_v61 }
 0x166   : > { %vm13046_vm4 = vcmp.le.f32.partialorder %v17727_v27, 0.7853982  ;;  %v9765_v24 = vadd.s32 4294967294, %v3438_v45  ;;  %v3616_v49 = vsel %vm3612_vm8, %v3600_v14, %v3615_v6  ;;  %v3264_v51 = vsel %vm3257_vm10, %v3260_v30, %v3263_v13  ;;  %v17731_v30 = vld [vmem:[#allocation22_spill] sm:$0xff] }
 0x167   : > { %v6803_v10 = vsel %vm6796_vm5, %v6799_v62, %v6802_v5  ;;  %v3618_v23 = vsel %vm3610_vm1, %v3597_v21, %v3600_v14  ;;  %v3619_v50 = vsel %vm3613_vm2, %v3606_v32, 920167782  ;;  %v3265_v59 = vsel %vm3254_vm12, nan, %v3264_v51  ;;  %v13114_v5 = vpop.f32.mrb[16].mxu0 }
 0x168   : > { %v6804_v46 = vsel %vm3254_vm12, nan, %v6803_v10  ;;  %vm9766_vm15 = vcmp.lt.s32.totalorder %v9765_v24, 0  ;;  %v3620_v17 = vsel %vm3612_vm8, %v3603_v34, %v3619_v50  ;;  %4810 = vperm.xlu0 %10550, %v3265_v59   ;;  %v3622_v52 = vsel %vm3610_vm1, %v3600_v14, %v3603_v34  ;;  %v17732_v10 = vld [vmem:[#allocation24_spill] sm:$0xff] }
 0x169   : > { %v3441_v26 = vsel %vm9766_vm15, 0, %v9765_v24  ;;  %v3621_v15 = vsel %vm3611_vm3, %v3618_v23, %v3620_v17  ;;  %v3623_v22 = vsel %vm3613_vm2, %v3609_v31, 1326507024  ;;  %v3617_v21 = vsel %vm3611_vm3, %v3614_v2, %v3616_v49  ;;  %v13118_v24 = vpop.f32.mrb[17].mxu0 }
 0x16a   : > { %v3442_v11 = vsub.s32 32, %v3441_v26  ;;  %v3443_v38 = vshll.u32 %v13013_v8, %v3441_v26  ;;  %v3446_v47 = vsub.s32 4294967266, %v3441_v26  ;;  %v3624_v3 = vsel %vm3612_vm8, %v3606_v32, %v3623_v22  ;;  %v13091_v8 = vld [vmem:[%s11274_s28 + $0x90] sm:$0xff] }
 0x16b   : > { %v3625_v35 = vsel %vm3611_vm3, %v3622_v52, %v3624_v3  ;;  %v3626_v44 = vshll.u32 %v3586_v43, 8  ;;  %v750_v34 = vadd.f32 %v12704_v53, %v12558_v33  ;;  %v745_v25 = vadd.f32 %v12558_v33, %v12719_v29  ;;  %v17730_v43 = vld [vmem:[#allocation27_spill] sm:$0xff] }
 0x16c   : > { %v3444_v14 = vshrl.u32 %v3426_v39, %v3442_v11  ;;  %v3447_v48 = vadd.s32 127, %v3446_v47  ;;  %v3266_v6 = vand.u32 2147483647, %v13091_v8  ;;  %8335 = vperm.xlu0 %10550, %v6804_v46   ;;  %v13102_v31 = vsub.s32 32, %v17730_v43 }
 0x16d   : > { %v13094_v32 = vmul.u32.u64.low %v3626_v44, %v3625_v35  ;;  %v13095_v63 = vmul.u32.u64.high %v3626_v44, %v3625_v35, %v13094_v32  ;;  %v13097_v45 = vmul.u32.u64.low %v3626_v44, %v3621_v15  ;;  %v13098_v37 = vmul.u32.u64.high %v3626_v44, %v3621_v15, %v13097_v45 }
 0x16e   : > { %v3445_v53 = vor.u32 %v3444_v14, %v3443_v38  ;;  %v3448_v39 = vshll.u32 %v3447_v48, 23  ;;  %v13106_v33 = vsel %vm13046_vm4, 0, %v3457_v57  ;;  %v13109_v29 = vsub.s32 32, %v12977_v18  ;;  %v17733_v48 = vld [vmem:[#allocation23_spill] sm:$0xff] }
 0x16f   : > { %v13112_v61 = vadd.s32 1, %v12990_v60  ;;  %v3633_v13 = vmul.u32 %v3626_v44, %v3617_v21  ;;  %10768 = vtanh.f32 %v745_v25  ;;  %v3283_v62 = vshll.u32 %v17653_v0, %v17731_v30 }
 0x170   : > { %v3449_v27 = vor.u32 4788187, %v3448_v39  ;;  %v3452_v2 = vcvt.s32.f32 %v3445_v53  ;;  %10770 = vtanh.f32 %v750_v34  ;;  %vm3901_vm6 = vcmp.gt.s32.totalorder %v12981_v16, 0 }
 0x171   : > { %v3463_v57 = vadd.s32 3, %v13106_v33  ;;  %vm3635_vm10 = vc.u32 %v13095_v63, %v13097_v45  ;;  %v3636_v60 = vadd.s32 1, %v13098_v37  ;;  %v3273_v49 = vand.u32 8388607, %v3266_v6 }
 0x172   : > { %v3450_v51 = vand.u32 2147483647, %v3449_v27  ;;  %v3284_v23 = vshrl.u32 %v17654_v28, %v17732_v10  ;;  %v3286_v50 = vshll.u32 %v17654_v28, %v17731_v30  ;;  %v3287_v59 = vshrl.u32 %v17655_v41, %v17732_v10 }
 0x173   : > { %v3637_v46 = vsel %vm3635_vm10, %v3636_v60, %v13098_v37  ;;  %v3289_v17 = vshll.u32 %v17655_v41, %v17731_v30  ;;  %v3290_v26 = vshrl.u32 %v17665_v4, %v17732_v10  ;;  %v3292_v15 = vshll.u32 %v17665_v4, %v17731_v30 }
 0x174   : > { %v3453_v52 = vmul.f32 %v3452_v2, %v3450_v51  ;;  %v3638_v22 = vadd.s32 %v3637_v46, %v3633_v13  ;;  %v3282_v11 = vshrl.u32 %v17653_v0, %v17732_v10  ;;  %v3285_v38 = vor.u32 %v3284_v23, %v3283_v62 }
 0x175   : > { %v3288_v47 = vor.u32 %v3287_v59, %v3286_v50  ;;  %v3293_v3 = vshrl.u32 %v17658_v9, %v17732_v10  ;;  %v3295_v21 = vshll.u32 %v17658_v9, %v17731_v30  ;;  %v3296_v35 = vshrl.u32 %v17659_v54, %v17732_v10 }
 0x176   : > { %v3454_v44 = vxor.u32 2147483648, %v3453_v52  ;;  %v3639_v34 = vadd.s32 536870912, %v3638_v22  ;;  %v3291_v14 = vor.u32 %v3290_v26, %v3289_v17  ;;  %vm3298_vm5 = vcmp.lt.s32.totalorder %v17733_v48, 1 }
 0x177   : > { %v3274_v25 = vor.u32 8388608, %v3273_v49  ;;  %v3294_v32 = vor.u32 %v3293_v3, %v3292_v15  ;;  %v3297_v37 = vor.u32 %v3296_v35, %v3295_v21  ;;  %vm3301_vm11 = vcmp.lt.s32.totalorder %v17733_v48, 4 }
 0x178   : > { %v3455_v53 = vsel %vm3372_vm7, %v3454_v44, %v3453_v52  ;;  %v3640_v39 = vshrl.u32 %v3639_v34, 30  ;;  %vm3300_vm12 = vcmp.lt.s32.totalorder %v17733_v48, 3  ;;  %v3303_v13 = vsel %vm3301_vm11, %v3291_v14, 2102212464 }
 0x179   : > { %v10769_v27 = vpop.eup %10768  ;;  %v3458_v2 = vsel %vm13046_vm4, %v12793_v56, %v3455_v53  ;;  %vm3299_vm0 = vcmp.lt.s32.totalorder %v17733_v48, 2  ;;  %v3306_v30 = vsel %vm3298_vm5, %v3285_v38, %v3288_v47  ;;  %v3307_v62 = vsel %vm3301_vm11, %v3294_v32, 920167782 }
 0x17a   : > { %v10771_v60 = vpop.eup %10770  ;;  %10772 = vcosq.f32 %v3458_v2  ;;  %v3641_v49 = vshll.u32 %v3640_v39, 30  ;;  %v3302_v51 = vsel %vm3298_vm5, %v3282_v11, %v3285_v38  ;;  %v3304_v10 = vsel %vm3300_vm12, %v3288_v47, %v3303_v13  ;;  %10202 = vmatprep.mubr.f32.mxu1 %v10769_v27 }
 0x17b   : > { %10774 = vsinq.f32 %v3458_v2  ;;  %v3308_v7 = vsel %vm3300_vm12, %v3291_v14, %v3307_v62  ;;  %v3310_v23 = vsel %vm3298_vm5, %v3288_v47, %v3291_v14  ;;  %v3311_v50 = vsel %vm3301_vm11, %v3297_v37, 1326507024  ;;  %10203 = vmatmul.mubr.f32.gmra.mrb[10].mxu1 %v10771_v60  ;;  %v13194_v47 = vld [vmem:[%s17480_s4] ss:$0 sm:$0xff]  ;;  %v17736_v60 = vld [vmem:[#allocation29_spill] sm:$0xff] }
 0x17c   : > { %v13176_v59 = vsel %vm3901_vm6, %v12981_v16, 0  ;;  %v13178_v46 = vsub.s32 %v3638_v22, %v3641_v49  ;;  %v3309_v17 = vsel %vm3299_vm0, %v3306_v30, %v3308_v7  ;;  %v3312_v26 = vsel %vm3300_vm12, %v3294_v32, %v3311_v50 }
 0x17d   : > { %vm3797_vm7 = vcmp.gt.s32.totalorder %v13112_v61, 0  ;;  %v7001_v15 = vand.u32 3, %v13106_v33  ;;  %v3313_v52 = vsel %vm3299_vm0, %v3310_v23, %v3312_v26  ;;  %v3314_v11 = vshll.u32 %v3274_v25, 8 }
 0x17e   : > { %v3464_v38 = vand.u32 3, %v3463_v57  ;;  %v3644_v16 = vsub.s32 0, %v13178_v46  ;;  %v3305_v22 = vsel %vm3299_vm0, %v3302_v51, %v3304_v10  ;;  %v760_v3 = vadd.f32 %v13194_v47, %v12811_v20 }
 0x17f   : > { %v13198_v21 = vmul.u32.u64.low %v3314_v11, %v3313_v52  ;;  %v13199_v33 = vmul.u32.u64.high %v3314_v11, %v3313_v52, %v13198_v21  ;;  %v13201_v35 = vmul.u32.u64.low %v3314_v11, %v3309_v17  ;;  %v13202_v44 = vmul.u32.u64.high %v3314_v11, %v3309_v17, %v13201_v35 }
 0x180   : > { %v13206_v57 = vsel %vm3797_vm7, %v13112_v61, 0  ;;  %vm3462_vm14 = vweird.f32 %v12793_v56  ;;  %v9772_v34 = vmin.u32 %v3644_v16, %v13178_v46  ;;  %v3664_v14 = vsub.s32 4, %v3640_v39 }
 0x181   : > { %vm7002_vm2 = vcmp.lt.s32.totalorder %v7001_v15, 2  ;;  %vm13212_vm1 = vcmp.le.f32.partialorder %v3578_v40, 0.7853982  ;;  %vm3580_vm3 = vcmp.lt.s32.totalorder %v12965_v1, 0  ;;  %v755_v48 = vadd.f32 %v13194_v47, %v12816_v42 }
 0x182   : > { %vm7003_vm4 = vcmp.eq.s32.totalorder %v7001_v15, 0  ;;  %vm7006_vm8 = vcmp.eq.s32.totalorder %v7001_v15, 2  ;;  %v3646_v61 = vclz %v9772_v34  ;;  %v3321_v25 = vmul.u32 %v3314_v11, %v3305_v22  ;;  %v13247_v15 = vpop.f32.mrb[18].mxu0 }
 0x183   : > { %vm3465_vm15 = vcmp.lt.s32.totalorder %v3464_v38, 2  ;;  %vm3323_vm6 = vc.u32 %v13199_v33, %v13201_v35  ;;  %v3324_v32 = vadd.s32 1, %v13202_v44  ;;  %10776 = vtanh.f32 %v760_v3 }
 0x184   : > { %v10773_v40 = vpop.eup %10772  ;;  %vm3469_vm10 = vcmp.eq.s32.totalorder %v3464_v38, 2  ;;  %v9773_v37 = vadd.s32 4294967294, %v3646_v61  ;;  %v3665_v53 = vsel %vm3580_vm3, %v3664_v14, %v3640_v39  ;;  %10778 = vtanh.f32 %v755_v48  ;;  %v13253_v48 = vld [vmem:[%s11274_s28 + $0xb0] sm:$0xff] }
 0x185   : > { %v10775_v13 = vpop.eup %10774  ;;  %vm3466_vm5 = vcmp.eq.s32.totalorder %v3464_v38, 0  ;;  %v3470_v42 = vxor.u32 2147483648, %v10773_v40  ;;  %v3634_v27 = vadd.s32 %v13097_v45, %v13095_v63  ;;  %v3325_v2 = vsel %vm3323_vm6, %v3324_v32, %v13202_v44 }
 0x186   : > { %v3467_v30 = vxor.u32 2147483648, %v10775_v13  ;;  %vm9774_vm11 = vcmp.lt.s32.totalorder %v9773_v37, 0  ;;  %v3326_v62 = vadd.s32 %v3325_v2, %v3321_v25  ;;  %v5044_v49 = vand.u32 3, %v17736_v60  ;;  %v13256_v25 = vpop.f32.mrb[19].mxu0 }
 0x187   : > { %v3471_v51 = vsel %vm3469_vm10, %v3470_v42, %v10775_v13  ;;  %v7008_v10 = vsel %vm7006_vm8, %v3470_v42, %v10775_v13  ;;  %v3649_v7 = vsel %vm9774_vm11, 0, %v9773_v37  ;;  %v13231_v39 = vsel %vm13212_vm1, 0, %v3665_v53  ;;  %v17737_v53 = vld [vmem:[#allocation33_spill] sm:$0xff]  ;;  %v17739_v42 = vld [vmem:[#allocation32_spill] sm:$0xff] }
 0x188   : > { %v3468_v23 = vsel %vm3466_vm5, %v10773_v40, %v3467_v30  ;;  %v7005_v50 = vsel %vm7003_vm4, %v10773_v40, %v3467_v30  ;;  %v3650_v17 = vsub.s32 32, %v3649_v7  ;;  %v3651_v63 = vshll.u32 %v13178_v46, %v3649_v7 }
 0x189   : > { %v3472_v45 = vsel %vm3465_vm15, %v3468_v23, %v3471_v51  ;;  %v7009_v26 = vsel %vm7002_vm2, %v7005_v50, %v7008_v10  ;;  %v3654_v52 = vsub.s32 4294967266, %v3649_v7  ;;  %v3327_v11 = vadd.s32 536870912, %v3326_v62 }
 0x18a   : > { %v13238_v16 = vand.u32 31, %v13176_v59  ;;  %v3473_v22 = vsel %vm3462_vm14, nan, %v3472_v45  ;;  %v3652_v3 = vshrl.u32 %v3634_v27, %v3650_v17  ;;  %vm5046_vm12 = vcmp.eq.s32.totalorder %v5044_v49, 0 }
 0x18b   : > { %v13243_v21 = vand.u32 31, %v13206_v57  ;;  %4820 = vperm.xlu0 %10550, %v3473_v22   ;;  %v3655_v46 = vadd.s32 127, %v3654_v52  ;;  %v13245_v38 = vshrl.u32 %v3327_v11, 30  ;;  %vm5049_vm0 = vcmp.eq.s32.totalorder %v5044_v49, 2 }
 0x18c   : > { %v7010_v44 = vsel %vm3462_vm14, nan, %v7009_v26  ;;  %v3653_v34 = vor.u32 %v3652_v3, %v3651_v63  ;;  %v3671_v14 = vadd.s32 3, %v13231_v39  ;;  %v3682_v61 = vand.u32 2147483647, %v13253_v48 }
 0x18d   : > { %v10777_v32 = vpop.eup %10776  ;;  %v3656_v40 = vshll.u32 %v3655_v46, 23  ;;  %v3329_v37 = vshll.u32 %v13245_v38, 30  ;;  %vm5045_vm7 = vcmp.lt.s32.totalorder %v5044_v49, 2  ;;  %v17738_v13 = vxor.u32 2147483648, %v17737_v53  ;;  %v17741_v49 = vld [vmem:[#allocation28_spill] sm:$0xff] }
 0x18e   : > { %v10779_v27 = vpop.eup %10778  ;;  %v17740_v2 = vxor.u32 2147483648, %v17739_v42  ;;  %v3699_v60 = vshll.u32 %v17653_v0, %v12977_v18  ;;  %v3700_v51 = vshrl.u32 %v17654_v28, %v13109_v29  ;;  %v3702_v10 = vshll.u32 %v17654_v28, %v12977_v18 }
 0x18f   : > { %v5048_v56 = vsel %vm5046_vm12, %v17739_v42, %v17738_v13  ;;  %8345 = vperm.xlu0 %10550, %v7010_v44   ;;  %v3657_v7 = vor.u32 4788187, %v3656_v40  ;;  %v3660_v23 = vcvt.s32.f32 %v3653_v34  ;;  %v13272_v50 = vsub.s32 %v3326_v62, %v3329_v37  ;;  %10205 = vmatprep.mubr.f32.mxu1 %v10779_v27 }
 0x190   : > { %v5051_v30 = vsel %vm5049_vm0, %v17740_v2, %v17737_v53  ;;  %v3703_v17 = vshrl.u32 %v17655_v41, %v13109_v29  ;;  %v13276_v63 = vand.u32 3, %v3671_v14  ;;  %v3689_v45 = vand.u32 8388607, %v3682_v61  ;;  %10206 = vmatmul.mubr.f32.gmra.mrb[12].mxu1 %v10777_v32 }
 0x191   : > { %v3708_v26 = vshll.u32 %v17665_v4, %v12977_v18  ;;  %v3709_v52 = vshrl.u32 %v17658_v9, %v13109_v29  ;;  %v3658_v11 = vand.u32 2147483647, %v3657_v7  ;;  %v3332_v62 = vsub.s32 0, %v13272_v50 }
 0x192   : > { %v3705_v22 = vshll.u32 %v17655_v41, %v12977_v18  ;;  %v3706_v3 = vshrl.u32 %v17665_v4, %v13109_v29  ;;  %v3322_v46 = vadd.s32 %v13201_v35, %v13199_v33  ;;  %v13292_v44 = vsel %vm5045_vm7, %v5048_v56, %v5051_v30 }
 0x193   : > { %v3711_v34 = vshll.u32 %v17658_v9, %v12977_v18  ;;  %v3712_v14 = vshrl.u32 %v17659_v54, %v13109_v29  ;;  %v3661_v32 = vmul.f32 %v3660_v23, %v3658_v11  ;;  %vm3268_vm14 = vcmp.lt.s32.totalorder %v13091_v8, 0 }
 0x194   : > { %v9760_v40 = vmin.u32 %v3332_v62, %v13272_v50  ;;  %v3701_v37 = vor.u32 %v3700_v51, %v3699_v60  ;;  %v3704_v53 = vor.u32 %v3703_v17, %v3702_v10  ;;  %v3690_v13 = vor.u32 8388608, %v3689_v45 }
 0x195   : > { %v3698_v33 = vshrl.u32 %v17653_v0, %v13109_v29  ;;  %v3710_v35 = vor.u32 %v3709_v52, %v3708_v26  ;;  %vm3714_vm2 = vcmp.lt.s32.totalorder %v17741_v49, 1  ;;  %v3662_v42 = vxor.u32 2147483648, %v3661_v32 }
 0x196   : > { %v3334_v56 = vclz %v9760_v40  ;;  %v3352_v18 = vsub.s32 4, %v13245_v38  ;;  %v3707_v27 = vor.u32 %v3706_v3, %v3705_v22  ;;  %vm13306_vm4 = vcmp.le.f32.partialorder %v3266_v6, 0.7853982 }
 0x197   : > { %v3713_v30 = vor.u32 %v3712_v14, %v3711_v34  ;;  %vm3715_vm8 = vcmp.lt.s32.totalorder %v17741_v49, 2  ;;  %vm3716_vm15 = vcmp.lt.s32.totalorder %v17741_v49, 3  ;;  %vm3717_vm6 = vcmp.lt.s32.totalorder %v17741_v49, 4 }
 0x198   : > { %v3663_v29 = vsel %vm3580_vm3, %v3662_v42, %v3661_v32  ;;  %v9761_v60 = vadd.s32 4294967294, %v3334_v56  ;;  %v3719_v51 = vsel %vm3717_vm6, %v3707_v27, 2102212464  ;;  %v3722_v6 = vsel %vm3714_vm2, %v3701_v37, %v3704_v53 }
 0x199   : > { %v3666_v10 = vsel %vm13212_vm1, %v12965_v1, %v3663_v29  ;;  %v3718_v7 = vsel %vm3714_vm2, %v3698_v33, %v3701_v37  ;;  %v3720_v23 = vsel %vm3716_vm15, %v3704_v53, %v3719_v51  ;;  %v3723_v17 = vsel %vm3717_vm6, %v3710_v35, 920167782 }
 0x19a   : > { %10780 = vcosq.f32 %v3666_v10  ;;  %vm9762_vm3 = vcmp.lt.s32.totalorder %v9761_v60, 0  ;;  %v3724_v45 = vsel %vm3716_vm15, %v3707_v27, %v3723_v17  ;;  %v3726_v26 = vsel %vm3714_vm2, %v3704_v53, %v3707_v27 }
 0x19b   : > { %10782 = vsinq.f32 %v3666_v10  ;;  %v3337_v20 = vsel %vm9762_vm3, 0, %v9761_v60  ;;  %v3725_v52 = vsel %vm3715_vm8, %v3722_v6, %v3724_v45  ;;  %v3727_v11 = vsel %vm3717_vm6, %v3713_v30, 1326507024 }
 0x19c   : > { %v3338_v62 = vsub.s32 32, %v3337_v20  ;;  %v3339_v22 = vshll.u32 %v13272_v50, %v3337_v20  ;;  %v3342_v3 = vsub.s32 4294967266, %v3337_v20  ;;  %v3728_v34 = vsel %vm3716_vm15, %v3710_v35, %v3727_v11 }
 0x19d   : > { %v3353_v14 = vsel %vm3268_vm14, %v3352_v18, %v13245_v38  ;;  %v3729_v32 = vsel %vm3715_vm8, %v3726_v26, %v3728_v34  ;;  %v3730_v40 = vshll.u32 %v3690_v13, 8  ;;  %v770_v37 = vadd.f32 %v13194_v47, %v12994_v55 }
 0x19e   : > { %vm3673_vm1 = vcmp.lt.s32.totalorder %v13276_v63, 2  ;;  %v3340_v53 = vshrl.u32 %v3322_v46, %v3338_v62  ;;  %v3343_v50 = vadd.s32 127, %v3342_v3  ;;  %v3721_v33 = vsel %vm3715_vm8, %v3718_v7, %v3720_v23 }
 0x19f   : > { %v765_v35 = vadd.f32 %v13194_v47, %v13004_v58  ;;  %vm3670_vm10 = vweird.f32 %v12965_v1  ;;  %v13352_v38 = vmul.u32.u64.low %v3730_v40, %v3729_v32  ;;  %v13353_v42 = vmul.u32.u64.high %v3730_v40, %v3729_v32, %v13352_v38  ;;  %v13366_v58 = vld [vmem:[%s11274_s28 + $0xa0] sm:$0xff] }
 0x1a0   : > { %v13355_v13 = vmul.u32.u64.low %v3730_v40, %v3725_v52  ;;  %v13356_v56 = vmul.u32.u64.high %v3730_v40, %v3725_v52, %v13355_v13  ;;  %v3341_v55 = vor.u32 %v3340_v53, %v3339_v22  ;;  %v3344_v18 = vshll.u32 %v3343_v50, 23 }
 0x1a1   : > { %v13361_v46 = vsel %vm13306_vm4, 0, %v3353_v14  ;;  %10784 = vtanh.f32 %v770_v37  ;;  %vm3674_vm5 = vcmp.eq.s32.totalorder %v13276_v63, 0  ;;  %vm3677_vm11 = vcmp.eq.s32.totalorder %v13276_v63, 2 }
 0x1a2   : > { %10786 = vtanh.f32 %v765_v35  ;;  %v17570_v49 = vand.u32 2147483647, %v13366_v58  ;;  %v3345_v27 = vor.u32 4788187, %v3344_v18  ;;  %v3348_v30 = vcvt.s32.f32 %v3341_v55 }
 0x1a3   : > { %v5053_v60 = vsel %vm1486_vm9, nan, %v13292_v44  ;;  %v3737_v51 = vmul.u32 %v3730_v40, %v3721_v33  ;;  %v13373_v6 = vadd.s32 3, %v13361_v46  ;;  %vm3739_vm12 = vc.u32 %v13353_v42, %v13355_v13  ;;  %v13399_v40 = vpop.f32.mrb[20].mxu0 }
 0x1a4   : > { %v3740_v10 = vadd.s32 1, %v13356_v56  ;;  %v3491_v7 = vshll.u32 %v17653_v0, %v17730_v43  ;;  %v13380_v23 = vpop.eup %10780  ;;  %v3346_v17 = vand.u32 2147483647, %v3345_v27  ;;  %v3492_v45 = vshrl.u32 %v17654_v28, %v13102_v31  ;;  %v13408_v35 = vpop.f32.mrb[21].mxu0 }
 0x1a5   : > { %v3494_v44 = vshll.u32 %v17654_v28, %v17730_v43  ;;  %v3495_v26 = vshrl.u32 %v17655_v41, %v13102_v31  ;;  %v13388_v20 = vpop.eup %10782  ;;  %v17568_v52 = vxor.u32 2147483648, %v13380_v23  ;;  %v3481_v62 = vand.u32 8388607, %v17570_v49 }
 0x1a6   : > { %v3741_v11 = vsel %vm3739_vm12, %v3740_v10, %v13356_v56  ;;  %v3497_v22 = vshll.u32 %v17655_v41, %v17730_v43  ;;  %v17569_v3 = vxor.u32 2147483648, %v13388_v20  ;;  %v3349_v34 = vmul.f32 %v3348_v30, %v3346_v17 }
 0x1a7   : > { %v3742_v14 = vadd.s32 %v3741_v11, %v3737_v51  ;;  %v3498_v32 = vshrl.u32 %v17665_v4, %v13102_v31  ;;  %v3679_v37 = vsel %vm3677_vm11, %v17568_v52, %v13388_v20  ;;  %v3493_v53 = vor.u32 %v3492_v45, %v3491_v7  ;;  %v17745_v51 = vld [vmem:[#allocation25_spill] sm:$0xff] }
 0x1a8   : > { %v3496_v50 = vor.u32 %v3495_v26, %v3494_v44  ;;  %v3500_v33 = vshll.u32 %v17665_v4, %v17730_v43  ;;  %v3676_v38 = vsel %vm3674_vm5, %v13380_v23, %v17569_v3  ;;  %v3350_v56 = vxor.u32 2147483648, %v3349_v34 }
 0x1a9   : > { %v3743_v55 = vadd.s32 536870912, %v3742_v14  ;;  %v3501_v18 = vshrl.u32 %v17658_v9, %v13102_v31  ;;  %v3680_v27 = vsel %vm3673_vm1, %v3676_v38, %v3679_v37  ;;  %v3503_v30 = vshll.u32 %v17658_v9, %v17730_v43 }
 0x1aa   : > { %v3504_v29 = vshrl.u32 %v17659_v54, %v13102_v31  ;;  %vm3506_vm9 = vcmp.lt.s32.totalorder %v17745_v51, 1  ;;  %v3681_v7 = vsel %vm3670_vm10, nan, %v3680_v27  ;;  %v3351_v17 = vsel %vm3268_vm14, %v3350_v56, %v3349_v34 }
 0x1ab   : > { %v10785_v10 = vpop.eup %10784  ;;  %v3744_v45 = vshrl.u32 %v3743_v55, 30  ;;  %v3502_v44 = vor.u32 %v3501_v18, %v3500_v33  ;;  %4830 = vperm.xlu0 %10550, %v3681_v7   ;;  %v3354_v43 = vsel %vm13306_vm4, %v13091_v8, %v3351_v17  ;;  %v3490_v63 = vshrl.u32 %v17653_v0, %v13102_v31 }
 0x1ac   : > { %v10787_v26 = vpop.eup %10786  ;;  %v3499_v11 = vor.u32 %v3498_v32, %v3497_v22  ;;  %v3505_v37 = vor.u32 %v3504_v29, %v3503_v30  ;;  %10788 = vcosq.f32 %v3354_v43  ;;  %vm3508_vm0 = vcmp.lt.s32.totalorder %v17745_v51, 3 }
 0x1ad   : > { %v3745_v38 = vshll.u32 %v3744_v45, 30  ;;  %vm3509_vm7 = vcmp.lt.s32.totalorder %v17745_v51, 4  ;;  %10208 = vmatprep.mubr.f32.mxu1 %v10787_v26  ;;  %10790 = vsinq.f32 %v3354_v43  ;;  %v3482_v34 = vor.u32 8388608, %v3481_v62 }
 0x1ae   : > { %vm3507_vm14 = vcmp.lt.s32.totalorder %v17745_v51, 2  ;;  %v3514_v2 = vsel %vm3506_vm9, %v3493_v53, %v3496_v50  ;;  %10209 = vmatmul.mubr.f32.gmra.mrb[14].mxu1 %v10785_v10  ;;  %v3768_v31 = vsub.s32 4, %v3744_v45  ;;  %v3511_v22 = vsel %vm3509_vm7, %v3499_v11, 2102212464 }
 0x1af   : > { %v13438_v33 = vsub.s32 %v3742_v14, %v3745_v38  ;;  %v3515_v32 = vsel %vm3509_vm7, %v3502_v44, 920167782  ;;  %8250 = vperm.xlu0 %10550, %v5053_v60   ;;  %v6898_v56 = vand.u32 3, %v13361_v46  ;;  %vm3684_vm2 = vcmp.lt.s32.totalorder %v13253_v48, 0 }
 0x1b0   : > { %v3516_v62 = vsel %vm3508_vm0, %v3499_v11, %v3515_v32  ;;  %v3518_v55 = vsel %vm3506_vm9, %v3496_v50, %v3499_v11  ;;  %v3360_v14 = vand.u32 3, %v13373_v6  ;;  %v3519_v60 = vsel %vm3509_vm7, %v3505_v37, 1326507024 }
 0x1b1   : > { %v3748_v18 = vsub.s32 0, %v13438_v33  ;;  %v3517_v27 = vsel %vm3507_vm14, %v3514_v2, %v3516_v62  ;;  %vm3358_vm4 = vweird.f32 %v13091_v8  ;;  %v3510_v46 = vsel %vm3506_vm9, %v3490_v63, %v3493_v53 }
 0x1b2   : > { %v3512_v30 = vsel %vm3508_vm0, %v3496_v50, %v3511_v22  ;;  %v3520_v29 = vsel %vm3508_vm0, %v3502_v44, %v3519_v60  ;;  %v3522_v6 = vshll.u32 %v3482_v34, 8  ;;  %vm13465_vm8 = vcmp.le.f32.partialorder %v3682_v61, 0.7853982  ;;  %v17748_v34 = vld [vmem:[#allocation36_spill] sm:$0xff] }
 0x1b3   : > { %v9776_v7 = vmin.u32 %v3748_v18, %v13438_v33  ;;  %v3769_v17 = vsel %vm3684_vm2, %v3768_v31, %v3744_v45  ;;  %v3521_v53 = vsel %vm3507_vm14, %v3518_v55, %v3520_v29  ;;  %vm6899_vm15 = vcmp.lt.s32.totalorder %v6898_v56, 2 }
 0x1b4   : > { %v13474_v26 = vmul.u32.u64.low %v3522_v6, %v3521_v53  ;;  %v13475_v50 = vmul.u32.u64.high %v3522_v6, %v3521_v53, %v13474_v26  ;;  %v13477_v43 = vmul.u32.u64.low %v3522_v6, %v3517_v27  ;;  %v13478_v44 = vmul.u32.u64.high %v3522_v6, %v3517_v27, %v13477_v43 }
 0x1b5   : > { %vm6900_vm6 = vcmp.eq.s32.totalorder %v6898_v56, 0  ;;  %v3750_v61 = vclz %v9776_v7  ;;  %v3513_v63 = vsel %vm3507_vm14, %v3510_v46, %v3512_v30  ;;  %vm3361_vm3 = vcmp.lt.s32.totalorder %v3360_v14, 2 }
 0x1b6   : > { %vm3362_vm1 = vcmp.eq.s32.totalorder %v3360_v14, 0  ;;  %vm3365_vm5 = vcmp.eq.s32.totalorder %v3360_v14, 2  ;;  %vm6903_vm11 = vcmp.eq.s32.totalorder %v6898_v56, 2  ;;  %v10789_v45 = vpop.eup %10788  ;;  %v3738_v11 = vadd.s32 %v13355_v13, %v13353_v42  ;;  %v17750_v14 = vld [vmem:[#allocation21_spill] sm:$0xff] }
 0x1b7   : > { %v9777_v37 = vadd.s32 4294967294, %v3750_v61  ;;  %v13487_v38 = vsel %vm13465_vm8, 0, %v3769_v17  ;;  %v13490_v2 = vand.u32 3, %v17748_v34  ;;  %v10791_v31 = vpop.eup %10790  ;;  %v3366_v22 = vxor.u32 2147483648, %v10789_v45  ;;  %v17749_v61 = vld [vmem:[#allocation20_spill] sm:$0xff] }
 0x1b8   : > { %v3529_v51 = vmul.u32 %v3522_v6, %v3513_v63  ;;  %vm3531_vm12 = vc.u32 %v13475_v50, %v13477_v43  ;;  %v3532_v32 = vadd.s32 1, %v13478_v44  ;;  %v3363_v62 = vxor.u32 2147483648, %v10791_v31 }
 0x1b9   : > { %vm9778_vm9 = vcmp.lt.s32.totalorder %v9777_v37, 0  ;;  %v780_v42 = vadd.f32 %v13194_v47, %v13114_v5  ;;  %v775_v13 = vadd.f32 %v13194_v47, %v13118_v24  ;;  %v3367_v55 = vsel %vm3365_vm5, %v3366_v22, %v10791_v31 }
 0x1ba   : > { %v6905_v18 = vsel %vm6903_vm11, %v3366_v22, %v10791_v31  ;;  %v3753_v27 = vsel %vm9778_vm9, 0, %v9777_v37  ;;  %v3533_v60 = vsel %vm3531_vm12, %v3532_v32, %v13478_v44  ;;  %v3364_v46 = vsel %vm3362_vm1, %v10789_v45, %v3363_v62  ;;  %v13519_v31 = vld [vmem:[%s11274_s28 + $0x10] sm:$0xff]  ;;  %v17751_v22 = vld [vmem:[#allocation2_spill] sm:$0xff] }
 0x1bb   : > { %v6902_v30 = vsel %vm6900_vm6, %v10789_v45, %v3363_v62  ;;  %v3754_v29 = vsub.s32 32, %v3753_v27  ;;  %v3755_v6 = vshll.u32 %v13438_v33, %v3753_v27  ;;  %v3368_v7 = vsel %vm3361_vm3, %v3364_v46, %v3367_v55 }
 0x1bc   : > { %v6906_v5 = vsel %vm6899_vm15, %v6902_v30, %v6905_v18  ;;  %v3758_v24 = vsub.s32 4294967266, %v3753_v27  ;;  %v3534_v17 = vadd.s32 %v3533_v60, %v3529_v51  ;;  %v3369_v53 = vsel %vm3358_vm4, nan, %v3368_v7 }
 0x1bd   : > { %v3756_v26 = vshrl.u32 %v3738_v11, %v3754_v29  ;;  %v3775_v44 = vadd.s32 3, %v13487_v38  ;;  %10792 = vtanh.f32 %v780_v42  ;;  %v13511_v63 = vadd.s32 4294967169, %v17749_v61  ;;  %4815 = vperm.xlu1 %10551, %v3369_v53   ;;  %v13553_v53 = vpop.f32.mrb[22].mxu0 }
 0x1be   : > { %v3759_v45 = vadd.s32 127, %v3758_v24  ;;  %v3535_v33 = vadd.s32 536870912, %v3534_v17  ;;  %10794 = vtanh.f32 %v775_v13  ;;  %v13514_v56 = vadd.s32 4294967169, %v17750_v14  ;;  %17757 = vst [vmem:[#allocation40_spill] sm:$0xff] %v13553_v53 }
 0x1bf   : > { %v6907_v37 = vsel %vm3358_vm4, nan, %v6906_v5  ;;  %v3757_v34 = vor.u32 %v3756_v26, %v3755_v6  ;;  %v17567_v11 = vand.u32 2147483647, %v13519_v31  ;;  %v17752_v51 = vand.u32 2139095040, %v17751_v22  ;;  %v17755_v6 = vld [vmem:[#allocation9_spill] sm:$0xff]  ;;  %v17756_v5 = vld [vmem:[#allocation15_spill] sm:$0xff] }
 0x1c0   : > { %v3760_v62 = vshll.u32 %v3759_v45, 23  ;;  %v13526_v42 = vshrl.u32 %v3535_v33, 30  ;;  %vm5149_vm0 = vcmp.eq.s32.totalorder %v13490_v2, 0  ;;  %v13530_v13 = vsub.s32 32, %v13238_v16  ;;  %v13561_v33 = vpop.f32.mrb[23].mxu0 }
 0x1c1   : > { %v13524_v32 = vshrl.u32 %v17752_v51, 23  ;;  %v13533_v8 = vshrl.u32 %v13206_v57, 5  ;;  %v13536_v55 = vsub.s32 32, %v13243_v21  ;;  %v13538_v18 = vand.u32 3, %v3775_v44  ;;  %8340 = vperm.xlu1 %10551, %v6907_v37   ;;  %17758 = vst [vmem:[#allocation34_spill] sm:$0xff] %v13561_v33  ;;  %v17760_v33 = vld [vmem:[#allocation14_spill] sm:$0xff] }
 0x1c2   : > { %17753 = vst [vmem:[#allocation35_spill] sm:$0xff] %v13530_v13  ;;  %v3761_v27 = vor.u32 4788187, %v3760_v62  ;;  %v3764_v60 = vcvt.s32.f32 %v3757_v34  ;;  %v3537_v46 = vshll.u32 %v13526_v42, 30  ;;  %vm5152_vm7 = vcmp.eq.s32.totalorder %v13490_v2, 2 }
 0x1c3   : > { %v17754_v30 = vxor.u32 2147483648, %v12619_v36  ;;  %v1609_v57 = vand.u32 8388607, %v17567_v11  ;;  %v1619_v7 = vshll.u32 %v17653_v0, %v17755_v6  ;;  %v1620_v24 = vshrl.u32 %v17654_v28, %v17756_v5 }
 0x1c4   : > { %v3762_v26 = vand.u32 2147483647, %v3761_v27  ;;  %v13555_v44 = vsub.s32 %v3534_v17, %v3537_v46  ;;  %v1622_v61 = vshll.u32 %v17654_v28, %v17755_v6  ;;  %v1623_v45 = vshrl.u32 %v17655_v41, %v17756_v5 }
 0x1c5   : > { %v13545_v29 = vsel %vm5149_vm0, %v12611_v19, %v17754_v30  ;;  %v1625_v14 = vshll.u32 %v17655_v41, %v17755_v6  ;;  %v1626_v37 = vshrl.u32 %v17665_v4, %v17756_v5  ;;  %v1628_v34 = vshll.u32 %v17665_v4, %v17755_v6 }
 0x1c6   : > { %v1629_v17 = vshrl.u32 %v17658_v9, %v17756_v5  ;;  %v3765_v22 = vmul.f32 %v3764_v60, %v3762_v26  ;;  %v3540_v51 = vsub.s32 0, %v13555_v44  ;;  %v17759_v62 = vxor.u32 2147483648, %v12611_v19 }
 0x1c7   : > { %v1631_v46 = vshll.u32 %v17658_v9, %v17755_v6  ;;  %v10793_v30 = vpop.eup %10792  ;;  %v3530_v11 = vadd.s32 %v13477_v43, %v13475_v50  ;;  %v3560_v52 = vsub.s32 4, %v13526_v42  ;;  %v1618_v60 = vshrl.u32 %v17653_v0, %v17756_v5 }
 0x1c8   : > { %v13577_v27 = vsel %vm5152_vm7, %v17759_v62, %v12619_v36  ;;  %v1632_v26 = vshrl.u32 %v17659_v54, %v17756_v5  ;;  %v10795_v19 = vpop.eup %10794  ;;  %v3766_v3 = vxor.u32 2147483648, %v3765_v22  ;;  %v9768_v36 = vmin.u32 %v3540_v51, %v13555_v44 }
 0x1c9   : > { %v1621_v62 = vor.u32 %v1620_v24, %v1619_v7  ;;  %v1624_v49 = vor.u32 %v1623_v45, %v1622_v61  ;;  %vm3476_vm14 = vcmp.lt.s32.totalorder %v13366_v58, 0  ;;  %vm5148_vm4 = vcmp.lt.s32.totalorder %v13490_v2, 2  ;;  %10211 = vmatprep.mubr.f32.mxu1 %v10795_v19 }
 0x1ca   : > { %v1610_v6 = vor.u32 8388608, %v1609_v57  ;;  %v1627_v50 = vor.u32 %v1626_v37, %v1625_v14  ;;  %v1630_v43 = vor.u32 %v1629_v17, %v1628_v34  ;;  %vm1634_vm15 = vcmp.lt.s32.totalorder %v17760_v33, 1  ;;  %10212 = vmatmul.mubr.f32.gmra.mrb[16].mxu1 %v10793_v30 }
 0x1cb   : > { %v3767_v53 = vsel %vm3684_vm2, %v3766_v3, %v3765_v22  ;;  %v3542_v5 = vclz %v9768_v36  ;;  %v1633_v13 = vor.u32 %v1632_v26, %v1631_v46  ;;  %vm1635_vm6 = vcmp.lt.s32.totalorder %v17760_v33, 2 }
 0x1cc   : > { %v3770_v7 = vsel %vm13465_vm8, %v13253_v48, %v3767_v53  ;;  %vm1636_vm3 = vcmp.lt.s32.totalorder %v17760_v33, 3  ;;  %vm1637_vm1 = vcmp.lt.s32.totalorder %v17760_v33, 4  ;;  %v1638_v57 = vsel %vm1634_vm15, %v1618_v60, %v1621_v62 }
 0x1cd   : > { %10796 = vcosq.f32 %v3770_v7  ;;  %v17761_v24 = vand.u32 2147483647, %v13366_v58  ;;  %v9769_v61 = vadd.s32 4294967294, %v3542_v5  ;;  %v1639_v45 = vsel %vm1637_vm1, %v1627_v50, 2102212464 }
 0x1ce   : > { %v1642_v10 = vsel %vm1634_vm15, %v1621_v62, %v1624_v49  ;;  %10798 = vsinq.f32 %v3770_v7  ;;  %v1640_v53 = vsel %vm1636_vm3, %v1624_v49, %v1639_v45  ;;  %v1643_v14 = vsel %vm1637_vm1, %v1630_v43, 920167782 }
 0x1cf   : > { %vm13604_vm2 = vcmp.le.f32.partialorder %v17761_v24, 0.7853982  ;;  %v1646_v37 = vsel %vm1634_vm15, %v1624_v49, %v1627_v50  ;;  %vm9770_vm8 = vcmp.lt.s32.totalorder %v9769_v61, 0  ;;  %v1641_v34 = vsel %vm1635_vm6, %v1638_v57, %v1640_v53 }
 0x1d0   : > { %v1644_v17 = vsel %vm1636_vm3, %v1627_v50, %v1643_v14  ;;  %v1647_v22 = vsel %vm1637_vm1, %v1633_v13, 1326507024  ;;  %v3545_v51 = vsel %vm9770_vm8, 0, %v9769_v61  ;;  %v1650_v60 = vshll.u32 %v1610_v6, 8 }
 0x1d1   : > { %v1645_v46 = vsel %vm1635_vm6, %v1642_v10, %v1644_v17  ;;  %v1648_v30 = vsel %vm1636_vm3, %v1630_v43, %v1647_v22  ;;  %vm3777_vm5 = vcmp.lt.s32.totalorder %v13538_v18, 2  ;;  %v3546_v26 = vsub.s32 32, %v3545_v51 }
 0x1d2   : > { %v3547_v49 = vshll.u32 %v13555_v44, %v3545_v51  ;;  %v3550_v19 = vsub.s32 4294967266, %v3545_v51  ;;  %v1649_v36 = vsel %vm1635_vm6, %v1646_v37, %v1648_v30  ;;  %vm3774_vm11 = vweird.f32 %v13253_v48 }
 0x1d3   : > { %v13627_v13 = vmul.u32.u64.low %v1650_v60, %v1649_v36  ;;  %v13628_v62 = vmul.u32.u64.high %v1650_v60, %v1649_v36, %v13627_v13  ;;  %v13630_v50 = vmul.u32.u64.low %v1650_v60, %v1645_v46  ;;  %v13631_v5 = vmul.u32.u64.high %v1650_v60, %v1645_v46, %v13630_v50  ;;  %v13679_v36 = vpop.f32.mrb[24].mxu0 }
 0x1d4   : > { %vm3778_vm12 = vcmp.eq.s32.totalorder %v13538_v18, 0  ;;  %v3548_v6 = vshrl.u32 %v3530_v11, %v3546_v26  ;;  %v3551_v43 = vadd.s32 127, %v3550_v19  ;;  %v3561_v44 = vsel %vm3476_vm14, %v3560_v52, %v13526_v42 }
 0x1d5   : > { %vm3781_vm9 = vcmp.eq.s32.totalorder %v13538_v18, 2  ;;  %v790_v33 = vadd.f32 %v13194_v47, %v13247_v15  ;;  %v785_v7 = vadd.f32 %v13194_v47, %v13256_v25  ;;  %v7207_v57 = vand.u32 3, %v13231_v39 }
 0x1d6   : > { %v3549_v24 = vor.u32 %v3548_v6, %v3547_v49  ;;  %v3552_v61 = vshll.u32 %v3551_v43, 23  ;;  %v5155_v11 = vsel %vm5148_vm4, %v13545_v29, %v13577_v27  ;;  %v1657_v45 = vmul.u32 %v1650_v60, %v1641_v34  ;;  %v13693_v6 = vpop.f32.mrb[25].mxu0 }
 0x1d7   : > { %v3563_v52 = vsel %vm13604_vm2, 0, %v3561_v44  ;;  %vm1659_vm0 = vc.u32 %v13628_v62, %v13630_v50  ;;  %v1660_v15 = vadd.s32 1, %v13631_v5  ;;  %10800 = vtanh.f32 %v790_v33  ;;  %v13653_v25 = vpop.eup %10796 }
 0x1d8   : > { %v3553_v39 = vor.u32 4788187, %v3552_v61  ;;  %v3556_v42 = vcvt.s32.f32 %v3549_v24  ;;  %10802 = vtanh.f32 %v785_v7  ;;  %vm7208_vm7 = vcmp.lt.s32.totalorder %v7207_v57, 2  ;;  %v13655_v10 = vpop.eup %10798 }
 0x1d9   : > { %v3782_v2 = vxor.u32 2147483648, %v13653_v25  ;;  %v1661_v29 = vsel %vm1659_vm0, %v1660_v15, %v13631_v5  ;;  %vm7209_vm4 = vcmp.eq.s32.totalorder %v7207_v57, 0  ;;  %vm7212_vm15 = vcmp.eq.s32.totalorder %v7207_v57, 2 }
 0x1da   : > { %v3779_v27 = vxor.u32 2147483648, %v13655_v10  ;;  %v3554_v53 = vand.u32 2147483647, %v3553_v39  ;;  %v1662_v14 = vadd.s32 %v1661_v29, %v1657_v45  ;;  %v17764_v37 = vxor.u32 2147483648, %v13388_v20 }
 0x1db   : > { %v3783_v17 = vsel %vm3781_vm9, %v3782_v2, %v13655_v10  ;;  %v3567_v22 = vadd.s32 3, %v3563_v52  ;;  %v5156_v51 = vsel %vm1590_vm13, nan, %v5155_v11  ;;  %v17765_v46 = vxor.u32 2147483648, %v13380_v23 }
 0x1dc   : > { %v7211_v34 = vsel %vm7209_vm4, %v13380_v23, %v17764_v37  ;;  %v3780_v60 = vsel %vm3778_vm12, %v13653_v25, %v3779_v27  ;;  %v3557_v26 = vmul.f32 %v3556_v42, %v3554_v53  ;;  %v1663_v49 = vadd.s32 536870912, %v1662_v14 }
 0x1dd   : > { %v7214_v30 = vsel %vm7212_vm15, %v17765_v46, %v13388_v20  ;;  %v3784_v12 = vsel %vm3777_vm5, %v3780_v60, %v3783_v17  ;;  %v13683_v13 = vand.u32 3, %v3563_v52  ;;  %v13690_v20 = vld [vmem:[%s11274_s28 + $0xb8] sm:$0xff]  ;;  %v3803_v18 = vshll.u32 %v17653_v0, %v13243_v21 }
 0x1de   : > { %v7215_v19 = vsel %vm7208_vm7, %v7211_v34, %v7214_v30  ;;  %v3786_v5 = vand.u32 2147483647, %v13690_v20  ;;  %v3785_v43 = vsel %vm3774_vm11, nan, %v3784_v12  ;;  %v3558_v44 = vxor.u32 2147483648, %v3557_v26 }
 0x1df   : > { %v13687_v23 = vsel %vm3670_vm10, nan, %v7215_v19  ;;  %v1664_v33 = vshrl.u32 %v1663_v49, 30  ;;  %4835 = vperm.xlu0 %10550, %v3785_v43   ;;  %v13699_v7 = vand.u32 3, %v3567_v22  ;;  %vm1604_vm13 = vcmp.lt.s32.totalorder %v13519_v31, 0 }
 0x1e0   : > { %v3804_v1 = vshrl.u32 %v17654_v28, %v13536_v55  ;;  %v3806_v57 = vshll.u32 %v17654_v28, %v13243_v21  ;;  %v3807_v24 = vshrl.u32 %v17655_v41, %v13536_v55  ;;  %v3559_v61 = vsel %vm3476_vm14, %v3558_v44, %v3557_v26 }
 0x1e1   : > { %v1665_v11 = vshll.u32 %v1664_v33, 30  ;;  %v3809_v45 = vshll.u32 %v17655_v41, %v13243_v21  ;;  %v3810_v52 = vshrl.u32 %v17665_v4, %v13536_v55  ;;  %v10801_v15 = vpop.eup %10800  ;;  %v3562_v39 = vsel %vm13604_vm2, %v13366_v58, %v3559_v61 }
 0x1e2   : > { %v3793_v42 = vand.u32 8388607, %v3786_v5  ;;  %v3802_v29 = vshrl.u32 %v17653_v0, %v13536_v55  ;;  %v3812_v53 = vshll.u32 %v17665_v4, %v13243_v21  ;;  %v10803_v37 = vpop.eup %10802  ;;  %10804 = vcosq.f32 %v3562_v39 }
 0x1e3   : > { %v13723_v34 = vsub.s32 %v1662_v14, %v1665_v11  ;;  %v1688_v17 = vsub.s32 4, %v1664_v33  ;;  %v3805_v22 = vor.u32 %v3804_v1, %v3803_v18  ;;  %10806 = vsinq.f32 %v3562_v39  ;;  %8255 = vperm.xlu0 %10550, %v5156_v51   ;;  %10214 = vmatprep.mubr.f32.mxu1 %v10803_v37 }
 0x1e4   : > { %v17766_v3 = vand.u32 2147483647, %v13519_v31  ;;  %v3808_v30 = vor.u32 %v3807_v24, %v3806_v57  ;;  %v3813_v60 = vshrl.u32 %v17658_v9, %v13536_v55  ;;  %v3815_v26 = vshll.u32 %v17658_v9, %v13243_v21  ;;  %10215 = vmatmul.mubr.f32.gmra.mrb[18].mxu1 %v10801_v15 }
 0x1e5   : > { %vm7109_vm14 = vcmp.eq.s32.totalorder %v13683_v13, 2  ;;  %v1668_v14 = vsub.s32 0, %v13723_v34  ;;  %v3811_v49 = vor.u32 %v3810_v52, %v3809_v45  ;;  %v3816_v51 = vshrl.u32 %v17659_v54, %v13536_v55 }
 0x1e6   : > { %vm13727_vm10 = vcmp.le.f32.partialorder %v17766_v3, 0.7853982  ;;  %vm3818_vm6 = vcmp.lt.s32.totalorder %v13533_v8, 1  ;;  %vm3570_vm3 = vcmp.eq.s32.totalorder %v13699_v7, 0  ;;  %vm7106_vm1 = vcmp.eq.s32.totalorder %v13683_v13, 0 }
 0x1e7   : > { %v3794_v19 = vor.u32 8388608, %v3793_v42  ;;  %v3814_v12 = vor.u32 %v3813_v60, %v3812_v53  ;;  %vm3821_vm2 = vcmp.lt.s32.totalorder %v13533_v8, 4  ;;  %vm3569_vm8 = vcmp.lt.s32.totalorder %v13699_v7, 2 }
 0x1e8   : > { %vm7105_vm5 = vcmp.lt.s32.totalorder %v13683_v13, 2  ;;  %v9696_v21 = vmin.u32 %v1668_v14, %v13723_v34  ;;  %v3817_v43 = vor.u32 %v3816_v51, %v3815_v26  ;;  %vm3819_vm12 = vcmp.lt.s32.totalorder %v13533_v8, 2 }
 0x1e9   : > { %vm3820_vm9 = vcmp.lt.s32.totalorder %v13533_v8, 3  ;;  %vm3566_vm0 = vweird.f32 %v13366_v58  ;;  %v3822_v55 = vsel %vm3818_vm6, %v3802_v29, %v3805_v22  ;;  %v3823_v44 = vsel %vm3821_vm2, %v3811_v49, 2102212464 }
 0x1ea   : > { %v3826_v18 = vsel %vm3818_vm6, %v3805_v22, %v3808_v30  ;;  %v3827_v1 = vsel %vm3821_vm2, %v3814_v12, 920167782  ;;  %vm3573_vm7 = vcmp.eq.s32.totalorder %v13699_v7, 2  ;;  %v1670_v57 = vclz %v9696_v21 }
 0x1eb   : > { %v1689_v24 = vsel %vm1604_vm13, %v1688_v17, %v1664_v33  ;;  %v3830_v61 = vsel %vm3818_vm6, %v3808_v30, %v3811_v49  ;;  %v3824_v11 = vsel %vm3820_vm9, %v3808_v30, %v3823_v44  ;;  %v3828_v45 = vsel %vm3820_vm9, %v3811_v49, %v3827_v1 }
 0x1ec   : > { %v3831_v52 = vsel %vm3821_vm2, %v3817_v43, 1326507024  ;;  %v3834_v15 = vshll.u32 %v3794_v19, 8  ;;  %v9697_v39 = vadd.s32 4294967294, %v1670_v57  ;;  %v3825_v42 = vsel %vm3819_vm12, %v3822_v55, %v3824_v11  ;;  %v10805_v3 = vpop.eup %10804 }
 0x1ed   : > { %v3829_v33 = vsel %vm3819_vm12, %v3826_v18, %v3828_v45  ;;  %v3832_v29 = vsel %vm3820_vm9, %v3814_v12, %v3831_v52  ;;  %v1658_v53 = vadd.s32 %v13630_v50, %v13628_v62  ;;  %v13784_v30 = vsel %vm13727_vm10, 0, %v1689_v24  ;;  %v10807_v14 = vpop.eup %10806  ;;  %v13804_v24 = vld [vmem:[%s11274_s28 + $0xc8] sm:$0xff] }
 0x1ee   : > { %v3833_v37 = vsel %vm3819_vm12, %v3830_v61, %v3832_v29  ;;  %v13778_v17 = vmul.u32.u64.low %v3834_v15, %v3829_v33  ;;  %v13779_v22 = vmul.u32.u64.high %v3834_v15, %v3829_v33, %v13778_v17  ;;  %vm9698_vm4 = vcmp.lt.s32.totalorder %v9697_v39, 0 }
 0x1ef   : > { %v13786_v60 = vmul.u32.u64.low %v3834_v15, %v3833_v37  ;;  %v13787_v26 = vmul.u32.u64.high %v3834_v15, %v3833_v37, %v13786_v60  ;;  %v3574_v49 = vxor.u32 2147483648, %v10805_v3  ;;  %v1673_v62 = vsel %vm9698_vm4, 0, %v9697_v39 }
 0x1f0   : > { %v3841_v50 = vmul.u32 %v3834_v15, %v3825_v42  ;;  %v800_v8 = vadd.f32 %v13194_v47, %v13399_v40  ;;  %v3571_v51 = vxor.u32 2147483648, %v10807_v14  ;;  %v1674_v19 = vsub.s32 32, %v1673_v62 }
 0x1f1   : > { %v1675_v12 = vshll.u32 %v13723_v34, %v1673_v62  ;;  %v1678_v21 = vsub.s32 4294967266, %v1673_v62  ;;  %v3575_v43 = vsel %vm3573_vm7, %v3574_v49, %v10807_v14  ;;  %v7111_v55 = vsel %vm7109_vm14, %v3574_v49, %v10807_v14  ;;  %v17769_v14 = vld [vmem:[#allocation19_spill] sm:$0xff] }
 0x1f2   : > { %v3844_v44 = vadd.s32 1, %v13779_v22  ;;  %v795_v18 = vadd.f32 %v13194_v47, %v13408_v35  ;;  %v3572_v1 = vsel %vm3570_vm3, %v10805_v3, %v3571_v51  ;;  %v7108_v40 = vsel %vm7106_vm1, %v10805_v3, %v3571_v51 }
 0x1f3   : > { %v1676_v57 = vshrl.u32 %v1658_v53, %v1674_v19  ;;  %v1679_v34 = vadd.s32 127, %v1678_v21  ;;  %v3997_v61 = vand.u32 2139095040, %v13804_v24  ;;  %v3576_v11 = vsel %vm3569_vm8, %v3572_v1, %v3575_v43  ;;  %v13821_v53 = vld [vmem:[%s11274_s28 + $0xc0] sm:$0xff]  ;;  %v17770_v43 = vld [vmem:[#allocation35_spill] sm:$0xff] }
 0x1f4   : > { %v7112_v45 = vsel %vm7105_vm5, %v7108_v40, %v7111_v55  ;;  %vm3843_vm15 = vc.u32 %v13787_v26, %v13778_v17  ;;  %v3577_v47 = vsel %vm3566_vm0, nan, %v3576_v11  ;;  %10808 = vtanh.f32 %v800_v8 }
 0x1f5   : > { %v1677_v35 = vor.u32 %v1676_v57, %v1675_v12  ;;  %v1680_v52 = vshll.u32 %v1679_v34, 23  ;;  %4825 = vperm.xlu1 %10551, %v3577_v47   ;;  %v1695_v15 = vadd.s32 3, %v13784_v30  ;;  %v3845_v39 = vsel %vm3843_vm15, %v3844_v44, %v13779_v22 }
 0x1f6   : > { %10810 = vtanh.f32 %v795_v18  ;;  %v7310_v7 = vand.u32 3, %v13487_v38  ;;  %v7113_v13 = vsel %vm3566_vm0, nan, %v7112_v45  ;;  %v3846_v29 = vadd.s32 %v3845_v39, %v3841_v50  ;;  %v13830_v38 = vpop.f32.mrb[26].mxu0 }
 0x1f7   : > { %v1681_v42 = vor.u32 4788187, %v1680_v52  ;;  %v1684_v33 = vcvt.s32.f32 %v1677_v35  ;;  %v3890_v37 = vand.u32 2147483647, %v13821_v53  ;;  %v13833_v49 = vsub.s32 32, %v17769_v14 }
 0x1f8   : > { %vm7311_vm14 = vcmp.lt.s32.totalorder %v7310_v7, 2  ;;  %vm7312_vm6 = vcmp.eq.s32.totalorder %v7310_v7, 0  ;;  %vm7315_vm3 = vcmp.eq.s32.totalorder %v7310_v7, 2  ;;  %v3847_v60 = vadd.s32 536870912, %v3846_v29 }
 0x1f9   : > { %v1682_v3 = vand.u32 2147483647, %v1681_v42  ;;  %v7314_v22 = vsel %vm7312_vm6, %v13653_v25, %v3779_v27  ;;  %v7317_v58 = vsel %vm7315_vm3, %v3782_v2, %v13655_v10  ;;  %v13836_v62 = vadd.s32 1, %v13511_v63  ;;  %8350 = vperm.xlu1 %10551, %v7113_v13   ;;  %v13844_v27 = vpop.f32.mrb[27].mxu0 }
 0x1fa   : > { %v13839_v50 = vadd.s32 1, %v13514_v56  ;;  %v13842_v8 = vadd.s32 4294967169, %v13524_v32  ;;  %v13847_v25 = vshrl.u32 %v13176_v59, 5  ;;  %v3998_v10 = vshrl.u32 %v3997_v61, 23 }
 0x1fb   : > { %v1685_v2 = vmul.f32 %v1684_v33, %v1682_v3  ;;  %v13849_v51 = vshrl.u32 %v3847_v60, 30  ;;  %v13851_v19 = vand.u32 3, %v1695_v15  ;;  %v7318_v63 = vsel %vm7311_vm14, %v7314_v22, %v7317_v58 }
 0x1fc   : > { %v3897_v56 = vand.u32 8388607, %v3890_v37  ;;  %v3907_v32 = vshll.u32 %v17653_v0, %v13238_v16  ;;  %v3908_v59 = vshrl.u32 %v17654_v28, %v17770_v43  ;;  %v3910_v55 = vshll.u32 %v17654_v28, %v13238_v16 }
 0x1fd   : > { %v1686_v12 = vxor.u32 2147483648, %v1685_v2  ;;  %v3849_v21 = vshll.u32 %v13849_v51, 30  ;;  %8355 = vperm.xlu1 %10551, %v13687_v23   ;;  %v3911_v44 = vshrl.u32 %v17655_v41, %v17770_v43  ;;  %v3913_v18 = vshll.u32 %v17655_v41, %v13238_v16 }
 0x1fe   : > { %v3914_v1 = vshrl.u32 %v17665_v4, %v17770_v43  ;;  %v3916_v40 = vshll.u32 %v17665_v4, %v13238_v16  ;;  %v10809_v57 = vpop.eup %10808  ;;  %v7319_v23 = vsel %vm3774_vm11, nan, %v7318_v63  ;;  %v3917_v11 = vshrl.u32 %v17658_v9, %v17770_v43 }
 0x1ff   : > { %v1687_v34 = vsel %vm1604_vm13, %v1686_v12, %v1685_v2  ;;  %v13874_v61 = vsub.s32 %v3846_v29, %v3849_v21  ;;  %v13880_v47 = vadd.s32 4294967169, %v3998_v10  ;;  %vm3788_vm1 = vcmp.lt.s32.totalorder %v13690_v20, 0 }
 0x200   : > { %v10811_v45 = vpop.eup %10810  ;;  %v1690_v35 = vsel %vm13727_vm10, %v13519_v31, %v1687_v34  ;;  %v3919_v52 = vshll.u32 %v17658_v9, %v13238_v16  ;;  %v3909_v48 = vor.u32 %v3908_v59, %v3907_v32  ;;  %v3918_v39 = vor.u32 %v3917_v11, %v3916_v40 }
 0x201   : > { %10812 = vcosq.f32 %v1690_v35  ;;  %v3852_v15 = vsub.s32 0, %v13874_v61  ;;  %10217 = vmatprep.mubr.f32.mxu1 %v10811_v45  ;;  %8360 = vperm.xlu1 %10551, %v7319_v23   ;;  %v3912_v7 = vor.u32 %v3911_v44, %v3910_v55  ;;  %v3915_v13 = vor.u32 %v3914_v1, %v3913_v18  ;;  %v13921_v18 = vld [vmem:[%s17480_s4] ss:$0 sm:$0xff]  ;;  %v17773_v1 = vld [vmem:[#allocation40_spill] sm:$0xff] }
 0x202   : > { %10814 = vsinq.f32 %v1690_v35  ;;  %v3920_v42 = vshrl.u32 %v17659_v54, %v17770_v43  ;;  %10218 = vmatmul.mubr.f32.gmra.mrb[20].mxu1 %v10809_v57  ;;  %vm1701_vm11 = vcmp.eq.s32.totalorder %v13851_v19, 2  ;;  %v3898_v33 = vor.u32 8388608, %v3897_v56 }
 0x203   : > { %v9780_v46 = vmin.u32 %v3852_v15, %v13874_v61  ;;  %v3906_v16 = vshrl.u32 %v17653_v0, %v17770_v43  ;;  %vm3922_vm13 = vcmp.lt.s32.totalorder %v13847_v25, 1  ;;  %vm1698_vm10 = vcmp.eq.s32.totalorder %v13851_v19, 0 }
 0x204   : > { %v3872_v29 = vsub.s32 4, %v13849_v51  ;;  %v3921_v3 = vor.u32 %v3920_v42, %v3919_v52  ;;  %vm3924_vm2 = vcmp.lt.s32.totalorder %v13847_v25, 3  ;;  %vm3925_vm8 = vcmp.lt.s32.totalorder %v13847_v25, 4 }
 0x205   : > { %vm1925_vm5 = vcmp.gt.s32.totalorder %v13836_v62, 0  ;;  %vm13903_vm12 = vcmp.le.f32.partialorder %v3786_v5, 0.7853982  ;;  %v3854_v22 = vclz %v9780_v46  ;;  %vm3923_vm9 = vcmp.lt.s32.totalorder %v13847_v25, 2 }
 0x206   : > { %v3927_v58 = vsel %vm3925_vm8, %v3915_v13, 2102212464  ;;  %v3931_v10 = vsel %vm3925_vm8, %v3918_v39, 920167782  ;;  %v3930_v2 = vsel %vm3922_vm13, %v3909_v48, %v3912_v7  ;;  %v3934_v56 = vsel %vm3922_vm13, %v3912_v7, %v3915_v13 }
 0x207   : > { %v3932_v63 = vsel %vm3924_vm2, %v3915_v13, %v3931_v10  ;;  %v3935_v32 = vsel %vm3925_vm8, %v3921_v3, 1326507024  ;;  %v9781_v12 = vadd.s32 4294967294, %v3854_v22  ;;  %v3926_v5 = vsel %vm3922_vm13, %v3906_v16, %v3909_v48 }
 0x208   : > { %v3928_v21 = vsel %vm3924_vm2, %v3912_v7, %v3927_v58  ;;  %v3936_v43 = vsel %vm3924_vm2, %v3918_v39, %v3935_v32  ;;  %v3842_v59 = vadd.s32 %v13778_v17, %v13787_v26  ;;  %v3938_v44 = vshll.u32 %v3898_v33, 8  ;;  %v17774_v26 = vld [vmem:[#allocation34_spill] sm:$0xff] }
 0x209   : > { %v3937_v55 = vsel %vm3923_vm9, %v3934_v56, %v3936_v43  ;;  %v810_v40 = vadd.f32 %v13921_v18, %v17773_v1  ;;  %vm9782_vm0 = vcmp.lt.s32.totalorder %v9781_v12, 0  ;;  %v3873_v57 = vsel %vm3788_vm1, %v3872_v29, %v13849_v51  ;;  %v13971_v56 = vld [vmem:[%s11274_s28 + $0x18] sm:$0xff] }
 0x20a   : > { %v3933_v17 = vsel %vm3923_vm9, %v3930_v2, %v3932_v63  ;;  %v805_v34 = vadd.f32 %v13921_v18, %v17774_v26  ;;  %v3857_v23 = vsel %vm9782_vm0, 0, %v9781_v12  ;;  %v3929_v11 = vsel %vm3923_vm9, %v3926_v5, %v3928_v21 }
 0x20b   : > { %v13934_v45 = vmul.u32.u64.low %v3938_v44, %v3937_v55  ;;  %v13935_v35 = vmul.u32.u64.high %v3938_v44, %v3937_v55, %v13934_v45  ;;  %v13937_v52 = vpop.eup %10812  ;;  %v3858_v15 = vsub.s32 32, %v3857_v23  ;;  %v3859_v48 = vshll.u32 %v13874_v61, %v3857_v23 }
 0x20c   : > { %v3862_v39 = vsub.s32 4294967266, %v3857_v23  ;;  %10816 = vtanh.f32 %v810_v40  ;;  %v13940_v51 = vpop.eup %10814  ;;  %v1702_v7 = vxor.u32 2147483648, %v13937_v52  ;;  %vm1697_vm7 = vcmp.lt.s32.totalorder %v13851_v19, 2 }
 0x20d   : > { %v13943_v13 = vmul.u32.u64.low %v3938_v44, %v3933_v17  ;;  %v13944_v42 = vmul.u32.u64.high %v3938_v44, %v3933_v17, %v13943_v13  ;;  %10818 = vtanh.f32 %v805_v34  ;;  %v1699_v25 = vxor.u32 2147483648, %v13940_v51 }
 0x20e   : > { %v3860_v46 = vshrl.u32 %v3842_v59, %v3858_v15  ;;  %v3863_v33 = vadd.s32 127, %v3862_v39  ;;  %vm1694_vm4 = vweird.f32 %v13519_v31  ;;  %v1703_v61 = vsel %vm1701_vm11, %v1702_v7, %v13940_v51 }
 0x20f   : > { %v3875_v16 = vsel %vm13903_vm12, 0, %v3873_v57  ;;  %v3945_v29 = vmul.u32 %v3938_v44, %v3929_v11  ;;  %v1700_v3 = vsel %vm1698_vm10, %v13937_v52, %v1699_v25  ;;  %vm3947_vm15 = vc.u32 %v13935_v35, %v13943_v13  ;;  %v13988_v44 = vpop.f32.mrb[28].mxu0 }
 0x210   : > { %v3861_v22 = vor.u32 %v3860_v46, %v3859_v48  ;;  %v3864_v58 = vshll.u32 %v3863_v33, 23  ;;  %v13967_v10 = vsel %vm1925_vm5, %v13836_v62, 0  ;;  %v1704_v2 = vsel %vm1697_vm7, %v1700_v3, %v1703_v61 }
 0x211   : > { %v3948_v63 = vadd.s32 1, %v13944_v42  ;;  %v1706_v32 = vand.u32 2147483647, %v13971_v56  ;;  %v13975_v19 = vshrl.u32 %v13967_v10, 5  ;;  %v1705_v12 = vsel %vm1694_vm4, nan, %v1704_v2 }
 0x212   : > { %v3865_v5 = vor.u32 4788187, %v3864_v58  ;;  %v3868_v21 = vcvt.s32.f32 %v3861_v22  ;;  %v13980_v43 = vadd.s32 1, %v13842_v8  ;;  %v13983_v62 = vadd.s32 1, %v13880_v47  ;;  %4735 = vperm.xlu0 %10550, %v1705_v12   ;;  %v13994_v8 = vpop.f32.mrb[29].mxu0 }
 0x213   : > { %v13985_v59 = vand.u32 3, %v3875_v16  ;;  %v3949_v55 = vsel %vm3947_vm15, %v3948_v63, %v13944_v42  ;;  %v1723_v57 = vshll.u32 %v17653_v0, %v17769_v14  ;;  %v1724_v17 = vshrl.u32 %v17654_v28, %v13833_v49 }
 0x214   : > { %v3866_v1 = vand.u32 2147483647, %v3865_v5  ;;  %v3950_v40 = vadd.s32 %v3949_v55, %v3945_v29  ;;  %v3879_v26 = vadd.s32 3, %v3875_v16  ;;  %v1713_v47 = vand.u32 8388607, %v1706_v32  ;;  %v17775_v5 = vld [vmem:[#allocation18_spill] sm:$0xff] }
 0x215   : > { %v1726_v34 = vshll.u32 %v17654_v28, %v17769_v14  ;;  %v1727_v23 = vshrl.u32 %v17655_v41, %v13833_v49  ;;  %v1729_v48 = vshll.u32 %v17655_v41, %v17769_v14  ;;  %v1730_v39 = vshrl.u32 %v17665_v4, %v13833_v49 }
 0x216   : > { %v10817_v11 = vpop.eup %10816  ;;  %v3869_v45 = vmul.f32 %v3868_v21, %v3866_v1  ;;  %v3951_v15 = vadd.s32 536870912, %v3950_v40  ;;  %v1725_v46 = vor.u32 %v1724_v17, %v1723_v57  ;;  %v1732_v33 = vshll.u32 %v17665_v4, %v17769_v14 }
 0x217   : > { %v10819_v42 = vpop.eup %10818  ;;  %v1733_v61 = vshrl.u32 %v17658_v9, %v13833_v49  ;;  %v1735_v16 = vshll.u32 %v17658_v9, %v17769_v14  ;;  %v1728_v22 = vor.u32 %v1727_v23, %v1726_v34  ;;  %v1736_v58 = vshrl.u32 %v17659_v54, %v13833_v49 }
 0x218   : > { %v3870_v29 = vxor.u32 2147483648, %v3869_v45  ;;  %v3952_v3 = vshrl.u32 %v3951_v15, 30  ;;  %10220 = vmatprep.mubr.f32.mxu1 %v10819_v42  ;;  %v1714_v2 = vor.u32 8388608, %v1713_v47  ;;  %v1722_v63 = vshrl.u32 %v17653_v0, %v13833_v49 }
 0x219   : > { %v1734_v12 = vor.u32 %v1733_v61, %v1732_v33  ;;  %vm1738_vm14 = vcmp.lt.s32.totalorder %v17775_v5, 1  ;;  %10221 = vmatmul.mubr.f32.gmra.mrb[22].mxu1 %v10817_v11  ;;  %v1731_v14 = vor.u32 %v1730_v39, %v1729_v48  ;;  %vm1739_vm6 = vcmp.lt.s32.totalorder %v17775_v5, 2 }
 0x21a   : > { %v3871_v21 = vsel %vm3788_vm1, %v3870_v29, %v3869_v45  ;;  %v3953_v55 = vshll.u32 %v3952_v3, 30  ;;  %v1737_v57 = vor.u32 %v1736_v58, %v1735_v16  ;;  %vm1740_vm3 = vcmp.lt.s32.totalorder %v17775_v5, 3 }
 0x21b   : > { %v3874_v1 = vsel %vm13903_vm12, %v13690_v20, %v3871_v21  ;;  %vm1741_vm11 = vcmp.lt.s32.totalorder %v17775_v5, 4  ;;  %v1746_v47 = vsel %vm1738_vm14, %v1725_v46, %v1728_v22  ;;  %vm3892_vm1 = vcmp.lt.s32.totalorder %v13821_v53, 0 }
 0x21c   : > { %10820 = vcosq.f32 %v3874_v1  ;;  %v14025_v49 = vsub.s32 %v3950_v40, %v3953_v55  ;;  %v1743_v17 = vsel %vm1741_vm11, %v1731_v14, 2102212464  ;;  %v14030_v34 = vand.u32 3, %v3879_v26 }
 0x21d   : > { %10822 = vsinq.f32 %v3874_v1  ;;  %v1747_v23 = vsel %vm1741_vm11, %v1734_v12, 920167782  ;;  %v1742_v11 = vsel %vm1738_vm14, %v1722_v63, %v1725_v46  ;;  %v1744_v45 = vsel %vm1740_vm3, %v1728_v22, %v1743_v17 }
 0x21e   : > { %v3956_v60 = vsub.s32 0, %v14025_v49  ;;  %v1748_v40 = vsel %vm1740_vm3, %v1731_v14, %v1747_v23  ;;  %v1750_v48 = vsel %vm1738_vm14, %v1728_v22, %v1731_v14  ;;  %v1751_v26 = vsel %vm1741_vm11, %v1737_v57, 1326507024 }
 0x21f   : > { %v1749_v15 = vsel %vm1739_vm6, %v1746_v47, %v1748_v40  ;;  %v1754_v39 = vshll.u32 %v1714_v2, 8  ;;  %vm7414_vm13 = vcmp.lt.s32.totalorder %v13985_v59, 2  ;;  %vm7415_vm10 = vcmp.eq.s32.totalorder %v13985_v59, 0 }
 0x220   : > { %vm7418_vm2 = vcmp.eq.s32.totalorder %v13985_v59, 2  ;;  %v9784_v42 = vmin.u32 %v3956_v60, %v14025_v49  ;;  %v1752_v46 = vsel %vm1740_vm3, %v1734_v12, %v1751_v26  ;;  %vm3878_vm8 = vweird.f32 %v13690_v20 }
 0x221   : > { %v3976_v33 = vsub.s32 4, %v3952_v3  ;;  %v1753_v61 = vsel %vm1739_vm6, %v1750_v48, %v1752_v46  ;;  %v14052_v16 = vmul.u32.u64.low %v1754_v39, %v1749_v15  ;;  %v14053_v29 = vmul.u32.u64.high %v1754_v39, %v1749_v15, %v14052_v16 }
 0x222   : > { %vm4005_vm5 = vcmp.gt.s32.totalorder %v13983_v62, 0  ;;  %v3946_v22 = vadd.s32 %v13943_v13, %v13935_v35  ;;  %v3958_v58 = vclz %v9784_v42  ;;  %vm3881_vm12 = vcmp.lt.s32.totalorder %v14030_v34, 2 }
 0x223   : > { %v1745_v2 = vsel %vm1739_vm6, %v1742_v11, %v1744_v45  ;;  %v14062_v63 = vmul.u32.u64.low %v1754_v39, %v1753_v61  ;;  %v14063_v12 = vmul.u32.u64.high %v1754_v39, %v1753_v61, %v14062_v63  ;;  %v820_v21 = vadd.f32 %v13921_v18, %v13679_v36  ;;  %v14076_v36 = vld [vmem:[%s11274_s28 + $0x20] sm:$0xff] }
 0x224   : > { %v815_v55 = vadd.f32 %v13921_v18, %v13693_v6  ;;  %v9785_v14 = vadd.s32 4294967294, %v3958_v58  ;;  %vm3882_vm9 = vcmp.eq.s32.totalorder %v14030_v34, 0  ;;  %vm3885_vm0 = vcmp.eq.s32.totalorder %v14030_v34, 2 }
 0x225   : > { %v5250_v35 = vand.u32 3, %v13784_v30  ;;  %v3977_v13 = vsel %vm3892_vm1, %v3976_v33, %v3952_v3  ;;  %v1761_v5 = vmul.u32 %v1754_v39, %v1745_v2  ;;  %v1764_v1 = vadd.s32 1, %v14053_v29 }
 0x226   : > { %10824 = vtanh.f32 %v820_v21  ;;  %v10821_v57 = vpop.eup %10820  ;;  %vm9786_vm7 = vcmp.lt.s32.totalorder %v9785_v14, 0  ;;  %v1810_v6 = vand.u32 2147483647, %v14076_v36  ;;  %vm1763_vm14 = vc.u32 %v14063_v12, %v14052_v16 }
 0x227   : > { %10826 = vtanh.f32 %v815_v55  ;;  %vm5252_vm15 = vcmp.eq.s32.totalorder %v5250_v35, 0  ;;  %v10823_v17 = vpop.eup %10822  ;;  %v3886_v47 = vxor.u32 2147483648, %v10821_v57  ;;  %v3961_v23 = vsel %vm9786_vm7, 0, %v9785_v14 }
 0x228   : > { %vm5251_vm6 = vcmp.lt.s32.totalorder %v5250_v35, 2  ;;  %v3883_v30 = vxor.u32 2147483648, %v10823_v17  ;;  %v3962_v3 = vsub.s32 32, %v3961_v23  ;;  %v3963_v60 = vshll.u32 %v14025_v49, %v3961_v23 }
 0x229   : > { %v3966_v11 = vsub.s32 4294967266, %v3961_v23  ;;  %v7420_v45 = vsel %vm7418_vm2, %v3886_v47, %v10823_v17  ;;  %v3887_v40 = vsel %vm3885_vm0, %v3886_v47, %v10823_v17  ;;  %v1765_v15 = vsel %vm1763_vm14, %v1764_v1, %v14053_v29  ;;  %v17779_v17 = vld [vmem:[#allocation7_spill] sm:$0xff] }
 0x22a   : > { %v5254_v48 = vsel %vm5252_vm15, %v13937_v52, %v1699_v25  ;;  %v7417_v26 = vsel %vm7415_vm10, %v10821_v57, %v3883_v30  ;;  %v3964_v39 = vshrl.u32 %v3946_v22, %v3962_v3  ;;  %v3884_v49 = vsel %vm3882_vm9, %v10821_v57, %v3883_v30  ;;  %v17778_v57 = vld [vmem:[#allocation3_spill] sm:$0xff] }
 0x22b   : > { %v3967_v42 = vadd.s32 127, %v3966_v11  ;;  %v7421_v46 = vsel %vm7414_vm13, %v7417_v26, %v7420_v45  ;;  %v3888_v33 = vsel %vm3881_vm12, %v3884_v49, %v3887_v40  ;;  %v1766_v61 = vadd.s32 %v1765_v15, %v1761_v5 }
 0x22c   : > { %vm5255_vm3 = vcmp.eq.s32.totalorder %v5250_v35, 2  ;;  %v7422_v29 = vsel %vm3878_vm8, nan, %v7421_v46  ;;  %v3965_v25 = vor.u32 %v3964_v39, %v3963_v60  ;;  %v3889_v22 = vsel %vm3878_vm8, nan, %v3888_v33 }
 0x22d   : > { %v3968_v58 = vshll.u32 %v3967_v42, 23  ;;  %vm4109_vm11 = vcmp.gt.s32.totalorder %v13980_v43, 0  ;;  %v14106_v59 = vsel %vm4005_vm5, %v13983_v62, 0  ;;  %8365 = vperm.xlu0 %10550, %v7422_v29   ;;  %4840 = vperm.xlu1 %10551, %v3889_v22   ;;  %v1767_v34 = vadd.s32 536870912, %v1766_v61 }
 0x22e   : > { %v5257_v2 = vsel %vm5255_vm3, %v1702_v7, %v13940_v51  ;;  %vm14113_vm13 = vcmp.le.f32.partialorder %v3890_v37, 0.7853982  ;;  %v3972_v21 = vcvt.s32.f32 %v3965_v25  ;;  %v1817_v37 = vand.u32 8388607, %v1810_v6  ;;  %v14128_v51 = vpop.f32.mrb[30].mxu0 }
 0x22f   : > { %v3969_v20 = vor.u32 4788187, %v3968_v58  ;;  %v5258_v55 = vsel %vm5251_vm6, %v5254_v48, %v5257_v2  ;;  %v14120_v62 = vsel %vm14113_vm13, 0, %v3977_v13  ;;  %v14122_v5 = vshrl.u32 %v1767_v34, 30  ;;  %v14136_v23 = vpop.f32.mrb[31].mxu0 }
 0x230   : > { %v10825_v14 = vpop.eup %10824  ;;  %v5259_v52 = vsel %vm1694_vm4, nan, %v5258_v55  ;;  %v1827_v35 = vshll.u32 %v17653_v0, %v17778_v57  ;;  %v1828_v47 = vshrl.u32 %v17654_v28, %v17779_v17  ;;  %v1830_v13 = vshll.u32 %v17654_v28, %v17778_v57 }
 0x231   : > { %v10827_v7 = vpop.eup %10826  ;;  %v3970_v1 = vand.u32 2147483647, %v3969_v20  ;;  %v1769_v31 = vshll.u32 %v14122_v5, 30  ;;  %8260 = vperm.xlu1 %10551, %v5259_v52   ;;  %v1831_v30 = vshrl.u32 %v17655_v41, %v17779_v17  ;;  %v1833_v3 = vshll.u32 %v17655_v41, %v17778_v57  ;;  %v17780_v20 = vld [vmem:[#allocation4_spill] sm:$0xff] }
 0x232   : > { %v1834_v60 = vshrl.u32 %v17665_v4, %v17779_v17  ;;  %10223 = vmatprep.mubr.f32.mxu1 %v10827_v7  ;;  %v14148_v11 = vsel %vm4109_vm11, %v13980_v43, 0  ;;  %v1836_v40 = vshll.u32 %v17665_v4, %v17778_v57  ;;  %v1837_v15 = vshrl.u32 %v17658_v9, %v17779_v17 }
 0x233   : > { %v3973_v45 = vmul.f32 %v3972_v21, %v3970_v1  ;;  %10224 = vmatmul.mubr.f32.gmra.mrb[24].mxu1 %v10825_v14  ;;  %v14155_v48 = vand.u32 31, %v14106_v59  ;;  %v3983_v26 = vadd.s32 3, %v14120_v62  ;;  %v14158_v39 = vsub.s32 %v1766_v61, %v1769_v31 }
 0x234   : > { %v1839_v42 = vshll.u32 %v17658_v9, %v17778_v57  ;;  %v1818_v49 = vor.u32 8388608, %v1817_v37  ;;  %v1826_v46 = vshrl.u32 %v17653_v0, %v17779_v17  ;;  %v1840_v33 = vshrl.u32 %v17659_v54, %v17779_v17 }
 0x235   : > { %v3974_v43 = vxor.u32 2147483648, %v3973_v45  ;;  %v1772_v29 = vsub.s32 0, %v14158_v39  ;;  %v1829_v25 = vor.u32 %v1828_v47, %v1827_v35  ;;  %v1832_v58 = vor.u32 %v1831_v30, %v1830_v13 }
 0x236   : > { %v1835_v22 = vor.u32 %v1834_v60, %v1833_v3  ;;  %v1838_v34 = vor.u32 %v1837_v15, %v1836_v40  ;;  %v1841_v2 = vor.u32 %v1840_v33, %v1839_v42  ;;  %vm1842_vm4 = vcmp.lt.s32.totalorder %v17780_v20, 1 }
 0x237   : > { %v3975_v61 = vsel %vm3892_vm1, %v3974_v43, %v3973_v45  ;;  %vm1708_vm10 = vcmp.lt.s32.totalorder %v13971_v56, 0  ;;  %v9700_v55 = vmin.u32 %v1772_v29, %v14158_v39  ;;  %vm1843_vm2 = vcmp.lt.s32.totalorder %v17780_v20, 2 }
 0x238   : > { %v3978_v21 = vsel %vm14113_vm13, %v13821_v53, %v3975_v61  ;;  %vm1845_vm8 = vcmp.lt.s32.totalorder %v17780_v20, 4  ;;  %vm1844_vm5 = vcmp.lt.s32.totalorder %v17780_v20, 3  ;;  %v1846_v14 = vsel %vm1842_vm4, %v1826_v46, %v1829_v25 }
 0x239   : > { %10828 = vcosq.f32 %v3978_v21  ;;  %v1847_v52 = vsel %vm1845_vm8, %v1835_v22, 2102212464  ;;  %v1774_v37 = vclz %v9700_v55  ;;  %v1850_v63 = vsel %vm1842_vm4, %v1829_v25, %v1832_v58 }
 0x23a   : > { %10830 = vsinq.f32 %v3978_v21  ;;  %v1848_v7 = vsel %vm1844_vm5, %v1832_v58, %v1847_v52  ;;  %v1762_v1 = vadd.s32 %v14052_v16, %v14063_v12  ;;  %v1851_v57 = vsel %vm1845_vm8, %v1838_v34, 920167782 }
 0x23b   : > { %v1854_v35 = vsel %vm1842_vm4, %v1832_v58, %v1835_v22  ;;  %v1855_v17 = vsel %vm1845_vm8, %v1841_v2, 1326507024  ;;  %v9701_v47 = vadd.s32 4294967294, %v1774_v37  ;;  %v1852_v13 = vsel %vm1844_vm5, %v1835_v22, %v1851_v57 }
 0x23c   : > { %v1856_v31 = vsel %vm1844_vm5, %v1838_v34, %v1855_v17  ;;  %v1858_v30 = vshll.u32 %v1818_v49, 8  ;;  %v1792_v3 = vsub.s32 4, %v14122_v5  ;;  %v1849_v60 = vsel %vm1843_vm2, %v1846_v14, %v1848_v7 }
 0x23d   : > { %v1853_v45 = vsel %vm1843_vm2, %v1850_v63, %v1852_v13  ;;  %v1857_v16 = vsel %vm1843_vm2, %v1854_v35, %v1856_v31  ;;  %vm9702_vm1 = vcmp.lt.s32.totalorder %v9701_v47, 0  ;;  %v830_v15 = vadd.f32 %v13921_v18, %v13830_v38 }
 0x23e   : > { %v14193_v12 = vmul.u32.u64.low %v1858_v30, %v1857_v16  ;;  %v14194_v40 = vmul.u32.u64.high %v1858_v30, %v1857_v16, %v14193_v12  ;;  %v3984_v42 = vand.u32 3, %v3983_v26  ;;  %v1777_v43 = vsel %vm9702_vm1, 0, %v9701_v47 }
 0x23f   : > { %v14198_v49 = vmul.u32.u64.low %v1858_v30, %v1853_v45  ;;  %v14199_v46 = vmul.u32.u64.high %v1858_v30, %v1853_v45, %v14198_v49  ;;  %v1778_v33 = vsub.s32 32, %v1777_v43  ;;  %v1779_v29 = vshll.u32 %v14158_v39, %v1777_v43 }
 0x240   : > { %v1782_v25 = vsub.s32 4294967266, %v1777_v43  ;;  %v825_v58 = vadd.f32 %v13921_v18, %v13844_v27  ;;  %v4009_v22 = vsub.s32 32, %v14155_v48  ;;  %vm3982_vm12 = vweird.f32 %v13821_v53 }
 0x241   : > { %v1793_v38 = vsel %vm1708_vm10, %v1792_v3, %v14122_v5  ;;  %v1865_v26 = vmul.u32 %v1858_v30, %v1849_v60  ;;  %v1780_v61 = vshrl.u32 %v1762_v1, %v1778_v33  ;;  %vm1867_vm9 = vc.u32 %v14194_v40, %v14198_v49 }
 0x242   : > { %v1783_v34 = vadd.s32 127, %v1782_v25  ;;  %10832 = vtanh.f32 %v830_v15  ;;  %vm3989_vm0 = vcmp.eq.s32.totalorder %v3984_v42, 2  ;;  %vm14216_vm7 = vcmp.le.f32.partialorder %v1706_v32, 0.7853982 }
 0x243   : > { %v14212_v39 = vpop.eup %10828  ;;  %v1868_v2 = vadd.s32 1, %v14199_v46  ;;  %10834 = vtanh.f32 %v825_v58  ;;  %vm3986_vm15 = vcmp.eq.s32.totalorder %v3984_v42, 0  ;;  %v1781_v21 = vor.u32 %v1780_v61, %v1779_v29 }
 0x244   : > { %v14221_v5 = vpop.eup %10830  ;;  %v3990_v20 = vxor.u32 2147483648, %v14212_v39  ;;  %v1784_v55 = vshll.u32 %v1783_v34, 23  ;;  %vm3985_vm14 = vcmp.lt.s32.totalorder %v3984_v42, 2  ;;  %v1795_v52 = vsel %vm14216_vm7, 0, %v1793_v38 }
 0x245   : > { %v3987_v14 = vxor.u32 2147483648, %v14221_v5  ;;  %v1869_v32 = vsel %vm1867_vm9, %v1868_v2, %v14199_v46  ;;  %v1788_v63 = vcvt.s32.f32 %v1781_v21  ;;  %v14232_v57 = vand.u32 31, %v14148_v11 }
 0x246   : > { %v3991_v37 = vsel %vm3989_vm0, %v3990_v20, %v14221_v5  ;;  %v1785_v7 = vor.u32 4788187, %v1784_v55  ;;  %v1870_v1 = vadd.s32 %v1869_v32, %v1865_v26  ;;  %v14235_v35 = vshrl.u32 %v14106_v59, 5 }
 0x247   : > { %v3988_v17 = vsel %vm3986_vm15, %v14212_v39, %v3987_v14  ;;  %v1799_v47 = vadd.s32 3, %v1795_v52  ;;  %v3994_v3 = vand.u32 2147483647, %v13804_v24  ;;  %v14243_v45 = vand.u32 3, %v1795_v52 }
 0x248   : > { %v3992_v13 = vsel %vm3985_vm14, %v3988_v17, %v3991_v37  ;;  %v1786_v31 = vand.u32 2147483647, %v1785_v7  ;;  %v1871_v30 = vadd.s32 536870912, %v1870_v1  ;;  %v4011_v16 = vshll.u32 %v17653_v0, %v14155_v48 }
 0x249   : > { %v3993_v60 = vsel %vm3982_vm12, nan, %v3992_v13  ;;  %v4012_v59 = vshrl.u32 %v17654_v28, %v4009_v22  ;;  %v4014_v42 = vshll.u32 %v17654_v28, %v14155_v48  ;;  %v4015_v43 = vshrl.u32 %v17655_v41, %v4009_v22 }
 0x24a   : > { %4845 = vperm.xlu0 %10550, %v3993_v60   ;;  %v1789_v12 = vmul.f32 %v1788_v63, %v1786_v31  ;;  %v14248_v15 = vshrl.u32 %v1871_v30, 30  ;;  %v4017_v46 = vshll.u32 %v17655_v41, %v14155_v48  ;;  %v4018_v33 = vshrl.u32 %v17665_v4, %v4009_v22 }
 0x24b   : > { %v4020_v29 = vshll.u32 %v17665_v4, %v14155_v48  ;;  %v4021_v25 = vshrl.u32 %v17658_v9, %v4009_v22  ;;  %v14260_v61 = vand.u32 3, %v1799_v47  ;;  %v4001_v34 = vand.u32 8388607, %v3994_v3 }
 0x24c   : > { %v10833_v58 = vpop.eup %10832  ;;  %v1790_v38 = vxor.u32 2147483648, %v1789_v12  ;;  %v1873_v26 = vshll.u32 %v14248_v15, 30  ;;  %v4010_v21 = vshrl.u32 %v17653_v0, %v4009_v22  ;;  %v4013_v55 = vor.u32 %v4012_v59, %v4011_v16 }
 0x24d   : > { %v10835_v2 = vpop.eup %10834  ;;  %v4023_v52 = vshll.u32 %v17658_v9, %v14155_v48  ;;  %v4024_v32 = vshrl.u32 %v17659_v54, %v4009_v22  ;;  %v4016_v63 = vor.u32 %v4015_v43, %v4014_v42  ;;  %v4022_v17 = vor.u32 %v4021_v25, %v4020_v29 }
 0x24e   : > { %v1791_v37 = vsel %vm1708_vm10, %v1790_v38, %v1789_v12  ;;  %v14270_v7 = vsub.s32 %v1870_v1, %v1873_v26  ;;  %10226 = vmatprep.mubr.f32.mxu1 %v10835_v2  ;;  %v4019_v13 = vor.u32 %v4018_v33, %v4017_v46  ;;  %vm4026_vm6 = vcmp.lt.s32.totalorder %v14235_v35, 1 }
 0x24f   : > { %v1794_v47 = vsel %vm14216_vm7, %v13971_v56, %v1791_v37  ;;  %v4025_v31 = vor.u32 %v4024_v32, %v4023_v52  ;;  %10227 = vmatmul.mubr.f32.gmra.mrb[26].mxu1 %v10833_v58  ;;  %vm4028_vm3 = vcmp.lt.s32.totalorder %v14235_v35, 3  ;;  %vm4029_vm11 = vcmp.lt.s32.totalorder %v14235_v35, 4 }
 0x250   : > { %10836 = vcosq.f32 %v1794_v47  ;;  %v1876_v48 = vsub.s32 0, %v14270_v7  ;;  %vm1812_vm13 = vcmp.lt.s32.totalorder %v14076_v36, 0  ;;  %v4002_v22 = vor.u32 8388608, %v4001_v34 }
 0x251   : > { %10838 = vsinq.f32 %v1794_v47  ;;  %vm4027_vm4 = vcmp.lt.s32.totalorder %v14235_v35, 2  ;;  %vm5358_vm10 = vcmp.eq.s32.totalorder %v14243_v45, 2  ;;  %v4031_v1 = vsel %vm4029_vm11, %v4019_v13, 2102212464 }
 0x252   : > { %v9704_v27 = vmin.u32 %v1876_v48, %v14270_v7  ;;  %v4034_v30 = vsel %vm4026_vm6, %v4013_v55, %v4016_v63  ;;  %v4035_v60 = vsel %vm4029_vm11, %v4022_v17, 920167782  ;;  %vm5355_vm2 = vcmp.eq.s32.totalorder %v14243_v45, 0 }
 0x253   : > { %v1866_v16 = vadd.s32 %v14198_v49, %v14194_v40  ;;  %v4036_v59 = vsel %vm4028_vm3, %v4019_v13, %v4035_v60  ;;  %v4038_v12 = vsel %vm4026_vm6, %v4016_v63, %v4019_v13  ;;  %v4039_v42 = vsel %vm4029_vm11, %v4025_v31, 1326507024 }
 0x254   : > { %vm5354_vm8 = vcmp.lt.s32.totalorder %v14243_v45, 2  ;;  %v1878_v43 = vclz %v9704_v27  ;;  %v1896_v46 = vsub.s32 4, %v14248_v15  ;;  %vm1801_vm5 = vcmp.lt.s32.totalorder %v14260_v61, 2 }
 0x255   : > { %v4030_v33 = vsel %vm4026_vm6, %v4010_v21, %v4013_v55  ;;  %vm1798_vm1 = vweird.f32 %v13971_v56  ;;  %v4032_v40 = vsel %vm4028_vm3, %v4016_v63, %v4031_v1  ;;  %v4037_v49 = vsel %vm4027_vm4, %v4034_v30, %v4036_v59 }
 0x256   : > { %v4040_v29 = vsel %vm4028_vm3, %v4022_v17, %v4039_v42  ;;  %v4042_v25 = vshll.u32 %v4002_v22, 8  ;;  %v9705_v58 = vadd.s32 4294967294, %v1878_v43  ;;  %vm1802_vm9 = vcmp.eq.s32.totalorder %v14260_v61, 0 }
 0x257   : > { %v4041_v38 = vsel %vm4027_vm4, %v4038_v12, %v4040_v29  ;;  %v840_v26 = vadd.f32 %v13921_v18, %v13988_v44  ;;  %vm2133_vm0 = vcmp.gt.s32.totalorder %v13839_v50, 0  ;;  %vm1805_vm15 = vcmp.eq.s32.totalorder %v14260_v61, 2 }
 0x258   : > { %v14310_v34 = vmul.u32.u64.low %v4042_v25, %v4041_v38  ;;  %v14311_v2 = vmul.u32.u64.high %v4042_v25, %v4041_v38, %v14310_v34  ;;  %v14313_v21 = vmul.u32.u64.low %v4042_v25, %v4037_v49  ;;  %v14314_v55 = vmul.u32.u64.high %v4042_v25, %v4037_v49, %v14313_v21 }
 0x259   : > { %vm9706_vm7 = vcmp.lt.s32.totalorder %v9705_v58, 0  ;;  %v4033_v52 = vsel %vm4027_vm4, %v4030_v33, %v4032_v40  ;;  %v835_v32 = vadd.f32 %v13921_v18, %v13994_v8  ;;  %v1897_v44 = vsel %vm1812_vm13, %v1896_v46, %v14248_v15 }
 0x25a   : > { %v1881_v37 = vsel %vm9706_vm7, 0, %v9705_v58  ;;  %10840 = vtanh.f32 %v840_v26  ;;  %v7516_v63 = vand.u32 3, %v14120_v62  ;;  %v10837_v17 = vpop.eup %10836  ;;  %v4049_v22 = vmul.u32 %v4042_v25, %v4033_v52 }
 0x25b   : > { %v1882_v47 = vsub.s32 32, %v1881_v37  ;;  %v1883_v13 = vshll.u32 %v14270_v7, %v1881_v37  ;;  %v1886_v31 = vsub.s32 4294967266, %v1881_v37  ;;  %10842 = vtanh.f32 %v835_v32  ;;  %v10839_v48 = vpop.eup %10838 }
 0x25c   : > { %v1806_v35 = vxor.u32 2147483648, %v10837_v17  ;;  %vm4051_vm14 = vc.u32 %v14311_v2, %v14313_v21  ;;  %v4052_v8 = vadd.s32 1, %v14314_v55  ;;  %v1803_v27 = vxor.u32 2147483648, %v10839_v48 }
 0x25d   : > { %v1884_v1 = vshrl.u32 %v1866_v16, %v1882_v47  ;;  %v1887_v15 = vadd.s32 127, %v1886_v31  ;;  %vm7517_vm6 = vcmp.lt.s32.totalorder %v7516_v63, 2  ;;  %vm7518_vm3 = vcmp.eq.s32.totalorder %v7516_v63, 0 }
 0x25e   : > { %v5360_v62 = vsel %vm5358_vm10, %v1806_v35, %v10839_v48  ;;  %v1807_v7 = vsel %vm1805_vm15, %v1806_v35, %v10839_v48  ;;  %v4053_v30 = vsel %vm4051_vm14, %v4052_v8, %v14314_v55  ;;  %v5357_v60 = vsel %vm5355_vm2, %v10837_v17, %v1803_v27  ;;  %v14397_v48 = vld [vmem:[%s11274_s28 + $0xd8] sm:$0xff] }
 0x25f   : > { %v1885_v59 = vor.u32 %v1884_v1, %v1883_v13  ;;  %v1888_v12 = vshll.u32 %v1887_v15, 23  ;;  %v1804_v42 = vsel %vm1802_vm9, %v10837_v17, %v1803_v27  ;;  %v5361_v16 = vsel %vm5354_vm8, %v5357_v60, %v5360_v62 }
 0x260   : > { %v1808_v43 = vsel %vm1801_vm5, %v1804_v42, %v1807_v7  ;;  %v4054_v46 = vadd.s32 %v4053_v30, %v4049_v22  ;;  %v7520_v33 = vsel %vm7518_vm3, %v14212_v39, %v3987_v14  ;;  %v5362_v40 = vsel %vm1798_vm1, nan, %v5361_v16  ;;  %v14381_v39 = vld [vmem:[%s11274_s28 + $0xd0] sm:$0xff] }
 0x261   : > { %v1889_v49 = vor.u32 4788187, %v1888_v12  ;;  %v1892_v29 = vcvt.s32.f32 %v1885_v59  ;;  %v1809_v25 = vsel %vm1798_vm1, nan, %v1808_v43  ;;  %v14351_v58 = vand.u32 31, %v13967_v10  ;;  %8265 = vperm.xlu0 %10550, %v5362_v40  }
 0x262   : > { %v4113_v45 = vsub.s32 32, %v14232_v57  ;;  %4740 = vperm.xlu1 %10551, %v1809_v25   ;;  %v4055_v61 = vadd.s32 536870912, %v4054_v46  ;;  %vm7521_vm11 = vcmp.eq.s32.totalorder %v7516_v63, 2  ;;  %v14357_v14 = vsel %vm2133_vm0, %v13839_v50, 0 }
 0x263   : > { %vm14361_vm4 = vcmp.le.f32.partialorder %v1810_v6, 0.7853982  ;;  %v1890_v10 = vand.u32 2147483647, %v1889_v49  ;;  %v7523_v38 = vsel %vm7521_vm11, %v3990_v20, %v14221_v5  ;;  %v14369_v34 = vshrl.u32 %v14148_v11, 5 }
 0x264   : > { %v10841_v26 = vpop.eup %10840  ;;  %v14373_v55 = vsel %vm14361_vm4, 0, %v1897_v44  ;;  %v14375_v50 = vshrl.u32 %v4055_v61, 30  ;;  %v7524_v6 = vsel %vm7517_vm6, %v7520_v33, %v7523_v38  ;;  %v4098_v5 = vand.u32 2147483647, %v14381_v39 }
 0x265   : > { %v10843_v52 = vpop.eup %10842  ;;  %v1893_v32 = vmul.f32 %v1892_v29, %v1890_v10  ;;  %v7525_v37 = vsel %vm3982_vm12, nan, %v7524_v6  ;;  %v4115_v11 = vshll.u32 %v17653_v0, %v14232_v57  ;;  %v4116_v44 = vshrl.u32 %v17654_v28, %v4113_v45 }
 0x266   : > { %v4057_v20 = vshll.u32 %v14375_v50, 30  ;;  %8370 = vperm.xlu1 %10551, %v7525_v37   ;;  %v4118_v63 = vshll.u32 %v17654_v28, %v14232_v57  ;;  %v4119_v17 = vshrl.u32 %v17655_v41, %v4113_v45  ;;  %10229 = vmatprep.mubr.f32.mxu1 %v10843_v52  ;;  %v4121_v47 = vshll.u32 %v17655_v41, %v14232_v57 }
 0x267   : > { %v1894_v53 = vxor.u32 2147483648, %v1893_v32  ;;  %v4122_v13 = vshrl.u32 %v17665_v4, %v4113_v45  ;;  %v4124_v31 = vshll.u32 %v17665_v4, %v14232_v57  ;;  %10230 = vmatmul.mubr.f32.gmra.mrb[28].mxu1 %v10841_v26  ;;  %v4205_v35 = vand.u32 2139095040, %v14397_v48 }
 0x268   : > { %v1903_v22 = vadd.s32 3, %v14373_v55  ;;  %v14401_v8 = vsub.s32 %v4054_v46, %v4057_v20  ;;  %v4125_v27 = vshrl.u32 %v17658_v9, %v4113_v45  ;;  %v4105_v15 = vand.u32 8388607, %v4098_v5 }
 0x269   : > { %v1895_v1 = vsel %vm1812_vm13, %v1894_v53, %v1893_v32  ;;  %v4114_v62 = vshrl.u32 %v17653_v0, %v4113_v45  ;;  %v4127_v7 = vshll.u32 %v17658_v9, %v14232_v57  ;;  %v4117_v59 = vor.u32 %v4116_v44, %v4115_v11 }
 0x26a   : > { %v1898_v30 = vsel %vm14361_vm4, %v14076_v36, %v1895_v1  ;;  %v4060_v60 = vsub.s32 0, %v14401_v8  ;;  %v4120_v12 = vor.u32 %v4119_v17, %v4118_v63  ;;  %v4123_v42 = vor.u32 %v4122_v13, %v4121_v47 }
 0x26b   : > { %10844 = vcosq.f32 %v1898_v30  ;;  %v4126_v16 = vor.u32 %v4125_v27, %v4124_v31  ;;  %v4128_v43 = vshrl.u32 %v17659_v54, %v4113_v45  ;;  %v1904_v46 = vand.u32 3, %v1903_v22 }
 0x26c   : > { %10846 = vsinq.f32 %v1898_v30  ;;  %v9788_v33 = vmin.u32 %v4060_v60, %v14401_v8  ;;  %vm4130_vm12 = vcmp.lt.s32.totalorder %v14369_v34, 1  ;;  %v4106_v57 = vor.u32 8388608, %v4105_v15 }
 0x26d   : > { %v4129_v40 = vor.u32 %v4128_v43, %v4127_v7  ;;  %vm4132_vm13 = vcmp.lt.s32.totalorder %v14369_v34, 3  ;;  %vm4133_vm10 = vcmp.lt.s32.totalorder %v14369_v34, 4  ;;  %vm4131_vm2 = vcmp.lt.s32.totalorder %v14369_v34, 2 }
 0x26e   : > { %v4062_v49 = vclz %v9788_v33  ;;  %v4134_v29 = vsel %vm4130_vm12, %v4114_v62, %v4117_v59  ;;  %v4135_v25 = vsel %vm4133_vm10, %v4123_v42, 2102212464  ;;  %v4138_v61 = vsel %vm4130_vm12, %v4117_v59, %v4120_v12  ;;  %v14450_v62 = vld [vmem:[%s11274_s28 + $0xc8] sm:$0xff] }
 0x26f   : > { %v4139_v56 = vsel %vm4133_vm10, %v4126_v16, 920167782  ;;  %v4142_v45 = vsel %vm4130_vm12, %v4120_v12, %v4123_v42  ;;  %v4143_v10 = vsel %vm4133_vm10, %v4129_v40, 1326507024  ;;  %vm1902_vm8 = vweird.f32 %v14076_v36 }
 0x270   : > { %v9789_v38 = vadd.s32 4294967294, %v4062_v49  ;;  %v4136_v26 = vsel %vm4132_vm13, %v4120_v12, %v4135_v25  ;;  %v4140_v6 = vsel %vm4132_vm13, %v4123_v42, %v4139_v56  ;;  %v4144_v52 = vsel %vm4132_vm13, %v4126_v16, %v4143_v10  ;;  %v14483_v56 = vld [vmem:[%s11274_s28 + $0xe0] sm:$0xff] }
 0x271   : > { %vm1909_vm5 = vcmp.eq.s32.totalorder %v1904_v46, 2  ;;  %v4050_v32 = vadd.s32 %v14313_v21, %v14311_v2  ;;  %v4145_v37 = vsel %vm4131_vm2, %v4142_v45, %v4144_v52  ;;  %v4146_v11 = vshll.u32 %v4106_v57, 8 }
 0x272   : > { %vm9790_vm1 = vcmp.lt.s32.totalorder %v9789_v38, 0  ;;  %v4141_v20 = vsel %vm4131_vm2, %v4138_v61, %v4140_v6  ;;  %v850_v44 = vadd.f32 %v13921_v18, %v14128_v51  ;;  %v845_v63 = vadd.f32 %v13921_v18, %v14136_v23 }
 0x273   : > { %v4065_v17 = vsel %vm9790_vm1, 0, %v9789_v38  ;;  %v4137_v53 = vsel %vm4131_vm2, %v4134_v29, %v4136_v26  ;;  %v14434_v47 = vmul.u32.u64.low %v4146_v11, %v4145_v37  ;;  %v14435_v2 = vmul.u32.u64.high %v4146_v11, %v4145_v37, %v14434_v47 }
 0x274   : > { %v4066_v21 = vsub.s32 32, %v4065_v17  ;;  %v4067_v13 = vshll.u32 %v14401_v8, %v4065_v17  ;;  %v4070_v31 = vsub.s32 4294967266, %v4065_v17  ;;  %10848 = vtanh.f32 %v850_v44 }
 0x275   : > { %v14438_v22 = vpop.eup %10844  ;;  %v4080_v51 = vsub.s32 4, %v14375_v50  ;;  %v14441_v27 = vmul.u32.u64.low %v4146_v11, %v4141_v20  ;;  %v14442_v1 = vmul.u32.u64.high %v4146_v11, %v4141_v20, %v14441_v27  ;;  %10850 = vtanh.f32 %v845_v63 }
 0x276   : > { %v14445_v18 = vpop.eup %10846  ;;  %vm1906_vm9 = vcmp.eq.s32.totalorder %v1904_v46, 0  ;;  %v1910_v23 = vxor.u32 2147483648, %v14438_v22  ;;  %v4068_v34 = vshrl.u32 %v4050_v32, %v4066_v21  ;;  %v4071_v15 = vadd.s32 127, %v4070_v31  ;;  %v14501_v21 = vpop.permute.xlu0 %1200 }
 0x277   : > { %vm1905_vm0 = vcmp.lt.s32.totalorder %v1904_v46, 2  ;;  %v1907_v8 = vxor.u32 2147483648, %v14445_v18  ;;  %vm3996_vm7 = vcmp.lt.s32.totalorder %v14450_v62, 0  ;;  %v4153_v7 = vmul.u32 %v4146_v11, %v4137_v53 }
 0x278   : > { %v1911_v30 = vsel %vm1909_vm5, %v1910_v23, %v14445_v18  ;;  %v4069_v60 = vor.u32 %v4068_v34, %v4067_v13  ;;  %v4072_v59 = vshll.u32 %v4071_v15, 23  ;;  %vm4155_vm15 = vc.u32 %v14435_v2, %v14441_v27 }
 0x279   : > { %v1929_v12 = vsub.s32 32, %v14351_v58  ;;  %v1908_v42 = vsel %vm1906_vm9, %v14438_v22, %v1907_v8  ;;  %v4081_v16 = vsel %vm3996_vm7, %v4080_v51, %v14375_v50  ;;  %v4156_v43 = vadd.s32 1, %v14442_v1  ;;  %v14479_v50 = vld [vmem:[%s11274_s28 + $0x28] sm:$0xff] }
 0x27a   : > { %v4206_v46 = vshrl.u32 %v4205_v35, 23  ;;  %v1912_v33 = vsel %vm1905_vm0, %v1908_v42, %v1911_v30  ;;  %v4073_v57 = vor.u32 4788187, %v4072_v59  ;;  %v4076_v40 = vcvt.s32.f32 %v4069_v60 }
 0x27b   : > { %v1913_v49 = vsel %vm1902_vm8, nan, %v1912_v33  ;;  %vm14473_vm14 = vcmp.le.f32.partialorder %v3994_v3, 0.7853982  ;;  %v4157_v25 = vsel %vm4155_vm15, %v4156_v43, %v14442_v1  ;;  %v1914_v61 = vand.u32 2147483647, %v14479_v50 }
 0x27c   : > { %v4309_v35 = vand.u32 2139095040, %v14483_v56  ;;  %4745 = vperm.xlu0 %10550, %v1913_v49   ;;  %v4074_v45 = vand.u32 2147483647, %v4073_v57  ;;  %v4083_v10 = vsel %vm14473_vm14, 0, %v4081_v16  ;;  %v4158_v24 = vadd.s32 %v4157_v25, %v4153_v7 }
 0x27d   : > { %v1931_v3 = vshll.u32 %v17653_v0, %v14351_v58  ;;  %v1932_v38 = vshrl.u32 %v17654_v28, %v1929_v12  ;;  %v1934_v26 = vshll.u32 %v17654_v28, %v14351_v58  ;;  %v1935_v6 = vshrl.u32 %v17655_v41, %v1929_v12 }
 0x27e   : > { %v10849_v52 = vpop.eup %10848  ;;  %v9795_v32 = vadd.s32 4294967169, %v4206_v46  ;;  %v4077_v37 = vmul.f32 %v4076_v40, %v4074_v45  ;;  %v4159_v11 = vadd.s32 536870912, %v4158_v24  ;;  %v4087_v20 = vadd.s32 3, %v4083_v10  ;;  %v14526_v40 = vpop.permute.xlu0 %1205 }
 0x27f   : > { %v10851_v44 = vpop.eup %10850  ;;  %v1921_v63 = vand.u32 8388607, %v1914_v61  ;;  %v1937_v17 = vshll.u32 %v17655_v41, %v14351_v58  ;;  %v1938_v53 = vshrl.u32 %v17665_v4, %v1929_v12  ;;  %v1940_v47 = vshll.u32 %v17665_v4, %v14351_v58 }
 0x280   : > { %v4078_v13 = vxor.u32 2147483648, %v4077_v37  ;;  %v14503_v31 = vshrl.u32 %v4159_v11, 30  ;;  %v1941_v51 = vshrl.u32 %v17658_v9, %v1929_v12  ;;  %v1943_v1 = vshll.u32 %v17658_v9, %v14351_v58  ;;  %10232 = vmatprep.mubr.f32.mxu1 %v10851_v44 }
 0x281   : > { %v1930_v34 = vshrl.u32 %v17653_v0, %v1929_v12  ;;  %v1933_v15 = vor.u32 %v1932_v38, %v1931_v3  ;;  %v1936_v7 = vor.u32 %v1935_v6, %v1934_v26  ;;  %v1944_v30 = vshrl.u32 %v17659_v54, %v1929_v12  ;;  %10233 = vmatmul.mubr.f32.gmra.mrb[30].mxu1 %v10849_v52 }
 0x282   : > { %v4079_v60 = vsel %vm3996_vm7, %v4078_v13, %v4077_v37  ;;  %v4161_v59 = vshll.u32 %v14503_v31, 30  ;;  %v1942_v42 = vor.u32 %v1941_v51, %v1940_v47  ;;  %vm1946_vm6 = vcmp.lt.s32.totalorder %v13975_v19, 1 }
 0x283   : > { %v4082_v58 = vsel %vm14473_vm14, %v14450_v62, %v4079_v60  ;;  %v1939_v16 = vor.u32 %v1938_v53, %v1937_v17  ;;  %v1945_v43 = vor.u32 %v1944_v30, %v1943_v1  ;;  %vm1949_vm3 = vcmp.lt.s32.totalorder %v13975_v19, 4  ;;  %v14560_v1 = vpop.permute.xlu0 %1220 }
 0x284   : > { %10852 = vcosq.f32 %v4082_v58  ;;  %v14518_v46 = vsub.s32 %v4158_v24, %v4161_v59  ;;  %v1922_v12 = vor.u32 8388608, %v1921_v63  ;;  %vm1948_vm11 = vcmp.lt.s32.totalorder %v13975_v19, 3  ;;  %17787 = vst [vmem:[#allocation38_spill] sm:$0xff] %v14560_v1 }
 0x285   : > { %10854 = vsinq.f32 %v4082_v58  ;;  %vm1947_vm4 = vcmp.lt.s32.totalorder %v13975_v19, 2  ;;  %v1951_v33 = vsel %vm1949_vm3, %v1939_v16, 2102212464  ;;  %v1954_v57 = vsel %vm1946_vm6, %v1933_v15, %v1936_v7 }
 0x286   : > { %v7619_v49 = vand.u32 3, %v4083_v10  ;;  %v4164_v29 = vsub.s32 0, %v14518_v46  ;;  %v1950_v25 = vsel %vm1946_vm6, %v1930_v34, %v1933_v15  ;;  %v1955_v45 = vsel %vm1949_vm3, %v1942_v42, 920167782 }
 0x287   : > { %v1952_v24 = vsel %vm1948_vm11, %v1936_v7, %v1951_v33  ;;  %v1956_v3 = vsel %vm1948_vm11, %v1939_v16, %v1955_v45  ;;  %v1958_v38 = vsel %vm1946_vm6, %v1936_v7, %v1939_v16  ;;  %v1959_v10 = vsel %vm1949_vm3, %v1945_v43, 1326507024 }
 0x288   : > { %v14541_v26 = vadd.s32 1, %v9795_v32  ;;  %v9792_v6 = vmin.u32 %v4164_v29, %v14518_v46  ;;  %v1957_v52 = vsel %vm1947_vm4, %v1954_v57, %v1956_v3  ;;  %v1960_v37 = vsel %vm1948_vm11, %v1942_v42, %v1959_v10  ;;  %v14575_v57 = vpop.permute.xlu0 %1230 }
 0x289   : > { %vm4086_vm12 = vweird.f32 %v14450_v62  ;;  %v4088_v11 = vand.u32 3, %v4087_v20  ;;  %v1961_v44 = vsel %vm1947_vm4, %v1958_v38, %v1960_v37  ;;  %v1962_v63 = vshll.u32 %v1922_v12, 8  ;;  %17788 = vst [vmem:[#allocation37_spill] sm:$0xff] %v14575_v57  ;;  %v14604_v62 = vld [vmem:[%s11274_s28 + $0x30] sm:$0xff] }
 0x28a   : > { %vm7620_vm13 = vcmp.lt.s32.totalorder %v7619_v49, 2  ;;  %vm7621_vm10 = vcmp.eq.s32.totalorder %v7619_v49, 0  ;;  %v4166_v17 = vclz %v9792_v6  ;;  %v1953_v32 = vsel %vm1947_vm4, %v1950_v25, %v1952_v24 }
 0x28b   : > { %v14553_v53 = vmul.u32.u64.low %v1962_v63, %v1961_v44  ;;  %v14554_v47 = vmul.u32.u64.high %v1962_v63, %v1961_v44, %v14553_v53  ;;  %v14556_v13 = vmul.u32.u64.low %v1962_v63, %v1957_v52  ;;  %v14557_v51 = vmul.u32.u64.high %v1962_v63, %v1957_v52, %v14556_v13 }
 0x28c   : > { %vm7624_vm2 = vcmp.eq.s32.totalorder %v7619_v49, 2  ;;  %v4154_v20 = vadd.s32 %v14441_v27, %v14435_v2  ;;  %v9793_v34 = vadd.s32 4294967294, %v4166_v17  ;;  %v5456_v15 = vand.u32 3, %v14373_v55 }
 0x28d   : > { %v4184_v7 = vsub.s32 4, %v14503_v31  ;;  %vm4089_vm5 = vcmp.lt.s32.totalorder %v4088_v11, 2  ;;  %vm4090_vm1 = vcmp.eq.s32.totalorder %v4088_v11, 0  ;;  %vm4093_vm9 = vcmp.eq.s32.totalorder %v4088_v11, 2 }
 0x28e   : > { %v10853_v19 = vpop.eup %10852  ;;  %vm9794_vm0 = vcmp.lt.s32.totalorder %v9793_v34, 0  ;;  %v1969_v30 = vmul.u32 %v1962_v63, %v1953_v32  ;;  %vm5457_vm7 = vcmp.lt.s32.totalorder %v5456_v15, 2  ;;  %vm5458_vm15 = vcmp.eq.s32.totalorder %v5456_v15, 0  ;;  %v17791_v32 = vld [vmem:[#allocation5_spill] sm:$0xff] }
 0x28f   : > { %v10855_v60 = vpop.eup %10854  ;;  %v4094_v59 = vxor.u32 2147483648, %v10853_v19  ;;  %v4169_v42 = vsel %vm9794_vm0, 0, %v9793_v34  ;;  %vm1971_vm14 = vc.u32 %v14554_v47, %v14556_v13  ;;  %vm5461_vm6 = vcmp.eq.s32.totalorder %v5456_v15, 2  ;;  %v14614_v34 = vpop.permute.xlu0 %1240 }
 0x290   : > { %v4091_v2 = vxor.u32 2147483648, %v10855_v60  ;;  %v4170_v27 = vsub.s32 32, %v4169_v42  ;;  %v4171_v55 = vshll.u32 %v14518_v46, %v4169_v42  ;;  %v4174_v58 = vsub.s32 4294967266, %v4169_v42  ;;  %17793 = vst [vmem:[#allocation41_spill] sm:$0xff] %v14614_v34  ;;  %v14616_v15 = vpop.permute.xlu1 %1210 }
 0x291   : > { %v7626_v16 = vsel %vm7624_vm2, %v4094_v59, %v10855_v60  ;;  %v4095_v43 = vsel %vm4093_vm9, %v4094_v59, %v10855_v60  ;;  %v1972_v12 = vadd.s32 1, %v14557_v51  ;;  %v5460_v33 = vsel %vm5458_vm15, %v14438_v22, %v1907_v8 }
 0x292   : > { %v7623_v29 = vsel %vm7621_vm10, %v10853_v19, %v4091_v2  ;;  %v4172_v25 = vshrl.u32 %v4154_v20, %v4170_v27  ;;  %v4175_v45 = vadd.s32 127, %v4174_v58  ;;  %v4092_v24 = vsel %vm4090_vm1, %v10853_v19, %v4091_v2 }
 0x293   : > { %v7627_v46 = vsel %vm7620_vm13, %v7623_v29, %v7626_v16  ;;  %v4096_v3 = vsel %vm4089_vm5, %v4092_v24, %v4095_v43  ;;  %v1973_v38 = vsel %vm1971_vm14, %v1972_v12, %v14557_v51  ;;  %v5463_v8 = vsel %vm5461_vm6, %v1910_v23, %v14445_v18  ;;  %v17792_v51 = vld [vmem:[#allocation10_spill] sm:$0xff] }
 0x294   : > { %v7628_v10 = vsel %vm4086_vm12, nan, %v7627_v46  ;;  %v4173_v6 = vor.u32 %v4172_v25, %v4171_v55  ;;  %v4176_v52 = vshll.u32 %v4175_v45, 23  ;;  %v4097_v49 = vsel %vm4086_vm12, nan, %v4096_v3  ;;  %v17794_v3 = vld [vmem:[#allocation8_spill] sm:$0xff] }
 0x295   : > { %8375 = vperm.xlu0 %10550, %v7628_v10   ;;  %vm14595_vm3 = vcmp.le.f32.partialorder %v4098_v5, 0.7853982  ;;  %vm4100_vm11 = vcmp.lt.s32.totalorder %v14381_v39, 0  ;;  %4850 = vperm.xlu1 %10551, %v4097_v49   ;;  %v1974_v22 = vadd.s32 %v1973_v38, %v1969_v30  ;;  %v5464_v18 = vsel %vm5457_vm7, %v5460_v33, %v5463_v8  ;;  %v14650_v38 = vpop.permute.xlu0 %1250 }
 0x296   : > { %v4177_v23 = vor.u32 4788187, %v4176_v52  ;;  %v4180_v11 = vcvt.s32.f32 %v4173_v6  ;;  %v5465_v44 = vsel %vm1902_vm8, nan, %v5464_v18  ;;  %v2018_v63 = vand.u32 2147483647, %v14604_v62  ;;  %17795 = vst [vmem:[#allocation26_spill] sm:$0xff] %v14650_v38  ;;  %v14655_v6 = vpop.permute.xlu1 %1215 }
 0x297   : > { %v4185_v5 = vsel %vm4100_vm11, %v4184_v7, %v14503_v31  ;;  %v1975_v17 = vadd.s32 536870912, %v1974_v22  ;;  %v2035_v53 = vshll.u32 %v17653_v0, %v17791_v32  ;;  %v2036_v20 = vshrl.u32 %v17654_v28, %v17792_v51  ;;  %17796 = vst [vmem:[#allocation30_spill] sm:$0xff] %v14655_v6 }
 0x298   : > { %v4178_v36 = vand.u32 2147483647, %v4177_v23  ;;  %v2038_v19 = vshll.u32 %v17654_v28, %v17791_v32  ;;  %v2039_v30 = vshrl.u32 %v17655_v41, %v17792_v51  ;;  %v2041_v31 = vshll.u32 %v17655_v41, %v17791_v32 }
 0x299   : > { %v14624_v7 = vshrl.u32 %v1975_v17, 30  ;;  %8270 = vperm.xlu1 %10551, %v5465_v44   ;;  %v2042_v60 = vshrl.u32 %v17665_v4, %v17792_v51  ;;  %v2044_v59 = vshll.u32 %v17665_v4, %v17791_v32  ;;  %v2045_v42 = vshrl.u32 %v17658_v9, %v17792_v51 }
 0x29a   : > { %v4181_v2 = vmul.f32 %v4180_v11, %v4178_v36  ;;  %v2025_v27 = vand.u32 8388607, %v2018_v63  ;;  %v2047_v55 = vshll.u32 %v17658_v9, %v17791_v32  ;;  %v2048_v58 = vshrl.u32 %v17659_v54, %v17792_v51 }
 0x29b   : > { %vm4213_vm8 = vcmp.gt.s32.totalorder %v14541_v26, 0  ;;  %v14641_v16 = vsel %vm14595_vm3, 0, %v4185_v5  ;;  %v1977_v43 = vshll.u32 %v14624_v7, 30  ;;  %v2034_v12 = vshrl.u32 %v17653_v0, %v17792_v51 }
 0x29c   : > { %v4182_v33 = vxor.u32 2147483648, %v4181_v2  ;;  %v2037_v29 = vor.u32 %v2036_v20, %v2035_v53  ;;  %v2040_v25 = vor.u32 %v2039_v30, %v2038_v19  ;;  %v2046_v45 = vor.u32 %v2045_v42, %v2044_v59  ;;  %v14689_v59 = vpop.permute.xlu0 %1260  ;;  %v14691_v42 = vpop.permute.xlu1 %1225 }
 0x29d   : > { %v14646_v24 = vsub.s32 %v1974_v22, %v1977_v43  ;;  %v2043_v46 = vor.u32 %v2042_v60, %v2041_v31  ;;  %vm2050_vm4 = vcmp.lt.s32.totalorder %v17794_v3, 1  ;;  %vm2053_vm12 = vcmp.lt.s32.totalorder %v17794_v3, 4  ;;  %17797 = vst [vmem:[#allocation39_spill] sm:$0xff] %v14691_v42 }
 0x29e   : > { %v4183_v8 = vsel %vm4100_vm11, %v4182_v33, %v4181_v2  ;;  %v4191_v10 = vadd.s32 3, %v14641_v16  ;;  %v2026_v52 = vor.u32 8388608, %v2025_v27  ;;  %v2049_v49 = vor.u32 %v2048_v58, %v2047_v55 }
 0x29f   : > { %v4186_v22 = vsel %vm14595_vm3, %v14381_v39, %v4183_v8  ;;  %v1980_v18 = vsub.s32 0, %v14646_v24  ;;  %vm2052_vm13 = vcmp.lt.s32.totalorder %v17794_v3, 3  ;;  %v2055_v23 = vsel %vm2053_vm12, %v2043_v46, 2102212464 }
 0x2a0   : > { %10856 = vcosq.f32 %v4186_v22  ;;  %vm2051_vm10 = vcmp.lt.s32.totalorder %v17794_v3, 2  ;;  %v2058_v11 = vsel %vm2050_vm4, %v2037_v29, %v2040_v25  ;;  %v2059_v44 = vsel %vm2053_vm12, %v2046_v45, 920167782 }
 0x2a1   : > { %10858 = vsinq.f32 %v4186_v22  ;;  %v9708_v37 = vmin.u32 %v1980_v18, %v14646_v24  ;;  %v2054_v5 = vsel %vm2050_vm4, %v2034_v12, %v2037_v29  ;;  %v2062_v17 = vsel %vm2050_vm4, %v2040_v25, %v2043_v46  ;;  %v14728_v18 = vpop.permute.xlu1 %1235 }
 0x2a2   : > { %v2056_v32 = vsel %vm2052_vm13, %v2040_v25, %v2055_v23  ;;  %v2060_v53 = vsel %vm2052_vm13, %v2043_v46, %v2059_v44  ;;  %v2063_v51 = vsel %vm2053_vm12, %v2049_v49, 1326507024  ;;  %v2066_v20 = vshll.u32 %v2026_v52, 8  ;;  %17798 = vst [vmem:[#allocation27_spill] sm:$0xff] %v14728_v18 }
 0x2a3   : > { %v4310_v36 = vshrl.u32 %v4309_v35, 23  ;;  %v1982_v19 = vclz %v9708_v37  ;;  %v2061_v30 = vsel %vm2051_vm10, %v2058_v11, %v2060_v53  ;;  %v2064_v31 = vsel %vm2052_vm13, %v2046_v45, %v2063_v51 }
 0x2a4   : > { %v4214_v60 = vsel %vm4213_vm8, %v14541_v26, 0  ;;  %v2065_v2 = vsel %vm2051_vm10, %v2062_v17, %v2064_v31  ;;  %v14695_v56 = vmul.u32.u64.low %v2066_v20, %v2061_v30  ;;  %v14696_v35 = vmul.u32.u64.high %v2066_v20, %v2061_v30, %v14695_v56 }
 0x2a5   : > { %v9709_v27 = vadd.s32 4294967294, %v1982_v19  ;;  %v2057_v55 = vsel %vm2051_vm10, %v2054_v5, %v2056_v32  ;;  %v14701_v58 = vmul.u32.u64.low %v2066_v20, %v2065_v2  ;;  %v14702_v43 = vmul.u32.u64.high %v2066_v20, %v2065_v2, %v14701_v58 }
 0x2a6   : > { %v14705_v26 = vshrl.u32 %v14357_v14, 5  ;;  %v14708_v12 = vand.u32 31, %v14357_v14  ;;  %v4192_v33 = vand.u32 3, %v4191_v10  ;;  %v2000_v29 = vsub.s32 4, %v14624_v7 }
 0x2a7   : > { %v9799_v25 = vadd.s32 4294967169, %v4310_v36  ;;  %v14711_v45 = vand.u32 31, %v4214_v60  ;;  %v1970_v46 = vadd.s32 %v14556_v13, %v14554_v47  ;;  %vm9710_vm2 = vcmp.lt.s32.totalorder %v9709_v27, 0  ;;  %v14724_v13 = vpop.permute.xlu0 %1270 }
 0x2a8   : > { %vm4190_vm5 = vweird.f32 %v14381_v39  ;;  %v1985_v3 = vsel %vm9710_vm2, 0, %v9709_v27  ;;  %v2073_v8 = vmul.u32 %v2066_v20, %v2057_v55  ;;  %v2076_v52 = vadd.s32 1, %v14696_v35 }
 0x2a9   : > { %vm1916_vm1 = vcmp.lt.s32.totalorder %v14479_v50, 0  ;;  %v1986_v14 = vsub.s32 32, %v1985_v3  ;;  %v1987_v10 = vshll.u32 %v14646_v24, %v1985_v3  ;;  %v1990_v49 = vsub.s32 4294967266, %v1985_v3  ;;  %v14760_v3 = vpop.permute.xlu1 %1245 }
 0x2aa   : > { %v14719_v22 = vpop.eup %10856  ;;  %vm4194_vm9 = vcmp.eq.s32.totalorder %v4192_v33, 0  ;;  %vm4197_vm0 = vcmp.eq.s32.totalorder %v4192_v33, 2  ;;  %v2001_v47 = vsel %vm1916_vm1, %v2000_v29, %v14624_v7  ;;  %vm2075_vm7 = vc.u32 %v14702_v43, %v14695_v56  ;;  %17801 = vst [vmem:[#allocation22_spill] sm:$0xff] %v14760_v3 }
 0x2ab   : > { %v14730_v23 = vpop.eup %10858  ;;  %v4198_v24 = vxor.u32 2147483648, %v14719_v22  ;;  %v1988_v11 = vshrl.u32 %v1970_v46, %v1986_v14  ;;  %v1991_v44 = vadd.s32 127, %v1990_v49  ;;  %v2077_v37 = vsel %vm2075_vm7, %v2076_v52, %v14696_v35  ;;  %v14758_v46 = vpop.permute.xlu0 %1280  ;;  %v14768_v14 = vld [vmem:[%s11274_s28 + $0x38] sm:$0xff] }
 0x2ac   : > { %vm4193_vm15 = vcmp.lt.s32.totalorder %v4192_v33, 2  ;;  %v17572_v5 = vxor.u32 2147483648, %v14730_v23  ;;  %vm14737_vm14 = vcmp.le.f32.partialorder %v1914_v61, 0.7853982  ;;  %v2078_v17 = vadd.s32 %v2077_v37, %v2073_v8 }
 0x2ad   : > { %v4199_v32 = vsel %vm4197_vm0, %v4198_v24, %v14730_v23  ;;  %v1989_v53 = vor.u32 %v1988_v11, %v1987_v10  ;;  %v1992_v51 = vshll.u32 %v1991_v44, 23  ;;  %v2003_v20 = vsel %vm14737_vm14, 0, %v2001_v47 }
 0x2ae   : > { %v4196_v36 = vsel %vm4194_vm9, %v14719_v22, %v17572_v5  ;;  %v2079_v19 = vadd.s32 536870912, %v2078_v17  ;;  %v2007_v30 = vadd.s32 3, %v2003_v20  ;;  %v14749_v61 = vand.u32 3, %v14641_v16 }
 0x2af   : > { %v2137_v31 = vsub.s32 32, %v14708_v12  ;;  %v4200_v2 = vsel %vm4193_vm15, %v4196_v36, %v4199_v32  ;;  %v1993_v35 = vor.u32 4788187, %v1992_v51  ;;  %v1996_v27 = vcvt.s32.f32 %v1989_v53 }
 0x2b0   : > { %v14752_v55 = vadd.s32 1, %v9799_v25  ;;  %v14754_v58 = vshrl.u32 %v4214_v60, 5  ;;  %v4201_v29 = vsel %vm4190_vm5, nan, %v4200_v2  ;;  %v2080_v33 = vshrl.u32 %v2079_v19, 30 }
 0x2b1   : > { %v14763_v16 = vsub.s32 32, %v14711_v45  ;;  %4855 = vperm.xlu0 %10550, %v4201_v29   ;;  %v1994_v8 = vand.u32 2147483647, %v1993_v35  ;;  %v14765_v52 = vand.u32 3, %v2003_v20  ;;  %v17573_v60 = vand.u32 2147483647, %v14768_v14 }
 0x2b2   : > { %vm2020_vm6 = vcmp.lt.s32.totalorder %v14604_v62, 0  ;;  %v14774_v25 = vadd.s32 %v14695_v56, %v14702_v43  ;;  %v2081_v10 = vshll.u32 %v2080_v33, 30  ;;  %v14776_v49 = vand.u32 3, %v2007_v30  ;;  %v14797_v30 = vpop.permute.xlu0 %1290 }
 0x2b3   : > { %vm7724_vm3 = vcmp.eq.s32.totalorder %v14749_v61, 0  ;;  %v1997_v47 = vmul.f32 %v1996_v27, %v1994_v8  ;;  %vm7727_vm11 = vcmp.eq.s32.totalorder %v14749_v61, 2  ;;  %v2139_v11 = vshll.u32 %v17653_v0, %v14708_v12  ;;  %v14802_v27 = vpop.permute.xlu1 %1255 }
 0x2b4   : > { %v2140_v44 = vshrl.u32 %v17654_v28, %v2137_v31  ;;  %v14783_v37 = vsub.s32 %v2078_v17, %v2081_v10  ;;  %v2142_v32 = vshll.u32 %v17654_v28, %v14708_v12  ;;  %v2143_v56 = vshrl.u32 %v17655_v41, %v2137_v31 }
 0x2b5   : > { %v2145_v43 = vshll.u32 %v17655_v41, %v14708_v12  ;;  %v1998_v53 = vxor.u32 2147483648, %v1997_v47  ;;  %v2146_v51 = vshrl.u32 %v17665_v4, %v2137_v31  ;;  %v2148_v20 = vshll.u32 %v17665_v4, %v14708_v12 }
 0x2b6   : > { %v2149_v36 = vshrl.u32 %v17658_v9, %v2137_v31  ;;  %v2084_v19 = vsub.s32 0, %v14783_v37  ;;  %vm7723_vm8 = vcmp.lt.s32.totalorder %v14749_v61, 2  ;;  %v7729_v17 = vsel %vm7727_vm11, %v4198_v24, %v14730_v23 }
 0x2b7   : > { %v2129_v2 = vand.u32 8388607, %v17573_v60  ;;  %v2138_v35 = vshrl.u32 %v17653_v0, %v2137_v31  ;;  %v1999_v29 = vsel %vm1916_vm1, %v1998_v53, %v1997_v47  ;;  %v2104_v8 = vsub.s32 4, %v2080_v33 }
 0x2b8   : > { %v2151_v10 = vshll.u32 %v17658_v9, %v14708_v12  ;;  %v2152_v5 = vshrl.u32 %v17659_v54, %v2137_v31  ;;  %v2002_v24 = vsel %vm14737_vm14, %v14479_v50, %v1999_v29  ;;  %vm14814_vm4 = vcmp.le.f32.partialorder %v2018_v63, 0.7853982 }
 0x2b9   : > { %v9712_v38 = vmin.u32 %v2084_v19, %v14783_v37  ;;  %v2141_v3 = vor.u32 %v2140_v44, %v2139_v11  ;;  %v2144_v47 = vor.u32 %v2143_v56, %v2142_v32  ;;  %10860 = vcosq.f32 %v2002_v24 }
 0x2ba   : > { %v2147_v53 = vor.u32 %v2146_v51, %v2145_v43  ;;  %v2150_v34 = vor.u32 %v2149_v36, %v2148_v20  ;;  %v2153_v12 = vor.u32 %v2152_v5, %v2151_v10  ;;  %10862 = vsinq.f32 %v2002_v24 }
 0x2bb   : > { %v2086_v31 = vclz %v9712_v38  ;;  %v17804_v18 = vxor.u32 2147483648, %v14730_v23  ;;  %v2130_v63 = vor.u32 8388608, %v2129_v2  ;;  %vm5564_vm12 = vcmp.eq.s32.totalorder %v14765_v52, 2 }
 0x2bc   : > { %v2105_v19 = vsel %vm2020_vm6, %v2104_v8, %v2080_v33  ;;  %vm2154_vm13 = vcmp.lt.s32.totalorder %v14705_v26, 1  ;;  %vm2155_vm10 = vcmp.lt.s32.totalorder %v14705_v26, 2  ;;  %vm2156_vm2 = vcmp.lt.s32.totalorder %v14705_v26, 3 }
 0x2bd   : > { %v7726_v7 = vsel %vm7724_vm3, %v14719_v22, %v17804_v18  ;;  %vm5561_vm1 = vcmp.eq.s32.totalorder %v14765_v52, 0  ;;  %v9713_v38 = vadd.s32 4294967294, %v2086_v31  ;;  %vm2157_vm9 = vcmp.lt.s32.totalorder %v14705_v26, 4  ;;  %v14832_v22 = vpop.permute.xlu0 %1300  ;;  %v14834_v18 = vpop.permute.xlu1 %1265 }
 0x2be   : > { %v2158_v23 = vsel %vm2154_vm13, %v2138_v35, %v2141_v3  ;;  %v2162_v5 = vsel %vm2154_vm13, %v2141_v3, %v2144_v47  ;;  %17805 = vst [vmem:[#allocation24_spill] sm:$0xff] %v14832_v22  ;;  %vm5560_vm0 = vcmp.lt.s32.totalorder %v14765_v52, 2  ;;  %v2159_v33 = vsel %vm2157_vm9, %v2147_v53, 2102212464 }
 0x2bf   : > { %v2163_v11 = vsel %vm2157_vm9, %v2150_v34, 920167782  ;;  %v2166_v44 = vsel %vm2154_vm13, %v2144_v47, %v2147_v53  ;;  %v2167_v32 = vsel %vm2157_vm9, %v2153_v12, 1326507024  ;;  %vm2006_vm7 = vweird.f32 %v14479_v50 }
 0x2c0   : > { %vm9714_vm15 = vcmp.lt.s32.totalorder %v9713_v38, 0  ;;  %v2160_v56 = vsel %vm2156_vm2, %v2144_v47, %v2159_v33  ;;  %v2164_v43 = vsel %vm2156_vm2, %v2147_v53, %v2163_v11  ;;  %v2168_v3 = vsel %vm2156_vm2, %v2150_v34, %v2167_v32 }
 0x2c1   : > { %v2089_v51 = vsel %vm9714_vm15, 0, %v9713_v38  ;;  %vm2009_vm14 = vcmp.lt.s32.totalorder %v14776_v49, 2  ;;  %v2165_v20 = vsel %vm2155_vm10, %v2162_v5, %v2164_v43  ;;  %v2169_v36 = vsel %vm2155_vm10, %v2166_v44, %v2168_v3 }
 0x2c2   : > { %v2090_v2 = vsub.s32 32, %v2089_v51  ;;  %v2091_v35 = vshll.u32 %v14783_v37, %v2089_v51  ;;  %v2094_v29 = vsub.s32 4294967266, %v2089_v51  ;;  %v2170_v8 = vshll.u32 %v2130_v63, 8  ;;  %v14863_v37 = vpop.permute.xlu0 %1310  ;;  %v14865_v63 = vpop.permute.xlu1 %1275 }
 0x2c3   : > { %v14852_v10 = vsel %vm14814_vm4, 0, %v2105_v19  ;;  %v7730_v34 = vsel %vm7723_vm8, %v7726_v7, %v7729_v17  ;;  %v2161_v24 = vsel %vm2155_vm10, %v2158_v23, %v2160_v56  ;;  %v17574_v47 = vand.u32 2147483647, %v14397_v48  ;;  %17806 = vst [vmem:[#allocation23_spill] sm:$0xff] %v14863_v37  ;;  %v10861_v19 = vpop.eup %10860  ;;  %v17851_v37 = vld [vmem:[#allocation12_spill] sm:$0xff] }
 0x2c4   : > { %v2092_v53 = vshrl.u32 %v14774_v25, %v2090_v2  ;;  %v2095_v12 = vadd.s32 127, %v2094_v29  ;;  %v14860_v31 = vmul.u32.u64.low %v2170_v8, %v2169_v36  ;;  %v14861_v38 = vmul.u32.u64.high %v2170_v8, %v2169_v36, %v14860_v31  ;;  %v10863_v17 = vpop.eup %10862 }
 0x2c5   : > { %vm2010_vm3 = vcmp.eq.s32.totalorder %v14776_v49, 0  ;;  %vm2013_vm11 = vcmp.eq.s32.totalorder %v14776_v49, 2  ;;  %v14869_v61 = vmul.u32.u64.low %v2170_v8, %v2165_v20  ;;  %v14870_v26 = vmul.u32.u64.high %v2170_v8, %v2165_v20, %v14869_v61 }
 0x2c6   : > { %v2014_v7 = vxor.u32 2147483648, %v10861_v19  ;;  %v2093_v25 = vor.u32 %v2092_v53, %v2091_v35  ;;  %v2096_v23 = vshll.u32 %v2095_v12, 23  ;;  %v7731_v5 = vsel %vm4190_vm5, nan, %v7730_v34  ;;  %v14899_v34 = vpop.permute.xlu0 %1320 }
 0x2c7   : > { %v2011_v33 = vxor.u32 2147483648, %v10863_v17  ;;  %v14876_v11 = vadd.s32 3, %v14852_v10  ;;  %v2177_v44 = vmul.u32 %v2170_v8, %v2161_v24  ;;  %v14880_v32 = vand.u32 8388607, %v17574_v47  ;;  %17807 = vst [vmem:[#allocation29_spill] sm:$0xff] %v14899_v34  ;;  %v14901_v24 = vpop.permute.xlu1 %1285 }
 0x2c8   : > { %v5566_v56 = vsel %vm5564_vm12, %v2014_v7, %v10863_v17  ;;  %v2097_v43 = vor.u32 4788187, %v2096_v23  ;;  %v2100_v3 = vcvt.s32.f32 %v2093_v25  ;;  %v2015_v51 = vsel %vm2013_vm11, %v2014_v7, %v10863_v17 }
 0x2c9   : > { %v5563_v39 = vsel %vm5561_vm1, %v10861_v19, %v2011_v33  ;;  %v2012_v20 = vsel %vm2010_vm3, %v10861_v19, %v2011_v33  ;;  %vm2179_vm5 = vc.u32 %v14861_v38, %v14869_v61  ;;  %v4218_v36 = vshrl.u32 %v17653_v0, %v14763_v16 }
 0x2ca   : > { %v5567_v2 = vsel %vm5560_vm0, %v5563_v39, %v5566_v56  ;;  %v2098_v35 = vand.u32 2147483647, %v2097_v43  ;;  %v2016_v29 = vsel %vm2009_vm14, %v2012_v20, %v2015_v51  ;;  %v2180_v8 = vadd.s32 1, %v14870_v26 }
 0x2cb   : > { %v5568_v53 = vsel %vm2006_vm7, nan, %v5567_v2  ;;  %v2017_v12 = vsel %vm2006_vm7, nan, %v2016_v29  ;;  %v4219_v52 = vshll.u32 %v17653_v0, %v14711_v45  ;;  %v4220_v31 = vshrl.u32 %v17654_v28, %v14763_v16 }
 0x2cc   : > { %8275 = vperm.xlu0 %10550, %v5568_v53   ;;  %v2101_v49 = vmul.f32 %v2100_v3, %v2098_v35  ;;  %4750 = vperm.xlu1 %10551, %v2017_v12   ;;  %v2181_v19 = vsel %vm2179_vm5, %v2180_v8, %v14870_v26  ;;  %v4210_v17 = vor.u32 8388608, %v14880_v32  ;;  %v4222_v7 = vshll.u32 %v17654_v28, %v14711_v45  ;;  %v14929_v3 = vpop.permute.xlu1 %1295  ;;  %v14933_v35 = vpop.f32.mrb[32].mxu0 }
 0x2cd   : > { %v2182_v25 = vadd.s32 %v2181_v19, %v2177_v44  ;;  %v4223_v50 = vshrl.u32 %v17655_v41, %v14763_v16  ;;  %v4225_v23 = vshll.u32 %v17655_v41, %v14711_v45  ;;  %v4226_v33 = vshrl.u32 %v17665_v4, %v14763_v16  ;;  %v14927_v44 = vpop.permute.xlu0 %1330  ;;  %17809 = vst [vmem:[#allocation32_spill] sm:$0xff] %v14929_v3 }
 0x2ce   : > { %v2102_v56 = vxor.u32 2147483648, %v2101_v49  ;;  %v4228_v43 = vshll.u32 %v17665_v4, %v14711_v45  ;;  %v4229_v26 = vshrl.u32 %v17658_v9, %v14763_v16  ;;  %v4231_v32 = vshll.u32 %v17658_v9, %v14711_v45  ;;  %17808 = vst [vmem:[#allocation33_spill] sm:$0xff] %v14927_v44  ;;  %17810 = vst [vmem:[#allocation28_spill] sm:$0xff] %v14933_v35  ;;  %v14938_v45 = vpop.f32.mrb[33].mxu0 }
 0x2cf   : > { %v2183_v51 = vadd.s32 536870912, %v2182_v25  ;;  %v4221_v39 = vor.u32 %v4220_v31, %v4219_v52  ;;  %v4224_v20 = vor.u32 %v4223_v50, %v4222_v7  ;;  %v4232_v2 = vshrl.u32 %v17659_v54, %v14763_v16  ;;  %17811 = vst [vmem:[#allocation31_spill] sm:$0xff] %v14938_v45  ;;  %v14946_v16 = vpop.f32.mrb[34].mxu0 }
 0x2d0   : > { %v2103_v29 = vsel %vm2020_vm6, %v2102_v56, %v2101_v49  ;;  %8380 = vperm.xlu1 %10551, %v7731_v5   ;;  %v4227_v8 = vor.u32 %v4226_v33, %v4225_v23  ;;  %v4230_v53 = vor.u32 %v4229_v26, %v4228_v43  ;;  %vm4234_vm8 = vcmp.lt.s32.totalorder %v14754_v58, 1  ;;  %17812 = vst [vmem:[#allocation25_spill] sm:$0xff] %v14946_v16  ;;  %v14954_v19 = vpop.permute.xlu1 %1305  ;;  %v14961_v23 = vpop.f32.mrb[35].mxu0 }
 0x2d1   : > { %v2106_v12 = vsel %vm14814_vm4, %v14604_v62, %v2103_v29  ;;  %v14943_v52 = vshrl.u32 %v2183_v51, 30  ;;  %v4233_v31 = vor.u32 %v4232_v2, %v4231_v32  ;;  %vm4237_vm12 = vcmp.lt.s32.totalorder %v14754_v58, 4  ;;  %v14952_v49 = vpop.permute.xlu0 %1340  ;;  %17814 = vst [vmem:[#allocation20_spill] sm:$0xff] %v14954_v19  ;;  %17815 = vst [vmem:[#allocation21_spill] sm:$0xff] %v14961_v23  ;;  %v14971_v32 = vpop.f32.mrb[36].mxu0 }
 0x2d2   : > { %10864 = vcosq.f32 %v2106_v12  ;;  %vm4235_vm6 = vcmp.lt.s32.totalorder %v14754_v58, 2  ;;  %vm4236_vm13 = vcmp.lt.s32.totalorder %v14754_v58, 3  ;;  %v4239_v5 = vsel %vm4237_vm12, %v4227_v8, 2102212464  ;;  %17813 = vst [vmem:[#allocation36_spill] sm:$0xff] %v14952_v49  ;;  %17816 = vst [vmem:[#allocation2_spill] sm:$0xff] %v14971_v32 }
 0x2d3   : > { %10866 = vsinq.f32 %v2106_v12  ;;  %v2185_v60 = vshll.u32 %v14943_v52, 30  ;;  %v4238_v7 = vsel %vm4234_vm8, %v4218_v36, %v4221_v39  ;;  %v4242_v50 = vsel %vm4234_vm8, %v4221_v39, %v4224_v20  ;;  %v17817_v36 = vld [vmem:[#allocation11_spill] sm:$0xff]  ;;  %v14983_v12 = vpop.f32.mrb[37].mxu0 }
 0x2d4   : > { %v4240_v33 = vsel %vm4236_vm13, %v4224_v20, %v4239_v5  ;;  %v4243_v56 = vsel %vm4237_vm12, %v4230_v53, 920167782  ;;  %v4246_v43 = vsel %vm4234_vm8, %v4224_v20, %v4227_v8  ;;  %v4247_v26 = vsel %vm4237_vm12, %v4233_v31, 1326507024  ;;  %17818 = vst [vmem:[#allocation9_spill] sm:$0xff] %v14983_v12 }
 0x2d5   : > { %v14975_v51 = vshll.u32 %v17665_v4, %v17817_v36  ;;  %v14977_v39 = vsub.s32 %v2182_v25, %v2185_v60  ;;  %v4244_v2 = vsel %vm4236_vm13, %v4227_v8, %v4243_v56  ;;  %v4248_v29 = vsel %vm4236_vm13, %v4230_v53, %v4247_v26  ;;  %v14990_v47 = vpop.permute.xlu0 %1350  ;;  %v14992_v25 = vpop.permute.xlu1 %1315 }
 0x2d6   : > { %vm4317_vm4 = vcmp.gt.s32.totalorder %v14752_v55, 0  ;;  %v4245_v20 = vsel %vm4235_vm6, %v4242_v50, %v4244_v2  ;;  %v4249_v31 = vsel %vm4235_vm6, %v4246_v43, %v4248_v29  ;;  %v4250_v5 = vshll.u32 %v4210_v17, 8  ;;  %17819 = vst [vmem:[#allocation15_spill] sm:$0xff] %v14990_v47  ;;  %17820 = vst [vmem:[#allocation14_spill] sm:$0xff] %v14992_v25  ;;  %v14999_v26 = vpop.f32.mrb[38].mxu0  ;;  %v17823_v47 = vld [vmem:[#allocation17_spill] sm:$0xff] }
 0x2d7   : > { %v2112_v8 = vand.u32 3, %v14876_v11  ;;  %v5662_v60 = vand.u32 3, %v14852_v10  ;;  %v2188_v53 = vsub.s32 0, %v14977_v39  ;;  %v4241_v56 = vsel %vm4235_vm6, %v4238_v7, %v4240_v33  ;;  %17821 = vst [vmem:[#allocation19_spill] sm:$0xff] %v14999_v26  ;;  %v15008_v29 = vpop.f32.mrb[39].mxu0 }
 0x2d8   : > { %v15001_v50 = vmul.u32.u64.low %v4250_v5, %v4249_v31  ;;  %v15002_v2 = vmul.u32.u64.high %v4250_v5, %v4249_v31, %v15001_v50  ;;  %v15004_v43 = vmul.u32.u64.low %v4250_v5, %v4245_v20  ;;  %v15005_v17 = vmul.u32.u64.high %v4250_v5, %v4245_v20, %v15004_v43  ;;  %17822 = vst [vmem:[#allocation35_spill] sm:$0xff] %v15008_v29  ;;  %v15018_v33 = vpop.f32.mrb[40].mxu0 }
 0x2d9   : > { %v2461_v11 = vshrl.u32 %v17658_v9, %v17823_v47  ;;  %v15014_v10 = vshll.u32 %v17658_v9, %v17817_v36  ;;  %v9716_v58 = vmin.u32 %v2188_v53, %v14977_v39  ;;  %v2208_v7 = vsub.s32 4, %v14943_v52  ;;  %17824 = vst [vmem:[#allocation40_spill] sm:$0xff] %v15018_v33  ;;  %v15033_v53 = vpop.permute.xlu0 %4725  ;;  %v15035_v44 = vpop.permute.xlu1 %1325 }
 0x2da   : > { %v15023_v20 = vsel %vm4317_vm4, %v14752_v55, 0  ;;  %vm2110_vm10 = vweird.f32 %v14604_v62  ;;  %v17825_v31 = vand.u32 2147483647, %v14768_v14  ;;  %vm2124_vm1 = vcmp.lt.s32.totalorder %v14768_v14, 0  ;;  %17828 = vst [vmem:[#allocation34_spill] sm:$0xff] %v15033_v53  ;;  %17829 = vst [vmem:[#allocation18_spill] sm:$0xff] %v15035_v44 }
 0x2db   : > { %vm5663_vm9 = vcmp.lt.s32.totalorder %v5662_v60, 2  ;;  %vm5664_vm0 = vcmp.eq.s32.totalorder %v5662_v60, 0  ;;  %v2190_v36 = vclz %v9716_v58  ;;  %v4257_v49 = vmul.u32 %v4250_v5, %v4241_v56  ;;  %v15037_v55 = vpop.f32.mrb[41].mxu0 }
 0x2dc   : > { %vm15028_vm2 = vcmp.le.f32.partialorder %v17825_v31, 0.7853982  ;;  %17830 = vst [vmem:[#allocation3_spill] sm:$0xff] %v15037_v55  ;;  %v10865_v57 = vpop.eup %10864  ;;  %vm2117_vm7 = vcmp.eq.s32.totalorder %v2112_v8, 2  ;;  %vm5667_vm15 = vcmp.eq.s32.totalorder %v5662_v60, 2  ;;  %vm4259_vm14 = vc.u32 %v15002_v2, %v15004_v43  ;;  %v15042_v42 = vpop.f32.mrb[42].mxu0 }
 0x2dd   : > { %v4260_v31 = vadd.s32 1, %v15005_v17  ;;  %17831 = vst [vmem:[#allocation7_spill] sm:$0xff] %v15042_v42  ;;  %v10867_v45 = vpop.eup %10866  ;;  %vm2114_vm3 = vcmp.eq.s32.totalorder %v2112_v8, 0  ;;  %v2118_v35 = vxor.u32 2147483648, %v10865_v57  ;;  %v9717_v44 = vadd.s32 4294967294, %v2190_v36  ;;  %v15047_v56 = vpop.f32.mrb[43].mxu0 }
 0x2de   : > { %v2209_v5 = vsel %vm2124_vm1, %v2208_v7, %v14943_v52  ;;  %17832 = vst [vmem:[#allocation4_spill] sm:$0xff] %v15047_v56  ;;  %vm2113_vm11 = vcmp.lt.s32.totalorder %v2112_v8, 2  ;;  %v2115_v58 = vxor.u32 2147483648, %v10867_v45  ;;  %v2178_v55 = vadd.s32 %v14869_v61, %v14861_v38  ;;  %v15052_v1 = vpop.permute.xlu0 %4780  ;;  %v15054_v42 = vpop.permute.xlu1 %1335 }
 0x2df   : > { %v4261_v33 = vsel %vm4259_vm14, %v4260_v31, %v15005_v17  ;;  %17833 = vst [vmem:[#allocation5_spill] sm:$0xff] %v15054_v42  ;;  %v2119_v29 = vsel %vm2117_vm7, %v2118_v35, %v10867_v45  ;;  %v5669_v36 = vsel %vm5667_vm15, %v2118_v35, %v10867_v45  ;;  %vm9718_vm5 = vcmp.lt.s32.totalorder %v9717_v44, 0  ;;  %v15058_v52 = vpop.f32.mrb[44].mxu0 }
 0x2e0   : > { %v4262_v26 = vadd.s32 %v4261_v33, %v4257_v49  ;;  %17834 = vst [vmem:[#allocation10_spill] sm:$0xff] %v15058_v52  ;;  %v2116_v7 = vsel %vm2114_vm3, %v10865_v57, %v2115_v58  ;;  %v5666_v56 = vsel %vm5664_vm0, %v10865_v57, %v2115_v58  ;;  %v2193_v38 = vsel %vm9718_vm5, 0, %v9717_v44  ;;  %v15066_v17 = vpop.f32.mrb[45].mxu0 }
 0x2e1   : > { %v15064_v61 = vsel %vm15028_vm2, 0, %v2209_v5  ;;  %17835 = vst [vmem:[#allocation8_spill] sm:$0xff] %v15066_v17  ;;  %v2120_v31 = vsel %vm2113_vm11, %v2116_v7, %v2119_v29  ;;  %v5670_v35 = vsel %vm5663_vm9, %v5666_v56, %v5669_v36  ;;  %v2194_v45 = vsub.s32 32, %v2193_v38  ;;  %v15071_v33 = vpop.f32.mrb[46].mxu0  ;;  %v15103_v17 = vld [vmem:[%s11274_s28 + $0x40] sm:$0xff] }
 0x2e2   : > { %v2195_v49 = vshll.u32 %v14977_v39, %v2193_v38  ;;  %17836 = vst [vmem:[#allocation42_spill] sm:$0xff] %v15071_v33  ;;  %v15075_v57 = vshrl.u32 %v17659_v54, %v17823_v47  ;;  %v2121_v44 = vsel %vm2110_vm10, nan, %v2120_v31  ;;  %v2198_v5 = vsub.s32 4294967266, %v2193_v38  ;;  %v15079_v42 = vpop.permute.xlu0 %4785  ;;  %v15081_v8 = vpop.permute.xlu1 %1345  ;;  %v15087_v39 = vld [vmem:[%s11274_s28 + $0x48] sm:$0xff]  ;;  %v17841_v33 = vld [vmem:[#allocation6_spill] sm:$0xff] }
 0x2e3   : > { %v4263_v58 = vadd.s32 536870912, %v4262_v26  ;;  %17837 = vst [vmem:[#allocation43_spill] sm:$0xff] %v15081_v8  ;;  %v15084_v60 = vor.u32 %v2461_v11, %v14975_v51  ;;  %v15091_v56 = vand.u32 31, %v15023_v20  ;;  %4755 = vperm.xlu0 %10550, %v2121_v44   ;;  %v2196_v36 = vshrl.u32 %v2178_v55, %v2194_v45  ;;  %v15093_v7 = vpop.f32.mrb[47].mxu0  ;;  %v17842_v45 = vld [vmem:[#allocation13_spill] sm:$0xff] }
 0x2e4   : > { %17839 = vst [vmem:[#allocation45_spill] sm:$0xff] %v15093_v7  ;;  %v5671_v38 = vsel %vm2110_vm10, nan, %v5670_v35  ;;  %v2199_v31 = vadd.s32 127, %v2198_v5  ;;  %v2215_v8 = vadd.s32 3, %v15064_v61  ;;  %v15100_v51 = vpop.f32.mrb[48].mxu0  ;;  %v2243_v55 = vshll.u32 %v17653_v0, %v17841_v33 }
 0x2e5   : > { %17838 = vst [vmem:[#allocation44_spill] sm:$0xff] %v15084_v60  ;;  %v15098_v47 = vshrl.u32 %v4263_v58, 30  ;;  %17840 = vst [vmem:[#allocation46_spill] sm:$0xff] %v15100_v51  ;;  %v2197_v11 = vor.u32 %v2196_v36, %v2195_v49  ;;  %v2244_v44 = vshrl.u32 %v17654_v28, %v17842_v45  ;;  %v15110_v62 = vpop.f32.mrb[49].mxu0  ;;  %v2246_v58 = vshll.u32 %v17654_v28, %v17841_v33 }
 0x2e6   : > { %17843 = vst [vmem:[#allocation6_spill] sm:$0xff] %v15110_v62  ;;  %v2200_v35 = vshll.u32 %v2199_v31, 23  ;;  %v2247_v49 = vshrl.u32 %v17655_v41, %v17842_v45  ;;  %v15117_v36 = vpop.permute.xlu0 %4790  ;;  %v15119_v29 = vpop.permute.xlu1 %1355  ;;  %v2249_v51 = vshll.u32 %v17655_v41, %v17841_v33  ;;  %v2250_v7 = vshrl.u32 %v17665_v4, %v17842_v45 }
 0x2e7   : > { %v4265_v5 = vshll.u32 %v15098_v47, 30  ;;  %17844 = vst [vmem:[#allocation13_spill] sm:$0xff] %v15119_v29  ;;  %8280 = vperm.xlu0 %10550, %v5671_v38   ;;  %v2252_v31 = vshll.u32 %v17665_v4, %v17841_v33  ;;  %v2253_v62 = vshrl.u32 %v17658_v9, %v17842_v45  ;;  %v15129_v52 = vpop.f32.mrb[50].mxu0  ;;  %v15132_v12 = vshrl.u32 %v15023_v20, 5 }
 0x2e8   : > { %17845 = vst [vmem:[#allocation47_spill] sm:$0xff] %v15129_v52  ;;  %v2201_v32 = vor.u32 4788187, %v2200_v35  ;;  %v2204_v29 = vcvt.s32.f32 %v2197_v11  ;;  %v15136_v23 = vpop.f32.mrb[51].mxu0  ;;  %v15139_v6 = vsub.s32 32, %v15091_v56  ;;  %v15141_v16 = vand.u32 3, %v2215_v8 }
 0x2e9   : > { %v15134_v38 = vsub.s32 %v4262_v26, %v4265_v5  ;;  %17846 = vst [vmem:[#allocation48_spill] sm:$0xff] %v15136_v23  ;;  %v2255_v34 = vshll.u32 %v17658_v9, %v17841_v33  ;;  %v2256_v52 = vshrl.u32 %v17659_v54, %v17842_v45  ;;  %v15147_v25 = vpop.f32.mrb[52].mxu0  ;;  %v17848_v26 = vand.u32 2147483647, %v15103_v17 }
 0x2ea   : > { %17847 = vst [vmem:[#allocation49_spill] sm:$0xff] %v15147_v25  ;;  %v2202_v20 = vand.u32 2147483647, %v2201_v32  ;;  %v2242_v5 = vshrl.u32 %v17653_v0, %v17842_v45  ;;  %v15154_v23 = vpop.permute.xlu0 %4795  ;;  %v15156_v8 = vpop.permute.xlu1 %4730  ;;  %v2245_v60 = vor.u32 %v2244_v44, %v2243_v55  ;;  %v2248_v33 = vor.u32 %v2247_v49, %v2246_v58  ;;  %v15174_v55 = vld [vmem:[%s11274_s28 + $0xd8] sm:$0xff] }
 0x2eb   : > { %v4268_v11 = vsub.s32 0, %v15134_v38  ;;  %v2233_v35 = vand.u32 8388607, %v17848_v26  ;;  %17849 = vst [vmem:[#allocation50_spill] sm:$0xff] %v15156_v8  ;;  %v2251_v19 = vor.u32 %v2250_v7, %v2249_v51  ;;  %v2254_v53 = vor.u32 %v2253_v62, %v2252_v31  ;;  %v15158_v3 = vpop.f32.mrb[53].mxu0 }
 0x2ec   : > { %17850 = vst [vmem:[#allocation51_spill] sm:$0xff] %v15158_v3  ;;  %v2205_v32 = vmul.f32 %v2204_v29, %v2202_v20  ;;  %vm2258_vm8 = vcmp.lt.s32.totalorder %v17851_v37, 1  ;;  %vm2261_vm12 = vcmp.lt.s32.totalorder %v17851_v37, 4  ;;  %v15163_v26 = vpop.f32.mrb[54].mxu0  ;;  %v15166_v45 = vand.u32 3, %v15064_v61 }
 0x2ed   : > { %v9796_v25 = vmin.u32 %v4268_v11, %v15134_v38  ;;  %17852 = vst [vmem:[#allocation12_spill] sm:$0xff] %v15163_v26  ;;  %v2257_v8 = vor.u32 %v2256_v52, %v2255_v34  ;;  %vm2260_vm6 = vcmp.lt.s32.totalorder %v17851_v37, 3  ;;  %v2263_v7 = vsel %vm2261_vm12, %v2251_v19, 2102212464  ;;  %v15171_v51 = vpop.f32.mrb[55].mxu0 }
 0x2ee   : > { %17853 = vst [vmem:[#allocation52_spill] sm:$0xff] %v15171_v51  ;;  %v2206_v29 = vxor.u32 2147483648, %v2205_v32  ;;  %vm4204_vm13 = vcmp.lt.s32.totalorder %v15174_v55, 0  ;;  %v2234_v62 = vor.u32 8388608, %v2233_v35  ;;  %vm2259_vm4 = vcmp.lt.s32.totalorder %v17851_v37, 2  ;;  %v15178_v58 = vpop.permute.xlu0 %4800  ;;  %v15180_v61 = vpop.permute.xlu1 %8305 }
 0x2ef   : > { %v4270_v44 = vclz %v9796_v25  ;;  %v4258_v34 = vadd.s32 %v15004_v43, %v15002_v2  ;;  %v2262_v52 = vsel %vm2258_vm8, %v2242_v5, %v2245_v60  ;;  %v2266_v49 = vsel %vm2258_vm8, %v2245_v60, %v2248_v33  ;;  %v15190_v25 = vpop.f32.mrb[56].mxu0 }
 0x2f0   : > { %v2267_v31 = vsel %vm2261_vm12, %v2254_v53, 920167782  ;;  %17854 = vst [vmem:[#allocation53_spill] sm:$0xff] %v15190_v25  ;;  %v2207_v20 = vsel %vm2124_vm1, %v2206_v29, %v2205_v32  ;;  %v2264_v35 = vsel %vm2260_vm6, %v2248_v33, %v2263_v7  ;;  %v15198_v43 = vpop.f32.mrb[57].mxu0  ;;  %v2270_v51 = vsel %vm2258_vm8, %v2248_v33, %v2251_v19  ;;  %v15236_v25 = vld [vmem:[%s11274_s28 + $0xe0] sm:$0xff] }
 0x2f1   : > { %v9797_v11 = vadd.s32 4294967294, %v4270_v44  ;;  %v2268_v2 = vsel %vm2260_vm6, %v2251_v19, %v2267_v31  ;;  %17855 = vst [vmem:[#allocation54_spill] sm:$0xff] %v15198_v43  ;;  %v2210_v60 = vsel %vm15028_vm2, %v14768_v14, %v2207_v20  ;;  %v2271_v32 = vsel %vm2261_vm12, %v2257_v8, 1326507024  ;;  %17859 = vst [vmem:[#allocation55_spill] sm:$0xff] %v15236_v25 }
 0x2f2   : > { %v2269_v5 = vsel %vm2259_vm4, %v2266_v49, %v2268_v2  ;;  %10868 = vcosq.f32 %v2210_v60  ;;  %v17856_v7 = vand.u32 2147483647, %v14397_v48  ;;  %v2272_v50 = vsel %vm2260_vm6, %v2254_v53, %v2271_v32  ;;  %v15217_v49 = vpop.permute.xlu0 %4805  ;;  %v15219_v31 = vpop.permute.xlu1 %8310 }
 0x2f3   : > { %vm9798_vm1 = vcmp.lt.s32.totalorder %v9797_v11, 0  ;;  %v2274_v44 = vshll.u32 %v2234_v62, 8  ;;  %10870 = vsinq.f32 %v2210_v60  ;;  %v4288_v8 = vsub.s32 4, %v15098_v47 }
 0x2f4   : > { %vm15211_vm10 = vcmp.le.f32.partialorder %v17856_v7, 0.7853982  ;;  %v4273_v19 = vsel %vm9798_vm1, 0, %v9797_v11  ;;  %v2273_v48 = vsel %vm2259_vm4, %v2270_v51, %v2272_v50  ;;  %v2265_v53 = vsel %vm2259_vm4, %v2262_v52, %v2264_v35 }
 0x2f5   : > { %v4274_v33 = vsub.s32 32, %v4273_v19  ;;  %v4275_v20 = vshll.u32 %v15134_v38, %v4273_v19  ;;  %v4278_v2 = vsub.s32 4294967266, %v4273_v19  ;;  %vm2217_vm2 = vcmp.lt.s32.totalorder %v15141_v16, 2 }
 0x2f6   : > { %v15227_v62 = vmul.u32.u64.low %v2274_v44, %v2273_v48  ;;  %v15228_v32 = vmul.u32.u64.high %v2274_v44, %v2273_v48, %v15227_v62  ;;  %v15230_v7 = vmul.u32.u64.low %v2274_v44, %v2269_v5  ;;  %v15231_v43 = vmul.u32.u64.high %v2274_v44, %v2269_v5, %v15230_v7  ;;  %v15239_v38 = vpop.permute.xlu0 %4810  ;;  %v15241_v50 = vpop.permute.xlu1 %8315 }
 0x2f7   : > { %v4276_v11 = vshrl.u32 %v4258_v34, %v4274_v33  ;;  %v4279_v60 = vadd.s32 127, %v4278_v2  ;;  %v17578_v51 = vand.u32 2147483647, %v15236_v25  ;;  %vm2214_vm9 = vweird.f32 %v14768_v14 }
 0x2f8   : > { %vm2218_vm0 = vcmp.eq.s32.totalorder %v15141_v16, 0  ;;  %v4289_v37 = vsel %vm4204_vm13, %v4288_v8, %v15098_v47  ;;  %v4323_v34 = vshll.u32 %v17653_v0, %v15091_v56  ;;  %v4324_v52 = vshrl.u32 %v17654_v28, %v15139_v6 }
 0x2f9   : > { %v4277_v35 = vor.u32 %v4276_v11, %v4275_v20  ;;  %v4280_v5 = vshll.u32 %v4279_v60, 23  ;;  %v2281_v19 = vmul.u32 %v2274_v44, %v2265_v53  ;;  %v15254_v48 = vand.u32 8388607, %v17578_v51 }
 0x2fa   : > { %vm2221_vm7 = vcmp.eq.s32.totalorder %v15141_v16, 2  ;;  %vm5766_vm15 = vcmp.lt.s32.totalorder %v15166_v45, 2  ;;  %vm2283_vm14 = vc.u32 %v15228_v32, %v15230_v7  ;;  %v2284_v47 = vadd.s32 1, %v15231_v43  ;;  %v15263_v44 = vpop.permute.xlu0 %8335  ;;  %v15265_v20 = vpop.permute.xlu1 %8320 }
 0x2fb   : > { %v4281_v8 = vor.u32 4788187, %v4280_v5  ;;  %v4284_v33 = vcvt.s32.f32 %v4277_v35  ;;  %vm5767_vm3 = vcmp.eq.s32.totalorder %v15166_v45, 0  ;;  %vm5770_vm11 = vcmp.eq.s32.totalorder %v15166_v45, 2  ;;  %17860 = vst [vmem:[#allocation56_spill] sm:$0xff] %v15263_v44  ;;  %17861 = vst [vmem:[#allocation57_spill] sm:$0xff] %v15265_v20 }
 0x2fc   : > { %v4291_v2 = vsel %vm15211_vm10, 0, %v4289_v37  ;;  %v2285_v53 = vsel %vm2283_vm14, %v2284_v47, %v15231_v43  ;;  %v15271_v11 = vor.u32 %v4324_v52, %v4323_v34  ;;  %v10869_v60 = vpop.eup %10868  ;;  %v4326_v51 = vshll.u32 %v17654_v28, %v15091_v56 }
 0x2fd   : > { %v4282_v5 = vand.u32 2147483647, %v4281_v8  ;;  %v2286_v35 = vadd.s32 %v2285_v53, %v2281_v19  ;;  %v4327_v26 = vshrl.u32 %v17655_v41, %v15139_v6  ;;  %v10871_v3 = vpop.eup %10870  ;;  %v2222_v25 = vxor.u32 2147483648, %v10869_v60 }
 0x2fe   : > { %v4329_v37 = vshll.u32 %v17655_v41, %v15091_v56  ;;  %v4330_v43 = vshrl.u32 %v17665_v4, %v15139_v6  ;;  %v4332_v34 = vshll.u32 %v17665_v4, %v15091_v56  ;;  %v2219_v52 = vxor.u32 2147483648, %v10871_v3  ;;  %v15285_v53 = vpop.permute.xlu0 %4820  ;;  %v15287_v62 = vpop.permute.xlu1 %8325 }
 0x2ff   : > { %v4285_v47 = vmul.f32 %v4284_v33, %v4282_v5  ;;  %v2287_v19 = vadd.s32 536870912, %v2286_v35  ;;  %v4333_v8 = vshrl.u32 %v17658_v9, %v15139_v6  ;;  %17862 = vst [vmem:[#allocation58_spill] sm:$0xff] %v15285_v53  ;;  %17863 = vst [vmem:[#allocation59_spill] sm:$0xff] %v15287_v62  ;;  %v2223_v28 = vsel %vm2221_vm7, %v2222_v25, %v10871_v3 }
 0x300   : > { %v5772_v41 = vsel %vm5770_vm11, %v2222_v25, %v10871_v3  ;;  %v4335_v20 = vshll.u32 %v17658_v9, %v15091_v56  ;;  %v4336_v33 = vshrl.u32 %v17659_v54, %v15139_v6  ;;  %v2220_v5 = vsel %vm2218_vm0, %v10869_v60, %v2219_v52 }
 0x301   : > { %v4286_v4 = vxor.u32 2147483648, %v4285_v47  ;;  %v5769_v53 = vsel %vm5767_vm3, %v10869_v60, %v2219_v52  ;;  %v15301_v62 = vshrl.u32 %v2287_v19, 30  ;;  %v2224_v44 = vsel %vm2217_vm2, %v2220_v5, %v2223_v28 }
 0x302   : > { %v5773_v3 = vsel %vm5766_vm15, %v5769_v53, %v5772_v41  ;;  %v4328_v25 = vor.u32 %v4327_v26, %v4326_v51  ;;  %v4331_v56 = vor.u32 %v4330_v43, %v4329_v37  ;;  %v2225_v54 = vsel %vm2214_vm9, nan, %v2224_v44  ;;  %v15312_v52 = vpop.permute.xlu1 %8330  ;;  %v15319_v16 = vpop.permute.xlu0 %8345 }
 0x303   : > { %v4287_v9 = vsel %vm4204_vm13, %v4286_v4, %v4285_v47  ;;  %v2289_v22 = vshll.u32 %v15301_v62, 30  ;;  %v4334_v60 = vor.u32 %v4333_v8, %v4332_v34  ;;  %4760 = vperm.xlu0 %10550, %v2225_v54   ;;  %v4337_v41 = vor.u32 %v4336_v33, %v4335_v20  ;;  %v11130_v54 = vld [vmem:[%s11274_s28 + $0xf0] sm:$0xff] }
 0x304   : > { %v4290_v28 = vsel %vm15211_vm10, %v15174_v55, %v4287_v9  ;;  %vm4338_vm5 = vcmp.lt.s32.totalorder %v15132_v12, 1  ;;  %vm4341_vm8 = vcmp.lt.s32.totalorder %v15132_v12, 4  ;;  %v5774_v4 = vsel %vm2214_vm9, nan, %v5773_v3 }
 0x305   : > { %10872 = vcosq.f32 %v4290_v28  ;;  %v15323_v26 = vsub.s32 %v2286_v35, %v2289_v22  ;;  %vm4340_vm12 = vcmp.lt.s32.totalorder %v15132_v12, 3  ;;  %v4517_v45 = vand.u32 2139095040, %v11130_v54 }
 0x306   : > { %10874 = vsinq.f32 %v4290_v28  ;;  %v4295_v29 = vadd.s32 3, %v4291_v2  ;;  %v15327_v9 = vand.u32 3, %v4291_v2  ;;  %vm4339_vm6 = vcmp.lt.s32.totalorder %v15132_v12, 2  ;;  %v15336_v22 = vpop.permute.xlu1 %4815  ;;  %v15359_v28 = vpop.permute.xlu0 %4830 }
 0x307   : > { %v2292_v51 = vsub.s32 0, %v15323_v26  ;;  %v4346_v44 = vsel %vm4338_vm5, %v15271_v11, %v4328_v25  ;;  %v4347_v14 = vsel %vm4341_vm8, %v4334_v60, 920167782  ;;  %8285 = vperm.xlu0 %10550, %v5774_v4   ;;  %v4322_v20 = vshrl.u32 %v17653_v0, %v15139_v6 }
 0x308   : > { %v4348_v2 = vsel %vm4340_vm12, %v4331_v56, %v4347_v14  ;;  %v4350_v35 = vsel %vm4338_vm5, %v4328_v25, %v4331_v56  ;;  %v4351_v37 = vsel %vm4341_vm8, %v4337_v41, 1326507024  ;;  %v4343_v34 = vsel %vm4341_vm8, %v4331_v56, 2102212464  ;;  %v15364_v56 = vld [vmem:[%s17485_s9] ss:$0 sm:$0xff] }
 0x309   : > { %v9720_v43 = vmin.u32 %v2292_v51, %v15323_v26  ;;  %v4352_v47 = vsel %vm4340_vm12, %v4334_v60, %v4351_v37  ;;  %v17864_v19 = vor.u32 8388608, %v15254_v48  ;;  %v17865_v8 = vand.u32 2139095040, %v15087_v39 }
 0x30a   : > { %v4296_v33 = vand.u32 3, %v4295_v29  ;;  %v4349_v5 = vsel %vm4339_vm6, %v4346_v44, %v4348_v2  ;;  %v4353_v3 = vsel %vm4339_vm6, %v4350_v35, %v4352_v47  ;;  %v4518_v41 = vshrl.u32 %v4517_v45, 23  ;;  %v15369_v39 = vpop.permute.xlu1 %8340 }
 0x30b   : > { %v4354_v6 = vshll.u32 %v17864_v19, 8  ;;  %v2334_v53 = vshrl.u32 %v17865_v8, 23  ;;  %v2294_v48 = vclz %v9720_v43  ;;  %v15373_v54 = vmul.f32 %v15364_v56, %v14802_v27  ;;  %v15395_v43 = vpop.permute.xlu0 %8250 }
 0x30c   : > { %vm4294_vm13 = vweird.f32 %v15174_v55  ;;  %v4342_v45 = vsel %vm4338_vm5, %v4322_v20, %v15271_v11  ;;  %v4344_v29 = vsel %vm4340_vm12, %v4328_v25, %v4343_v34  ;;  %vm7826_vm4 = vcmp.lt.s32.totalorder %v15327_v9, 2 }
 0x30d   : > { %v15366_v60 = vmul.u32.u64.low %v4354_v6, %v4353_v3  ;;  %v15367_v4 = vmul.u32.u64.high %v4354_v6, %v4353_v3, %v15366_v60  ;;  %v9721_v51 = vadd.s32 4294967294, %v2294_v48  ;;  %vm4297_vm10 = vcmp.lt.s32.totalorder %v4296_v33, 2 }
 0x30e   : > { %v15382_v44 = vmul.u32.u64.low %v4354_v6, %v4349_v5  ;;  %v15383_v14 = vmul.u32.u64.high %v4354_v6, %v4349_v5, %v15382_v44  ;;  %vm4298_vm1 = vcmp.eq.s32.totalorder %v4296_v33, 0  ;;  %vm7827_vm2 = vcmp.eq.s32.totalorder %v15327_v9, 0 }
 0x30f   : > { %vm7830_vm9 = vcmp.eq.s32.totalorder %v15327_v9, 2  ;;  %v10873_v27 = vpop.eup %10872  ;;  %vm4301_vm0 = vcmp.eq.s32.totalorder %v4296_v33, 2  ;;  %v2282_v11 = vadd.s32 %v15230_v7, %v15228_v32  ;;  %vm9722_vm7 = vcmp.lt.s32.totalorder %v9721_v51, 0  ;;  %v15398_v32 = vpop.permute.xlu1 %4825  ;;  %v15423_v9 = vld [vmem:[%s17485_s9 + $0x1] ss:$0 sm:$0xff] }
 0x310   : > { %v4345_v25 = vsel %vm4339_vm6, %v4342_v45, %v4344_v29  ;;  %v10875_v20 = vpop.eup %10874  ;;  %v4302_v2 = vxor.u32 2147483648, %v10873_v27  ;;  %v2297_v35 = vsel %vm9722_vm7, 0, %v9721_v51  ;;  %v2312_v37 = vsub.s32 4, %v15301_v62 }
 0x311   : > { %vm4363_vm15 = vc.u32 %v15367_v4, %v15382_v44  ;;  %v4299_v34 = vxor.u32 2147483648, %v10875_v20  ;;  %v2298_v47 = vsub.s32 32, %v2297_v35  ;;  %v2299_v19 = vshll.u32 %v15323_v26, %v2297_v35 }
 0x312   : > { %v2302_v8 = vsub.s32 4294967266, %v2297_v35  ;;  %v4303_v12 = vsel %vm4301_vm0, %v4302_v2, %v10875_v20  ;;  %v7832_v7 = vsel %vm7830_vm9, %v4302_v2, %v10875_v20  ;;  %v4361_v5 = vmul.u32 %v4354_v6, %v4345_v25 }
 0x313   : > { %v4364_v3 = vadd.s32 1, %v15383_v14  ;;  %v4300_v48 = vsel %vm4298_vm1, %v10873_v27, %v4299_v34  ;;  %v7829_v60 = vsel %vm7827_vm2, %v10873_v27, %v4299_v34  ;;  %v2300_v45 = vshrl.u32 %v2282_v11, %v2298_v47  ;;  %v15427_v34 = vpop.permute.xlu0 %4835 }
 0x314   : > { %v2303_v29 = vadd.s32 127, %v2302_v8  ;;  %v4304_v26 = vsel %vm4297_vm10, %v4300_v48, %v4303_v12  ;;  %v7833_v51 = vsel %vm7826_vm4, %v7829_v60, %v7832_v7  ;;  %vm2228_vm14 = vcmp.lt.s32.totalorder %v15103_v17, 0  ;;  %v15445_v7 = vpop.f32.mrb[58].mxu0 }
 0x315   : > { %v4365_v6 = vsel %vm4363_vm15, %v4364_v3, %v15383_v14  ;;  %v4305_v25 = vsel %vm4294_vm13, nan, %v4304_v26  ;;  %v2301_v20 = vor.u32 %v2300_v45, %v2299_v19  ;;  %v2313_v33 = vsel %vm2228_vm14, %v2312_v37, %v15301_v62 }
 0x316   : > { %v2304_v2 = vshll.u32 %v2303_v29, 23  ;;  %v9723_v27 = vadd.s32 4294967169, %v2334_v53  ;;  %v9807_v11 = vadd.s32 4294967169, %v4518_v41  ;;  %4860 = vperm.xlu1 %10551, %v4305_v25   ;;  %v4366_v35 = vadd.s32 %v4365_v6, %v4361_v5  ;;  %v15437_v53 = vpop.permute.xlu1 %8350 }
 0x317   : > { %v4898_v14 = vmul.f32 %v15423_v9, %v15052_v1  ;;  %v7834_v47 = vsel %vm4294_vm13, nan, %v7833_v51  ;;  %v17866_v19 = vand.u32 2147483647, %v15103_v17  ;;  %v2308_v8 = vcvt.s32.f32 %v2301_v20 }
 0x318   : > { %v2305_v37 = vor.u32 4788187, %v2304_v2  ;;  %v1374_v41 = vmul.f32 %v15364_v56, %v14689_v59  ;;  %v1375_v1 = vmul.f32 %v15364_v56, %v14834_v18  ;;  %v4367_v12 = vadd.s32 536870912, %v4366_v35  ;;  %v15452_v59 = vpop.f32.mrb[59].mxu0 }
 0x319   : > { %vm15433_vm3 = vcmp.le.f32.partialorder %v17866_v19, 0.7853982  ;;  %v4930_v3 = vadd.f32 %v4898_v14, %v15373_v54  ;;  %v4899_v48 = vmul.f32 %v15423_v9, %v15079_v42  ;;  %v4900_v60 = vmul.f32 %v15423_v9, %v15117_v36  ;;  %v15465_v54 = vld [vmem:[%s17485_s9 + $0x2] ss:$0 sm:$0xff]  ;;  %v15468_v42 = vld [vmem:[%s11274_s28 + $0xe8] sm:$0xff] }
 0x31a   : > { %v2315_v55 = vsel %vm15433_vm3, 0, %v2313_v33  ;;  %v2306_v5 = vand.u32 2147483647, %v2305_v37  ;;  %v15456_v45 = vadd.s32 1, %v9723_v27  ;;  %v15458_v29 = vadd.s32 1, %v9807_v11  ;;  %8385 = vperm.xlu1 %10551, %v7834_v47   ;;  %17869 = vst [vmem:[#allocation60_spill] sm:$0xff] %v15468_v42  ;;  %v15482_v11 = vpop.permute.xlu0 %8255  ;;  %v15486_v37 = vpop.permute.xlu1 %8355 }
 0x31b   : > { %v15460_v26 = vshrl.u32 %v4367_v12, 30  ;;  %v15473_v51 = vmul.f32 %v15364_v56, %v14501_v21  ;;  %v8423_v25 = vmul.f32 %v15465_v54, %v15180_v61  ;;  %v1376_v20 = vmul.f32 %v15364_v56, %v14724_v13 }
 0x31c   : > { %v2309_v6 = vmul.f32 %v2308_v8, %v2306_v5  ;;  %v1378_v2 = vmul.f32 %v15364_v56, %v14758_v46  ;;  %v2319_v33 = vadd.s32 3, %v2315_v55  ;;  %v4931_v47 = vadd.f32 %v4899_v48, %v1374_v41 }
 0x31d   : > { %v4369_v27 = vshll.u32 %v15460_v26, 30  ;;  %v4932_v19 = vadd.f32 %v4900_v60, %v1375_v1  ;;  %v15484_v21 = vadd.f32 %v8423_v25, %v4930_v3  ;;  %v1377_v61 = vmul.f32 %v15364_v56, %v14865_v63  ;;  %v15512_v3 = vpop.f32.mrb[60].mxu0  ;;  %v17873_v25 = vld [vmem:[#allocation24_spill] sm:$0xff] }
 0x31e   : > { %v2310_v14 = vxor.u32 2147483648, %v2309_v6  ;;  %v1379_v13 = vmul.f32 %v15364_v56, %v14901_v24  ;;  %v8424_v46 = vmul.f32 %v15465_v54, %v15219_v31  ;;  %v4901_v41 = vmul.f32 %v15423_v9, %v15154_v23  ;;  %v15520_v48 = vpop.f32.mrb[61].mxu0 }
 0x31f   : > { %17870 = vst [vmem:[#allocation61_spill] sm:$0xff] %v15484_v21  ;;  %v15490_v8 = vsub.s32 %v4366_v35, %v4369_v27  ;;  %v4904_v1 = vmul.f32 %v15423_v9, %v15239_v38  ;;  %v8425_v63 = vmul.f32 %v15465_v54, %v15241_v50  ;;  %v15507_v24 = vand.u32 3, %v2319_v33 }
 0x320   : > { %v2311_v12 = vsel %vm2228_vm14, %v2310_v14, %v2309_v6  ;;  %v4902_v5 = vmul.f32 %v15423_v9, %v15178_v58  ;;  %v4903_v23 = vmul.f32 %v15423_v9, %v15217_v49  ;;  %v15516_v38 = vadd.f32 %v8424_v46, %v4931_v47  ;;  %v15531_v6 = vpop.permute.xlu0 %4735  ;;  %v15541_v14 = vpop.permute.xlu1 %8360  ;;  %v17874_v47 = vld [vmem:[#allocation23_spill] sm:$0xff]  ;;  %v17875_v46 = vld [vmem:[#allocation32_spill] sm:$0xff] }
 0x321   : > { %v2314_v35 = vsel %vm15433_vm3, %v15103_v17, %v2311_v12  ;;  %v4372_v31 = vsub.s32 0, %v15490_v8  ;;  %v15518_v50 = vadd.f32 %v8425_v63, %v4932_v19  ;;  %v15524_v62 = vmul.f32 %v15364_v56, %v14526_v40 }
 0x322   : > { %10876 = vcosq.f32 %v2314_v35  ;;  %17871 = vst [vmem:[#allocation62_spill] sm:$0xff] %v15516_v38  ;;  %v15528_v60 = vmul.f32 %v15364_v56, %v14616_v15  ;;  %v15535_v49 = vmul.f32 %v15364_v56, %v14797_v30  ;;  %v15539_v33 = vmul.f32 %v15364_v56, %v17873_v25 }
 0x323   : > { %17872 = vst [vmem:[#allocation63_spill] sm:$0xff] %v15518_v50  ;;  %10878 = vsinq.f32 %v2314_v35  ;;  %v9800_v58 = vmin.u32 %v4372_v31, %v15490_v8  ;;  %v4933_v27 = vadd.f32 %v4901_v41, %v1376_v20  ;;  %v4936_v40 = vadd.f32 %v4904_v1, %v1379_v13  ;;  %v17876_v31 = vld [vmem:[#allocation56_spill] sm:$0xff]  ;;  %v17877_v20 = vld [vmem:[#allocation57_spill] sm:$0xff] }
 0x324   : > { %v15545_v15 = vmul.f32 %v15364_v56, %v17874_v47  ;;  %v1381_v12 = vmul.f32 %v15364_v56, %v17875_v46  ;;  %v4934_v63 = vadd.f32 %v4902_v5, %v1377_v61  ;;  %vm2321_vm11 = vcmp.lt.s32.totalorder %v15507_v24, 2  ;;  %v17879_v61 = vld [vmem:[#allocation59_spill] sm:$0xff] }
 0x325   : > { %v4374_v19 = vclz %v9800_v58  ;;  %v5868_v30 = vand.u32 3, %v2315_v55  ;;  %v4935_v35 = vadd.f32 %v4903_v23, %v1378_v2  ;;  %v8429_v25 = vmul.f32 %v15465_v54, %v17876_v31  ;;  %v17878_v58 = vld [vmem:[#allocation58_spill] sm:$0xff] }
 0x326   : > { %v8426_v13 = vmul.f32 %v15465_v54, %v17877_v20  ;;  %vm2318_vm5 = vweird.f32 %v15103_v17  ;;  %v4362_v41 = vadd.s32 %v15382_v44, %v15367_v4  ;;  %v4906_v47 = vmul.f32 %v15423_v9, %v17878_v58  ;;  %v17882_v31 = vld [vmem:[#allocation34_spill] sm:$0xff]  ;;  %v15573_v20 = vpop.permute.xlu0 %8365 }
 0x327   : > { %v9801_v1 = vadd.s32 4294967294, %v4374_v19  ;;  %v8427_v5 = vmul.f32 %v15465_v54, %v17879_v61  ;;  %v15561_v55 = vadd.f32 %v8429_v25, %v4936_v40  ;;  %v8431_v23 = vmul.f32 %v15465_v54, %v15319_v16  ;;  %v15579_v16 = vpop.permute.xlu1 %4840 }
 0x328   : > { %v15563_v2 = vadd.f32 %v8426_v13, %v4933_v27  ;;  %v8428_v46 = vmul.f32 %v15465_v54, %v15312_v52  ;;  %v4887_v4 = vmul.f32 %v15423_v9, %v17882_v31  ;;  %v4938_v44 = vadd.f32 %v4906_v47, %v1381_v12  ;;  %v17885_v12 = vld [vmem:[#allocation20_spill] sm:$0xff] }
 0x329   : > { %17880 = vst [vmem:[#allocation24_spill] sm:$0xff] %v15561_v55  ;;  %vm9802_vm8 = vcmp.lt.s32.totalorder %v9801_v1, 0  ;;  %v15571_v19 = vadd.f32 %v8427_v5, %v4934_v63  ;;  %vm2322_vm12 = vcmp.eq.s32.totalorder %v15507_v24, 0  ;;  %vm2325_vm6 = vcmp.eq.s32.totalorder %v15507_v24, 2  ;;  %v17887_v5 = vld [vmem:[#allocation16_spill] sm:$0xff] }
 0x32a   : > { %17881 = vst [vmem:[#allocation23_spill] sm:$0xff] %v15563_v2  ;;  %v4377_v27 = vsel %vm9802_vm8, 0, %v9801_v1  ;;  %v15577_v40 = vadd.f32 %v8428_v46, %v4935_v35  ;;  %vm5869_vm13 = vcmp.lt.s32.totalorder %v5868_v30, 2  ;;  %vm5870_vm4 = vcmp.eq.s32.totalorder %v5868_v30, 0 }
 0x32b   : > { %17883 = vst [vmem:[#allocation32_spill] sm:$0xff] %v15571_v19  ;;  %v4378_v25 = vsub.s32 32, %v4377_v27  ;;  %v4379_v52 = vshll.u32 %v15490_v8, %v4377_v27  ;;  %v4382_v13 = vsub.s32 4294967266, %v4377_v27  ;;  %vm5873_vm10 = vcmp.eq.s32.totalorder %v5868_v30, 2  ;;  %v17888_v27 = vld [vmem:[#allocation50_spill] sm:$0xff] }
 0x32c   : > { %17884 = vst [vmem:[#allocation56_spill] sm:$0xff] %v15577_v40  ;;  %v10877_v58 = vpop.eup %10876  ;;  %v1383_v63 = vmul.f32 %v15364_v56, %v17885_v12  ;;  %v15584_v47 = vadd.f32 %v8431_v23, %v4938_v44  ;;  %vm2469_vm1 = vcmp.lt.s32.totalorder %v17887_v5, 4  ;;  %v4919_v31 = vadd.f32 %v4887_v4, %v15473_v51  ;;  %v4846_v4 = vpop.permute.xlu0 %4845 }
 0x32d   : > { %v10879_v61 = vpop.eup %10878  ;;  %v2326_v35 = vxor.u32 2147483648, %v10877_v58  ;;  %v4380_v1 = vshrl.u32 %v4362_v41, %v4378_v25  ;;  %v4383_v46 = vadd.s32 127, %v4382_v13  ;;  %vm4525_vm2 = vcmp.gt.s32.totalorder %v15458_v29, 0 }
 0x32e   : > { %17886 = vst [vmem:[#allocation57_spill] sm:$0xff] %v15584_v47  ;;  %v2323_v8 = vxor.u32 2147483648, %v10879_v61  ;;  %v4888_v36 = vmul.f32 %v15423_v9, %v17888_v27  ;;  %v4908_v18 = vmul.f32 %v15423_v9, %v15359_v28  ;;  %v4905_v23 = vmul.f32 %v15423_v9, %v15336_v22  ;;  %v8261_v22 = vpop.permute.xlu1 %8260 }
 0x32f   : > { %vm2341_vm9 = vcmp.gt.s32.totalorder %v15456_v45, 0  ;;  %v2327_v41 = vsel %vm2325_vm6, %v2326_v35, %v10879_v61  ;;  %v4381_v44 = vor.u32 %v4380_v1, %v4379_v52  ;;  %v4384_v25 = vshll.u32 %v4383_v46, 23 }
 0x330   : > { %v5875_v51 = vsel %vm5873_vm10, %v2326_v35, %v10879_v61  ;;  %v2324_v13 = vsel %vm2322_vm12, %v10877_v58, %v2323_v8  ;;  %v4392_v12 = vsub.s32 4, %v15460_v26  ;;  %v5872_v28 = vsel %vm5870_vm4, %v10877_v58, %v2323_v8 }
 0x331   : > { %v4937_v27 = vadd.f32 %v4905_v23, %v15535_v49  ;;  %v2328_v47 = vsel %vm2321_vm11, %v2324_v13, %v2327_v41  ;;  %v4385_v55 = vor.u32 4788187, %v4384_v25  ;;  %v4388_v40 = vcvt.s32.f32 %v4381_v44  ;;  %v17895_v41 = vld [vmem:[#allocation44_spill] sm:$0xff] }
 0x332   : > { %v5876_v52 = vsel %vm5869_vm13, %v5872_v28, %v5875_v51  ;;  %v2329_v61 = vsel %vm2318_vm5, nan, %v2328_v47  ;;  %v4920_v35 = vadd.f32 %v4888_v36, %v15524_v62  ;;  %v4940_v1 = vadd.f32 %v4908_v18, %v1383_v63  ;;  %v17890_v36 = vld [vmem:[#allocation55_spill] sm:$0xff] }
 0x333   : > { %v8412_v46 = vmul.f32 %v15465_v54, %v15395_v43  ;;  %4765 = vperm.xlu0 %10550, %v2329_v61   ;;  %v4386_v58 = vand.u32 2147483647, %v4385_v55  ;;  %v8430_v49 = vmul.f32 %v15465_v54, %v15369_v39  ;;  %v4909_v24 = vmul.f32 %v15423_v9, %v15427_v34  ;;  %v8266_v55 = vpop.permute.xlu0 %8265 }
 0x334   : > { %v4907_v30 = vmul.f32 %v15423_v9, %v15398_v32  ;;  %v5877_v47 = vsel %vm2318_vm5, nan, %v5876_v52  ;;  %v8413_v18 = vmul.f32 %v15465_v54, %v15482_v11  ;;  %v8432_v43 = vmul.f32 %v15465_v54, %v15437_v53  ;;  %v4741_v53 = vpop.permute.xlu1 %4740 }
 0x335   : > { %v15620_v8 = vadd.f32 %v8412_v46, %v4919_v31  ;;  %vm4308_vm0 = vcmp.lt.s32.totalorder %v17890_v36, 0  ;;  %v4389_v39 = vmul.f32 %v4388_v40, %v4386_v58  ;;  %v15627_v62 = vadd.f32 %v8430_v49, %v4937_v27  ;;  %v17904_v58 = vld [vmem:[#allocation29_spill] sm:$0xff] }
 0x336   : > { %v4939_v34 = vadd.f32 %v4907_v30, %v15539_v33  ;;  %v4393_v17 = vsel %vm4308_vm0, %v4392_v12, %v15460_v26  ;;  %v4941_v32 = vadd.f32 %v4909_v24, %v15545_v15  ;;  %v15634_v63 = vadd.f32 %v8413_v18, %v4920_v35  ;;  %v17900_v12 = vld [vmem:[#allocation14_spill] sm:$0xff] }
 0x337   : > { %17889 = vst [vmem:[#allocation58_spill] sm:$0xff] %v15620_v8  ;;  %17891 = vst [vmem:[#allocation59_spill] sm:$0xff] %v15627_v62  ;;  %v8433_v11 = vmul.f32 %v15465_v54, %v15486_v37  ;;  %v17893_v31 = vand.u32 2147483647, %v17890_v36  ;;  %v4390_v40 = vxor.u32 2147483648, %v4389_v39  ;;  %8290 = vperm.xlu0 %10550, %v5877_v47   ;;  %v4889_v33 = vmul.f32 %v15423_v9, %v15531_v6  ;;  %v17949_v62 = vld [vmem:[#allocation46_spill] sm:$0xff] }
 0x338   : > { %17892 = vst [vmem:[#allocation34_spill] sm:$0xff] %v15634_v63  ;;  %v15640_v23 = vadd.f32 %v8432_v43, %v4939_v34  ;;  %v15647_v26 = vsel %vm2469_vm1, %v17895_v41, 920167782  ;;  %v17897_v15 = vor.u32 %v15075_v57, %v15014_v10  ;;  %v8434_v25 = vmul.f32 %v15465_v54, %v15541_v14  ;;  %v15692_v24 = vld [vmem:[%s17484_s8] ss:$0 sm:$0xff]  ;;  %v11132_v63 = vld [vmem:[%s11274_s28 + $0xf8] sm:$0xff] }
 0x339   : > { %vm4307_vm7 = vcmp.le.f32.partialorder %v17893_v31, 0.7853982  ;;  %17896 = vst [vmem:[#allocation50_spill] sm:$0xff] %v15647_v26  ;;  %v15656_v44 = vadd.f32 %v8433_v11, %v4940_v1  ;;  %v15663_v6 = vsel %vm4525_vm2, %v15458_v29, 0  ;;  %v4391_v51 = vsel %vm4308_vm0, %v4390_v40, %v4389_v39  ;;  %v4746_v1 = vpop.permute.xlu0 %4745  ;;  %v17906_v39 = vld [vmem:[#allocation30_spill] sm:$0xff] }
 0x33a   : > { %17894 = vst [vmem:[#allocation20_spill] sm:$0xff] %v15640_v23  ;;  %v15654_v37 = vsel %vm2469_vm1, %v17897_v15, 1326507024  ;;  %v4395_v13 = vsel %vm4307_vm7, 0, %v4393_v17  ;;  %v1385_v10 = vmul.f32 %v15364_v56, %v17900_v12  ;;  %v15672_v57 = vsel %vm2341_vm9, %v15456_v45, 0  ;;  %v17907_v17 = vld [vmem:[#allocation21_spill] sm:$0xff] }
 0x33b   : > { %17898 = vst [vmem:[#allocation55_spill] sm:$0xff] %v15654_v37  ;;  %17899 = vst [vmem:[#allocation64_spill] sm:$0xff] %v15656_v44  ;;  %v17901_v28 = vand.u32 2139095040, %v15468_v42  ;;  %v4394_v27 = vsel %vm4307_vm7, %v17890_v36, %v4391_v51  ;;  %v15677_v52 = vadd.f32 %v8434_v25, %v4941_v32  ;;  %v4921_v29 = vadd.f32 %v4889_v33, %v15528_v60  ;;  %v8371_v60 = vpop.permute.xlu1 %8370  ;;  %v17908_v11 = vld [vmem:[#allocation2_spill] sm:$0xff]  ;;  %v17912_v12 = vld [vmem:[#allocation19_spill] sm:$0xff] }
 0x33c   : > { %10880 = vcosq.f32 %v4394_v27  ;;  %v8435_v61 = vmul.f32 %v15465_v54, %v15573_v20  ;;  %v4910_v35 = vmul.f32 %v15423_v9, %v15579_v16  ;;  %v15685_v45 = vand.u32 31, %v15663_v6  ;;  %v17905_v16 = vld [vmem:[#allocation25_spill] sm:$0xff] }
 0x33d   : > { %v4414_v14 = vshrl.u32 %v17901_v28, 23  ;;  %17902 = vst [vmem:[#allocation14_spill] sm:$0xff] %v15677_v52  ;;  %10882 = vsinq.f32 %v4394_v27  ;;  %v4399_v46 = vadd.s32 3, %v4395_v13  ;;  %v1386_v49 = vmul.f32 %v15364_v56, %v17904_v58  ;;  %v8376_v58 = vpop.permute.xlu0 %8375 }
 0x33e   : > { %17903 = vst [vmem:[#allocation65_spill] sm:$0xff] %v15685_v45  ;;  %v4911_v20 = vmul.f32 %v15423_v9, %v4846_v4  ;;  %v4942_v30 = vadd.f32 %v4910_v35, %v1385_v10  ;;  %v15697_v47 = vadd.f32 %v17905_v16, %v15692_v24  ;;  %v8414_v18 = vmul.f32 %v15465_v54, %v8261_v22  ;;  %v17911_v22 = vld [vmem:[#allocation9_spill] sm:$0xff] }
 0x33f   : > { %v9803_v43 = vadd.s32 4294967169, %v4414_v14  ;;  %v1365_v34 = vmul.f32 %v15364_v56, %v17906_v39  ;;  %v15704_v32 = vadd.f32 %v15692_v24, %v17907_v17  ;;  %v15708_v31 = vadd.f32 %v17908_v11, %v15692_v24  ;;  %v17917_v17 = vld [vmem:[#allocation18_spill] sm:$0xff] }
 0x340   : > { %v15711_v4 = vand.u32 31, %v15672_v57  ;;  %v15713_v40 = vadd.f32 %v8435_v61, %v4942_v30  ;;  %v15715_v33 = vadd.f32 %v8414_v18, %v4921_v29  ;;  %v15719_v15 = vadd.f32 %v15692_v24, %v17911_v22  ;;  %v17914_v29 = vld [vmem:[#allocation35_spill] sm:$0xff]  ;;  %v17916_v18 = vld [vmem:[#allocation40_spill] sm:$0xff] }
 0x341   : > { %v7928_v25 = vand.u32 3, %v4395_v13  ;;  %v8415_v51 = vmul.f32 %v15465_v54, %v8266_v55  ;;  %v15724_v10 = vadd.f32 %v17912_v12, %v15692_v24  ;;  %v4890_v28 = vmul.f32 %v15423_v9, %v4741_v53  ;;  %v17915_v13 = vld [vmem:[#allocation38_spill] sm:$0xff]  ;;  %v4851_v53 = vpop.permute.xlu1 %4850 }
 0x342   : > { %17909 = vst [vmem:[#allocation29_spill] sm:$0xff] %v15713_v40  ;;  %17910 = vst [vmem:[#allocation25_spill] sm:$0xff] %v15715_v33  ;;  %v15728_v14 = vsub.s32 32, %v15685_v45  ;;  %v4400_v27 = vand.u32 3, %v4399_v46  ;;  %v4943_v61 = vadd.f32 %v4911_v20, %v1386_v49  ;;  %v15732_v35 = vadd.f32 %v15692_v24, %v17914_v29  ;;  %v17918_v49 = vld [vmem:[#allocation3_spill] sm:$0xff]  ;;  %v17921_v12 = vld [vmem:[#allocation10_spill] sm:$0xff] }
 0x343   : > { %v4420_v30 = vadd.s32 1, %v9803_v43  ;;  %v1366_v55 = vmul.f32 %v15364_v56, %v17915_v13  ;;  %v4922_v16 = vadd.f32 %v4890_v28, %v1365_v34  ;;  %v15738_v39 = vadd.f32 %v17916_v18, %v15692_v24  ;;  %v17920_v34 = vld [vmem:[#allocation4_spill] sm:$0xff] }
 0x344   : > { %17913 = vst [vmem:[#allocation30_spill] sm:$0xff] %v15728_v14  ;;  %vm4398_vm15 = vweird.f32 %v17890_v36  ;;  %v1387_v46 = vmul.f32 %v15364_v56, %v17917_v17  ;;  %v15745_v20 = vadd.f32 %v15692_v24, %v17918_v49  ;;  %v8436_v43 = vmul.f32 %v15465_v54, %v8371_v60  ;;  %v17924_v17 = vld [vmem:[#allocation42_spill] sm:$0xff] }
 0x345   : > { %vm7929_vm14 = vcmp.lt.s32.totalorder %v7928_v25, 2  ;;  %v15748_v11 = vadd.f32 %v8415_v51, %v4922_v16  ;;  %v15752_v22 = vadd.f32 %v15692_v24, %v17920_v34  ;;  %v15756_v28 = vadd.f32 %v17921_v12, %v15692_v24  ;;  %v17923_v51 = vld [vmem:[#allocation28_spill] sm:$0xff]  ;;  %v17925_v12 = vld [vmem:[#allocation31_spill] sm:$0xff] }
 0x346   : > { %v10881_v29 = vpop.eup %10880  ;;  %vm4405_vm3 = vcmp.eq.s32.totalorder %v4400_v27, 2  ;;  %vm7930_vm11 = vcmp.eq.s32.totalorder %v7928_v25, 0  ;;  %vm7933_vm5 = vcmp.eq.s32.totalorder %v7928_v25, 2  ;;  %v15758_v13 = vadd.f32 %v8436_v43, %v4943_v61  ;;  %v15769_v61 = vpop.permute.xlu0 %4855 }
 0x347   : > { %17919 = vst [vmem:[#allocation21_spill] sm:$0xff] %v15748_v11  ;;  %v10883_v18 = vpop.eup %10882  ;;  %vm4402_vm8 = vcmp.eq.s32.totalorder %v4400_v27, 0  ;;  %v4406_v60 = vxor.u32 2147483648, %v10881_v29  ;;  %v8756_v16 = vadd.f32 %v17923_v51, %v15692_v24  ;;  %v15764_v49 = vadd.f32 %v17924_v17, %v15692_v24  ;;  %17926 = vst [vmem:[#allocation9_spill] sm:$0xff] %v15769_v61  ;;  %v8271_v51 = vpop.permute.xlu1 %8270  ;;  %v17927_v61 = vld [vmem:[#allocation39_spill] sm:$0xff] }
 0x348   : > { %17922 = vst [vmem:[#allocation2_spill] sm:$0xff] %v15758_v13  ;;  %vm4401_vm12 = vcmp.lt.s32.totalorder %v4400_v27, 2  ;;  %v4403_v34 = vxor.u32 2147483648, %v10883_v18  ;;  %v8751_v11 = vadd.f32 %v15692_v24, %v17925_v12  ;;  %v4891_v33 = vmul.f32 %v15423_v9, %v4746_v1  ;;  %v17929_v27 = vld [vmem:[#allocation6_spill] sm:$0xff]  ;;  %v10284_v25 = vpop.f32.mrb[62].mxu0 }
 0x349   : > { %v4407_v43 = vsel %vm4405_vm3, %v4406_v60, %v10883_v18  ;;  %v7935_v13 = vsel %vm7933_vm5, %v4406_v60, %v10883_v18  ;;  %v8437_v40 = vmul.f32 %v15465_v54, %v8376_v58  ;;  %v4912_v52 = vmul.f32 %v15423_v9, %v4851_v53 }
 0x34a   : > { %vm4421_vm6 = vcmp.gt.s32.totalorder %v4420_v30, 0  ;;  %v4621_v17 = vand.u32 2139095040, %v11132_v63  ;;  %v4404_v44 = vsel %vm4402_vm8, %v10881_v29, %v4403_v34  ;;  %v7932_v23 = vsel %vm7930_vm11, %v10881_v29, %v4403_v34 }
 0x34b   : > { %v4408_v8 = vsel %vm4401_vm12, %v4404_v44, %v4407_v43  ;;  %v7936_v12 = vsel %vm7929_vm14, %v7932_v23, %v7935_v13  ;;  %10884 = vtanh.f32 %v8756_v16  ;;  %v4944_v1 = vadd.f32 %v4912_v52, %v1387_v46  ;;  %v17930_v23 = vld [vmem:[#allocation47_spill] sm:$0xff]  ;;  %v4751_v60 = vpop.permute.xlu1 %4750  ;;  %v17935_v43 = vld [vmem:[#allocation12_spill] sm:$0xff] }
 0x34c   : > { %v1367_v18 = vmul.f32 %v15364_v56, %v17927_v61  ;;  %v4409_v58 = vsel %vm4398_vm15, nan, %v4408_v8  ;;  %10886 = vtanh.f32 %v8751_v11  ;;  %v4923_v53 = vadd.f32 %v4891_v33, %v1366_v55  ;;  %v8276_v8 = vpop.permute.xlu0 %8275  ;;  %v17933_v13 = vld [vmem:[#allocation51_spill] sm:$0xff] }
 0x34d   : > { %4865 = vperm.xlu1 %10551, %v4409_v58   ;;  %10888 = vtanh.f32 %v15697_v47  ;;  %v15782_v63 = vadd.f32 %v8437_v40, %v4944_v1  ;;  %v15786_v44 = vadd.f32 %v15692_v24, %v17929_v27  ;;  %v15790_v52 = vadd.f32 %v17930_v23, %v15692_v24  ;;  %v17931_v47 = vld [vmem:[#allocation48_spill] sm:$0xff]  ;;  %v17937_v1 = vld [vmem:[#allocation54_spill] sm:$0xff] }
 0x34e   : > { %v7937_v46 = vsel %vm4398_vm15, nan, %v7936_v12  ;;  %10890 = vtanh.f32 %v15704_v32  ;;  %v8416_v33 = vmul.f32 %v15465_v54, %v8271_v51  ;;  %v15798_v40 = vadd.f32 %v15692_v24, %v17931_v47  ;;  %v8900_v32 = vpop.f32.mrb[63].mxu0 }
 0x34f   : > { %17928 = vst [vmem:[#allocation19_spill] sm:$0xff] %v15782_v63  ;;  %v17932_v55 = vmov 2102212464   ;;  %v4422_v29 = vsel %vm4421_vm6, %v4420_v30, 0  ;;  %10892 = vtanh.f32 %v15708_v31  ;;  %v15806_v36 = vadd.f32 %v15692_v24, %v17933_v13  ;;  %v17936_v31 = vld [vmem:[#allocation53_spill] sm:$0xff] }
 0x350   : > { %v4540_v11 = vshll.u32 %v17932_v55, %v15685_v45  ;;  %v8417_v16 = vmul.f32 %v15465_v54, %v8276_v8  ;;  %v15809_v34 = vadd.f32 %v8416_v33, %v4923_v53  ;;  %v4892_v61 = vmul.f32 %v15423_v9, %v4751_v60  ;;  %v17938_v53 = vld [vmem:[#allocation7_spill] sm:$0xff] }
 0x351   : > { %v15814_v51 = vadd.f32 %v17935_v43, %v15692_v24  ;;  %v4622_v12 = vshrl.u32 %v4621_v17, 23  ;;  %8390 = vperm.xlu1 %10551, %v7937_v46   ;;  %10894 = vtanh.f32 %v15719_v15  ;;  %v15819_v30 = vadd.f32 %v17936_v31, %v15692_v24  ;;  %v10189_v43 = vpop.f32.mrb[0].mxu1 }
 0x352   : > { %17934 = vst [vmem:[#allocation35_spill] sm:$0xff] %v15809_v34  ;;  %v15823_v58 = vadd.f32 %v15692_v24, %v17937_v1  ;;  %10896 = vtanh.f32 %v15724_v10  ;;  %v8806_v27 = vadd.f32 %v17938_v53, %v15692_v24  ;;  %v4924_v23 = vadd.f32 %v4892_v61, %v1367_v18 }
 0x353   : > { %v15830_v17 = vadd.f32 %v15445_v7, %v15692_v24  ;;  %v17939_v15 = vmov 920167782   ;;  %10898 = vtanh.f32 %v15732_v35  ;;  %v15837_v8 = vadd.f32 %v15692_v24, %v15452_v59  ;;  %v17941_v59 = vld [vmem:[#allocation8_spill] sm:$0xff] }
 0x354   : > { %v4541_v46 = vshrl.u32 %v17939_v15, %v15728_v14  ;;  %v15841_v10 = vadd.f32 %v15512_v3, %v15692_v24  ;;  %10900 = vtanh.f32 %v15738_v39  ;;  %v15844_v18 = vadd.f32 %v8417_v16, %v4924_v23 }
 0x355   : > { %v15848_v7 = vadd.f32 %v15692_v24, %v15520_v48  ;;  %v15851_v33 = vadd.f32 %v10284_v25, %v15692_v24  ;;  %v15853_v35 = vpop.eup %10884  ;;  %v4424_v47 = vand.u32 31, %v4422_v29  ;;  %10902 = vtanh.f32 %v15745_v20 }
 0x356   : > { %17940 = vst [vmem:[#allocation38_spill] sm:$0xff] %v15844_v18  ;;  %v8811_v3 = vadd.f32 %v15692_v24, %v17941_v59  ;;  %v15859_v13 = vadd.f32 %v15692_v24, %v8900_v32  ;;  %v15861_v39 = vpop.eup %10886  ;;  %v15864_v60 = vshrl.u32 %v15672_v57, 5  ;;  %v15867_v48 = vsub.s32 32, %v15711_v4  ;;  %v17943_v32 = vld [vmem:[#allocation49_spill] sm:$0xff] }
 0x357   : > { %v9811_v25 = vadd.s32 4294967169, %v4622_v12  ;;  %10904 = vtanh.f32 %v8806_v27  ;;  %v15869_v16 = vpop.eup %10888  ;;  %v15872_v20 = vshrl.u32 %v15663_v6, 5  ;;  %v15876_v61 = vshll.u32 %v17939_v15, %v15685_v45  ;;  %v15884_v12 = vld [vmem:[%s17482_s6] ss:$0 sm:$0xff]  ;;  %v974_v27 = vpop.f32.mrb[1].mxu1 }
 0x358   : > { %17942 = vst [vmem:[#allocation40_spill] sm:$0xff] %v15869_v16  ;;  %10906 = vtanh.f32 %v15752_v22  ;;  %v8856_v57 = vadd.f32 %v17943_v32, %v15692_v24  ;;  %v15886_v31 = vpop.eup %10890  ;;  %v15888_v1 = vor.u32 %v4541_v46, %v4540_v11  ;;  %v17945_v6 = vmov 1326507024   ;;  %v10192_v46 = vpop.f32.mrb[2].mxu1 }
 0x359   : > { %17944 = vst [vmem:[#allocation18_spill] sm:$0xff] %v15886_v31  ;;  %v15892_v53 = vshrl.u32 %v17945_v6, %v15728_v14  ;;  %10908 = vtanh.f32 %v15756_v28  ;;  %v15896_v22 = vadd.f32 %v10189_v43, %v15884_v12  ;;  %v15898_v23 = vpop.eup %10892  ;;  %v15900_v59 = vshrl.u32 %v4422_v29, 5  ;;  %v17947_v28 = vld [vmem:[#allocation45_spill] sm:$0xff]  ;;  %v984_v63 = vpop.f32.mrb[3].mxu1 }
 0x35a   : > { %17946 = vst [vmem:[#allocation3_spill] sm:$0xff] %v15898_v23  ;;  %v15902_v32 = vsub.s32 32, %v4424_v47  ;;  %10910 = vtanh.f32 %v8811_v3  ;;  %v15905_v11 = vadd.f32 %v15884_v12, %v974_v27  ;;  %v15907_v18 = vadd.s32 1, %v9811_v25  ;;  %v17950_v27 = vld [vmem:[#allocation52_spill] sm:$0xff] }
 0x35b   : > { %10912 = vtanh.f32 %v15764_v49  ;;  %v8821_v43 = vadd.f32 %v15692_v24, %v17947_v28  ;;  %v15913_v34 = vadd.f32 %v10192_v46, %v15884_v12  ;;  %v15915_v29 = vpop.eup %10894  ;;  %v8836_v3 = vadd.f32 %v17949_v62, %v15692_v24  ;;  %v10195_v49 = vpop.f32.mrb[4].mxu1 }
 0x35c   : > { %17948 = vst [vmem:[#allocation4_spill] sm:$0xff] %v15915_v29  ;;  %10914 = vtanh.f32 %v8856_v57  ;;  %v8861_v19 = vadd.f32 %v15692_v24, %v17950_v27  ;;  %v15922_v25 = vadd.f32 %v15884_v12, %v984_v63  ;;  %v15924_v2 = vpop.eup %10896  ;;  %v15927_v28 = vadd.f32 %v10195_v49, %v15884_v12  ;;  %v994_v46 = vpop.f32.mrb[5].mxu1 }
 0x35d   : > { %17951 = vst [vmem:[#allocation10_spill] sm:$0xff] %v15924_v2  ;;  %v4427_v38 = vshll.u32 %v17653_v0, %v4424_v47  ;;  %v4436_v62 = vshll.u32 %v17932_v55, %v4424_v47  ;;  %v15932_v57 = vpop.eup %10898  ;;  %v15935_v24 = vadd.f32 %v15884_v12, %v994_v46  ;;  %v10198_v63 = vpop.f32.mrb[6].mxu1  ;;  %v17955_v27 = vmov 2475754826  }
 0x35e   : > { %17952 = vst [vmem:[#allocation28_spill] sm:$0xff] %v15927_v28  ;;  %17953 = vst [vmem:[#allocation42_spill] sm:$0xff] %v15932_v57  ;;  %v4428_v21 = vshrl.u32 %v17955_v27, %v15902_v32  ;;  %v4430_v2 = vshll.u32 %v17955_v27, %v4424_v47  ;;  %v4437_v49 = vshrl.u32 %v17939_v15, %v15902_v32  ;;  %v15942_v23 = vpop.eup %10900  ;;  %v1004_v29 = vpop.f32.mrb[7].mxu1  ;;  %v17958_v57 = vmov 2131351028  }
 0x35f   : > { %17954 = vst [vmem:[#allocation31_spill] sm:$0xff] %v15935_v24  ;;  %17956 = vst [vmem:[#allocation39_spill] sm:$0xff] %v15942_v23  ;;  %v15945_v50 = vadd.f32 %v10198_v63, %v15884_v12  ;;  %v4431_v16 = vshrl.u32 %v17958_v57, %v15902_v32  ;;  %v4433_v46 = vshll.u32 %v17958_v57, %v4424_v47  ;;  %v15952_v41 = vpop.eup %10902  ;;  %10916 = vtanh.f32 %v8861_v19  ;;  %v10201_v5 = vpop.f32.mrb[8].mxu1 }
 0x360   : > { %v4434_v26 = vshrl.u32 %v17932_v55, %v15902_v32  ;;  %17959 = vst [vmem:[#allocation47_spill] sm:$0xff] %v15952_v41  ;;  %v15955_v37 = vadd.f32 %v15884_v12, %v1004_v29  ;;  %v4439_v23 = vshll.u32 %v17939_v15, %v4424_v47  ;;  %v4440_v63 = vshrl.u32 %v17945_v6, %v15902_v32 }
 0x361   : > { %17957 = vst [vmem:[#allocation6_spill] sm:$0xff] %v15945_v50  ;;  %v15960_v14 = vpop.eup %10904  ;;  %vm4629_vm13 = vcmp.gt.s32.totalorder %v15907_v18, 0  ;;  %10918 = vtanh.f32 %v8821_v43  ;;  %v15964_v45 = vadd.f32 %v10201_v5, %v15884_v12  ;;  %v1014_v50 = vpop.f32.mrb[9].mxu1  ;;  %v4438_v41 = vor.u32 %v4437_v49, %v4436_v62 }
 0x362   : > { %17960 = vst [vmem:[#allocation48_spill] sm:$0xff] %v15955_v37  ;;  %v15966_v19 = vpop.eup %10906  ;;  %10920 = vtanh.f32 %v8836_v3  ;;  %v15969_v29 = vadd.f32 %v15884_v12, %v1014_v50  ;;  %v15971_v47 = vpop.f32.mrb[10].mxu1  ;;  %v17963_v37 = vand.u32 2147483647, %v15468_v42  ;;  %vm4445_vm4 = vcmp.lt.s32.totalorder %v15900_v59, 4 }
 0x363   : > { %17961 = vst [vmem:[#allocation51_spill] sm:$0xff] %v15966_v19  ;;  %v15976_v28 = vpop.eup %10908  ;;  %10922 = vtanh.f32 %v15786_v44  ;;  %v1024_v5 = vpop.f32.mrb[11].mxu1  ;;  %v4429_v43 = vor.u32 %v4428_v21, %v4427_v38  ;;  %v4432_v62 = vor.u32 %v4431_v16, %v4430_v2  ;;  %v4435_v49 = vor.u32 %v4434_v26, %v4433_v46  ;;  %v17965_v44 = vld [vmem:[#allocation37_spill] sm:$0xff] }
 0x364   : > { %17962 = vst [vmem:[#allocation12_spill] sm:$0xff] %v15969_v29  ;;  %v4417_v24 = vand.u32 8388607, %v17963_v37  ;;  %v15979_v19 = vpop.eup %10910  ;;  %10924 = vtanh.f32 %v15814_v51  ;;  %v15983_v50 = vadd.f32 %v15884_v12, %v1024_v5  ;;  %v15985_v3 = vpop.f32.mrb[12].mxu1  ;;  %v4441_v37 = vor.u32 %v4440_v63, %v4439_v23 }
 0x365   : > { %vm4442_vm10 = vcmp.lt.s32.totalorder %v15900_v59, 1  ;;  %v15988_v29 = vpop.eup %10912  ;;  %vm4549_vm2 = vcmp.lt.s32.totalorder %v15872_v20, 4  ;;  %v1368_v21 = vmul.f32 %v15364_v56, %v17965_v44  ;;  %10926 = vtanh.f32 %v15790_v52  ;;  %v15994_v38 = vpop.f32.mrb[13].mxu1 }
 0x366   : > { %17964 = vst [vmem:[#allocation53_spill] sm:$0xff] %v15983_v50  ;;  %vm4444_vm9 = vcmp.lt.s32.totalorder %v15900_v59, 3  ;;  %v4451_v2 = vsel %vm4445_vm4, %v4438_v41, 920167782  ;;  %v10915_v26 = vpop.eup %10914  ;;  %10928 = vtanh.f32 %v15798_v40  ;;  %v4756_v51 = vpop.permute.xlu0 %4755  ;;  %v4418_v23 = vor.u32 8388608, %v4417_v24 }
 0x367   : > { %v16000_v16 = vpop.f32.mrb[14].mxu1  ;;  %v4426_v46 = vshrl.u32 %v17653_v0, %v15902_v32  ;;  %vm4443_vm0 = vcmp.lt.s32.totalorder %v15900_v59, 2  ;;  %v4893_v56 = vmul.f32 %v15423_v9, %v4756_v51  ;;  %v10552_v52 = vpack.i.bf16 %v10915_v26, %v15861_v39 }
 0x368   : > { %v16007_v63 = vpop.f32.mrb[15].mxu1  ;;  %v4447_v5 = vsel %vm4445_vm4, %v4435_v49, 2102212464  ;;  %v4454_v40 = vsel %vm4442_vm10, %v4432_v62, %v4435_v49  ;;  %10930 = vtanh.f32 %v15806_v36  ;;  %v4450_v32 = vsel %vm4442_vm10, %v4429_v43, %v4432_v62 }
 0x369   : > { %v16014_v24 = vpop.f32.mrb[16].mxu1  ;;  %v4452_v9 = vsel %vm4444_vm9, %v4435_v49, %v4451_v2  ;;  %v4455_v39 = vsel %vm4445_vm4, %v4441_v37, 1326507024  ;;  %v16025_v44 = vsel %vm4629_vm13, %v15907_v18, 0  ;;  %v4925_v26 = vadd.f32 %v4893_v56, %v1368_v21  ;;  %10553 = vrot.lane.b32.xlu1 %v10552_v52, %s11159_s22  ;;  %v10917_v49 = vpop.eup %10916 }
 0x36a   : > { %10932 = vtanh.f32 %v15819_v30  ;;  %v16029_v36 = vpop.f32.mrb[17].mxu1  ;;  %v4456_v51 = vsel %vm4444_vm9, %v4438_v41, %v4455_v39  ;;  %v8281_v2 = vpop.permute.xlu0 %8280  ;;  %v4446_v37 = vsel %vm4442_vm10, %v4426_v46, %v4429_v43  ;;  %v4448_v18 = vsel %vm4444_vm9, %v4432_v62, %v4447_v5 }
 0x36b   : > { %v10216_v50 = vpop.f32.mrb[18].mxu1  ;;  %v4457_v30 = vsel %vm4443_vm0, %v4454_v40, %v4456_v51  ;;  %v16039_v21 = vshll.u32 %v4418_v23, 8  ;;  %v16041_v56 = vpop.eup %10918  ;;  %v8418_v52 = vmul.f32 %v15465_v54, %v8281_v2  ;;  %v10557_v41 = vpack.i.bf16 %v10917_v49, %v15853_v35 }
 0x36c   : > { %v16046_v39 = vadd.f32 %v10216_v50, %v15884_v12  ;;  %v1064_v42 = vpop.f32.mrb[19].mxu1  ;;  %v4453_v43 = vsel %vm4443_vm0, %v4450_v32, %v4452_v9  ;;  %v16050_v46 = vpop.eup %10920  ;;  %10934 = vtanh.f32 %v15823_v58  ;;  %v4545_v50 = vor.u32 %v15892_v53, %v15876_v61 }
 0x36d   : > { %v16054_v62 = vadd.f32 %v15884_v12, %v1064_v42  ;;  %v10219_v23 = vpop.f32.mrb[20].mxu1  ;;  %v16057_v5 = vmul.u32.u64.low %v16039_v21, %v4457_v30  ;;  %v16058_v54 = vmul.u32.u64.high %v16039_v21, %v4457_v30, %v16057_v5  ;;  %v16060_v35 = vpop.eup %10922  ;;  %v16064_v40 = vadd.f32 %v8418_v52, %v4925_v26  ;;  %10558 = vrot.lane.b32.xlu1 %v10557_v41, %s11159_s22 }
 0x36e   : > { %10936 = vtanh.f32 %v15830_v17  ;;  %v16069_v58 = vadd.f32 %v10219_v23, %v15884_v12  ;;  %v1074_v42 = vpop.f32.mrb[21].mxu1  ;;  %v16071_v32 = vpop.eup %10924  ;;  %v4449_v9 = vsel %vm4443_vm0, %v4446_v37, %v4448_v18  ;;  %v16084_v26 = vand.u32 31, %v16025_v44 }
 0x36f   : > { %17966 = vst [vmem:[#allocation54_spill] sm:$0xff] %v16064_v40  ;;  %17967 = vst [vmem:[#allocation7_spill] sm:$0xff] %v16071_v32  ;;  %10938 = vtanh.f32 %v15837_v8  ;;  %v16077_v51 = vmul.u32.u64.low %v16039_v21, %v4453_v43  ;;  %v16078_v61 = vmul.u32.u64.high %v16039_v21, %v4453_v43, %v16077_v51  ;;  %v10222_v53 = vpop.f32.mrb[22].mxu1  ;;  %v16081_v17 = vpop.eup %10926  ;;  %v16088_v49 = vadd.f32 %v15884_v12, %v1074_v42 }
 0x370   : > { %17968 = vst [vmem:[#allocation8_spill] sm:$0xff] %v16084_v26  ;;  %10940 = vtanh.f32 %v15841_v10  ;;  %v16091_v8 = vadd.f32 %v10222_v53, %v15884_v12  ;;  %v1084_v59 = vpop.f32.mrb[23].mxu1  ;;  %v16093_v2 = vpop.eup %10928  ;;  %v16098_v37 = vsel %vm4549_vm2, %v15888_v1, 920167782  ;;  %v1030_v18 = vadd.f32 %v15971_v47, %v15884_v12 }
 0x371   : > { %10942 = vtanh.f32 %v15848_v7  ;;  %v16104_v10 = vadd.f32 %v15884_v12, %v1084_v59  ;;  %v10225_v30 = vpop.f32.mrb[24].mxu1  ;;  %v4465_v52 = vmul.u32 %v16039_v21, %v4449_v9  ;;  %vm4467_vm7 = vc.u32 %v16058_v54, %v16077_v51 }
 0x372   : > { %v16110_v41 = vadd.f32 %v10225_v30, %v15884_v12  ;;  %v1094_v23 = vpop.f32.mrb[25].mxu1  ;;  %v16114_v7 = vpop.eup %10930  ;;  %v16118_v47 = vsel %vm4549_vm2, %v4545_v50, 1326507024  ;;  %10944 = vtanh.f32 %v15851_v33  ;;  %v4468_v21 = vadd.s32 1, %v16078_v61 }
 0x373   : > { %17970 = vst [vmem:[#allocation45_spill] sm:$0xff] %v16114_v7  ;;  %v16123_v5 = vadd.f32 %v15884_v12, %v1094_v23  ;;  %v10228_v42 = vpop.f32.mrb[26].mxu1  ;;  %v16128_v53 = vsub.s32 32, %v16084_v26  ;;  %10946 = vtanh.f32 %v15859_v13  ;;  %v1040_v59 = vadd.f32 %v15985_v3, %v15884_v12 }
 0x374   : > { %17969 = vst [vmem:[#allocation49_spill] sm:$0xff] %v16110_v41  ;;  %v16125_v9 = vpop.eup %10932  ;;  %v16134_v50 = vadd.f32 %v10228_v42, %v15884_v12  ;;  %v1104_v33 = vpop.f32.mrb[27].mxu1  ;;  %10948 = vtanh.f32 %v15896_v22  ;;  %v1035_v30 = vadd.f32 %v15884_v12, %v15994_v38  ;;  %v4469_v23 = vsel %vm4467_vm7, %v4468_v21, %v16078_v61 }
 0x375   : > { %17971 = vst [vmem:[#allocation46_spill] sm:$0xff] %v16123_v5  ;;  %17972 = vst [vmem:[#allocation52_spill] sm:$0xff] %v16125_v9  ;;  %v16144_v13 = vadd.f32 %v15884_v12, %v1104_v33  ;;  %v16146_v43 = vpop.f32.mrb[28].mxu1  ;;  %v16149_v3 = vshrl.u32 %v16025_v44, 5  ;;  %10950 = vtanh.f32 %v1030_v18  ;;  %v1050_v22 = vadd.f32 %v16000_v16, %v15884_v12  ;;  %v16163_v33 = vld [vmem:[%s11274_s28 + $0x48] sm:$0xff] }
 0x376   : > { %17973 = vst [vmem:[#allocation37_spill] sm:$0xff] %v16128_v53  ;;  %17974 = vst [vmem:[#allocation66_spill] sm:$0xff] %v16134_v50  ;;  %v4470_v42 = vadd.s32 %v4469_v23, %v4465_v52  ;;  %v16153_v40 = vpop.f32.mrb[29].mxu1  ;;  %v16155_v38 = vpop.eup %10934  ;;  %v4644_v61 = vshll.u32 %v17932_v55, %v16084_v26  ;;  %10952 = vtanh.f32 %v15905_v11  ;;  %v1045_v21 = vadd.f32 %v15884_v12, %v16007_v63 }
 0x377   : > { %17975 = vst [vmem:[#allocation67_spill] sm:$0xff] %v16144_v13  ;;  %17976 = vst [vmem:[#allocation68_spill] sm:$0xff] %v16155_v38  ;;  %v16166_v18 = vpop.f32.mrb[30].mxu1  ;;  %v16172_v52 = vshll.u32 %v17939_v15, %v16084_v26  ;;  %10954 = vtanh.f32 %v1040_v59  ;;  %v1060_v23 = vadd.f32 %v16014_v24, %v15884_v12  ;;  %v4645_v44 = vshrl.u32 %v17939_v15, %v16128_v53 }
 0x378   : > { %v16168_v16 = vpop.eup %10936  ;;  %v4471_v11 = vadd.s32 536870912, %v4470_v42  ;;  %v16176_v9 = vpop.f32.mrb[31].mxu1  ;;  %v16184_v38 = vshrl.u32 %v17945_v6, %v16128_v53  ;;  %10956 = vtanh.f32 %v1035_v30  ;;  %v2356_v26 = vshll.u32 %v17932_v55, %v15711_v4 }
 0x379   : > { %17977 = vst [vmem:[#allocation69_spill] sm:$0xff] %v16168_v16  ;;  %v16178_v63 = vpop.eup %10938  ;;  %v1055_v16 = vadd.f32 %v15884_v12, %v16029_v36  ;;  %10958 = vtanh.f32 %v1050_v22  ;;  %v17981_v53 = vand.u32 2147483647, %v16163_v33  ;;  %v2347_v36 = vshll.u32 %v17653_v0, %v15711_v4 }
 0x37a   : > { %17978 = vst [vmem:[#allocation70_spill] sm:$0xff] %v16178_v63  ;;  %v16188_v59 = vpop.eup %10940  ;;  %v16190_v24 = vshrl.u32 %v4471_v11, 30  ;;  %v2357_v63 = vshrl.u32 %v17939_v15, %v15867_v48  ;;  %10960 = vtanh.f32 %v1045_v21  ;;  %v2348_v22 = vshrl.u32 %v17955_v27, %v15867_v48 }
 0x37b   : > { %17979 = vst [vmem:[#allocation71_spill] sm:$0xff] %v16188_v59  ;;  %v16196_v31 = vpop.eup %10942  ;;  %v16200_v30 = vand.u32 8388607, %v17981_v53  ;;  %10962 = vtanh.f32 %v1060_v23  ;;  %v2350_v59 = vshll.u32 %v17955_v27, %v15711_v4  ;;  %v16213_v32 = vor.u32 %v4645_v44, %v4644_v61 }
 0x37c   : > { %17980 = vst [vmem:[#allocation72_spill] sm:$0xff] %v16196_v31  ;;  %v4473_v11 = vshll.u32 %v16190_v24, 30  ;;  %v2351_v31 = vshrl.u32 %v17958_v57, %v15867_v48  ;;  %v16211_v21 = vpop.eup %10944  ;;  %10964 = vtanh.f32 %v15913_v34  ;;  %v2353_v53 = vshll.u32 %v17958_v57, %v15711_v4  ;;  %v16233_v34 = vld [vmem:[%s17485_s9] ss:$0 sm:$0xff] }
 0x37d   : > { %17982 = vst [vmem:[#allocation73_spill] sm:$0xff] %v16211_v21  ;;  %v2354_v23 = vshrl.u32 %v17932_v55, %v15867_v48  ;;  %v16220_v7 = vpop.eup %10946  ;;  %v2358_v50 = vor.u32 %v2357_v63, %v2356_v26  ;;  %v2359_v5 = vshll.u32 %v17939_v15, %v15711_v4  ;;  %v2360_v61 = vshrl.u32 %v17945_v6, %v15867_v48  ;;  %v17985_v21 = vld [vmem:[#allocation27_spill] sm:$0xff] }
 0x37e   : > { %17983 = vst [vmem:[#allocation74_spill] sm:$0xff] %v16220_v7  ;;  %v16222_v13 = vsub.s32 %v4470_v42, %v4473_v11  ;;  %v16228_v44 = vpop.eup %10948  ;;  %v1369_v41 = vmul.f32 %v16233_v34, %v17985_v21  ;;  %10966 = vtanh.f32 %v1055_v16  ;;  %v2346_v26 = vshrl.u32 %v17653_v0, %v15867_v48 }
 0x37f   : > { %17984 = vst [vmem:[#allocation75_spill] sm:$0xff] %v16228_v44  ;;  %vm2365_vm15 = vcmp.lt.s32.totalorder %v15864_v60, 4  ;;  %v10951_v4 = vpop.eup %10950  ;;  %v2338_v6 = vor.u32 8388608, %v16200_v30  ;;  %v2349_v42 = vor.u32 %v2348_v22, %v2347_v36  ;;  %v2352_v63 = vor.u32 %v2351_v31, %v2350_v59 }
 0x380   : > { %v4476_v15 = vsub.s32 0, %v16222_v13  ;;  %v16242_v11 = vpop.eup %10952  ;;  %10968 = vtanh.f32 %v16046_v39  ;;  %v10562_v7 = vpack.i.bf16 %v15960_v14, %v10951_v4  ;;  %v2355_v21 = vor.u32 %v2354_v23, %v2353_v53 }
 0x381   : > { %17986 = vst [vmem:[#allocation27_spill] sm:$0xff] %v16242_v11  ;;  %vm2362_vm14 = vcmp.lt.s32.totalorder %v15864_v60, 1  ;;  %v16247_v16 = vpop.eup %10954  ;;  %v2361_v44 = vor.u32 %v2360_v61, %v2359_v5  ;;  %vm2364_vm3 = vcmp.lt.s32.totalorder %v15864_v60, 3  ;;  %v2371_v30 = vsel %vm2365_vm15, %v2358_v50, 920167782 }
 0x382   : > { %v9804_v48 = vmin.u32 %v4476_v15, %v16222_v13  ;;  %v10957_v31 = vpop.eup %10956  ;;  %10563 = vrot.lane.b32.xlu1 %v10562_v7, %s11159_s22  ;;  %10970 = vtanh.f32 %v16054_v62  ;;  %vm2363_vm11 = vcmp.lt.s32.totalorder %v15864_v60, 2  ;;  %v2367_v39 = vsel %vm2365_vm15, %v2355_v21, 2102212464 }
 0x383   : > { %v16260_v59 = vpop.eup %10958  ;;  %10972 = vtanh.f32 %v16069_v58  ;;  %v2366_v36 = vsel %vm2362_vm14, %v2346_v26, %v2349_v42  ;;  %v2370_v7 = vsel %vm2362_vm14, %v2349_v42, %v2352_v63  ;;  %v10577_v22 = vpack.i.bf16 %v15979_v19, %v10957_v31 }
 0x384   : > { %v4478_v5 = vclz %v9804_v48  ;;  %v10961_v62 = vpop.eup %10960  ;;  %v2372_v23 = vsel %vm2364_vm3, %v2355_v21, %v2371_v30  ;;  %v2374_v61 = vsel %vm2362_vm14, %v2352_v63, %v2355_v21  ;;  %v2368_v26 = vsel %vm2364_vm3, %v2352_v63, %v2367_v39  ;;  %v4761_v48 = vpop.permute.xlu0 %4760 }
 0x385   : > { %v10963_v58 = vpop.eup %10962  ;;  %v10587_v15 = vpack.i.bf16 %v16041_v56, %v10961_v62  ;;  %v2375_v42 = vsel %vm2365_vm15, %v2361_v44, 1326507024  ;;  %vm4653_vm5 = vcmp.lt.s32.totalorder %v16149_v3, 4  ;;  %v4466_v30 = vadd.s32 %v16077_v51, %v16058_v54  ;;  %10578 = vrot.lane.b32.xlu0 %v10577_v22, %s11159_s22  ;;  %v16291_v44 = vld [vmem:[%s17485_s9 + $0x1] ss:$0 sm:$0xff] }
 0x386   : > { %v9805_v4 = vadd.s32 4294967294, %v4478_v5  ;;  %v16279_v19 = vpop.eup %10964  ;;  %v10592_v21 = vpack.i.bf16 %v16050_v46, %v10963_v58  ;;  %v2376_v56 = vsel %vm2364_vm3, %v2358_v50, %v2375_v42  ;;  %v2378_v31 = vshll.u32 %v2338_v6, 8 }
 0x387   : > { %17987 = vst [vmem:[#allocation76_spill] sm:$0xff] %v16279_v19  ;;  %v4894_v63 = vmul.f32 %v16291_v44, %v4761_v48  ;;  %v2373_v39 = vsel %vm2363_vm11, %v2370_v7, %v2372_v23  ;;  %v2377_v54 = vsel %vm2363_vm11, %v2374_v61, %v2376_v56  ;;  %v2369_v50 = vsel %vm2363_vm11, %v2366_v36, %v2368_v26 }
 0x388   : > { %vm9806_vm8 = vcmp.lt.s32.totalorder %v9805_v4, 0  ;;  %v16298_v51 = vpop.eup %10966  ;;  %v16302_v6 = vmul.u32.u64.low %v2378_v31, %v2377_v54  ;;  %v16303_v5 = vmul.u32.u64.high %v2378_v31, %v2377_v54, %v16302_v6  ;;  %v8286_v7 = vpop.permute.xlu0 %8285  ;;  %10974 = vtanh.f32 %v15922_v25 }
 0x389   : > { %v4481_v46 = vsel %vm9806_vm8, 0, %v9805_v4  ;;  %v4926_v62 = vadd.f32 %v4894_v63, %v1369_v41  ;;  %10588 = vrot.lane.b32.xlu0 %v10587_v15, %s11159_s22  ;;  %v16310_v23 = vmul.u32.u64.low %v2378_v31, %v2373_v39  ;;  %v16311_v61 = vmul.u32.u64.high %v2378_v31, %v2373_v39, %v16310_v23  ;;  %v16321_v41 = vld [vmem:[%s17485_s9 + $0x2] ss:$0 sm:$0xff]  ;;  %v17989_v6 = vld [vmem:[#allocation28_spill] sm:$0xff] }
 0x38a   : > { %v4482_v22 = vsub.s32 32, %v4481_v46  ;;  %v4483_v58 = vshll.u32 %v16222_v13, %v4481_v46  ;;  %v4486_v42 = vsub.s32 4294967266, %v4481_v46  ;;  %v16306_v48 = vpop.eup %10968  ;;  %v16316_v60 = vadd.f32 %v16146_v43, %v15884_v12 }
 0x38b   : > { %v8419_v13 = vmul.f32 %v16321_v41, %v8286_v7  ;;  %v4496_v26 = vsub.s32 4, %v16190_v24  ;;  %v2385_v56 = vmul.u32 %v2378_v31, %v2369_v50  ;;  %vm2387_vm12 = vc.u32 %v16303_v5, %v16310_v23  ;;  %v17991_v50 = vld [vmem:[#allocation31_spill] sm:$0xff] }
 0x38c   : > { %v4484_v36 = vshrl.u32 %v4466_v30, %v4482_v22  ;;  %v4487_v25 = vadd.s32 127, %v4486_v42  ;;  %v16326_v15 = vpop.eup %10970  ;;  %v16333_v43 = vadd.f32 %v15884_v12, %v16153_v40  ;;  %10976 = vtanh.f32 %v17989_v6  ;;  %v16343_v22 = vld [vmem:[%s11274_s28 + $0xe8] sm:$0xff] }
 0x38d   : > { %v16335_v63 = vpop.eup %10972  ;;  %v16337_v39 = vadd.f32 %v8419_v13, %v4926_v62  ;;  %vm4412_vm6 = vcmp.lt.s32.totalorder %v16343_v22, 0  ;;  %10593 = vrot.lane.b32.xlu0 %v10592_v21, %s11159_s22  ;;  %v2388_v40 = vadd.s32 1, %v16311_v61  ;;  %v16350_v31 = vadd.f32 %v16166_v18, %v15884_v12  ;;  %v17992_v13 = vld [vmem:[#allocation6_spill] sm:$0xff] }
 0x38e   : > { %v4485_v30 = vor.u32 %v4484_v36, %v4483_v58  ;;  %v4488_v54 = vshll.u32 %v4487_v25, 23  ;;  %10978 = vtanh.f32 %v17991_v50  ;;  %v16355_v42 = vadd.f32 %v15884_v12, %v16176_v9  ;;  %v17993_v9 = vld [vmem:[#allocation48_spill] sm:$0xff]  ;;  %v16373_v36 = vpop.permute.xlu1 %8380 }
 0x38f   : > { %17988 = vst [vmem:[#allocation77_spill] sm:$0xff] %v16337_v39  ;;  %17990 = vst [vmem:[#allocation28_spill] sm:$0xff] %v16350_v31  ;;  %v4649_v7 = vor.u32 %v16184_v38, %v16172_v52  ;;  %10980 = vtanh.f32 %v17992_v13  ;;  %v4497_v21 = vsel %vm4412_vm6, %v4496_v26, %v16190_v24  ;;  %v2389_v18 = vsel %vm2387_vm12, %v2388_v40, %v16311_v61  ;;  %v17995_v25 = vld [vmem:[#allocation60_spill] sm:$0xff]  ;;  %v18006_v26 = vld [vmem:[#allocation41_spill] sm:$0xff] }
 0x390   : > { %v4489_v62 = vor.u32 4788187, %v4488_v54  ;;  %v4492_v58 = vcvt.s32.f32 %v4485_v30  ;;  %v16370_v12 = vsel %vm4653_vm5, %v16213_v32, 920167782  ;;  %10982 = vtanh.f32 %v17993_v9  ;;  %17994 = vst [vmem:[#allocation31_spill] sm:$0xff] %v16373_v36  ;;  %v16391_v40 = vld [vmem:[%s11274_s28 + $0xf0] sm:$0xff] }
 0x391   : > { %v2390_v52 = vadd.s32 %v2389_v18, %v2385_v56  ;;  %10984 = vtanh.f32 %v15964_v45  ;;  %v17996_v24 = vand.u32 2147483647, %v17995_v25  ;;  %v17618_v45 = vand.u32 2147483647, %v16391_v40  ;;  %v18000_v18 = vld [vmem:[#allocation12_spill] sm:$0xff]  ;;  %v18001_v9 = vld [vmem:[#allocation65_spill] sm:$0xff] }
 0x392   : > { %v4490_v38 = vand.u32 2147483647, %v4489_v62  ;;  %v16394_v50 = vpop.eup %10974  ;;  %v17999_v62 = vld [vmem:[#allocation5_spill] sm:$0xff]  ;;  %10986 = vtanh.f32 %v18000_v18  ;;  %v4531_v25 = vshll.u32 %v17653_v0, %v18001_v9  ;;  %v4534_v61 = vshll.u32 %v17955_v27, %v18001_v9 }
 0x393   : > { %vm16378_vm13 = vcmp.le.f32.partialorder %v17996_v24, 0.7853982  ;;  %v2391_v6 = vadd.s32 536870912, %v2390_v52  ;;  %v1389_v13 = vmul.f32 %v16233_v34, %v17999_v62  ;;  %v18003_v30 = vld [vmem:[#allocation53_spill] sm:$0xff]  ;;  %v4537_v18 = vshll.u32 %v17958_v57, %v18001_v9 }
 0x394   : > { %v4493_v54 = vmul.f32 %v4492_v58, %v4490_v38  ;;  %v16388_v56 = vsel %vm16378_vm13, 0, %v4497_v21  ;;  %v18002_v58 = vld [vmem:[#allocation30_spill] sm:$0xff]  ;;  %10988 = vtanh.f32 %v18003_v30  ;;  %v4521_v14 = vand.u32 8388607, %v17618_v45 }
 0x395   : > { %v4532_v38 = vshrl.u32 %v17955_v27, %v18002_v58  ;;  %v16403_v24 = vshrl.u32 %v2391_v6, 30  ;;  %v4535_v46 = vshrl.u32 %v17958_v57, %v18002_v58  ;;  %v4503_v62 = vadd.s32 3, %v16388_v56  ;;  %v4861_v30 = vpop.permute.xlu1 %4860 }
 0x396   : > { %v4494_v21 = vxor.u32 2147483648, %v4493_v54  ;;  %v4538_v4 = vshrl.u32 %v17932_v55, %v18002_v58  ;;  %10990 = vtanh.f32 %v16088_v49  ;;  %v16421_v39 = vpop.eup %10976  ;;  %vm4546_vm4 = vcmp.lt.s32.totalorder %v15872_v20, 1 }
 0x397   : > { %v2393_v53 = vshll.u32 %v16403_v24, 30  ;;  %18004 = vst [vmem:[#allocation6_spill] sm:$0xff] %v16421_v39  ;;  %v4533_v36 = vor.u32 %v4532_v38, %v4531_v25  ;;  %v4536_v31 = vor.u32 %v4535_v46, %v4534_v61  ;;  %v16436_v45 = vsel %vm4653_vm5, %v4649_v7, 1326507024  ;;  %v18035_v39 = vld [vmem:[#allocation50_spill] sm:$0xff] }
 0x398   : > { %v4495_v6 = vsel %vm4412_vm6, %v4494_v21, %v4493_v54  ;;  %v4539_v19 = vor.u32 %v4538_v4, %v4537_v18  ;;  %v16426_v11 = vpop.eup %10978  ;;  %v4914_v54 = vmul.f32 %v16291_v44, %v4861_v30  ;;  %v16440_v25 = vmul.f32 %v16233_v34, %v18006_v26 }
 0x399   : > { %v4498_v9 = vsel %vm16378_vm13, %v16343_v22, %v4495_v6  ;;  %v16429_v49 = vsub.s32 %v2390_v52, %v2393_v53  ;;  %v16432_v21 = vpop.eup %10980  ;;  %vm4548_vm10 = vcmp.lt.s32.totalorder %v15872_v20, 3  ;;  %v16445_v53 = vand.u32 3, %v4503_v62  ;;  %v8386_v7 = vpop.permute.xlu1 %8385 }
 0x39a   : > { %10992 = vcosq.f32 %v4498_v9  ;;  %18005 = vst [vmem:[#allocation48_spill] sm:$0xff] %v16432_v21  ;;  %v16443_v4 = vpop.eup %10982  ;;  %v4946_v46 = vadd.f32 %v4914_v54, %v1389_v13  ;;  %v4530_v61 = vshrl.u32 %v17653_v0, %v18002_v58  ;;  %v4522_v18 = vor.u32 8388608, %v4521_v14  ;;  %v18010_v14 = vld [vmem:[#allocation36_spill] sm:$0xff] }
 0x39b   : > { %10994 = vsinq.f32 %v4498_v9  ;;  %18007 = vst [vmem:[#allocation60_spill] sm:$0xff] %v16443_v4  ;;  %v2396_v52 = vsub.s32 0, %v16429_v49  ;;  %v16450_v38 = vpop.eup %10984  ;;  %vm4547_vm9 = vcmp.lt.s32.totalorder %v15872_v20, 2  ;;  %v4554_v6 = vsel %vm4546_vm4, %v4533_v36, %v4536_v31 }
 0x39c   : > { %18008 = vst [vmem:[#allocation5_spill] sm:$0xff] %v16450_v38  ;;  %v4556_v13 = vsel %vm4548_vm10, %v4539_v19, %v16098_v37  ;;  %v8439_v62 = vmul.f32 %v16321_v41, %v8386_v7  ;;  %10996 = vtanh.f32 %v16091_v8  ;;  %v4551_v58 = vsel %vm4549_vm2, %v4539_v19, 2102212464  ;;  %v16463_v9 = vpop.eup %10986  ;;  %v18024_v38 = vld [vmem:[#allocation17_spill] sm:$0xff] }
 0x39d   : > { %v9724_v30 = vmin.u32 %v2396_v52, %v16429_v49  ;;  %18009 = vst [vmem:[#allocation12_spill] sm:$0xff] %v16463_v9  ;;  %v16467_v54 = vmul.f32 %v16233_v34, %v18010_v14  ;;  %vm4502_vm0 = vweird.f32 %v16343_v22  ;;  %10998 = vtanh.f32 %v16104_v10 }
 0x39e   : > { %v4558_v37 = vsel %vm4546_vm4, %v4536_v31, %v4539_v19  ;;  %v16473_v26 = vadd.f32 %v8439_v62, %v4946_v46  ;;  %vm4505_vm7 = vcmp.lt.s32.totalorder %v16445_v53, 2  ;;  %v4557_v52 = vsel %vm4547_vm9, %v4554_v6, %v4556_v13  ;;  %v16478_v7 = vpop.eup %10988 }
 0x39f   : > { %v2398_v8 = vclz %v9724_v30  ;;  %18012 = vst [vmem:[#allocation30_spill] sm:$0xff] %v16478_v7  ;;  %vm2332_vm2 = vcmp.lt.s32.totalorder %v16163_v33, 0  ;;  %v4550_v34 = vsel %vm4546_vm4, %v4530_v61, %v4533_v36  ;;  %v4552_v10 = vsel %vm4548_vm10, %v4536_v31, %v4551_v58 }
 0x3a0   : > { %18011 = vst [vmem:[#allocation65_spill] sm:$0xff] %v16473_v26  ;;  %v4560_v19 = vsel %vm4548_vm10, %v15888_v1, %v16118_v47  ;;  %v4562_v46 = vshll.u32 %v4522_v18, 8  ;;  %v16489_v62 = vpop.eup %10990  ;;  %vm4506_vm15 = vcmp.eq.s32.totalorder %v16445_v53, 0  ;;  %vm4509_vm14 = vcmp.eq.s32.totalorder %v16445_v53, 2  ;;  %v18014_v1 = vld [vmem:[#allocation49_spill] sm:$0xff] }
 0x3a1   : > { %18013 = vst [vmem:[#allocation53_spill] sm:$0xff] %v16489_v62  ;;  %v9725_v6 = vadd.s32 4294967294, %v2398_v8  ;;  %v4561_v13 = vsel %vm4547_vm9, %v4558_v37, %v4560_v19  ;;  %11000 = vtanh.f32 %v18014_v1  ;;  %v18015_v47 = vand.u32 2147483647, %v16163_v33  ;;  %v18018_v19 = vld [vmem:[#allocation46_spill] sm:$0xff] }
 0x3a2   : > { %v16495_v36 = vmul.u32.u64.low %v4562_v46, %v4561_v13  ;;  %v16496_v61 = vmul.u32.u64.high %v4562_v46, %v4561_v13, %v16495_v36  ;;  %v16498_v31 = vmul.u32.u64.low %v4562_v46, %v4557_v52  ;;  %v16499_v30 = vmul.u32.u64.high %v4562_v46, %v4557_v52, %v16498_v31 }
 0x3a3   : > { %vm16507_vm3 = vcmp.le.f32.partialorder %v18015_v47, 0.7853982  ;;  %v2386_v14 = vadd.s32 %v16310_v23, %v16303_v5  ;;  %vm9726_vm11 = vcmp.lt.s32.totalorder %v9725_v6, 0  ;;  %v4553_v37 = vsel %vm4547_vm9, %v4550_v34, %v4552_v10  ;;  %v18019_v5 = vld [vmem:[#allocation66_spill] sm:$0xff]  ;;  %v16529_v34 = vld [vmem:[%s11274_s28 + $0x50] sm:$0xff] }
 0x3a4   : > { %v16502_v58 = vpop.eup %10992  ;;  %11002 = vtanh.f32 %v18018_v19  ;;  %v2401_v13 = vsel %vm9726_vm11, 0, %v9725_v6  ;;  %v2416_v36 = vsub.s32 4, %v16403_v24  ;;  %v4569_v23 = vmul.u32 %v4562_v46, %v4553_v37  ;;  %18020 = vst [vmem:[#allocation41_spill] sm:$0xff] %v16529_v34  ;;  %v18021_v37 = vld [vmem:[#allocation67_spill] sm:$0xff] }
 0x3a5   : > { %v16515_v8 = vpop.eup %10994  ;;  %v17620_v52 = vxor.u32 2147483648, %v16502_v58  ;;  %v2402_v47 = vsub.s32 32, %v2401_v13  ;;  %v2403_v26 = vshll.u32 %v16429_v49, %v2401_v13  ;;  %v2406_v7 = vsub.s32 4294967266, %v2401_v13 }
 0x3a6   : > { %v17621_v1 = vxor.u32 2147483648, %v16515_v8  ;;  %11004 = vtanh.f32 %v18019_v5  ;;  %v16532_v6 = vpop.eup %10996  ;;  %vm4571_vm8 = vc.u32 %v16496_v61, %v16498_v31  ;;  %v16547_v5 = vand.u32 3, %v16388_v56 }
 0x3a7   : > { %v4511_v20 = vsel %vm4509_vm14, %v17620_v52, %v16515_v8  ;;  %v2404_v19 = vshrl.u32 %v2386_v14, %v2402_v47  ;;  %v2407_v13 = vadd.s32 127, %v2406_v7  ;;  %v16541_v52 = vpop.eup %10998  ;;  %11006 = vtanh.f32 %v18021_v37  ;;  %v18023_v37 = vld [vmem:[#allocation11_spill] sm:$0xff] }
 0x3a8   : > { %v4508_v49 = vsel %vm4506_vm15, %v16502_v58, %v17621_v1  ;;  %v4572_v10 = vadd.s32 1, %v16499_v30  ;;  %v2417_v47 = vsel %vm2332_vm2, %v2416_v36, %v16403_v24  ;;  %v2451_v56 = vshll.u32 %v17653_v0, %v18023_v37 }
 0x3a9   : > { %v4512_v46 = vsel %vm4505_vm7, %v4508_v49, %v4511_v20  ;;  %v2405_v14 = vor.u32 %v2404_v19, %v2403_v26  ;;  %v2408_v7 = vshll.u32 %v2407_v13, 23  ;;  %v18022_v20 = vand.u32 2147483647, %v16529_v34 }
 0x3aa   : > { %v4513_v1 = vsel %vm4502_vm0, nan, %v4512_v46  ;;  %v4573_v53 = vsel %vm4571_vm8, %v4572_v10, %v16499_v30  ;;  %v2452_v9 = vshrl.u32 %v17955_v27, %v18024_v38  ;;  %v2454_v19 = vshll.u32 %v17955_v27, %v18023_v37 }
 0x3ab   : > { %4870 = vperm.xlu1 %10551, %v4513_v1   ;;  %v2441_v49 = vand.u32 8388607, %v18022_v20  ;;  %v2409_v21 = vor.u32 4788187, %v2408_v7  ;;  %v2412_v46 = vcvt.s32.f32 %v2405_v14  ;;  %v4574_v26 = vadd.s32 %v4573_v53, %v4569_v23  ;;  %v16573_v1 = vpop.eup %11000 }
 0x3ac   : > { %v16566_v24 = vsel %vm16507_vm3, 0, %v2417_v47  ;;  %vm8033_vm12 = vcmp.eq.s32.totalorder %v16547_v5, 0  ;;  %v2455_v30 = vshrl.u32 %v17958_v57, %v18024_v38  ;;  %v2457_v36 = vshll.u32 %v17958_v57, %v18023_v37  ;;  %v18027_v37 = vld [vmem:[#allocation16_spill] sm:$0xff] }
 0x3ad   : > { %v2410_v10 = vand.u32 2147483647, %v2409_v21  ;;  %vm8032_vm6 = vcmp.lt.s32.totalorder %v16547_v5, 2  ;;  %v4575_v23 = vadd.s32 536870912, %v4574_v26  ;;  %v2453_v13 = vor.u32 %v2452_v9, %v2451_v56 }
 0x3ae   : > { %v2458_v14 = vshrl.u32 %v17932_v55, %v18024_v38  ;;  %v16578_v7 = vpop.eup %11002  ;;  %v18026_v47 = vpack.i.bf16 %v15976_v28, %v16247_v16  ;;  %v2442_v53 = vor.u32 8388608, %v2441_v49  ;;  %v2456_v20 = vor.u32 %v2455_v30, %v2454_v19 }
 0x3af   : > { %18025 = vst [vmem:[#allocation36_spill] sm:$0xff] %v16578_v7  ;;  %vm2466_vm13 = vcmp.lt.s32.totalorder %v18027_v37, 1  ;;  %vm2468_vm4 = vcmp.lt.s32.totalorder %v18027_v37, 3  ;;  %v2413_v21 = vmul.f32 %v2412_v46, %v2410_v10  ;;  %vm8036_vm10 = vcmp.eq.s32.totalorder %v16547_v5, 2  ;;  %v18030_v10 = vld [vmem:[#allocation55_spill] sm:$0xff] }
 0x3b0   : > { %10568 = vrot.lane.b32.xlu1 %v18026_v47, %s11159_s22  ;;  %v16587_v9 = vshrl.u32 %v4575_v23, 30  ;;  %v2459_v56 = vor.u32 %v2458_v14, %v2457_v36  ;;  %v16589_v34 = vpop.eup %11004  ;;  %v2423_v4 = vadd.s32 3, %v16566_v24  ;;  %v2450_v28 = vshrl.u32 %v17653_v0, %v18024_v38  ;;  %v18031_v36 = vld [vmem:[#allocation44_spill] sm:$0xff]  ;;  %v18032_v38 = vld [vmem:[#allocation7_spill] sm:$0xff]  ;;  %v18033_v47 = vld [vmem:[#allocation18_spill] sm:$0xff] }
 0x3b1   : > { %18028 = vst [vmem:[#allocation49_spill] sm:$0xff] %v16589_v34  ;;  %vm2467_vm9 = vcmp.lt.s32.totalorder %v18027_v37, 2  ;;  %v2414_v19 = vxor.u32 2147483648, %v2413_v21  ;;  %v2474_v30 = vsel %vm2466_vm13, %v2453_v13, %v2456_v20  ;;  %v2480_v23 = vsel %vm2468_vm4, %v18031_v36, %v18030_v10  ;;  %v16604_v14 = vpop.eup %11006 }
 0x3b2   : > { %v4577_v46 = vshll.u32 %v16587_v9, 30  ;;  %v18034_v34 = vpack.i.bf16 %v18032_v38, %v18033_v47  ;;  %v2476_v49 = vsel %vm2468_vm4, %v2459_v56, %v18035_v39  ;;  %v2478_v62 = vsel %vm2466_vm13, %v2456_v20, %v2459_v56  ;;  %v4766_v47 = vpop.permute.xlu0 %4765 }
 0x3b3   : > { %v16615_v16 = vshll.u32 %v2442_v53, 8  ;;  %v2415_v10 = vsel %vm2332_vm2, %v2414_v19, %v2413_v21  ;;  %v18036_v36 = vxor.u32 2147483648, %v16502_v58  ;;  %v2471_v39 = vsel %vm2469_vm1, %v2459_v56, 2102212464 }
 0x3b4   : > { %10573 = vrot.lane.b32.xlu1 %v18034_v34, %s11159_s22  ;;  %v16626_v38 = vsub.s32 %v4574_v26, %v4577_v46  ;;  %v2418_v53 = vsel %vm16507_vm3, %v16163_v33, %v2415_v10  ;;  %v18037_v7 = vxor.u32 2147483648, %v16515_v8  ;;  %v2470_v19 = vsel %vm2466_vm13, %v2450_v28, %v2453_v13 }
 0x3b5   : > { %v8038_v34 = vsel %vm8036_vm10, %v18036_v36, %v16515_v8  ;;  %v2481_v26 = vsel %vm2467_vm9, %v2478_v62, %v2480_v23  ;;  %v4895_v46 = vmul.f32 %v16291_v44, %v4766_v47  ;;  %11008 = vcosq.f32 %v2418_v53  ;;  %v18041_v36 = vld [vmem:[#allocation75_spill] sm:$0xff]  ;;  %v18080_v23 = vld [vmem:[#allocation53_spill] sm:$0xff] }
 0x3b6   : > { %v8035_v21 = vsel %vm8033_vm12, %v16502_v58, %v18037_v7  ;;  %v4580_v56 = vsub.s32 0, %v16626_v38  ;;  %v2477_v18 = vsel %vm2467_vm9, %v2474_v30, %v2476_v49  ;;  %v18038_v8 = vpack.i.bf16 %v15988_v29, %v16260_v59  ;;  %v18039_v49 = vld [vmem:[#allocation40_spill] sm:$0xff]  ;;  %v8291_v10 = vpop.permute.xlu0 %8290 }
 0x3b7   : > { %11010 = vsinq.f32 %v2418_v53  ;;  %v2472_v58 = vsel %vm2468_vm4, %v2456_v20, %v2471_v39  ;;  %v16653_v13 = vmul.u32.u64.low %v16615_v16, %v2481_v26  ;;  %v16654_v62 = vmul.u32.u64.high %v16615_v16, %v2481_v26, %v16653_v13  ;;  %v18040_v30 = vld [vmem:[#allocation68_spill] sm:$0xff] }
 0x3b8   : > { %10583 = vrot.lane.b32.xlu1 %v18038_v8, %s11159_s22  ;;  %v4927_v7 = vadd.f32 %v4895_v46, %v16440_v25  ;;  %11012 = vtanh.f32 %v16316_v60  ;;  %v9808_v28 = vmin.u32 %v4580_v56, %v16626_v38  ;;  %v8039_v29 = vsel %vm8032_vm6, %v8035_v21, %v8038_v34 }
 0x3b9   : > { %v16664_v59 = vmul.u32.u64.low %v16615_v16, %v2477_v18  ;;  %v16665_v20 = vmul.u32.u64.high %v16615_v16, %v2477_v18, %v16664_v59  ;;  %v8420_v25 = vmul.f32 %v16321_v41, %v8291_v10  ;;  %11014 = vtanh.f32 %v16333_v43 }
 0x3ba   : > { %v4582_v60 = vclz %v9808_v28  ;;  %v2473_v47 = vsel %vm2467_vm9, %v2470_v19, %v2472_v58  ;;  %vm2422_vm1 = vweird.f32 %v16163_v33  ;;  %v2424_v5 = vand.u32 3, %v2423_v4  ;;  %v9263_v33 = vld [vmem:[%s17487_s11 + $0x8] sm:$0xff] }
 0x3bb   : > { %v18042_v34 = vpack.i.bf16 %v16060_v35, %v16298_v51  ;;  %11016 = vtanh.f32 %v16355_v42  ;;  %v16681_v53 = vand.u32 3, %v16566_v24  ;;  %v16683_v21 = vadd.f32 %v8420_v25, %v4927_v7  ;;  %v16710_v7 = vld [vmem:[%s11274_s28 + $0xf8] sm:$0xff]  ;;  %v18052_v24 = vld [vmem:[#allocation76_spill] sm:$0xff]  ;;  %v18078_v51 = vld [vmem:[#allocation30_spill] sm:$0xff] }
 0x3bc   : > { %v8040_v43 = vsel %vm4502_vm0, nan, %v8039_v29  ;;  %v9809_v37 = vadd.s32 4294967294, %v4582_v60  ;;  %vm2491_vm7 = vc.u32 %v16654_v62, %v16664_v59  ;;  %v4600_v4 = vsub.s32 4, %v16587_v9 }
 0x3bd   : > { %10598 = vrot.lane.b32.xlu1 %v18042_v34, %s11159_s22  ;;  %v2489_v19 = vmul.u32 %v16615_v16, %v2473_v47  ;;  %v2492_v35 = vadd.s32 1, %v16665_v20  ;;  %v18043_v42 = vand.u32 2147483647, %v16391_v40  ;;  %vm4516_vm0 = vcmp.lt.s32.totalorder %v16391_v40, 0 }
 0x3be   : > { %v4570_v22 = vadd.s32 %v16498_v31, %v16496_v61  ;;  %vm9810_vm15 = vcmp.lt.s32.totalorder %v9809_v37, 0  ;;  %vm2425_vm14 = vcmp.lt.s32.totalorder %v2424_v5, 2  ;;  %vm2426_vm3 = vcmp.eq.s32.totalorder %v2424_v5, 0 }
 0x3bf   : > { %vm16696_vm2 = vcmp.le.f32.partialorder %v18043_v42, 0.7853982  ;;  %vm5973_vm11 = vcmp.eq.s32.totalorder %v16681_v53, 0  ;;  %v4585_v16 = vsel %vm9810_vm15, 0, %v9809_v37  ;;  %v2493_v26 = vsel %vm2491_vm7, %v2492_v35, %v16665_v20  ;;  %v11009_v46 = vpop.eup %11008 }
 0x3c0   : > { %vm2429_vm8 = vcmp.eq.s32.totalorder %v2424_v5, 2  ;;  %v4586_v56 = vsub.s32 32, %v4585_v16  ;;  %v4587_v18 = vshll.u32 %v16626_v38, %v4585_v16  ;;  %v4590_v8 = vsub.s32 4294967266, %v4585_v16  ;;  %v18046_v38 = vld [vmem:[#allocation8_spill] sm:$0xff] }
 0x3c1   : > { %8395 = vperm.xlu1 %10551, %v8040_v43   ;;  %v11011_v58 = vpop.eup %11010  ;;  %v2430_v13 = vxor.u32 2147483648, %v11009_v46  ;;  %v4601_v61 = vsel %vm4516_vm0, %v4600_v4, %v16587_v9  ;;  %v2494_v31 = vadd.s32 %v2493_v26, %v2489_v19  ;;  %v17632_v28 = vand.u32 2147483647, %v16710_v7  ;;  %v18048_v43 = vld [vmem:[#allocation37_spill] sm:$0xff] }
 0x3c2   : > { %v16713_v10 = vpop.eup %11012  ;;  %v2427_v29 = vxor.u32 2147483648, %v11011_v58  ;;  %vm5972_vm12 = vcmp.lt.s32.totalorder %v16681_v53, 2  ;;  %v4588_v20 = vshrl.u32 %v4570_v22, %v4586_v56  ;;  %v4591_v25 = vadd.s32 127, %v4590_v8 }
 0x3c3   : > { %v4635_v60 = vshll.u32 %v17653_v0, %v18046_v38  ;;  %v2431_v47 = vsel %vm2429_vm8, %v2430_v13, %v11011_v58  ;;  %v18047_v9 = vpack.i.bf16 %v16093_v2, %v16326_v15  ;;  %v2495_v34 = vadd.s32 536870912, %v2494_v31  ;;  %v16727_v19 = vpop.eup %11014 }
 0x3c4   : > { %v4636_v37 = vshrl.u32 %v17955_v27, %v18048_v43  ;;  %v4638_v4 = vshll.u32 %v17955_v27, %v18046_v38  ;;  %v2428_v35 = vsel %vm2426_vm3, %v11009_v46, %v2427_v29  ;;  %v4589_v42 = vor.u32 %v4588_v20, %v4587_v18 }
 0x3c5   : > { %10608 = vrot.lane.b32.xlu1 %v18047_v9, %s11159_s22  ;;  %v4592_v22 = vshll.u32 %v4591_v25, 23  ;;  %v16732_v16 = vsel %vm16696_vm2, 0, %v4601_v61  ;;  %v16734_v26 = vpop.eup %11016  ;;  %v2432_v2 = vsel %vm2425_vm14, %v2428_v35, %v2431_v47  ;;  %v16737_v15 = vshrl.u32 %v2495_v34, 30 }
 0x3c6   : > { %v4625_v56 = vand.u32 8388607, %v17632_v28  ;;  %v4639_v27 = vshrl.u32 %v17958_v57, %v18048_v43  ;;  %v2433_v18 = vsel %vm2422_vm1, nan, %v2432_v2  ;;  %vm5976_vm6 = vcmp.eq.s32.totalorder %v16681_v53, 2  ;;  %v18079_v28 = vld [vmem:[#allocation45_spill] sm:$0xff] }
 0x3c7   : > { %v4593_v8 = vor.u32 4788187, %v4592_v22  ;;  %v4596_v61 = vcvt.s32.f32 %v4589_v42  ;;  %4770 = vperm.xlu0 %10550, %v2433_v18   ;;  %v2497_v20 = vshll.u32 %v16737_v15, 30  ;;  %v4637_v5 = vor.u32 %v4636_v37, %v4635_v60 }
 0x3c8   : > { %v4640_v25 = vor.u32 %v4639_v27, %v4638_v4  ;;  %v4641_v47 = vshll.u32 %v17958_v57, %v18046_v38  ;;  %v4607_v34 = vadd.s32 3, %v16732_v16  ;;  %v4642_v35 = vshrl.u32 %v17932_v55, %v18048_v43 }
 0x3c9   : > { %v4594_v9 = vand.u32 2147483647, %v4593_v8  ;;  %vm4650_vm13 = vcmp.lt.s32.totalorder %v16149_v3, 1  ;;  %v16753_v2 = vsub.s32 %v2494_v31, %v2497_v20  ;;  %v4626_v22 = vor.u32 8388608, %v4625_v56  ;;  %v18050_v8 = vld [vmem:[#allocation27_spill] sm:$0xff] }
 0x3ca   : > { %v4634_v42 = vshrl.u32 %v17653_v0, %v18048_v43  ;;  %vm4652_vm4 = vcmp.lt.s32.totalorder %v16149_v3, 3  ;;  %v5975_v60 = vsel %vm5973_vm11, %v11009_v46, %v2427_v29  ;;  %v5978_v57 = vsel %vm5976_vm6, %v2430_v13, %v11011_v58 }
 0x3cb   : > { %v4597_v38 = vmul.f32 %v4596_v61, %v4594_v9  ;;  %v4643_v37 = vor.u32 %v4642_v35, %v4641_v47  ;;  %v18049_v55 = vpack.i.bf16 %v16081_v17, %v16306_v48  ;;  %v2500_v31 = vsub.s32 0, %v16753_v2  ;;  %v18053_v35 = vld [vmem:[#allocation36_spill] sm:$0xff] }
 0x3cc   : > { %vm4651_vm10 = vcmp.lt.s32.totalorder %v16149_v3, 2  ;;  %v4658_v0 = vsel %vm4650_vm13, %v4637_v5, %v4640_v25  ;;  %v4664_v46 = vsel %vm4652_vm4, %v16213_v32, %v16436_v45  ;;  %v5979_v29 = vsel %vm5972_vm12, %v5975_v60, %v5978_v57  ;;  %v4866_v45 = vpop.permute.xlu1 %4865 }
 0x3cd   : > { %10603 = vrot.lane.b32.xlu0 %v18049_v55, %s11159_s22  ;;  %v4598_v58 = vxor.u32 2147483648, %v4597_v38  ;;  %v4655_v13 = vsel %vm4653_vm5, %v4643_v37, 2102212464  ;;  %v4660_v17 = vsel %vm4652_vm4, %v4643_v37, %v16370_v12  ;;  %v4662_v48 = vsel %vm4650_vm13, %v4640_v25, %v4643_v37  ;;  %v18054_v37 = vld [vmem:[#allocation4_spill] sm:$0xff] }
 0x3ce   : > { %v9728_v43 = vmin.u32 %v2500_v31, %v16753_v2  ;;  %v4654_v4 = vsel %vm4650_vm13, %v4634_v42, %v4637_v5  ;;  %v4656_v32 = vsel %vm4652_vm4, %v4640_v25, %v4655_v13  ;;  %v16790_v27 = vand.u32 3, %v4607_v34  ;;  %v9262_v42 = vld [vmem:[%s17487_s11] sm:$0xff]  ;;  %v18055_v55 = vld [vmem:[#allocation52_spill] sm:$0xff]  ;;  %v18069_v31 = vld [vmem:[#allocation41_spill] sm:$0xff] }
 0x3cf   : > { %v4599_v56 = vsel %vm4516_vm0, %v4598_v58, %v4597_v38  ;;  %v4661_v12 = vsel %vm4651_vm10, %v4658_v0, %v4660_v17  ;;  %v4666_v18 = vshll.u32 %v4626_v22, 8  ;;  %v4915_v53 = vmul.f32 %v16291_v44, %v4866_v45  ;;  %v18056_v58 = vld [vmem:[#allocation6_spill] sm:$0xff]  ;;  %v18058_v45 = vld [vmem:[#allocation28_spill] sm:$0xff]  ;;  %v18075_v22 = vld [vmem:[#allocation5_spill] sm:$0xff] }
 0x3d0   : > { %v18051_v61 = vpack.i.bf16 %v16335_v63, %v18050_v8  ;;  %v4602_v20 = vsel %vm16696_vm2, %v16391_v40, %v4599_v56  ;;  %v2502_v5 = vclz %v9728_v43  ;;  %v4665_v25 = vsel %vm4651_vm10, %v4662_v48, %v4664_v46  ;;  %v8391_v60 = vpop.permute.xlu1 %8390 }
 0x3d1   : > { %v5980_v47 = vsel %vm2422_vm1, nan, %v5979_v29  ;;  %11018 = vcosq.f32 %v4602_v20  ;;  %v2490_v44 = vadd.s32 %v16664_v59, %v16654_v62  ;;  %v4657_v9 = vsel %vm4651_vm10, %v4654_v4, %v4656_v32  ;;  %v9265_v32 = vld [vmem:[%s17487_s11 + $0x18] sm:$0xff] }
 0x3d2   : > { %10613 = vrot.lane.b32.xlu0 %v18051_v61, %s11159_s22  ;;  %v4947_v63 = vadd.f32 %v4915_v53, %v16467_v54  ;;  %11020 = vsinq.f32 %v4602_v20  ;;  %v9729_v34 = vadd.s32 4294967294, %v2502_v5  ;;  %v8440_v54 = vmul.f32 %v16321_v41, %v8391_v60  ;;  %v9264_v41 = vld [vmem:[%s17487_s11 + $0x10] sm:$0xff]  ;;  %v9267_v53 = vld [vmem:[%s17487_s11 + $0x28] sm:$0xff]  ;;  %v18060_v5 = vld [vmem:[#allocation70_spill] sm:$0xff] }
 0x3d3   : > { %v16819_v62 = vmul.u32.u64.low %v4666_v18, %v4665_v25  ;;  %v16820_v59 = vmul.u32.u64.high %v4666_v18, %v4665_v25, %v16819_v62  ;;  %v16822_v3 = vmul.u32.u64.low %v4666_v18, %v4661_v12  ;;  %v16823_v57 = vmul.u32.u64.high %v4666_v18, %v4661_v12, %v16822_v3  ;;  %v18059_v20 = vld [vmem:[#allocation3_spill] sm:$0xff] }
 0x3d4   : > { %vm9730_vm5 = vcmp.lt.s32.totalorder %v9729_v34, 0  ;;  %v4673_v38 = vmul.u32 %v4666_v18, %v4657_v9  ;;  %v10326_v46 = vpack.c.bf16 %v9263_v33, %v9262_v42  ;;  %v16831_v17 = vadd.f32 %v8440_v54, %v4947_v63  ;;  %v9266_v18 = vld [vmem:[%s17487_s11 + $0x20] sm:$0xff]  ;;  %v18062_v42 = vld [vmem:[#allocation49_spill] sm:$0xff] }
 0x3d5   : > { %v2505_v0 = vsel %vm9730_vm5, 0, %v9729_v34  ;;  %v11160_v4 = vmov 0.0|0.0   ;;  %11022 = vtanh.f32 %v18058_v45  ;;  %vm4675_vm9 = vc.u32 %v16820_v59, %v16822_v3  ;;  %v18061_v34 = vld [vmem:[#allocation60_spill] sm:$0xff]  ;;  %v18063_v62 = vld [vmem:[#allocation42_spill] sm:$0xff]  ;;  %v18064_v54 = vld [vmem:[#allocation69_spill] sm:$0xff] }
 0x3d6   : > { %8295 = vperm.xlu0 %10550, %v5980_v47   ;;  %18057 = vst [vmem:[#allocation46_spill] sm:$0xff] %v16831_v17  ;;  %v2506_v48 = vsub.s32 32, %v2505_v0  ;;  %v2507_v29 = vshll.u32 %v16753_v2, %v2505_v0  ;;  %v2510_v43 = vsub.s32 4294967266, %v2505_v0  ;;  %10373 = vmatprep.subr.bf16.mxu1 %v11160_v4  ;;  %v4676_v2 = vadd.s32 1, %v16823_v57 }
 0x3d7   : > { %10325 = vmatprep.subr.bf16.mxu0 %v11160_v4  ;;  %10389 = vmatpush1.bf16.msra.mxu1 %v10326_v46  ;;  %vm4606_vm1 = vweird.f32 %v16391_v40  ;;  %vm4609_vm7 = vcmp.lt.s32.totalorder %v16790_v27, 2  ;;  %vm4610_vm2 = vcmp.eq.s32.totalorder %v16790_v27, 0  ;;  %v10329_v61 = vpack.c.bf16 %v9265_v32, %v9264_v41  ;;  %v9277_v40 = vld [vmem:[%s17487_s11 + $0x78] sm:$0xff] }
 0x3d8   : > { %10327 = vmatpush1.bf16.msra.mxu0 %v10326_v46  ;;  %v2508_v56 = vshrl.u32 %v2490_v44, %v2506_v48  ;;  %v2511_v12 = vadd.s32 127, %v2510_v43  ;;  %10374 = vmatprep.subr.bf16.mxu1 %v11160_v4  ;;  %v4677_v8 = vsel %vm4675_vm9, %v4676_v2, %v16823_v57  ;;  %vm4613_vm0 = vcmp.eq.s32.totalorder %v16790_v27, 2  ;;  %v18065_v46 = vld [vmem:[#allocation48_spill] sm:$0xff] }
 0x3d9   : > { %10328 = vmatprep.subr.bf16.mxu0 %v11160_v4  ;;  %v4678_v9 = vadd.s32 %v4677_v8, %v4673_v38  ;;  %v10332_v60 = vpack.c.bf16 %v9267_v53, %v9266_v18  ;;  %v9268_v38 = vld [vmem:[%s17487_s11 + $0x30] sm:$0xff]  ;;  %v8134_v25 = vand.u32 3, %v16732_v16  ;;  %vm2436_vm15 = vcmp.lt.s32.totalorder %v18069_v31, 0  ;;  %v9270_v16 = vld [vmem:[%s17487_s11 + $0x40] sm:$0xff] }
 0x3da   : > { %v2509_v47 = vor.u32 %v2508_v56, %v2507_v29  ;;  %v2512_v44 = vshll.u32 %v2511_v12, 23  ;;  %v9269_v29 = vld [vmem:[%s17487_s11 + $0x38] sm:$0xff]  ;;  %v2520_v56 = vsub.s32 4, %v16737_v15  ;;  %v18066_v12 = vld [vmem:[#allocation10_spill] sm:$0xff]  ;;  %v18067_v18 = vld [vmem:[#allocation72_spill] sm:$0xff]  ;;  %v18081_v17 = vpack.i.bf16 %v18079_v28, %v18080_v23 }
 0x3db   : > { %v11019_v63 = vpop.eup %11018  ;;  %10390 = vmatpush1.bf16.msra.mxu1 %v10329_v61  ;;  %v4679_v45 = vadd.s32 536870912, %v4678_v9  ;;  %v18068_v8 = vld [vmem:[#allocation12_spill] sm:$0xff]  ;;  %v10335_v33 = vpack.c.bf16 %v9269_v29, %v9268_v38  ;;  %vm8136_vm3 = vcmp.eq.s32.totalorder %v8134_v25, 0  ;;  %vm8139_vm11 = vcmp.eq.s32.totalorder %v8134_v25, 2  ;;  %v9274_v23 = vld [vmem:[%s17487_s11 + $0x60] sm:$0xff]  ;;  %v9275_v28 = vld [vmem:[%s17487_s11 + $0x68] sm:$0xff] }
 0x3dc   : > { %v11021_v48 = vpop.eup %11020  ;;  %v4614_v43 = vxor.u32 2147483648, %v11019_v63  ;;  %v2513_v41 = vor.u32 4788187, %v2512_v44  ;;  %v2516_v32 = vcvt.s32.f32 %v2509_v47  ;;  %10375 = vmatprep.subr.bf16.mxu1 %v11160_v4  ;;  %10330 = vmatpush1.bf16.msra.mxu0 %v10329_v61  ;;  %v2521_v38 = vsel %vm2436_vm15, %v2520_v56, %v16737_v15 }
 0x3dd   : > { %v4611_v2 = vxor.u32 2147483648, %v11021_v48  ;;  %10331 = vmatprep.subr.bf16.mxu0 %v11160_v4  ;;  %v16883_v57 = vshrl.u32 %v4679_v45, 30  ;;  %vm8135_vm8 = vcmp.lt.s32.totalorder %v8134_v25, 2  ;;  %vm2526_vm10 = vweird.f32 %v18069_v31 }
 0x3de   : > { %v4615_v44 = vsel %vm4613_vm0, %v4614_v43, %v11021_v48  ;;  %v2514_v0 = vand.u32 2147483647, %v2513_v41  ;;  %v9271_v41 = vld [vmem:[%s17487_s11 + $0x48] sm:$0xff]  ;;  %vm9197_vm5 = vcmask 523264   ;;  %vm4620_vm9 = vcmp.lt.s32.totalorder %v16710_v7, 0 }
 0x3df   : > { %v4612_v61 = vsel %vm4610_vm2, %v11019_v63, %v4611_v2  ;;  %10391 = vmatpush1.bf16.msra.mxu1 %v10332_v60  ;;  %v4681_v13 = vshll.u32 %v16883_v57, 30  ;;  %v16898_v45 = vpop.eup %11022 }
 0x3e0   : > { %v4616_v53 = vsel %vm4609_vm7, %v4612_v61, %v4615_v44  ;;  %v2517_v47 = vmul.f32 %v2516_v32, %v2514_v0  ;;  %10376 = vmatprep.subr.bf16.mxu1 %v11160_v4  ;;  %10333 = vmatpush1.bf16.msra.mxu0 %v10332_v60  ;;  %v18070_v0 = vand.u32 2147483647, %v18069_v31  ;;  %v18073_v44 = vld [vmem:[#allocation47_spill] sm:$0xff]  ;;  %v10702_v39 = vpack.i.bf16 %v16898_v45, %v18078_v51  ;;  %v18083_v32 = vld [vmem:[#allocation73_spill] sm:$0xff]  ;;  %v18106_v51 = vld [vmem:[#allocation56_spill] sm:$0xff] }
 0x3e1   : > { %v4617_v27 = vsel %vm4606_vm1, nan, %v4616_v53  ;;  %10334 = vmatprep.subr.bf16.mxu0 %v11160_v4  ;;  %v16912_v60 = vsub.s32 %v4678_v9, %v4681_v13  ;;  %v10338_v53 = vpack.c.bf16 %v9271_v41, %v9270_v16  ;;  %v18074_v61 = vld [vmem:[#allocation71_spill] sm:$0xff]  ;;  %v9272_v13 = vld [vmem:[%s17487_s11 + $0x50] sm:$0xff]  ;;  %v9273_v9 = vld [vmem:[%s17487_s11 + $0x58] sm:$0xff] }
 0x3e2   : > { %vm16904_vm14 = vcmp.le.f32.partialorder %v18070_v0, 0.7853982  ;;  %4875 = vperm.xlu1 %10551, %v4617_v27   ;;  %v2518_v29 = vxor.u32 2147483648, %v2517_v47  ;;  %v18076_v16 = vld [vmem:[#allocation39_spill] sm:$0xff]  ;;  %v18077_v41 = vld [vmem:[#allocation74_spill] sm:$0xff] }
 0x3e3   : > { %10392 = vmatpush1.bf16.msra.mxu1 %v10335_v33  ;;  %v16922_v56 = vsel %vm16904_vm14, 0, %v2521_v38  ;;  %v4684_v27 = vsub.s32 0, %v16912_v60  ;;  %v8138_v38 = vsel %vm8136_vm3, %v11019_v63, %v4611_v2  ;;  %v18082_v0 = vld [vmem:[#allocation51_spill] sm:$0xff]  ;;  %v10341_v63 = vpack.c.bf16 %v9273_v9, %v9272_v13 }
 0x3e4   : > { %v2519_v15 = vsel %vm2436_vm15, %v2518_v29, %v2517_v47  ;;  %10377 = vmatprep.subr.bf16.mxu1 %v11160_v4  ;;  %10336 = vmatpush1.bf16.msra.mxu0 %v10335_v33  ;;  %v8141_v29 = vsel %vm8139_vm11, %v4614_v43, %v11021_v48  ;;  %v2527_v48 = vadd.s32 3, %v16922_v56  ;;  %v10344_v13 = vpack.c.bf16 %v9275_v28, %v9274_v23 }
 0x3e5   : > { %v2522_v47 = vsel %vm16904_vm14, %v18069_v31, %v2519_v15  ;;  %10337 = vmatprep.subr.bf16.mxu0 %v11160_v4  ;;  %v9812_v33 = vmin.u32 %v4684_v27, %v16912_v60  ;;  %v10707_v15 = vpack.i.bf16 %v18083_v32, %v18082_v0  ;;  %v8142_v43 = vsel %vm8135_vm8, %v8138_v38, %v8141_v29  ;;  %v16967_v38 = vpop.permute.xlu1 %10553 }
 0x3e6   : > { %11024 = vcosq.f32 %v2522_v47  ;;  %10618 = vrot.lane.b32.xlu1 %v18081_v17, %s11159_s22  ;;  %v18084_v17 = vpack.i.bf16 %v18040_v30, %v18039_v49  ;;  %v8143_v27 = vsel %vm4606_vm1, nan, %v8142_v43  ;;  %v2528_v9 = vand.u32 3, %v2527_v48  ;;  %v9276_v49 = vld [vmem:[%s17487_s11 + $0x70] sm:$0xff] }
 0x3e7   : > { %11026 = vsinq.f32 %v2522_v47  ;;  %10393 = vmatpush1.bf16.msra.mxu1 %v10338_v53  ;;  %v4686_v2 = vclz %v9812_v33  ;;  %v4674_v47 = vadd.s32 %v16822_v3, %v16820_v59  ;;  %v10347_v29 = vpack.c.bf16 %v9277_v40, %v9276_v49 }
 0x3e8   : > { %10378 = vmatprep.subr.bf16.mxu1 %v11160_v4  ;;  %10339 = vmatpush1.bf16.msra.mxu0 %v10338_v53  ;;  %vm2533_vm6 = vcmp.eq.s32.totalorder %v2528_v9, 2  ;;  %vm2530_vm13 = vcmp.eq.s32.totalorder %v2528_v9, 0  ;;  %vm2529_vm4 = vcmp.lt.s32.totalorder %v2528_v9, 2  ;;  %vm4710_vm11 = vweird.f32 %v16710_v7 }
 0x3e9   : > { %10340 = vmatprep.subr.bf16.mxu0 %v11160_v4  ;;  %v9813_v25 = vadd.s32 4294967294, %v4686_v2  ;;  %v9279_v2 = vld [vmem:[%s17487_s11 + $0x88] sm:$0xff] }
 0x3ea   : > { %10623 = vrot.lane.b32.xlu1 %v18084_v17, %s11159_s22 }
 0x3eb   : > { %10394 = vmatpush1.bf16.msra.mxu1 %v10341_v63  ;;  %vm9814_vm12 = vcmp.lt.s32.totalorder %v9813_v25, 0 }
 0x3ec   : > { %10379 = vmatprep.subr.bf16.mxu1 %v11160_v4  ;;  %10342 = vmatpush1.bf16.msra.mxu0 %v10341_v63  ;;  %v4689_v30 = vsel %vm9814_vm12, 0, %v9813_v25  ;;  %v9278_v63 = vld [vmem:[%s17487_s11 + $0x80] sm:$0xff] }
 0x3ed   : > { %10343 = vmatprep.subr.bf16.mxu0 %v11160_v4  ;;  %v4690_v53 = vsub.s32 32, %v4689_v30  ;;  %v4691_v59 = vshll.u32 %v16912_v60, %v4689_v30  ;;  %v4694_v3 = vsub.s32 4294967266, %v4689_v30 }
 0x3ee   : > { %8400 = vperm.xlu1 %10551, %v8143_v27   ;;  %v16992_v27 = vpop.permute.xlu1 %10558 }
 0x3ef   : > { %10395 = vmatpush1.bf16.msra.mxu1 %v10344_v13  ;;  %v4692_v48 = vshrl.u32 %v4674_v47, %v4690_v53  ;;  %v4695_v43 = vadd.s32 127, %v4694_v3  ;;  %v10350_v47 = vpack.c.bf16 %v9279_v2, %v9278_v63  ;;  %v9280_v53 = vld [vmem:[%s17487_s11 + $0x90] sm:$0xff]  ;;  %v4704_v63 = vsub.s32 4, %v16883_v57 }
 0x3f0   : > { %v16978_v33 = vpop.eup %11024  ;;  %10380 = vmatprep.subr.bf16.mxu1 %v11160_v4  ;;  %10345 = vmatpush1.bf16.msra.mxu0 %v10344_v13 }
 0x3f1   : > { %v16987_v60 = vpop.eup %11026  ;;  %v2534_v23 = vxor.u32 2147483648, %v16978_v33  ;;  %10346 = vmatprep.subr.bf16.mxu0 %v11160_v4  ;;  %v4693_v17 = vor.u32 %v4692_v48, %v4691_v59  ;;  %v4696_v25 = vshll.u32 %v4695_v43, 23  ;;  %v9281_v59 = vld [vmem:[%s17487_s11 + $0x98] sm:$0xff] }
 0x3f2   : > { %v2531_v28 = vxor.u32 2147483648, %v16987_v60 }
 0x3f3   : > { %v2535_v13 = vsel %vm2533_vm6, %v2534_v23, %v16987_v60  ;;  %10396 = vmatpush1.bf16.msra.mxu1 %v10347_v29  ;;  %v4697_v40 = vor.u32 4788187, %v4696_v25  ;;  %v4700_v30 = vcvt.s32.f32 %v4693_v17  ;;  %v10353_v17 = vpack.c.bf16 %v9281_v59, %v9280_v53 }
 0x3f4   : > { %v2532_v49 = vsel %vm2530_vm13, %v16978_v33, %v2531_v28  ;;  %10381 = vmatprep.subr.bf16.mxu1 %v11160_v4  ;;  %10348 = vmatpush1.bf16.msra.mxu0 %v10347_v29  ;;  %v17014_v2 = vpop.permute.xlu1 %10563  ;;  %v4705_v59 = vsel %vm4620_vm9, %v4704_v63, %v16883_v57  ;;  %v9285_v57 = vld [vmem:[%s17487_s11 + $0xb8] sm:$0xff]  ;;  %vm9526_vm13 = vcmask 130048  }
 0x3f5   : > { %v2536_v3 = vsel %vm2529_vm4, %v2532_v49, %v2535_v13  ;;  %10349 = vmatprep.subr.bf16.mxu0 %v11160_v4  ;;  %v4698_v43 = vand.u32 2147483647, %v4697_v40  ;;  %v10566_v25 = vunpack.i.h.bf16 %v17014_v2  ;;  %v10565_v29 = vunpack.i.l.bf16 %v17014_v2  ;;  %v9282_v13 = vld [vmem:[%s17487_s11 + $0xa0] sm:$0xff]  ;;  %v9283_v49 = vld [vmem:[%s17487_s11 + $0xa8] sm:$0xff] }
 0x3f6   : > { %v2537_v48 = vsel %vm2526_vm10, nan, %v2536_v3  ;;  %v18086_v3 = vpack.i.bf16 %v16532_v6, %v16394_v50  ;;  %v18087_v6 = vpack.i.bf16 %v16541_v52, %v18041_v36 }
 0x3f7   : > { %4775 = vperm.xlu0 %10550, %v2537_v48   ;;  %10397 = vmatpush1.bf16.msra.mxu1 %v10350_v47  ;;  %v4701_v9 = vmul.f32 %v4700_v30, %v4698_v43  ;;  %v9241_v40 = vsel %vm9197_vm5, %v10565_v29, %v10566_v25  ;;  %v18085_v30 = vand.u32 2147483647, %v16710_v7  ;;  %v10356_v48 = vpack.c.bf16 %v9283_v49, %v9282_v13  ;;  %v9284_v25 = vld [vmem:[%s17487_s11 + $0xb0] sm:$0xff]  ;;  %v9287_v13 = vld [vmem:[%s17487_s11 + $0xc8] sm:$0xff] }
 0x3f8   : > { %10382 = vmatprep.subr.bf16.mxu1 %v11160_v4  ;;  %10351 = vmatpush1.bf16.msra.mxu0 %v10350_v47  ;;  %v6074_v47 = vand.u32 3, %v16922_v56  ;;  %v10359_v56 = vpack.c.bf16 %v9285_v57, %v9284_v25  ;;  %v18088_v49 = vpack.i.bf16 %v16573_v1, %v16426_v11  ;;  %v18089_v1 = vld [vmem:[#allocation61_spill] sm:$0xff]  ;;  %v18091_v25 = vld [vmem:[#allocation62_spill] sm:$0xff] }
 0x3f9   : > { %10352 = vmatprep.subr.bf16.mxu0 %v11160_v4  ;;  %vm4619_vm1 = vcmp.le.f32.partialorder %v18085_v30, 0.7853982  ;;  %v4702_v53 = vxor.u32 2147483648, %v4701_v9  ;;  %9420 = vmatprep.mubr.f32.mxu1 %v9241_v40 }
 0x3fa   : > { %v4707_v50 = vsel %vm4619_vm1, 0, %v4705_v59  ;;  %vm6076_vm7 = vcmp.eq.s32.totalorder %v6074_v47, 0  ;;  %vm6079_vm2 = vcmp.eq.s32.totalorder %v6074_v47, 2  ;;  %vm6075_vm0 = vcmp.lt.s32.totalorder %v6074_v47, 2 }
 0x3fb   : > { %10633 = vrot.lane.b32.xlu0 %v18086_v3, %s11159_s22  ;;  %10398 = vmatpush1.bf16.msra.mxu1 %v10353_v17  ;;  %v4703_v43 = vsel %vm4620_vm9, %v4702_v53, %v4701_v9  ;;  %v4711_v9 = vadd.s32 3, %v4707_v50  ;;  %v6078_v52 = vsel %vm6076_vm7, %v16978_v33, %v2531_v28  ;;  %v6081_v36 = vsel %vm6079_vm2, %v2534_v23, %v16987_v60  ;;  %v9288_v53 = vld [vmem:[%s17487_s11 + $0xd0] sm:$0xff]  ;;  %v9289_v28 = vld [vmem:[%s17487_s11 + $0xd8] sm:$0xff]  ;;  %v17079_v33 = vld [vmem:[%s17486_s10] ss:$0 sm:$0xff] }
 0x3fc   : > { %10383 = vmatprep.subr.bf16.mxu1 %v11160_v4  ;;  %10354 = vmatpush1.bf16.msra.mxu0 %v10353_v17  ;;  %v4706_v63 = vsel %vm4619_vm1, %v16710_v7, %v4703_v43  ;;  %v9286_v17 = vld [vmem:[%s17487_s11 + $0xc0] sm:$0xff]  ;;  %v6082_v11 = vsel %vm6075_vm0, %v6078_v52, %v6081_v36  ;;  %v8494_v60 = vadd.f32 %v17079_v33, %v18089_v1  ;;  %v8237_v59 = vand.u32 3, %v4707_v50 }
 0x3fd   : > { %10355 = vmatprep.subr.bf16.mxu0 %v11160_v4  ;;  %11028 = vcosq.f32 %v4706_v63  ;;  %v10362_v40 = vpack.c.bf16 %v9287_v13, %v9286_v17  ;;  %v4712_v30 = vand.u32 3, %v4711_v9  ;;  %v18090_v23 = vpack.i.bf16 %v18053_v35, %v18052_v24  ;;  %v9290_v24 = vld [vmem:[%s17487_s11 + $0xe0] sm:$0xff]  ;;  %v9291_v35 = vld [vmem:[%s17487_s11 + $0xe8] sm:$0xff]  ;;  %v9292_v17 = vld [vmem:[%s17487_s11 + $0xf0] sm:$0xff] }
 0x3fe   : > { %11030 = vsinq.f32 %v4706_v63  ;;  %v10365_v3 = vpack.c.bf16 %v9289_v28, %v9288_v53  ;;  %v8495_v57 = vadd.f32 %v17079_v33, %v18091_v25  ;;  %vm8239_vm8 = vcmp.eq.s32.totalorder %v8237_v59, 0  ;;  %v9293_v13 = vld [vmem:[%s17487_s11 + $0xf8] sm:$0xff] }
 0x3ff   : > { %10638 = vrot.lane.b32.xlu0 %v18087_v6, %s11159_s22  ;;  %10399 = vmatpush1.bf16.msra.mxu1 %v10356_v48  ;;  %vm4717_vm15 = vcmp.eq.s32.totalorder %v4712_v30, 2  ;;  %vm4714_vm14 = vcmp.eq.s32.totalorder %v4712_v30, 0  ;;  %11032 = vtanh.f32 %v8494_v60  ;;  %vm4713_vm3 = vcmp.lt.s32.totalorder %v4712_v30, 2  ;;  %v10579_v30 = vpop.permute.xlu0 %10578 }
 0x400   : > { %10384 = vmatprep.subr.bf16.mxu1 %v11160_v4  ;;  %10357 = vmatpush1.bf16.msra.mxu0 %v10356_v48  ;;  %v6083_v48 = vsel %vm2526_vm10, nan, %v6082_v11  ;;  %vm8242_vm12 = vcmp.eq.s32.totalorder %v8237_v59, 2  ;;  %11034 = vtanh.f32 %v8495_v57  ;;  %vm8238_vm6 = vcmp.lt.s32.totalorder %v8237_v59, 2 }
 0x401   : > { %10358 = vmatprep.subr.bf16.mxu0 %v11160_v4  ;;  %v10371_v53 = vpack.c.bf16 %v9293_v13, %v9292_v17  ;;  %v10581_v11 = vunpack.i.h.bf16 %v10579_v30  ;;  %v10580_v1 = vunpack.i.l.bf16 %v10579_v30  ;;  %v18093_v60 = vpack.i.bf16 %v18055_v55, %v18054_v37 }
 0x402   : > { %v18095_v37 = vpack.i.bf16 %v16727_v19, %v18065_v46  ;;  %v18096_v55 = vpack.i.bf16 %v18060_v5, %v18059_v20  ;;  %v18098_v19 = vpack.i.bf16 %v18064_v54, %v18063_v62  ;;  %v18100_v46 = vld [vmem:[#allocation63_spill] sm:$0xff]  ;;  %v18101_v5 = vpack.i.bf16 %v18067_v18, %v18066_v12  ;;  %v18104_v62 = vld [vmem:[#allocation32_spill] sm:$0xff] }
 0x403   : > { %10643 = vrot.lane.b32.xlu0 %v18088_v49, %s11159_s22  ;;  %10400 = vmatpush1.bf16.msra.mxu1 %v10359_v56  ;;  %v9242_v59 = vsel %vm9197_vm5, %v10580_v1, %v10581_v11  ;;  %v8496_v20 = vadd.f32 %v17079_v33, %v18100_v46  ;;  %v8498_v54 = vadd.f32 %v17079_v33, %v18104_v62  ;;  %v18109_v11 = vld [vmem:[#allocation43_spill] sm:$0xff] }
 0x404   : > { %10385 = vmatprep.subr.bf16.mxu1 %v11160_v4  ;;  %10360 = vmatpush1.bf16.msra.mxu0 %v10359_v56  ;;  %v10368_v56 = vpack.c.bf16 %v9291_v35, %v9290_v24  ;;  %v18105_v12 = vpack.i.bf16 %v18077_v41, %v18076_v16 }
 0x405   : > { %10361 = vmatprep.subr.bf16.mxu0 %v11160_v4  ;;  %11036 = vtanh.f32 %v8496_v20 }
 0x407   : > { %10648 = vrot.lane.b32.xlu0 %v18090_v23, %s11159_s22  ;;  %10401 = vmatpush1.bf16.msra.mxu1 %v10362_v40  ;;  %v11029_v47 = vpop.eup %11028 }
 0x408   : > { %10386 = vmatprep.subr.bf16.mxu1 %v11160_v4  ;;  %10363 = vmatpush1.bf16.msra.mxu0 %v10362_v40  ;;  %v11031_v43 = vpop.eup %11030  ;;  %v4718_v63 = vxor.u32 2147483648, %v11029_v47  ;;  %v18092_v40 = vpack.i.bf16 %v16604_v14, %v18056_v58  ;;  %v18094_v14 = vpack.i.bf16 %v18062_v42, %v18061_v34  ;;  %v18097_v34 = vpack.i.bf16 %v16713_v10, %v18068_v8 }
 0x409   : > { %10364 = vmatprep.subr.bf16.mxu0 %v11160_v4  ;;  %v4715_v31 = vxor.u32 2147483648, %v11031_v43  ;;  %v11033_v58 = vpop.eup %11032  ;;  %v18099_v42 = vpack.i.bf16 %v16734_v26, %v18075_v22  ;;  %v18102_v10 = vpack.i.bf16 %v18074_v61, %v18073_v44  ;;  %v18103_v26 = vld [vmem:[#allocation23_spill] sm:$0xff]  ;;  %v8499_v8 = vadd.f32 %v17079_v33, %v18106_v51 }
 0x40a   : > { %v4719_v50 = vsel %vm4717_vm15, %v4718_v63, %v11031_v43  ;;  %v8244_v49 = vsel %vm8242_vm12, %v4718_v63, %v11031_v43  ;;  %v8497_v22 = vadd.f32 %v17079_v33, %v18103_v26  ;;  %v18107_v43 = vld [vmem:[#allocation24_spill] sm:$0xff] }
 0x40b   : > { %8300 = vperm.xlu0 %10550, %v6083_v48   ;;  %10402 = vmatpush1.bf16.msra.mxu1 %v10365_v3  ;;  %v4716_v6 = vsel %vm4714_vm14, %v11029_v47, %v4715_v31  ;;  %v8241_v36 = vsel %vm8239_vm8, %v11029_v47, %v4715_v31  ;;  %v8500_v25 = vadd.f32 %v17079_v33, %v18107_v43 }
 0x40c   : > { %10387 = vmatprep.subr.bf16.mxu1 %v11160_v4  ;;  %10366 = vmatpush1.bf16.msra.mxu0 %v10365_v3  ;;  %v4720_v9 = vsel %vm4713_vm3, %v4716_v6, %v4719_v50  ;;  %v8245_v28 = vsel %vm8238_vm6, %v8241_v36, %v8244_v49  ;;  %v11035_v3 = vpop.eup %11034  ;;  %11038 = vtanh.f32 %v8497_v22  ;;  %v17195_v36 = vld [vmem:[%s17485_s9 + $0x1] ss:$0 sm:$0xff] }
 0x40d   : > { %10367 = vmatprep.subr.bf16.mxu0 %v11160_v4  ;;  %v4721_v52 = vsel %vm4710_vm11, nan, %v4720_v9  ;;  %v8246_v23 = vsel %vm4710_vm11, nan, %v8245_v28  ;;  %v9210_v7 = vsel %vm9197_vm5, %v11035_v3, %v10580_v1  ;;  %11040 = vtanh.f32 %v8498_v54  ;;  %v17201_v28 = vld [vmem:[%s17485_s9] ss:$0 sm:$0xff]  ;;  %v17212_v3 = vld [vmem:[%s17485_s9 + $0x2] ss:$0 sm:$0xff] }
 0x40e   : > { %4880 = vperm.xlu1 %10551, %v4721_v52   ;;  %11042 = vtanh.f32 %v8499_v8  ;;  %v1391_v1 = vmul.f32 %v17201_v28, %v18109_v11 }
 0x40f   : > { %10658 = vrot.lane.b32.xlu0 %v18092_v40, %s11159_s22  ;;  %10403 = vmatpush1.bf16.msra.mxu1 %v10368_v56  ;;  %v11037_v47 = vpop.eup %11036  ;;  %11044 = vtanh.f32 %v8500_v25  ;;  %v18113_v25 = vld [vmem:[#allocation64_spill] sm:$0xff] }
 0x410   : > { %10369 = vmatpush1.bf16.msra.mxu0 %v10368_v56  ;;  %10388 = vmatprep.subr.bf16.mxu1 %v11160_v4 }
 0x411   : > { %10370 = vmatprep.subr.bf16.mxu0 %v11160_v4  ;;  %v9209_v4 = vsel %vm9197_vm5, %v11033_v58, %v10565_v29 }
 0x412   : > { %10628 = vrot.lane.b32.xlu1 %v18093_v60, %s11159_s22 }
 0x413   : > { %10663 = vrot.lane.b32.xlu0 %v18094_v14, %s11159_s22  ;;  %10404 = vmatpush1.bf16.msra.mxu1 %v10371_v53 }
 0x414   : > { %10372 = vmatpush1.bf16.msra.mxu0 %v10371_v53 }
 0x416   : > { %8405 = vperm.xlu1 %10551, %v8246_v23   ;;  %9421 = vmatmul.mubr.f32.vlgmr.msra.gmra.mrb[32].mxu1 %v9209_v4  ;;  %v11039_v32 = vpop.eup %11038  ;;  %v18110_v23 = vld [vmem:[#allocation57_spill] sm:$0xff] }
 0x417   : > { %10678 = vrot.lane.b32.xlu0 %v18095_v37, %s11159_s22  ;;  %9425 = vmatprep.mubr.f32.mxu1 %v9242_v59  ;;  %v11041_v6 = vpop.eup %11040  ;;  %v8502_v4 = vadd.f32 %v17079_v33, %v18110_v23  ;;  %v18119_v23 = vld [vmem:[#allocation2_spill] sm:$0xff] }
 0x418   : > { %v11043_v53 = vpop.eup %11042 }
 0x41a   : > { %10653 = vrot.lane.b32.xlu1 %v18096_v55, %s11159_s22  ;;  %9426 = vmatmul.mubr.f32.gmra.mrb[34].mxu1 %v9210_v7  ;;  %v11045_v55 = vpop.eup %11044 }
 0x41b   : > { %10683 = vrot.lane.b32.xlu0 %v18097_v34, %s11159_s22 }
 0x41e   : > { %10668 = vrot.lane.b32.xlu1 %v18098_v19, %s11159_s22  ;;  %v18111_v19 = vld [vmem:[#allocation58_spill] sm:$0xff] }
 0x41f   : > { %10698 = vrot.lane.b32.xlu0 %v18099_v42, %s11159_s22  ;;  %v8483_v42 = vadd.f32 %v17079_v33, %v18111_v19 }
 0x422   : > { %10673 = vrot.lane.b32.xlu1 %v18101_v5, %s11159_s22 }
 0x423   : > { %10703 = vrot.lane.b32.xlu0 %v10702_v39, %s11159_s22  ;;  %v10589_v39 = vpop.permute.xlu0 %10588 }
 0x424   : > { %v10591_v44 = vunpack.i.h.bf16 %v10589_v39  ;;  %v10590_v61 = vunpack.i.l.bf16 %v10589_v39 }
 0x426   : > { %10688 = vrot.lane.b32.xlu1 %v18102_v10, %s11159_s22  ;;  %v9244_v0 = vsel %vm9197_vm5, %v10590_v61, %v10591_v44  ;;  %v9212_v24 = vsel %vm9197_vm5, %v11039_v32, %v10590_v61  ;;  %v10555_v61 = vunpack.i.l.bf16 %v16967_v38 }
 0x427   : > { %v10594_v35 = vpop.permute.xlu0 %10593 }
 0x428   : > { %v10596_v17 = vunpack.i.h.bf16 %v10594_v35  ;;  %v10595_v52 = vunpack.i.l.bf16 %v10594_v35 }
 0x42a   : > { %10693 = vrot.lane.b32.xlu1 %v18105_v12, %s11159_s22  ;;  %v4871_v18 = vpop.permute.xlu1 %4870  ;;  %v9247_v7 = vsel %vm9197_vm5, %v10595_v52, %v10596_v17  ;;  %v9215_v20 = vsel %vm9197_vm5, %v11045_v55, %v10595_v52  ;;  %v18114_v52 = vld [vmem:[#allocation34_spill] sm:$0xff] }
 0x42b   : > { %v4916_v49 = vmul.f32 %v17195_v36, %v4871_v18 }
 0x42d   : > { %v4948_v59 = vadd.f32 %v4916_v49, %v1391_v1  ;;  %v8484_v49 = vadd.f32 %v17079_v33, %v18114_v52  ;;  %v18117_v1 = vld [vmem:[#allocation25_spill] sm:$0xff] }
 0x42e   : > { %10708 = vrot.lane.b32.xlu1 %v10707_v15, %s11159_s22  ;;  %v10569_v45 = vpop.permute.xlu1 %10568  ;;  %v18108_v15 = vld [vmem:[#allocation59_spill] sm:$0xff] }
 0x42f   : > { %v10571_v2 = vunpack.i.h.bf16 %v10569_v45  ;;  %v10570_v29 = vunpack.i.l.bf16 %v10569_v45  ;;  %v8501_v57 = vadd.f32 %v17079_v33, %v18108_v15 }
 0x431   : > { %v9243_v16 = vsel %vm9197_vm5, %v10570_v29, %v10571_v2  ;;  %v9211_v41 = vsel %vm9197_vm5, %v11037_v47, %v10570_v29  ;;  %11046 = vtanh.f32 %v8501_v57 }
 0x432   : > { %v17182_v48 = vpop.permute.xlu1 %10573  ;;  %9430 = vmatprep.mubr.f32.mxu1 %v9243_v16  ;;  %11048 = vtanh.f32 %v8502_v4  ;;  %v8507_v4 = vadd.f32 %v17079_v33, %v18119_v23 }
 0x433   : > { %9431 = vmatmul.mubr.f32.gmra.mrb[36].mxu1 %v9211_v41  ;;  %11050 = vtanh.f32 %v8483_v42  ;;  %v18112_v41 = vld [vmem:[#allocation20_spill] sm:$0xff] }
 0x434   : > { %9435 = vmatprep.mubr.f32.mxu1 %v9244_v0  ;;  %v8503_v43 = vadd.f32 %v17079_v33, %v18112_v41  ;;  %v8504_v0 = vadd.f32 %v17079_v33, %v18113_v25  ;;  %v18122_v41 = vld [vmem:[#allocation19_spill] sm:$0xff] }
 0x435   : > { %v18123_v25 = vld [vmem:[#allocation35_spill] sm:$0xff] }
 0x436   : > { %v10584_v63 = vpop.permute.xlu1 %10583  ;;  %11052 = vtanh.f32 %v8503_v43  ;;  %v8508_v43 = vadd.f32 %v17079_v33, %v18122_v41 }
 0x437   : > { %v10586_v31 = vunpack.i.h.bf16 %v10584_v63  ;;  %v10585_v50 = vunpack.i.l.bf16 %v10584_v63  ;;  %9436 = vmatmul.mubr.f32.gmra.mrb[38].mxu1 %v9212_v24  ;;  %11054 = vtanh.f32 %v8504_v0  ;;  %v8487_v0 = vadd.f32 %v17079_v33, %v18123_v25 }
 0x438   : > { %11056 = vtanh.f32 %v8484_v49 }
 0x439   : > { %v9245_v56 = vsel %vm9197_vm5, %v10585_v50, %v10586_v31  ;;  %v9213_v9 = vsel %vm9197_vm5, %v11041_v6, %v10585_v50  ;;  %v10556_v31 = vunpack.i.h.bf16 %v16967_v38 }
 0x43a   : > { %v10599_v13 = vpop.permute.xlu1 %10598  ;;  %9440 = vmatprep.mubr.f32.mxu1 %v9245_v56 }
 0x43b   : > { %v10601_v40 = vunpack.i.h.bf16 %v10599_v13  ;;  %v10600_v30 = vunpack.i.l.bf16 %v10599_v13  ;;  %9441 = vmatmul.mubr.f32.gmra.mrb[40].mxu1 %v9213_v9  ;;  %v11047_v26 = vpop.eup %11046 }
 0x43c   : > { %v11049_v51 = vpop.eup %11048 }
 0x43d   : > { %v9246_v60 = vsel %vm9197_vm5, %v10600_v30, %v10601_v40  ;;  %v9214_v14 = vsel %vm9197_vm5, %v11043_v53, %v10600_v30  ;;  %v11051_v29 = vpop.eup %11050  ;;  %v18115_v40 = vld [vmem:[#allocation14_spill] sm:$0xff]  ;;  %v18116_v30 = vld [vmem:[#allocation29_spill] sm:$0xff] }
 0x43e   : > { %9445 = vmatprep.mubr.f32.mxu1 %v9246_v60  ;;  %v8505_v38 = vadd.f32 %v17079_v33, %v18115_v40  ;;  %v8506_v53 = vadd.f32 %v17079_v33, %v18116_v30  ;;  %v8485_v60 = vadd.f32 %v17079_v33, %v18117_v1 }
 0x43f   : > { %9446 = vmatmul.mubr.f32.gmra.mrb[42].mxu1 %v9214_v14  ;;  %v18118_v14 = vld [vmem:[#allocation21_spill] sm:$0xff] }
 0x440   : > { %v8396_v58 = vpop.permute.xlu1 %8395  ;;  %9450 = vmatprep.mubr.f32.mxu1 %v9247_v7  ;;  %v11053_v35 = vpop.eup %11052  ;;  %11058 = vtanh.f32 %v8505_v38  ;;  %v10560_v7 = vunpack.i.l.bf16 %v16992_v27 }
 0x441   : > { %v8441_v37 = vmul.f32 %v17212_v3, %v8396_v58  ;;  %v11055_v9 = vpop.eup %11054  ;;  %v8486_v58 = vadd.f32 %v17079_v33, %v18118_v14  ;;  %11060 = vtanh.f32 %v8506_v53 }
 0x442   : > { %11062 = vtanh.f32 %v8485_v60  ;;  %v18125_v60 = vld [vmem:[#allocation38_spill] sm:$0xff] }
 0x443   : > { %v17216_v34 = vadd.f32 %v8441_v37, %v4948_v59  ;;  %9451 = vmatmul.mubr.f32.gmra.mrb[44].mxu1 %v9215_v20  ;;  %11064 = vtanh.f32 %v8486_v58  ;;  %v10561_v37 = vunpack.i.h.bf16 %v16992_v27  ;;  %v8488_v14 = vadd.f32 %v17079_v33, %v18125_v60 }
 0x444   : > { %v10609_v46 = vpop.permute.xlu1 %10608  ;;  %11066 = vtanh.f32 %v8507_v4 }
 0x445   : > { %v10611_v5 = vunpack.i.h.bf16 %v10609_v46  ;;  %v10610_v10 = vunpack.i.l.bf16 %v10609_v46  ;;  %11068 = vtanh.f32 %v8508_v43 }
 0x446   : > { %v17223_v54 = vpop.permute.xlu0 %4770  ;;  %11070 = vtanh.f32 %v8487_v0  ;;  %v8512_v0 = vadd.f32 %v17079_v33, %v17216_v34 }
 0x447   : > { %v9248_v22 = vsel %vm9197_vm5, %v10610_v10, %v10611_v5  ;;  %v9216_v62 = vsel %vm9197_vm5, %v11047_v26, %v10610_v10  ;;  %v11057_v5 = vpop.eup %11056  ;;  %v18120_v10 = vld [vmem:[#allocation33_spill] sm:$0xff]  ;;  %11072 = vtanh.f32 %v8488_v14 }
 0x448   : > { %9455 = vmatprep.mubr.f32.mxu1 %v9248_v22  ;;  %v1388_v26 = vmul.f32 %v17201_v28, %v18120_v10  ;;  %v18121_v22 = vld [vmem:[#allocation9_spill] sm:$0xff] }
 0x449   : > { %9456 = vmatmul.mubr.f32.gmra.mrb[46].mxu1 %v9216_v62  ;;  %v4913_v62 = vmul.f32 %v17195_v36, %v18121_v22 }
 0x44a   : > { %v10604_v12 = vpop.permute.xlu0 %10603 }
 0x44b   : > { %v10606_v18 = vunpack.i.h.bf16 %v10604_v12  ;;  %v10605_v39 = vunpack.i.l.bf16 %v10604_v12  ;;  %v10576_v12 = vunpack.i.h.bf16 %v17182_v48 }
 0x44d   : > { %v9249_v8 = vsel %vm9197_vm5, %v10605_v39, %v10606_v18  ;;  %v9217_v44 = vsel %vm9197_vm5, %v11049_v51, %v10605_v39  ;;  %v11059_v18 = vpop.eup %11058  ;;  %v10575_v39 = vunpack.i.l.bf16 %v17182_v48 }
 0x44e   : > { %v10614_v45 = vpop.permute.xlu0 %10613  ;;  %9460 = vmatprep.mubr.f32.mxu1 %v9249_v8  ;;  %v11061_v48 = vpop.eup %11060 }
 0x44f   : > { %v10615_v2 = vunpack.i.l.bf16 %v10614_v45  ;;  %9461 = vmatmul.mubr.f32.gmra.mrb[48].mxu1 %v9217_v44  ;;  %v10616_v57 = vunpack.i.h.bf16 %v10614_v45 }
 0x451   : > { %v9230_v47 = vsel %vm9197_vm5, %v10615_v2, %v10555_v61  ;;  %v9198_v16 = vsel %vm9197_vm5, %v11051_v29, %v10615_v2  ;;  %v9251_v56 = vsel %vm9197_vm5, %v10616_v57, %v10556_v31  ;;  %v9219_v17 = vsel %vm9197_vm5, %v11055_v9, %v10616_v57 }
 0x452   : > { %9365 = vmatprep.mubr.f32.mxu0 %v9230_v47  ;;  %v11063_v47 = vpop.eup %11062 }
 0x453   : > { %9366 = vmatmul.mubr.f32.vlgmr.msra.gmra.mrb[64].mxu0 %v9198_v16  ;;  %v4945_v16 = vadd.f32 %v4913_v62, %v1388_v26  ;;  %v11065_v31 = vpop.eup %11064  ;;  %v18129_v26 = vld [vmem:[#allocation65_spill] sm:$0xff] }
 0x454   : > { %v8510_v22 = vadd.f32 %v17079_v33, %v18129_v26 }
 0x455   : > { %v17241_v13 = vpop.permute.xlu0 %8295 }
 0x461   : > { %v17234_v32 = vpop.permute.xlu1 %4875 }
 0x465   : > { %v10619_v15 = vpop.permute.xlu1 %10618 }
 0x466   : > { %v10621_v63 = vunpack.i.h.bf16 %v10619_v15  ;;  %v10620_v24 = vunpack.i.l.bf16 %v10619_v15  ;;  %v18124_v15 = vld [vmem:[#allocation31_spill] sm:$0xff] }
 0x467   : > { %v8438_v57 = vmul.f32 %v17212_v3, %v18124_v15 }
 0x468   : > { %v9250_v50 = vsel %vm9197_vm5, %v10620_v24, %v10621_v63  ;;  %v9218_v6 = vsel %vm9197_vm5, %v11053_v35, %v10620_v24 }
 0x469   : > { %9465 = vmatprep.mubr.f32.mxu1 %v9250_v50  ;;  %v10624_v45 = vpop.permute.xlu1 %10623  ;;  %v8470_v1 = vadd.f32 %v8438_v57, %v4945_v16 }
 0x46a   : > { %9466 = vmatmul.mubr.f32.gmra.mrb[50].mxu1 %v9218_v6  ;;  %v10626_v50 = vunpack.i.h.bf16 %v10624_v45  ;;  %v10625_v6 = vunpack.i.l.bf16 %v10624_v45  ;;  %v4917_v45 = vmul.f32 %v17195_v36, %v17234_v32  ;;  %v18132_v32 = vld [vmem:[#allocation26_spill] sm:$0xff] }
 0x46b   : > { %9470 = vmatprep.mubr.f32.mxu1 %v9251_v56  ;;  %v8509_v4 = vadd.f32 %v17079_v33, %v8470_v1  ;;  %v1372_v43 = vmul.f32 %v17201_v28, %v18132_v32 }
 0x46d   : > { %v8401_v52 = vpop.permute.xlu1 %8400  ;;  %11074 = vtanh.f32 %v8509_v4 }
 0x46e   : > { %9471 = vmatmul.mubr.f32.gmra.mrb[52].mxu1 %v9219_v17  ;;  %v11067_v17 = vpop.eup %11066  ;;  %v8442_v16 = vmul.f32 %v17212_v3, %v8401_v52 }
 0x476   : > { %v17249_v11 = vpop.permute.xlu0 %4775 }
 0x477   : > { %v4897_v25 = vmul.f32 %v17195_v36, %v17249_v11 }
 0x479   : > { %v4929_v34 = vadd.f32 %v4897_v25, %v1372_v43 }
 0x47a   : > { %v10634_v59 = vpop.permute.xlu0 %10633 }
 0x47b   : > { %v10636_v19 = vunpack.i.h.bf16 %v10634_v59  ;;  %v10635_v42 = vunpack.i.l.bf16 %v10634_v59  ;;  %v18126_v59 = vld [vmem:[#allocation22_spill] sm:$0xff] }
 0x47d   : > { %v9232_v2 = vsel %vm9197_vm5, %v10635_v42, %v10575_v39  ;;  %v9253_v29 = vsel %vm9197_vm5, %v10636_v19, %v10576_v12  ;;  %v9200_v24 = vsel %vm9197_vm5, %v11063_v47, %v10635_v42  ;;  %v9221_v35 = vsel %vm9197_vm5, %v11061_v48, %v10636_v19  ;;  %v18128_v42 = vld [vmem:[#allocation54_spill] sm:$0xff]  ;;  %v11069_v39 = vpop.eup %11068 }
 0x47e   : > { %v10639_v55 = vpop.permute.xlu0 %10638  ;;  %v4896_v19 = vmul.f32 %v17195_v36, %v17223_v54 }
 0x47f   : > { %v10641_v46 = vunpack.i.h.bf16 %v10639_v55  ;;  %v10640_v20 = vunpack.i.l.bf16 %v10639_v55 }
 0x481   : > { %v9231_v51 = vsel %vm9197_vm5, %v10640_v20, %v10560_v7  ;;  %v9199_v27 = vsel %vm9197_vm5, %v11057_v5, %v10640_v20  ;;  %v9252_v8 = vsel %vm9197_vm5, %v10641_v46, %v10561_v37  ;;  %v9220_v61 = vsel %vm9197_vm5, %v11059_v18, %v10641_v46  ;;  %v18127_v7 = vld [vmem:[#allocation15_spill] sm:$0xff] }
 0x482   : > { %v17268_v44 = vpop.permute.xlu0 %10643  ;;  %9370 = vmatprep.mubr.f32.mxu0 %v9231_v51  ;;  %9475 = vmatprep.mubr.f32.mxu1 %v9252_v8  ;;  %v1371_v37 = vmul.f32 %v17201_v28, %v18126_v59  ;;  %v1392_v55 = vmul.f32 %v17201_v28, %v18127_v7  ;;  %v8489_v46 = vadd.f32 %v17079_v33, %v18128_v42  ;;  %v18130_v51 = vld [vmem:[#allocation77_spill] sm:$0xff] }
 0x483   : > { %9371 = vmatmul.mubr.f32.gmra.mrb[66].mxu0 %v9199_v27  ;;  %9476 = vmatmul.mubr.f32.gmra.mrb[54].mxu1 %v9220_v61  ;;  %v10646_v20 = vunpack.i.h.bf16 %v17268_v44  ;;  %v10645_v5 = vunpack.i.l.bf16 %v17268_v44  ;;  %v8490_v54 = vadd.f32 %v17079_v33, %v18130_v51  ;;  %v8491_v27 = vadd.f32 %v17079_v33, %v16683_v21  ;;  %v11071_v44 = vpop.eup %11070  ;;  %v18131_v61 = vld [vmem:[#allocation46_spill] sm:$0xff] }
 0x484   : > { %9375 = vmatprep.mubr.f32.mxu0 %v9232_v2  ;;  %9480 = vmatprep.mubr.f32.mxu1 %v9253_v29  ;;  %v8421_v8 = vmul.f32 %v17212_v3, %v17241_v13  ;;  %v8511_v2 = vadd.f32 %v17079_v33, %v18131_v61  ;;  %v4928_v29 = vadd.f32 %v4896_v19, %v1371_v37  ;;  %11076 = vtanh.f32 %v8489_v46 }
 0x485   : > { %v9202_v21 = vsel %vm9197_vm5, %v11071_v44, %v10645_v5  ;;  %v9223_v13 = vsel %vm9197_vm5, %v11069_v39, %v10646_v20  ;;  %11078 = vtanh.f32 %v8510_v22  ;;  %v4949_v57 = vadd.f32 %v4917_v45, %v1392_v55 }
 0x486   : > { %v10649_v63 = vpop.permute.xlu0 %10648  ;;  %11080 = vtanh.f32 %v8490_v54  ;;  %v8453_v15 = vadd.f32 %v8421_v8, %v4928_v29 }
 0x487   : > { %v10651_v56 = vunpack.i.h.bf16 %v10649_v63  ;;  %v10650_v9 = vunpack.i.l.bf16 %v10649_v63  ;;  %9376 = vmatmul.mubr.f32.gmra.mrb[68].mxu0 %v9200_v24  ;;  %9481 = vmatmul.mubr.f32.gmra.mrb[56].mxu1 %v9221_v35  ;;  %v18133_v63 = vld [vmem:[#allocation13_spill] sm:$0xff]  ;;  %11082 = vtanh.f32 %v8491_v27  ;;  %v8474_v11 = vadd.f32 %v8442_v16, %v4949_v57 }
 0x488   : > { %v1393_v24 = vmul.f32 %v17201_v28, %v18133_v63  ;;  %11084 = vtanh.f32 %v8511_v2  ;;  %v11073_v28 = vpop.eup %11072 }
 0x489   : > { %v9233_v49 = vsel %vm9197_vm5, %v10650_v9, %v10625_v6  ;;  %v9201_v40 = vsel %vm9197_vm5, %v11065_v31, %v10650_v9  ;;  %v9254_v38 = vsel %vm9197_vm5, %v10651_v56, %v10626_v50  ;;  %v9222_v53 = vsel %vm9197_vm5, %v11067_v17, %v10651_v56 }
 0x48a   : > { %v8301_v30 = vpop.permute.xlu0 %8300  ;;  %9380 = vmatprep.mubr.f32.mxu0 %v9233_v49  ;;  %9485 = vmatprep.mubr.f32.mxu1 %v9254_v38  ;;  %11086 = vtanh.f32 %v8512_v0  ;;  %v8513_v4 = vadd.f32 %v17079_v33, %v8474_v11 }
 0x48b   : > { %9381 = vmatmul.mubr.f32.gmra.mrb[70].mxu0 %v9201_v40  ;;  %9486 = vmatmul.mubr.f32.gmra.mrb[58].mxu1 %v9222_v53  ;;  %v8422_v31 = vmul.f32 %v17212_v3, %v8301_v30  ;;  %v11075_v40 = vpop.eup %11074 }
 0x48d   : > { %v4881_v58 = vpop.permute.xlu1 %4880  ;;  %v8454_v30 = vadd.f32 %v8422_v31, %v4929_v34 }
 0x48e   : > { %v17287_v23 = vpop.permute.xlu0 %10658  ;;  %v4918_v35 = vmul.f32 %v17195_v36, %v4881_v58  ;;  %v8492_v36 = vadd.f32 %v17079_v33, %v8453_v15  ;;  %v11077_v19 = vpop.eup %11076 }
 0x48f   : > { %v10661_v6 = vunpack.i.h.bf16 %v17287_v23  ;;  %v10660_v56 = vunpack.i.l.bf16 %v17287_v23  ;;  %v11079_v42 = vpop.eup %11078  ;;  %v8493_v46 = vadd.f32 %v17079_v33, %v8454_v30 }
 0x490   : > { %v4950_v38 = vadd.f32 %v4918_v35, %v1393_v24  ;;  %11088 = vtanh.f32 %v8492_v36 }
 0x491   : > { %v10629_v10 = vpop.permute.xlu1 %10628  ;;  %v9224_v23 = vsel %vm9197_vm5, %v11075_v40, %v10661_v6  ;;  %11090 = vtanh.f32 %v8513_v4 }
 0x492   : > { %v10631_v62 = vunpack.i.h.bf16 %v10629_v10  ;;  %v10630_v12 = vunpack.i.l.bf16 %v10629_v10  ;;  %v17302_v18 = vpop.permute.xlu0 %10663  ;;  %v11081_v10 = vpop.eup %11080  ;;  %11092 = vtanh.f32 %v8493_v46 }
 0x493   : > { %v10666_v60 = vunpack.i.h.bf16 %v17302_v18  ;;  %v10665_v14 = vunpack.i.l.bf16 %v17302_v18  ;;  %v11083_v39 = vpop.eup %11082 }
 0x494   : > { %v9234_v48 = vsel %vm9197_vm5, %v10645_v5, %v10630_v12  ;;  %v9255_v47 = vsel %vm9197_vm5, %v10646_v20, %v10631_v62  ;;  %v11085_v8 = vpop.eup %11084 }
 0x495   : > { %v8406_v41 = vpop.permute.xlu1 %8405  ;;  %9385 = vmatprep.mubr.f32.mxu0 %v9234_v48  ;;  %9490 = vmatprep.mubr.f32.mxu1 %v9255_v47  ;;  %v9204_v12 = vsel %vm9197_vm5, %v11077_v19, %v10665_v14  ;;  %v9225_v18 = vsel %vm9197_vm5, %v11079_v42, %v10666_v60  ;;  %v11087_v2 = vpop.eup %11086 }
 0x496   : > { %9386 = vmatmul.mubr.f32.gmra.mrb[72].mxu0 %v9202_v21  ;;  %9491 = vmatmul.mubr.f32.gmra.mrb[60].mxu1 %v9223_v13  ;;  %v17329_v50 = vpop.permute.xlu0 %10678  ;;  %v8443_v17 = vmul.f32 %v17212_v3, %v8406_v41  ;;  %v9203_v3 = vsel %vm9197_vm5, %v11073_v28, %v10660_v56 }
 0x497   : > { %v10681_v26 = vunpack.i.h.bf16 %v17329_v50  ;;  %v10680_v22 = vunpack.i.l.bf16 %v17329_v50 }
 0x498   : > { %v8475_v59 = vadd.f32 %v8443_v17, %v4950_v38 }
 0x499   : > { %v10654_v9 = vpop.permute.xlu1 %10653  ;;  %v9205_v16 = vsel %vm9197_vm5, %v11081_v10, %v10680_v22 }
 0x49a   : > { %v10656_v52 = vunpack.i.h.bf16 %v10654_v9  ;;  %v10655_v49 = vunpack.i.l.bf16 %v10654_v9  ;;  %v10684_v55 = vpop.permute.xlu0 %10683  ;;  %v8514_v51 = vadd.f32 %v17079_v33, %v8475_v59  ;;  %v9226_v33 = vsel %vm9197_vm5, %v11085_v8, %v10681_v26  ;;  %v11089_v63 = vpop.eup %11088 }
 0x49b   : > { %v10686_v29 = vunpack.i.h.bf16 %v10684_v55  ;;  %v10685_v48 = vunpack.i.l.bf16 %v10684_v55  ;;  %v11091_v50 = vpop.eup %11090 }
 0x49c   : > { %v9235_v53 = vsel %vm9197_vm5, %v10660_v56, %v10655_v49  ;;  %v9256_v1 = vsel %vm9197_vm5, %v10661_v6, %v10656_v52  ;;  %11094 = vtanh.f32 %v8514_v51  ;;  %v11093_v49 = vpop.eup %11092 }
 0x49d   : > { %v10669_v58 = vpop.permute.xlu1 %10668  ;;  %9390 = vmatprep.mubr.f32.mxu0 %v9235_v53  ;;  %9495 = vmatprep.mubr.f32.mxu1 %v9256_v1  ;;  %v9206_v15 = vsel %vm9197_vm5, %v11083_v39, %v10685_v48  ;;  %v9227_v57 = vsel %vm9197_vm5, %v11087_v2, %v10686_v29 }
 0x49e   : > { %v10671_v37 = vunpack.i.h.bf16 %v10669_v58  ;;  %v10670_v7 = vunpack.i.l.bf16 %v10669_v58  ;;  %9391 = vmatmul.mubr.f32.gmra.mrb[74].mxu0 %v9203_v3  ;;  %9496 = vmatmul.mubr.f32.gmra.mrb[62].mxu1 %v9224_v23  ;;  %v10699_v61 = vpop.permute.xlu0 %10698 }
 0x49f   : > { %v10701_v43 = vunpack.i.h.bf16 %v10699_v61  ;;  %v10700_v25 = vunpack.i.l.bf16 %v10699_v61 }
 0x4a0   : > { %v9236_v20 = vsel %vm9197_vm5, %v10665_v14, %v10670_v7  ;;  %v9257_v5 = vsel %vm9197_vm5, %v10666_v60, %v10671_v37  ;;  %v17369_v60 = vld [vmem:[%s17488_s12] ss:$0 sm:$0xff] }
 0x4a1   : > { %v10674_v62 = vpop.permute.xlu1 %10673  ;;  %9395 = vmatprep.mubr.f32.mxu0 %v9236_v20  ;;  %9500 = vmatprep.mubr.f32.mxu1 %v9257_v5  ;;  %v9207_v17 = vsel %vm9197_vm5, %v11089_v63, %v10700_v25  ;;  %v9228_v52 = vsel %vm9197_vm5, %v11091_v50, %v10701_v43 }
 0x4a2   : > { %v10676_v54 = vunpack.i.h.bf16 %v10674_v62  ;;  %v10675_v27 = vunpack.i.l.bf16 %v10674_v62  ;;  %9396 = vmatmul.mubr.f32.gmra.mrb[76].mxu0 %v9204_v12  ;;  %9501 = vmatmul.mubr.f32.gmra.mrb[64].mxu1 %v9225_v18  ;;  %v10704_v31 = vpop.permute.xlu0 %10703 }
 0x4a3   : > { %v10706_v56 = vunpack.i.h.bf16 %v10704_v31  ;;  %v10705_v9 = vunpack.i.l.bf16 %v10704_v31 }
 0x4a4   : > { %v9237_v45 = vsel %vm9197_vm5, %v10680_v22, %v10675_v27  ;;  %v9258_v44 = vsel %vm9197_vm5, %v10681_v26, %v10676_v54 }
 0x4a5   : > { %v10689_v47 = vpop.permute.xlu1 %10688  ;;  %9400 = vmatprep.mubr.f32.mxu0 %v9237_v45  ;;  %9505 = vmatprep.mubr.f32.mxu1 %v9258_v44  ;;  %v9208_v53 = vsel %vm9197_vm5, %v11093_v49, %v10705_v9 }
 0x4a6   : > { %v10691_v41 = vunpack.i.h.bf16 %v10689_v47  ;;  %v10690_v21 = vunpack.i.l.bf16 %v10689_v47  ;;  %9401 = vmatmul.mubr.f32.gmra.mrb[78].mxu0 %v9205_v16  ;;  %9506 = vmatmul.mubr.f32.gmra.mrb[66].mxu1 %v9226_v33  ;;  %v11095_v40 = vpop.eup %11094 }
 0x4a7   : > { %v9229_v1 = vsel %vm9197_vm5, %v11095_v40, %v10706_v56 }
 0x4a8   : > { %v9238_v13 = vsel %vm9197_vm5, %v10685_v48, %v10690_v21  ;;  %v9259_v32 = vsel %vm9197_vm5, %v10686_v29, %v10691_v41 }
 0x4a9   : > { %v10694_v0 = vpop.permute.xlu1 %10693  ;;  %9405 = vmatprep.mubr.f32.mxu0 %v9238_v13  ;;  %9510 = vmatprep.mubr.f32.mxu1 %v9259_v32 }
 0x4aa   : > { %v10696_v24 = vunpack.i.h.bf16 %v10694_v0  ;;  %v10695_v35 = vunpack.i.l.bf16 %v10694_v0  ;;  %9406 = vmatmul.mubr.f32.gmra.mrb[80].mxu0 %v9206_v15  ;;  %9511 = vmatmul.mubr.f32.gmra.mrb[68].mxu1 %v9227_v57 }
 0x4ac   : > { %v9239_v11 = vsel %vm9197_vm5, %v10700_v25, %v10695_v35  ;;  %v9260_v6 = vsel %vm9197_vm5, %v10701_v43, %v10696_v24 }
 0x4ad   : > { %v10709_v34 = vpop.permute.xlu1 %10708  ;;  %9410 = vmatprep.mubr.f32.mxu0 %v9239_v11  ;;  %9515 = vmatprep.mubr.f32.mxu1 %v9260_v6 }
 0x4ae   : > { %v10711_v28 = vunpack.i.h.bf16 %v10709_v34  ;;  %v10710_v36 = vunpack.i.l.bf16 %v10709_v34  ;;  %9411 = vmatmul.mubr.f32.gmra.mrb[82].mxu0 %v9207_v17  ;;  %9516 = vmatmul.mubr.f32.gmra.mrb[70].mxu1 %v9228_v52 }
 0x4b0   : > { %v9240_v38 = vsel %vm9197_vm5, %v10705_v9, %v10710_v36  ;;  %v9261_v30 = vsel %vm9197_vm5, %v10706_v56, %v10711_v28 }
 0x4b1   : > { %9415 = vmatprep.mubr.f32.mxu0 %v9240_v38  ;;  %9520 = vmatprep.mubr.f32.mxu1 %v9261_v30 }
 0x4b2   : > { %9416 = vmatmul.mubr.f32.gmra.mrb[84].mxu0 %v9208_v53  ;;  %9521 = vmatmul.mubr.f32.gmra.mrb[72].mxu1 %v9229_v1 }
 0x4e9   : > { %v9422_v14 = vpop.f32.mrb[32].mxu1 }
 0x4ea   : > { %v9423_v58 = vadd.f32 %v17369_v60, %v9422_v14  ;;  %v9424_v3 = vpop.f32.mrb[33].mxu1 }
 0x4ec   : > { %9538 = vst.msk [vmem:[%s17375_s18 + $0x58] sm:$0xff] %vm9526_vm13, %v9423_v58 }
 0x4ed   : > { %v9427_v23 = vpop.f32.mrb[34].mxu1 }
 0x4ee   : > { %v9428_v4 = vadd.f32 %v17369_v60, %v9427_v23  ;;  %v9429_v59 = vpop.f32.mrb[35].mxu1 }
 0x4f0   : > { %9539 = vst.msk [vmem:[%s17375_s18 + $0x60] sm:$0xff] %vm9526_vm13, %v9428_v4 }
 0x506   : > { %v9432_v37 = vpop.f32.mrb[36].mxu1 }
 0x507   : > { %v9433_v7 = vadd.f32 %v17369_v60, %v9432_v37  ;;  %v9434_v55 = vpop.f32.mrb[37].mxu1 }
 0x509   : > { %9540 = vst.msk [vmem:[%s17375_s18 + $0x68] sm:$0xff] %vm9526_vm13, %v9433_v7 }
 0x50a   : > { %v9437_v19 = vpop.f32.mrb[38].mxu1 }
 0x50b   : > { %v9438_v42 = vadd.f32 %v17369_v60, %v9437_v19  ;;  %v9439_v46 = vpop.f32.mrb[39].mxu1 }
 0x50d   : > { %9541 = vst.msk [vmem:[%s17375_s18 + $0x70] sm:$0xff] %vm9526_vm13, %v9438_v42 }
 0x50e   : > { %v9442_v20 = vpop.f32.mrb[40].mxu1 }
 0x50f   : > { %v9443_v5 = vadd.f32 %v17369_v60, %v9442_v20  ;;  %v9444_v10 = vpop.f32.mrb[41].mxu1 }
 0x511   : > { %9542 = vst.msk [vmem:[%s17375_s18 + $0x78] sm:$0xff] %vm9526_vm13, %v9443_v5 }
 0x512   : > { %v9447_v26 = vpop.f32.mrb[42].mxu1 }
 0x513   : > { %v9448_v22 = vadd.f32 %v17369_v60, %v9447_v26  ;;  %v9449_v62 = vpop.f32.mrb[43].mxu1 }
 0x515   : > { %9543 = vst.msk [vmem:[%s17375_s18 + $0x80] sm:$0xff] %vm9526_vm13, %v9448_v22 }
 0x516   : > { %v9452_v12 = vpop.f32.mrb[44].mxu1 }
 0x517   : > { %v9453_v18 = vadd.f32 %v17369_v60, %v9452_v12  ;;  %v9454_v39 = vpop.f32.mrb[45].mxu1 }
 0x519   : > { %9544 = vst.msk [vmem:[%s17375_s18 + $0x88] sm:$0xff] %vm9526_vm13, %v9453_v18 }
 0x51c   : > { %v9457_v51 = vpop.f32.mrb[46].mxu1 }
 0x51d   : > { %v9458_v54 = vadd.f32 %v17369_v60, %v9457_v51  ;;  %v9459_v27 = vpop.f32.mrb[47].mxu1 }
 0x51f   : > { %9545 = vst.msk [vmem:[%s17375_s18 + $0x90] sm:$0xff] %vm9526_vm13, %v9458_v54 }
 0x522   : > { %v9462_v8 = vpop.f32.mrb[48].mxu1 }
 0x523   : > { %v9463_v45 = vadd.f32 %v17369_v60, %v9462_v8  ;;  %v9464_v44 = vpop.f32.mrb[49].mxu1 }
 0x525   : > { %9546 = vst.msk [vmem:[%s17375_s18 + $0x98] sm:$0xff] %vm9526_vm13, %v9463_v45 }
 0x526   : > { %v9367_v61 = vpop.f32.mrb[64].mxu0 }
 0x527   : > { %v9368_v2 = vadd.f32 %v17369_v60, %v9367_v61  ;;  %v9369_v29 = vpop.f32.mrb[65].mxu0 }
 0x529   : > { %9527 = vst.msk [vmem:[%s17375_s18] sm:$0xff] %vm9526_vm13, %v9368_v2 }
 0x53d   : > { %v9467_v48 = vpop.f32.mrb[50].mxu1 }
 0x53e   : > { %v9468_v47 = vadd.f32 %v17369_v60, %v9467_v48  ;;  %v9469_v16 = vpop.f32.mrb[51].mxu1 }
 0x540   : > { %9547 = vst.msk [vmem:[%s17375_s18 + $0xa0] sm:$0xff] %vm9526_vm13, %v9468_v47 }
 0x541   : > { %v9472_v33 = vpop.f32.mrb[52].mxu1 }
 0x542   : > { %v9473_v41 = vadd.f32 %v17369_v60, %v9472_v33  ;;  %v9474_v21 = vpop.f32.mrb[53].mxu1 }
 0x544   : > { %9548 = vst.msk [vmem:[%s17375_s18 + $0xa8] sm:$0xff] %vm9526_vm13, %v9473_v41 }
 0x556   : > { %v9372_v13 = vpop.f32.mrb[66].mxu0  ;;  %v9477_v32 = vpop.f32.mrb[54].mxu1 }
 0x557   : > { %v9373_v43 = vadd.f32 %v17369_v60, %v9372_v13  ;;  %v9374_v25 = vpop.f32.mrb[67].mxu0  ;;  %v9478_v0 = vadd.f32 %v17369_v60, %v9477_v32  ;;  %v9479_v15 = vpop.f32.mrb[55].mxu1 }
 0x559   : > { %9528 = vst.msk [vmem:[%s17375_s18 + $0x8] sm:$0xff] %vm9526_vm13, %v9373_v43  ;;  %9549 = vst.msk [vmem:[%s17375_s18 + $0xb0] sm:$0xff] %vm9526_vm13, %v9478_v0 }
 0x55a   : > { %v9377_v57 = vpop.f32.mrb[68].mxu0  ;;  %v9482_v63 = vpop.f32.mrb[56].mxu1 }
 0x55b   : > { %v9378_v24 = vadd.f32 %v17369_v60, %v9377_v57  ;;  %v9379_v35 = vpop.f32.mrb[69].mxu0  ;;  %v9483_v31 = vadd.f32 %v17369_v60, %v9482_v63  ;;  %v9484_v50 = vpop.f32.mrb[57].mxu1 }
 0x55d   : > { %9529 = vst.msk [vmem:[%s17375_s18 + $0x10] sm:$0xff] %vm9526_vm13, %v9378_v24  ;;  %9550 = vst.msk [vmem:[%s17375_s18 + $0xb8] sm:$0xff] %vm9526_vm13, %v9483_v31 }
 0x55e   : > { %v9382_v11 = vpop.f32.mrb[70].mxu0  ;;  %v9487_v6 = vpop.f32.mrb[58].mxu1 }
 0x55f   : > { %v9383_v56 = vadd.f32 %v17369_v60, %v9382_v11  ;;  %v9384_v9 = vpop.f32.mrb[71].mxu0  ;;  %v9488_v34 = vadd.f32 %v17369_v60, %v9487_v6  ;;  %v9489_v17 = vpop.f32.mrb[59].mxu1 }
 0x561   : > { %9530 = vst.msk [vmem:[%s17375_s18 + $0x18] sm:$0xff] %vm9526_vm13, %v9383_v56  ;;  %9551 = vst.msk [vmem:[%s17375_s18 + $0xc0] sm:$0xff] %vm9526_vm13, %v9488_v34 }
 0x569   : > { %v9387_v52 = vpop.f32.mrb[72].mxu0  ;;  %v9492_v49 = vpop.f32.mrb[60].mxu1 }
 0x56a   : > { %v9388_v28 = vadd.f32 %v17369_v60, %v9387_v52  ;;  %v9389_v36 = vpop.f32.mrb[73].mxu0  ;;  %v9493_v40 = vadd.f32 %v17369_v60, %v9492_v49  ;;  %v9494_v38 = vpop.f32.mrb[61].mxu1 }
 0x56c   : > { %9531 = vst.msk [vmem:[%s17375_s18 + $0x20] sm:$0xff] %vm9526_vm13, %v9388_v28  ;;  %9552 = vst.msk [vmem:[%s17375_s18 + $0xc8] sm:$0xff] %vm9526_vm13, %v9493_v40 }
 0x571   : > { %v9392_v30 = vpop.f32.mrb[74].mxu0  ;;  %v9497_v53 = vpop.f32.mrb[62].mxu1 }
 0x572   : > { %v9393_v1 = vadd.f32 %v17369_v60, %v9392_v30  ;;  %v9498_v14 = vadd.f32 %v17369_v60, %v9497_v53  ;;  %v9394_v58 = vpop.f32.mrb[75].mxu0  ;;  %v9499_v3 = vpop.f32.mrb[63].mxu1 }
 0x574   : > { %9532 = vst.msk [vmem:[%s17375_s18 + $0x28] sm:$0xff] %vm9526_vm13, %v9393_v1  ;;  %9553 = vst.msk [vmem:[%s17375_s18 + $0xd0] sm:$0xff] %vm9526_vm13, %v9498_v14 }
 0x575   : > { %v9397_v23 = vpop.f32.mrb[76].mxu0  ;;  %v9502_v4 = vpop.f32.mrb[64].mxu1 }
 0x576   : > { %v9398_v59 = vadd.f32 %v17369_v60, %v9397_v23  ;;  %v9503_v37 = vadd.f32 %v17369_v60, %v9502_v4  ;;  %v9399_v7 = vpop.f32.mrb[77].mxu0  ;;  %v9504_v55 = vpop.f32.mrb[65].mxu1 }
 0x578   : > { %9533 = vst.msk [vmem:[%s17375_s18 + $0x30] sm:$0xff] %vm9526_vm13, %v9398_v59  ;;  %9554 = vst.msk [vmem:[%s17375_s18 + $0xd8] sm:$0xff] %vm9526_vm13, %v9503_v37 }
 0x579   : > { %v9402_v19 = vpop.f32.mrb[78].mxu0  ;;  %v9507_v42 = vpop.f32.mrb[66].mxu1 }
 0x57a   : > { %v9403_v46 = vadd.f32 %v17369_v60, %v9402_v19  ;;  %v9508_v20 = vadd.f32 %v17369_v60, %v9507_v42  ;;  %v9404_v5 = vpop.f32.mrb[79].mxu0  ;;  %v9509_v10 = vpop.f32.mrb[67].mxu1 }
 0x57c   : > { %9534 = vst.msk [vmem:[%s17375_s18 + $0x38] sm:$0xff] %vm9526_vm13, %v9403_v46  ;;  %9555 = vst.msk [vmem:[%s17375_s18 + $0xe0] sm:$0xff] %vm9526_vm13, %v9508_v20 }
 0x57d   : > { %v9407_v26 = vpop.f32.mrb[80].mxu0  ;;  %v9512_v22 = vpop.f32.mrb[68].mxu1 }
 0x57e   : > { %v9408_v62 = vadd.f32 %v17369_v60, %v9407_v26  ;;  %v9513_v12 = vadd.f32 %v17369_v60, %v9512_v22  ;;  %v9409_v18 = vpop.f32.mrb[81].mxu0  ;;  %v9514_v39 = vpop.f32.mrb[69].mxu1 }
 0x580   : > { %9535 = vst.msk [vmem:[%s17375_s18 + $0x40] sm:$0xff] %vm9526_vm13, %v9408_v62  ;;  %9556 = vst.msk [vmem:[%s17375_s18 + $0xe8] sm:$0xff] %vm9526_vm13, %v9513_v12 }
 0x581   : > { %v9412_v51 = vpop.f32.mrb[82].mxu0  ;;  %v9517_v54 = vpop.f32.mrb[70].mxu1 }
 0x582   : > { %v9413_v27 = vadd.f32 %v17369_v60, %v9412_v51  ;;  %v9518_v8 = vadd.f32 %v17369_v60, %v9517_v54  ;;  %v9414_v45 = vpop.f32.mrb[83].mxu0  ;;  %v9519_v44 = vpop.f32.mrb[71].mxu1 }
 0x584   : > { %9536 = vst.msk [vmem:[%s17375_s18 + $0x48] sm:$0xff] %vm9526_vm13, %v9413_v27  ;;  %9557 = vst.msk [vmem:[%s17375_s18 + $0xf0] sm:$0xff] %vm9526_vm13, %v9518_v8 }
 0x585   : > { %v9417_v61 = vpop.f32.mrb[84].mxu0  ;;  %v9522_v2 = vpop.f32.mrb[72].mxu1 }
 0x586   : > { %v9418_v29 = vadd.f32 %v17369_v60, %v9417_v61  ;;  %v9523_v48 = vadd.f32 %v17369_v60, %v9522_v2  ;;  %v9419_v47 = vpop.f32.mrb[85].mxu0  ;;  %v9524_v16 = vpop.f32.mrb[73].mxu1 }
 0x588   : > { %9537 = vst.msk [vmem:[%s17375_s18 + $0x50] sm:$0xff] %vm9526_vm13, %v9418_v29  ;;  %9558 = vst.msk [vmem:[%s17375_s18 + $0xf8] sm:$0xff] %vm9526_vm13, %v9523_v48 }
 0x589 PF: > { %s23_s25 = sadd.s32 1, %s11150_s25  }
 0x58a   : > { %p20_p4 = scmp.ge.s32.totalorder %s23_s25, 4  }
 0x58c   :  { %22 = sbr.rel (!%p20_p4) target bundleno = 1 (0x1), region = 108 }

</bundles_post_ra>
